<compile_context>
chip_gen: v7x
topology: tpu7x:2x2x1
jax: 0.10.0
libtpu: 0.0.40
codegen_flags: <defaults>
</compile_context>

<pallas_src>
import functools

import jax
import jax.numpy as jnp
from jax.experimental import pallas as pl
from jax.experimental.pallas import tpu as pltpu


def _resnet_kernel(x_ref, win_ref, bin_ref, w1s_ref, b1s_ref,
                   w2s_ref, b2s_ref, wout_ref, bout_ref, o_ref):
    # Transposed-activation layout: batch lives on the lane axis.
    # x_ref:    (1, tb)      f32   lane-dense batch tile of the scalar input
    # win_ref:  (H, 1)       f32   input-layer weight column (Linear(1,H) weight)
    # bin_ref:  (H, 1)       f32
    # w1s_ref:  (NB, H, H)   bf16  first linear of each block, PyTorch (out,in)
    # b1s_ref:  (NB, H, 1)   f32
    # w2s_ref:  (NB, H, H)   bf16  second linear of each block, PyTorch (out,in)
    # b2s_ref:  (NB, H, 1)   f32
    # wout_ref: (H, 1)       f32   output-layer weight column
    # bout_ref: (1, 1)       f32
    # o_ref:    (1, tb)      f32   lane-dense output tile
    num_blocks = w1s_ref.shape[0]

    x_row = x_ref[...].astype(jnp.float32)                      # (1, tb)

    # Input layer, in_dim == 1: outer product on the VPU (avoids a K=1 matmul).
    # hT[j, b] = relu(w_in[j] * x[b] + b_in[j])
    h = jnp.maximum(win_ref[...] * x_row + bin_ref[...], 0.0)    # (H, tb) f32

    # Residual blocks — static unroll (num_blocks is a compile-time constant).
    # Transposed form:  tT = relu(W1 @ hT + b1);  hT = relu(W2 @ tT + b2 + hT)
    for i in range(num_blocks):
        t = jnp.dot(w1s_ref[i], h.astype(jnp.bfloat16),
                    preferred_element_type=jnp.float32) + b1s_ref[i]
        t = jnp.maximum(t, 0.0)
        t = jnp.dot(w2s_ref[i], t.astype(jnp.bfloat16),
                    preferred_element_type=jnp.float32) + b2s_ref[i]
        h = jnp.maximum(t + h, 0.0)                              # residual in f32

    # Output layer, out_dim == 1: sublane reduction (XLU) -> lane-dense row.
    y = jnp.sum(h * wout_ref[...], axis=0, keepdims=True) + bout_ref[...]  # (1, tb)
    o_ref[...] = y.astype(o_ref.dtype)


def prepare_params(w_in, b_in, w1s, b1s, w2s, b2s, w_out, b_out):
    """One-time conversion from PyTorch layout to kernel layout.
    Call once at init, NOT per forward pass.  Block weights stay in their
    native (out_features, in_features) layout (used directly as W @ hT);
    only the bf16 cast and bias/vector reshapes happen here."""
    NB, H, _ = w1s.shape
    return dict(
        win=jnp.asarray(w_in, jnp.float32).reshape(H, 1),        # (H, 1)
        bin=jnp.asarray(b_in, jnp.float32).reshape(H, 1),        # (H, 1)
        w1s=jnp.asarray(w1s).astype(jnp.bfloat16),               # (NB, H, H)
        b1s=jnp.asarray(b1s, jnp.float32).reshape(NB, H, 1),     # (NB, H, 1)
        w2s=jnp.asarray(w2s).astype(jnp.bfloat16),               # (NB, H, H)
        b2s=jnp.asarray(b2s, jnp.float32).reshape(NB, H, 1),     # (NB, H, 1)
        wout=jnp.asarray(w_out, jnp.float32).reshape(H, 1),      # (H, 1)
        bout=jnp.asarray(b_out, jnp.float32).reshape(1, 1),      # (1, 1)
    )


def _choose_grid(batch, max_tile=1024):
    """Pick (block_b, n_steps): block_b a multiple of 128, as few steps as
    possible on single-TC chips, an even step count on 2-TC (v7x) chips."""
    b128 = max(128, ((batch + 127) // 128) * 128)
    kind = ""
    try:
        kind = jax.devices()[0].device_kind.lower()
    except Exception:  # pragma: no cover - device query should not fail
        pass
    two_tc = "v7" in kind
    steps = -(-b128 // max_tile)
    if two_tc and b128 >= 256:
        steps = max(steps, 2)            # give both TensorCores work
    if two_tc and steps % 2:
        steps += 1                       # even split across the 2 TCs
    per_step = -(-b128 // steps)
    block_b = ((per_step + 127) // 128) * 128
    return block_b, steps


@functools.partial(jax.jit, static_argnames=("block_b", "n_steps"))
def _forward(x, params, *, block_b, n_steps):
    """Forward pass for x of shape (B, 1) -> (B, 1); B_pad = block_b*n_steps."""
    B = x.shape[0]
    H = params["win"].shape[0]
    NB = params["w1s"].shape[0]
    B_pad = block_b * n_steps

    x_row = x.reshape(1, B)                              # lane-dense layout
    if B_pad != B:
        x_row = jnp.pad(x_row, ((0, 0), (0, B_pad - B)))

    flops = (2 * B_pad * H                               # input layer
             + NB * 2 * (2 * B_pad * H * H)              # two matmuls per block
             + 2 * B_pad * H)                            # output reduction
    bytes_accessed = (B_pad * 4 + B_pad * 4
                      + params["w1s"].size * 2 + params["w2s"].size * 2
                      + (params["b1s"].size + params["b2s"].size) * 4
                      + (3 * H + 1) * 4)

    out = pl.pallas_call(
        _resnet_kernel,
        out_shape=jax.ShapeDtypeStruct((1, B_pad), jnp.float32),
        grid_spec=pltpu.PrefetchScalarGridSpec(
            num_scalar_prefetch=0,
            grid=(n_steps,),
            in_specs=[
                pl.BlockSpec((1, block_b), lambda i: (0, i)),     # x row (streamed, lane-dense)
                pl.BlockSpec((H, 1), lambda i: (0, 0)),           # w_in column (resident)
                pl.BlockSpec((H, 1), lambda i: (0, 0)),           # b_in
                pl.BlockSpec((NB, H, H), lambda i: (0, 0, 0)),    # W1 stack (resident)
                pl.BlockSpec((NB, H, 1), lambda i: (0, 0, 0)),    # b1 stack
                pl.BlockSpec((NB, H, H), lambda i: (0, 0, 0)),    # W2 stack (resident)
                pl.BlockSpec((NB, H, 1), lambda i: (0, 0, 0)),    # b2 stack
                pl.BlockSpec((H, 1), lambda i: (0, 0)),           # w_out column
                pl.BlockSpec((1, 1), lambda i: (0, 0)),           # b_out
            ],
            out_specs=pl.BlockSpec((1, block_b), lambda i: (0, i)),  # lane-dense store
        ),
        compiler_params=pltpu.CompilerParams(
            dimension_semantics=("parallel",),      # batch axis -> megacore on v7x
            vmem_limit_bytes=32 * 1024 * 1024,
        ),
        cost_estimate=pl.CostEstimate(
            flops=flops, transcendentals=0, bytes_accessed=bytes_accessed),
    )(x_row, params["win"], params["bin"], params["w1s"], params["b1s"],
      params["w2s"], params["b2s"], params["wout"], params["bout"])

    return out[0, :B].reshape(B, 1)


def residual_network(x, params, *, block_b=None):
    """Public entry point: ResidualNetwork forward for x of shape (B, 1)."""
    B, in_dim = x.shape
    assert in_dim == 1, "module is defined with input_dim=1"
    if block_b is None:
        block_b, n_steps = _choose_grid(B)
    else:
        assert block_b % 128 == 0, "block_b must be a multiple of 128"
        n_steps = -(-B // block_b)
    return _forward(x, params, block_b=block_b, n_steps=n_steps)


def _reference(x, w_in, b_in, w1s, b1s, w2s, b2s, w_out, b_out):
    """Pure-JAX f32 reference matching the PyTorch module."""
    h = jnp.maximum(x @ w_in.T + b_in, 0.0)
    for i in range(w1s.shape[0]):
        t = jnp.maximum(h @ w1s[i].T + b1s[i], 0.0)
        t = t @ w2s[i].T + b2s[i] + h
        h = jnp.maximum(t, 0.0)
    return h @ w_out.T + b_out


if __name__ == "__main__":
    key = jax.random.PRNGKey(0)
    B, IN_DIM, H, NB, OUT_DIM = 512, 1, 128, 5, 1   # module defaults: hidden=128, 5 blocks

    keys = jax.random.split(key, 10)
    x = jax.random.normal(keys[0], (B, IN_DIM), dtype=jnp.float32)

    # PyTorch-layout (out_features, in_features) weights, nn.Linear-style init.
    bound_in = 1.0 / jnp.sqrt(jnp.float32(IN_DIM))
    bound_h = 1.0 / jnp.sqrt(jnp.float32(H))
    w_in = jax.random.uniform(keys[1], (H, IN_DIM), jnp.float32, -bound_in, bound_in)
    b_in = jax.random.uniform(keys[2], (H,), jnp.float32, -bound_in, bound_in)
    w1s = jax.random.uniform(keys[3], (NB, H, H), jnp.float32, -bound_h, bound_h)
    b1s = jax.random.uniform(keys[4], (NB, H), jnp.float32, -bound_h, bound_h)
    w2s = jax.random.uniform(keys[5], (NB, H, H), jnp.float32, -bound_h, bound_h)
    b2s = jax.random.uniform(keys[6], (NB, H), jnp.float32, -bound_h, bound_h)
    w_out = jax.random.uniform(keys[7], (OUT_DIM, H), jnp.float32, -bound_h, bound_h)
    b_out = jax.random.uniform(keys[8], (OUT_DIM,), jnp.float32, -bound_h, bound_h)

    # One-time parameter prep (bf16 cast + vector reshapes) outside the hot path.
    params = prepare_params(w_in, b_in, w1s, b1s, w2s, b2s, w_out, b_out)

    out = residual_network(x, params)
    out = jax.block_until_ready(out)

    ref = _reference(x, w_in, b_in, w1s, b1s, w2s, b2s, w_out, b_out)
    assert out.shape == (B, OUT_DIM)
    # bf16 MXU operands with f32 accumulation -> slightly looser tolerance vs f32 ref.
    assert jnp.allclose(out, ref, atol=5e-2, rtol=5e-2), (
        "mismatch vs reference; max abs diff = "
        f"{float(jnp.max(jnp.abs(out - ref)))}")

    print("KERNEL_OK")
</pallas_src>

<mosaic_0001>
module attributes {stable_mosaic.version = 11 : i64} {
  func.func @_resnet_kernel(%arg0: i32, %arg1: memref<1x512xf32, #tpu.memory_space<vmem>>, %arg2: memref<128x1xf32, #tpu.memory_space<vmem>>, %arg3: memref<128x1xf32, #tpu.memory_space<vmem>>, %arg4: memref<5x128x128xbf16, #tpu.memory_space<vmem>>, %arg5: memref<5x128x1xf32, #tpu.memory_space<vmem>>, %arg6: memref<5x128x128xbf16, #tpu.memory_space<vmem>>, %arg7: memref<5x128x1xf32, #tpu.memory_space<vmem>>, %arg8: memref<128x1xf32, #tpu.memory_space<vmem>>, %arg9: memref<1x1xf32, #tpu.memory_space<vmem>>, %arg10: memref<1x512xf32, #tpu.memory_space<vmem>>) attributes {dimension_semantics = [#tpu.dimension_semantics<parallel>], iteration_bounds = array<i64: 1>, scalar_prefetch = 0 : i64, scratch_operands = 0 : i64, tpu.core_type = #tpu.core_type<tc>, window_params = [{transform_indices = @transform_0, window_bounds = array<i64: 1, 512>}, {pipeline_mode = #tpu.pipeline_mode<synchronous>, transform_indices = @transform_1, window_bounds = array<i64: 128, 1>}, {pipeline_mode = #tpu.pipeline_mode<synchronous>, transform_indices = @transform_2, window_bounds = array<i64: 128, 1>}, {pipeline_mode = #tpu.pipeline_mode<synchronous>, transform_indices = @transform_3, window_bounds = array<i64: 5, 128, 128>}, {pipeline_mode = #tpu.pipeline_mode<synchronous>, transform_indices = @transform_4, window_bounds = array<i64: 5, 128, 1>}, {pipeline_mode = #tpu.pipeline_mode<synchronous>, transform_indices = @transform_5, window_bounds = array<i64: 5, 128, 128>}, {pipeline_mode = #tpu.pipeline_mode<synchronous>, transform_indices = @transform_6, window_bounds = array<i64: 5, 128, 1>}, {pipeline_mode = #tpu.pipeline_mode<synchronous>, transform_indices = @transform_7, window_bounds = array<i64: 128, 1>}, {pipeline_mode = #tpu.pipeline_mode<synchronous>, transform_indices = @transform_8, window_bounds = array<i64: 1, 1>}, {transform_indices = @transform_9, window_bounds = array<i64: 1, 512>}]} {
    %c0 = arith.constant 0 : index
    %c0_0 = arith.constant 0 : index
    %0 = vector.load %arg1[%c0, %c0_0] : memref<1x512xf32, #tpu.memory_space<vmem>>, vector<1x512xf32>
    %c0_1 = arith.constant 0 : index
    %c0_2 = arith.constant 0 : index
    %1 = vector.load %arg2[%c0_1, %c0_2] : memref<128x1xf32, #tpu.memory_space<vmem>>, vector<128x1xf32>
    %2 = vector.broadcast %1 : vector<128x1xf32> to vector<128x512xf32>
    %3 = vector.broadcast %0 : vector<1x512xf32> to vector<128x512xf32>
    %4 = arith.mulf %2, %3 : vector<128x512xf32>
    %c0_3 = arith.constant 0 : index
    %c0_4 = arith.constant 0 : index
    %5 = vector.load %arg3[%c0_3, %c0_4] : memref<128x1xf32, #tpu.memory_space<vmem>>, vector<128x1xf32>
    %6 = vector.broadcast %5 : vector<128x1xf32> to vector<128x512xf32>
    %7 = arith.addf %4, %6 : vector<128x512xf32>
    %cst = arith.constant 0.000000e+00 : f32
    %8 = vector.broadcast %cst : f32 to vector<128x512xf32>
    %9 = arith.maximumf %7, %8 : vector<128x512xf32>
    %c0_5 = arith.constant 0 : index
    %c0_6 = arith.constant 0 : index
    %c0_7 = arith.constant 0 : index
    %10 = vector.load %arg4[%c0_5, %c0_6, %c0_7] : memref<5x128x128xbf16, #tpu.memory_space<vmem>>, vector<1x128x128xbf16>
    %11 = vector.shape_cast %10 : vector<1x128x128xbf16> to vector<128x128xbf16>
    %12 = arith.truncf %9 : vector<128x512xf32> to vector<128x512xbf16>
    %cst_8 = arith.constant dense<0.000000e+00> : vector<128x512xf32>
    %13 = tpu.matmul %11, %12, %cst_8 {dimension_numbers = #tpu.dot_dimension_numbers<[1], [0], [0], [1], [0, 0, 1, 1], [], []>} : vector<128x128xbf16>, vector<128x512xbf16>, vector<128x512xf32> -> vector<128x512xf32>
    %c0_9 = arith.constant 0 : index
    %c0_10 = arith.constant 0 : index
    %c0_11 = arith.constant 0 : index
    %14 = vector.load %arg5[%c0_9, %c0_10, %c0_11] : memref<5x128x1xf32, #tpu.memory_space<vmem>>, vector<1x128x1xf32>
    %15 = vector.shape_cast %14 : vector<1x128x1xf32> to vector<128x1xf32>
    %16 = vector.broadcast %15 : vector<128x1xf32> to vector<128x512xf32>
    %17 = arith.addf %13, %16 : vector<128x512xf32>
    %cst_12 = arith.constant 0.000000e+00 : f32
    %18 = vector.broadcast %cst_12 : f32 to vector<128x512xf32>
    %19 = arith.maximumf %17, %18 : vector<128x512xf32>
    %c0_13 = arith.constant 0 : index
    %c0_14 = arith.constant 0 : index
    %c0_15 = arith.constant 0 : index
    %20 = vector.load %arg6[%c0_13, %c0_14, %c0_15] : memref<5x128x128xbf16, #tpu.memory_space<vmem>>, vector<1x128x128xbf16>
    %21 = vector.shape_cast %20 : vector<1x128x128xbf16> to vector<128x128xbf16>
    %22 = arith.truncf %19 : vector<128x512xf32> to vector<128x512xbf16>
    %cst_16 = arith.constant dense<0.000000e+00> : vector<128x512xf32>
    %23 = tpu.matmul %21, %22, %cst_16 {dimension_numbers = #tpu.dot_dimension_numbers<[1], [0], [0], [1], [0, 0, 1, 1], [], []>} : vector<128x128xbf16>, vector<128x512xbf16>, vector<128x512xf32> -> vector<128x512xf32>
    %c0_17 = arith.constant 0 : index
    %c0_18 = arith.constant 0 : index
    %c0_19 = arith.constant 0 : index
    %24 = vector.load %arg7[%c0_17, %c0_18, %c0_19] : memref<5x128x1xf32, #tpu.memory_space<vmem>>, vector<1x128x1xf32>
    %25 = vector.shape_cast %24 : vector<1x128x1xf32> to vector<128x1xf32>
    %26 = vector.broadcast %25 : vector<128x1xf32> to vector<128x512xf32>
    %27 = arith.addf %23, %26 : vector<128x512xf32>
    %28 = arith.addf %27, %9 : vector<128x512xf32>
    %cst_20 = arith.constant 0.000000e+00 : f32
    %29 = vector.broadcast %cst_20 : f32 to vector<128x512xf32>
    %30 = arith.maximumf %28, %29 : vector<128x512xf32>
    %c1 = arith.constant 1 : index
    %c0_21 = arith.constant 0 : index
    %c0_22 = arith.constant 0 : index
    %31 = vector.load %arg4[%c1, %c0_21, %c0_22] : memref<5x128x128xbf16, #tpu.memory_space<vmem>>, vector<1x128x128xbf16>
    %32 = vector.shape_cast %31 : vector<1x128x128xbf16> to vector<128x128xbf16>
    %33 = arith.truncf %30 : vector<128x512xf32> to vector<128x512xbf16>
    %cst_23 = arith.constant dense<0.000000e+00> : vector<128x512xf32>
    %34 = tpu.matmul %32, %33, %cst_23 {dimension_numbers = #tpu.dot_dimension_numbers<[1], [0], [0], [1], [0, 0, 1, 1], [], []>} : vector<128x128xbf16>, vector<128x512xbf16>, vector<128x512xf32> -> vector<128x512xf32>
    %c1_24 = arith.constant 1 : index
    %c0_25 = arith.constant 0 : index
    %c0_26 = arith.constant 0 : index
    %35 = vector.load %arg5[%c1_24, %c0_25, %c0_26] : memref<5x128x1xf32, #tpu.memory_space<vmem>>, vector<1x128x1xf32>
    %36 = vector.shape_cast %35 : vector<1x128x1xf32> to vector<128x1xf32>
    %37 = vector.broadcast %36 : vector<128x1xf32> to vector<128x512xf32>
    %38 = arith.addf %34, %37 : vector<128x512xf32>
    %cst_27 = arith.constant 0.000000e+00 : f32
    %39 = vector.broadcast %cst_27 : f32 to vector<128x512xf32>
    %40 = arith.maximumf %38, %39 : vector<128x512xf32>
    %c1_28 = arith.constant 1 : index
    %c0_29 = arith.constant 0 : index
    %c0_30 = arith.constant 0 : index
    %41 = vector.load %arg6[%c1_28, %c0_29, %c0_30] : memref<5x128x128xbf16, #tpu.memory_space<vmem>>, vector<1x128x128xbf16>
    %42 = vector.shape_cast %41 : vector<1x128x128xbf16> to vector<128x128xbf16>
    %43 = arith.truncf %40 : vector<128x512xf32> to vector<128x512xbf16>
    %cst_31 = arith.constant dense<0.000000e+00> : vector<128x512xf32>
    %44 = tpu.matmul %42, %43, %cst_31 {dimension_numbers = #tpu.dot_dimension_numbers<[1], [0], [0], [1], [0, 0, 1, 1], [], []>} : vector<128x128xbf16>, vector<128x512xbf16>, vector<128x512xf32> -> vector<128x512xf32>
    %c1_32 = arith.constant 1 : index
    %c0_33 = arith.constant 0 : index
    %c0_34 = arith.constant 0 : index
    %45 = vector.load %arg7[%c1_32, %c0_33, %c0_34] : memref<5x128x1xf32, #tpu.memory_space<vmem>>, vector<1x128x1xf32>
    %46 = vector.shape_cast %45 : vector<1x128x1xf32> to vector<128x1xf32>
    %47 = vector.broadcast %46 : vector<128x1xf32> to vector<128x512xf32>
    %48 = arith.addf %44, %47 : vector<128x512xf32>
    %49 = arith.addf %48, %30 : vector<128x512xf32>
    %cst_35 = arith.constant 0.000000e+00 : f32
    %50 = vector.broadcast %cst_35 : f32 to vector<128x512xf32>
    %51 = arith.maximumf %49, %50 : vector<128x512xf32>
    %c2 = arith.constant 2 : index
    %c0_36 = arith.constant 0 : index
    %c0_37 = arith.constant 0 : index
    %52 = vector.load %arg4[%c2, %c0_36, %c0_37] : memref<5x128x128xbf16, #tpu.memory_space<vmem>>, vector<1x128x128xbf16>
    %53 = vector.shape_cast %52 : vector<1x128x128xbf16> to vector<128x128xbf16>
    %54 = arith.truncf %51 : vector<128x512xf32> to vector<128x512xbf16>
    %cst_38 = arith.constant dense<0.000000e+00> : vector<128x512xf32>
    %55 = tpu.matmul %53, %54, %cst_38 {dimension_numbers = #tpu.dot_dimension_numbers<[1], [0], [0], [1], [0, 0, 1, 1], [], []>} : vector<128x128xbf16>, vector<128x512xbf16>, vector<128x512xf32> -> vector<128x512xf32>
    %c2_39 = arith.constant 2 : index
    %c0_40 = arith.constant 0 : index
    %c0_41 = arith.constant 0 : index
    %56 = vector.load %arg5[%c2_39, %c0_40, %c0_41] : memref<5x128x1xf32, #tpu.memory_space<vmem>>, vector<1x128x1xf32>
    %57 = vector.shape_cast %56 : vector<1x128x1xf32> to vector<128x1xf32>
    %58 = vector.broadcast %57 : vector<128x1xf32> to vector<128x512xf32>
    %59 = arith.addf %55, %58 : vector<128x512xf32>
    %cst_42 = arith.constant 0.000000e+00 : f32
    %60 = vector.broadcast %cst_42 : f32 to vector<128x512xf32>
    %61 = arith.maximumf %59, %60 : vector<128x512xf32>
    %c2_43 = arith.constant 2 : index
    %c0_44 = arith.constant 0 : index
    %c0_45 = arith.constant 0 : index
    %62 = vector.load %arg6[%c2_43, %c0_44, %c0_45] : memref<5x128x128xbf16, #tpu.memory_space<vmem>>, vector<1x128x128xbf16>
    %63 = vector.shape_cast %62 : vector<1x128x128xbf16> to vector<128x128xbf16>
    %64 = arith.truncf %61 : vector<128x512xf32> to vector<128x512xbf16>
    %cst_46 = arith.constant dense<0.000000e+00> : vector<128x512xf32>
    %65 = tpu.matmul %63, %64, %cst_46 {dimension_numbers = #tpu.dot_dimension_numbers<[1], [0], [0], [1], [0, 0, 1, 1], [], []>} : vector<128x128xbf16>, vector<128x512xbf16>, vector<128x512xf32> -> vector<128x512xf32>
    %c2_47 = arith.constant 2 : index
    %c0_48 = arith.constant 0 : index
    %c0_49 = arith.constant 0 : index
    %66 = vector.load %arg7[%c2_47, %c0_48, %c0_49] : memref<5x128x1xf32, #tpu.memory_space<vmem>>, vector<1x128x1xf32>
    %67 = vector.shape_cast %66 : vector<1x128x1xf32> to vector<128x1xf32>
    %68 = vector.broadcast %67 : vector<128x1xf32> to vector<128x512xf32>
    %69 = arith.addf %65, %68 : vector<128x512xf32>
    %70 = arith.addf %69, %51 : vector<128x512xf32>
    %cst_50 = arith.constant 0.000000e+00 : f32
    %71 = vector.broadcast %cst_50 : f32 to vector<128x512xf32>
    %72 = arith.maximumf %70, %71 : vector<128x512xf32>
    %c3 = arith.constant 3 : index
    %c0_51 = arith.constant 0 : index
    %c0_52 = arith.constant 0 : index
    %73 = vector.load %arg4[%c3, %c0_51, %c0_52] : memref<5x128x128xbf16, #tpu.memory_space<vmem>>, vector<1x128x128xbf16>
    %74 = vector.shape_cast %73 : vector<1x128x128xbf16> to vector<128x128xbf16>
    %75 = arith.truncf %72 : vector<128x512xf32> to vector<128x512xbf16>
    %cst_53 = arith.constant dense<0.000000e+00> : vector<128x512xf32>
    %76 = tpu.matmul %74, %75, %cst_53 {dimension_numbers = #tpu.dot_dimension_numbers<[1], [0], [0], [1], [0, 0, 1, 1], [], []>} : vector<128x128xbf16>, vector<128x512xbf16>, vector<128x512xf32> -> vector<128x512xf32>
    %c3_54 = arith.constant 3 : index
    %c0_55 = arith.constant 0 : index
    %c0_56 = arith.constant 0 : index
    %77 = vector.load %arg5[%c3_54, %c0_55, %c0_56] : memref<5x128x1xf32, #tpu.memory_space<vmem>>, vector<1x128x1xf32>
    %78 = vector.shape_cast %77 : vector<1x128x1xf32> to vector<128x1xf32>
    %79 = vector.broadcast %78 : vector<128x1xf32> to vector<128x512xf32>
    %80 = arith.addf %76, %79 : vector<128x512xf32>
    %cst_57 = arith.constant 0.000000e+00 : f32
    %81 = vector.broadcast %cst_57 : f32 to vector<128x512xf32>
    %82 = arith.maximumf %80, %81 : vector<128x512xf32>
    %c3_58 = arith.constant 3 : index
    %c0_59 = arith.constant 0 : index
    %c0_60 = arith.constant 0 : index
    %83 = vector.load %arg6[%c3_58, %c0_59, %c0_60] : memref<5x128x128xbf16, #tpu.memory_space<vmem>>, vector<1x128x128xbf16>
    %84 = vector.shape_cast %83 : vector<1x128x128xbf16> to vector<128x128xbf16>
    %85 = arith.truncf %82 : vector<128x512xf32> to vector<128x512xbf16>
    %cst_61 = arith.constant dense<0.000000e+00> : vector<128x512xf32>
    %86 = tpu.matmul %84, %85, %cst_61 {dimension_numbers = #tpu.dot_dimension_numbers<[1], [0], [0], [1], [0, 0, 1, 1], [], []>} : vector<128x128xbf16>, vector<128x512xbf16>, vector<128x512xf32> -> vector<128x512xf32>
    %c3_62 = arith.constant 3 : index
    %c0_63 = arith.constant 0 : index
    %c0_64 = arith.constant 0 : index
    %87 = vector.load %arg7[%c3_62, %c0_63, %c0_64] : memref<5x128x1xf32, #tpu.memory_space<vmem>>, vector<1x128x1xf32>
    %88 = vector.shape_cast %87 : vector<1x128x1xf32> to vector<128x1xf32>
    %89 = vector.broadcast %88 : vector<128x1xf32> to vector<128x512xf32>
    %90 = arith.addf %86, %89 : vector<128x512xf32>
    %91 = arith.addf %90, %72 : vector<128x512xf32>
    %cst_65 = arith.constant 0.000000e+00 : f32
    %92 = vector.broadcast %cst_65 : f32 to vector<128x512xf32>
    %93 = arith.maximumf %91, %92 : vector<128x512xf32>
    %c4 = arith.constant 4 : index
    %c0_66 = arith.constant 0 : index
    %c0_67 = arith.constant 0 : index
    %94 = vector.load %arg4[%c4, %c0_66, %c0_67] : memref<5x128x128xbf16, #tpu.memory_space<vmem>>, vector<1x128x128xbf16>
    %95 = vector.shape_cast %94 : vector<1x128x128xbf16> to vector<128x128xbf16>
    %96 = arith.truncf %93 : vector<128x512xf32> to vector<128x512xbf16>
    %cst_68 = arith.constant dense<0.000000e+00> : vector<128x512xf32>
    %97 = tpu.matmul %95, %96, %cst_68 {dimension_numbers = #tpu.dot_dimension_numbers<[1], [0], [0], [1], [0, 0, 1, 1], [], []>} : vector<128x128xbf16>, vector<128x512xbf16>, vector<128x512xf32> -> vector<128x512xf32>
    %c4_69 = arith.constant 4 : index
    %c0_70 = arith.constant 0 : index
    %c0_71 = arith.constant 0 : index
    %98 = vector.load %arg5[%c4_69, %c0_70, %c0_71] : memref<5x128x1xf32, #tpu.memory_space<vmem>>, vector<1x128x1xf32>
    %99 = vector.shape_cast %98 : vector<1x128x1xf32> to vector<128x1xf32>
    %100 = vector.broadcast %99 : vector<128x1xf32> to vector<128x512xf32>
    %101 = arith.addf %97, %100 : vector<128x512xf32>
    %cst_72 = arith.constant 0.000000e+00 : f32
    %102 = vector.broadcast %cst_72 : f32 to vector<128x512xf32>
    %103 = arith.maximumf %101, %102 : vector<128x512xf32>
    %c4_73 = arith.constant 4 : index
    %c0_74 = arith.constant 0 : index
    %c0_75 = arith.constant 0 : index
    %104 = vector.load %arg6[%c4_73, %c0_74, %c0_75] : memref<5x128x128xbf16, #tpu.memory_space<vmem>>, vector<1x128x128xbf16>
    %105 = vector.shape_cast %104 : vector<1x128x128xbf16> to vector<128x128xbf16>
    %106 = arith.truncf %103 : vector<128x512xf32> to vector<128x512xbf16>
    %cst_76 = arith.constant dense<0.000000e+00> : vector<128x512xf32>
    %107 = tpu.matmul %105, %106, %cst_76 {dimension_numbers = #tpu.dot_dimension_numbers<[1], [0], [0], [1], [0, 0, 1, 1], [], []>} : vector<128x128xbf16>, vector<128x512xbf16>, vector<128x512xf32> -> vector<128x512xf32>
    %c4_77 = arith.constant 4 : index
    %c0_78 = arith.constant 0 : index
    %c0_79 = arith.constant 0 : index
    %108 = vector.load %arg7[%c4_77, %c0_78, %c0_79] : memref<5x128x1xf32, #tpu.memory_space<vmem>>, vector<1x128x1xf32>
    %109 = vector.shape_cast %108 : vector<1x128x1xf32> to vector<128x1xf32>
    %110 = vector.broadcast %109 : vector<128x1xf32> to vector<128x512xf32>
    %111 = arith.addf %107, %110 : vector<128x512xf32>
    %112 = arith.addf %111, %93 : vector<128x512xf32>
    %cst_80 = arith.constant 0.000000e+00 : f32
    %113 = vector.broadcast %cst_80 : f32 to vector<128x512xf32>
    %114 = arith.maximumf %112, %113 : vector<128x512xf32>
    %c0_81 = arith.constant 0 : index
    %c0_82 = arith.constant 0 : index
    %115 = vector.load %arg8[%c0_81, %c0_82] : memref<128x1xf32, #tpu.memory_space<vmem>>, vector<128x1xf32>
    %116 = vector.broadcast %115 : vector<128x1xf32> to vector<128x512xf32>
    %117 = arith.mulf %114, %116 : vector<128x512xf32>
    %cst_83 = arith.constant dense<0.000000e+00> : vector<512xf32>
    %118 = vector.multi_reduction <add>, %117, %cst_83 [0] : vector<128x512xf32> to vector<512xf32>
    %119 = vector.shape_cast %118 : vector<512xf32> to vector<1x512xf32>
    %c0_84 = arith.constant 0 : index
    %c0_85 = arith.constant 0 : index
    %120 = vector.load %arg9[%c0_84, %c0_85] : memref<1x1xf32, #tpu.memory_space<vmem>>, vector<1x1xf32>
    %121 = vector.broadcast %120 : vector<1x1xf32> to vector<1x512xf32>
    %122 = arith.addf %119, %121 : vector<1x512xf32>
    %c0_86 = arith.constant 0 : index
    %c0_87 = arith.constant 0 : index
    %123 = vector.load %arg10[%c0_86, %c0_87] : memref<1x512xf32, #tpu.memory_space<vmem>>, vector<1x512xf32>
    tpu.vector_store %arg10[%c0_86, %c0_87], %122 {strides = array<i32>} : memref<1x512xf32, #tpu.memory_space<vmem>>, vector<1x512xf32>,
    return
  }
  func.func @transform_0(%arg0: i32) -> (i32, i32) {
    %c0_i32 = arith.constant 0 : i32
    %c0_i32_0 = arith.constant 0 : i32
    return %c0_i32, %arg0 : i32, i32
  }
  func.func @transform_1(%arg0: i32) -> (i32, i32) {
    %c0_i32 = arith.constant 0 : i32
    %c0_i32_0 = arith.constant 0 : i32
    %c0_i32_1 = arith.constant 0 : i32
    return %c0_i32, %c0_i32_0 : i32, i32
  }
  func.func @transform_2(%arg0: i32) -> (i32, i32) {
    %c0_i32 = arith.constant 0 : i32
    %c0_i32_0 = arith.constant 0 : i32
    %c0_i32_1 = arith.constant 0 : i32
    return %c0_i32, %c0_i32_0 : i32, i32
  }
  func.func @transform_3(%arg0: i32) -> (i32, i32, i32) {
    %c0_i32 = arith.constant 0 : i32
    %c0_i32_0 = arith.constant 0 : i32
    %c0_i32_1 = arith.constant 0 : i32
    %c0_i32_2 = arith.constant 0 : i32
    return %c0_i32, %c0_i32_0, %c0_i32_1 : i32, i32, i32
  }
  func.func @transform_4(%arg0: i32) -> (i32, i32, i32) {
    %c0_i32 = arith.constant 0 : i32
    %c0_i32_0 = arith.constant 0 : i32
    %c0_i32_1 = arith.constant 0 : i32
    %c0_i32_2 = arith.constant 0 : i32
    return %c0_i32, %c0_i32_0, %c0_i32_1 : i32, i32, i32
  }
  func.func @transform_5(%arg0: i32) -> (i32, i32, i32) {
    %c0_i32 = arith.constant 0 : i32
    %c0_i32_0 = arith.constant 0 : i32
    %c0_i32_1 = arith.constant 0 : i32
    %c0_i32_2 = arith.constant 0 : i32
    return %c0_i32, %c0_i32_0, %c0_i32_1 : i32, i32, i32
  }
  func.func @transform_6(%arg0: i32) -> (i32, i32, i32) {
    %c0_i32 = arith.constant 0 : i32
    %c0_i32_0 = arith.constant 0 : i32
    %c0_i32_1 = arith.constant 0 : i32
    %c0_i32_2 = arith.constant 0 : i32
    return %c0_i32, %c0_i32_0, %c0_i32_1 : i32, i32, i32
  }
  func.func @transform_7(%arg0: i32) -> (i32, i32) {
    %c0_i32 = arith.constant 0 : i32
    %c0_i32_0 = arith.constant 0 : i32
    %c0_i32_1 = arith.constant 0 : i32
    return %c0_i32, %c0_i32_0 : i32, i32
  }
  func.func @transform_8(%arg0: i32) -> (i32, i32) {
    %c0_i32 = arith.constant 0 : i32
    %c0_i32_0 = arith.constant 0 : i32
    %c0_i32_1 = arith.constant 0 : i32
    return %c0_i32, %c0_i32_0 : i32, i32
  }
  func.func @transform_9(%arg0: i32) -> (i32, i32) {
    %c0_i32 = arith.constant 0 : i32
    %c0_i32_0 = arith.constant 0 : i32
    return %c0_i32, %arg0 : i32, i32
  }
}

</mosaic_0001>

<bundles_post_ra>
// kernel: _forward.1
= control target key start
LH: loop header
LB: loop body
LE: loop exit
PB: predicated region body
PF: predicated region fallthrough
CT: control target
= control target key end

     0   :  { %s10389_s0 = inlined_call_operand.vmem [shape: f32[1,512], index: 0, kind: input, shape index: {}]   ;;  %s10390_s1 = inlined_call_operand.vmem [shape: f32[128,1], index: 1, kind: input, shape index: {}]   ;;  %s10391_s2 = inlined_call_operand.vmem [shape: f32[128,1], index: 2, kind: input, shape index: {}]   ;;  %s10392_s3 = inlined_call_operand.vmem [shape: bf16[5,128,128], index: 3, kind: input, shape index: {}]   ;;  %s10393_s4 = inlined_call_operand.vmem [shape: f32[5,128,1], index: 4, kind: input, shape index: {}]   ;;  %s10394_s5 = inlined_call_operand.vmem [shape: bf16[5,128,128], index: 5, kind: input, shape index: {}]   ;;  %s10395_s6 = inlined_call_operand.vmem [shape: f32[5,128,1], index: 6, kind: input, shape index: {}]   ;;  %s10396_s7 = inlined_call_operand.vmem [shape: f32[128,1], index: 7, kind: input, shape index: {}]   ;;  %s10397_s8 = inlined_call_operand.<no memory space> [shape: f32[1,1], index: 8, kind: input, shape index: {}]   ;;  %s10398_s9 = inlined_call_operand.hbm [shape: f32[1,512], index: 9, kind: output, shape index: {}]  }
   0x1   :  { %v14_v0 = vstv %s10397_s8 }
   0x2   :  { %15 = vst [vmem:[#allocation2] sm:$0x1] %v14_v0 }
   0x3   :  { %v218_v1 = vld [vmem:[%s10391_s2] sm:$0xff]  ;;  %v10441_v3 = vmov 0   ;;  %v219_v4 = vld [vmem:[%s10391_s2 + $0x8] sm:$0xff]  ;;  %v40_v6 = vld [vmem:[%s10390_s1 + $0x18] sm:$0xff] }
   0x4   :  { %v37_v2 = vld [vmem:[%s10390_s1] sm:$0xff]  ;;  %6244 = vset.pattern.permute.xlu1 %v10441_v3  ;;  %6243 = vset.pattern.permute.xlu0 %v10441_v3  ;;  %v38_v5 = vld [vmem:[%s10390_s1 + $0x8] sm:$0xff]  ;;  %v39_v7 = vld [vmem:[%s10390_s1 + $0x10] sm:$0xff] }
   0x5   :  { %236 = vperm.xlu1 %6244, %v218_v1   ;;  %55 = vperm.xlu0 %6243, %v37_v2   ;;  %v221_v8 = vld [vmem:[%s10391_s2 + $0x18] sm:$0xff]  ;;  %v220_v9 = vld [vmem:[%s10391_s2 + $0x10] sm:$0xff]  ;;  %v42_v10 = vld [vmem:[%s10390_s1 + $0x28] sm:$0xff] }
   0x6   :  { %666 = vmatprep.mubr.bf16.mxu0 %v10441_v3  ;;  %779 = vmatprep.mubr.bf16.mxu1 %v10441_v3  ;;  %v41_v11 = vld [vmem:[%s10390_s1 + $0x20] sm:$0xff]  ;;  %v223_v12 = vld [vmem:[%s10391_s2 + $0x28] sm:$0xff]  ;;  %v44_v14 = vld [vmem:[%s10390_s1 + $0x38] sm:$0xff] }
   0x7   :  { %v222_v13 = vld [vmem:[%s10391_s2 + $0x20] sm:$0xff]  ;;  %v43_v15 = vld [vmem:[%s10390_s1 + $0x30] sm:$0xff]  ;;  %v225_v16 = vld [vmem:[%s10391_s2 + $0x38] sm:$0xff] }
   0x8   :  { %v224_v17 = vld [vmem:[%s10391_s2 + $0x30] sm:$0xff]  ;;  %v46_v18 = vld [vmem:[%s10390_s1 + $0x48] sm:$0xff]  ;;  %v45_v19 = vld [vmem:[%s10390_s1 + $0x40] sm:$0xff] }
   0x9   :  { %241 = vperm.xlu1 %6244, %v219_v4   ;;  %60 = vperm.xlu0 %6243, %v38_v5   ;;  %v227_v20 = vld [vmem:[%s10391_s2 + $0x48] sm:$0xff]  ;;  %v226_v21 = vld [vmem:[%s10391_s2 + $0x40] sm:$0xff]  ;;  %v48_v22 = vld [vmem:[%s10390_s1 + $0x58] sm:$0xff] }
   0xa   :  { %v47_v23 = vld [vmem:[%s10390_s1 + $0x50] sm:$0xff]  ;;  %v229_v24 = vld [vmem:[%s10391_s2 + $0x58] sm:$0xff]  ;;  %v50_v26 = vld [vmem:[%s10390_s1 + $0x68] sm:$0xff] }
   0xb   :  { %v228_v25 = vld [vmem:[%s10391_s2 + $0x50] sm:$0xff]  ;;  %v49_v27 = vld [vmem:[%s10390_s1 + $0x60] sm:$0xff]  ;;  %v231_v28 = vld [vmem:[%s10391_s2 + $0x68] sm:$0xff] }
   0xc   :  { %v230_v29 = vld [vmem:[%s10391_s2 + $0x60] sm:$0xff]  ;;  %v52_v30 = vld [vmem:[%s10390_s1 + $0x78] sm:$0xff]  ;;  %v51_v31 = vld [vmem:[%s10390_s1 + $0x70] sm:$0xff] }
   0xd   :  { %70 = vperm.xlu1 %6244, %v40_v6   ;;  %65 = vperm.xlu0 %6243, %v39_v7   ;;  %v233_v32 = vld [vmem:[%s10391_s2 + $0x78] sm:$0xff]  ;;  %v232_v33 = vld [vmem:[%s10391_s2 + $0x70] sm:$0xff]  ;;  %v491_v34 = vld [vmem:[%s10393_s4 + $0x8] sm:$0xff] }
   0xe   :  { %v490_v35 = vld [vmem:[%s10393_s4] sm:$0xff]  ;;  %v493_v36 = vld [vmem:[%s10393_s4 + $0x18] sm:$0xff]  ;;  %v492_v37 = vld [vmem:[%s10393_s4 + $0x10] sm:$0xff] }
   0xf   :  { %v495_v38 = vld [vmem:[%s10393_s4 + $0x28] sm:$0xff]  ;;  %v494_v39 = vld [vmem:[%s10393_s4 + $0x20] sm:$0xff]  ;;  %v497_v40 = vld [vmem:[%s10393_s4 + $0x38] sm:$0xff] }
  0x10   :  { %v496_v41 = vld [vmem:[%s10393_s4 + $0x30] sm:$0xff]  ;;  %v499_v42 = vld [vmem:[%s10393_s4 + $0x48] sm:$0xff]  ;;  %v498_v43 = vld [vmem:[%s10393_s4 + $0x40] sm:$0xff] }
  0x11   :  { %251 = vperm.xlu1 %6244, %v221_v8   ;;  %246 = vperm.xlu0 %6243, %v220_v9   ;;  %v501_v44 = vld [vmem:[%s10393_s4 + $0x58] sm:$0xff]  ;;  %v500_v45 = vld [vmem:[%s10393_s4 + $0x50] sm:$0xff]  ;;  %v503_v46 = vld [vmem:[%s10393_s4 + $0x68] sm:$0xff] }
  0x12   :  { %v502_v47 = vld [vmem:[%s10393_s4 + $0x60] sm:$0xff]  ;;  %v505_v48 = vld [vmem:[%s10393_s4 + $0x78] sm:$0xff]  ;;  %v504_v49 = vld [vmem:[%s10393_s4 + $0x70] sm:$0xff] }
  0x15   :  { %80 = vperm.xlu1 %6244, %v42_v10   ;;  %75 = vperm.xlu0 %6243, %v41_v11  }
  0x19   :  { %261 = vperm.xlu1 %6244, %v223_v12   ;;  %256 = vperm.xlu0 %6243, %v222_v13  }
  0x1d   :  { %90 = vperm.xlu1 %6244, %v44_v14   ;;  %85 = vperm.xlu0 %6243, %v43_v15  }
  0x21   :  { %271 = vperm.xlu1 %6244, %v225_v16   ;;  %266 = vperm.xlu0 %6243, %v224_v17  }
  0x25   :  { %100 = vperm.xlu1 %6244, %v46_v18   ;;  %95 = vperm.xlu0 %6243, %v45_v19  }
  0x29   :  { %281 = vperm.xlu1 %6244, %v227_v20   ;;  %276 = vperm.xlu0 %6243, %v226_v21  }
  0x2d   :  { %110 = vperm.xlu1 %6244, %v48_v22   ;;  %105 = vperm.xlu0 %6243, %v47_v23  }
  0x31   :  { %291 = vperm.xlu1 %6244, %v229_v24   ;;  %286 = vperm.xlu0 %6243, %v228_v25  }
  0x35   :  { %120 = vperm.xlu1 %6244, %v50_v26   ;;  %115 = vperm.xlu0 %6243, %v49_v27  }
  0x39   :  { %301 = vperm.xlu1 %6244, %v231_v28   ;;  %296 = vperm.xlu0 %6243, %v230_v29  }
  0x3d   :  { %130 = vperm.xlu1 %6244, %v52_v30   ;;  %125 = vperm.xlu0 %6243, %v51_v31  }
  0x41   :  { %311 = vperm.xlu1 %6244, %v233_v32   ;;  %306 = vperm.xlu0 %6243, %v232_v33  }
  0x45   :  { %513 = vperm.xlu1 %6244, %v491_v34   ;;  %508 = vperm.xlu0 %6243, %v490_v35  }
  0x49   :  { %523 = vperm.xlu1 %6244, %v493_v36   ;;  %518 = vperm.xlu0 %6243, %v492_v37  }
  0x4d   :  { %533 = vperm.xlu1 %6244, %v495_v38   ;;  %528 = vperm.xlu0 %6243, %v494_v39  }
  0x51   :  { %543 = vperm.xlu1 %6244, %v497_v40   ;;  %538 = vperm.xlu0 %6243, %v496_v41  }
  0x55   :  { %553 = vperm.xlu1 %6244, %v499_v42   ;;  %548 = vperm.xlu0 %6243, %v498_v43  }
  0x59   :  { %563 = vperm.xlu1 %6244, %v501_v44   ;;  %558 = vperm.xlu0 %6243, %v500_v45  }
  0x5d   :  { %573 = vperm.xlu1 %6244, %v503_v46   ;;  %568 = vperm.xlu0 %6243, %v502_v47  }
  0x5e   :  { %16 = vsyncpa [#allocation4], 0  ;;  %v973_v50 = vld [vmem:[%s10395_s6 + $0x8] sm:$0xff]  ;;  %v972_v51 = vld [vmem:[%s10395_s6] sm:$0xff]  ;;  %v10399_v60 = vlaneseq }
  0x5f   :  { %v975_v52 = vld [vmem:[%s10395_s6 + $0x18] sm:$0xff]  ;;  %v974_v53 = vld [vmem:[%s10395_s6 + $0x10] sm:$0xff]  ;;  %v977_v54 = vld [vmem:[%s10395_s6 + $0x28] sm:$0xff] }
  0x60   :  { %v976_v55 = vld [vmem:[%s10395_s6 + $0x20] sm:$0xff]  ;;  %v979_v56 = vld [vmem:[%s10395_s6 + $0x38] sm:$0xff]  ;;  %v978_v57 = vld [vmem:[%s10395_s6 + $0x30] sm:$0xff]  ;;  %v6590_v63 = vshrl.u32 %v10399_v60, 7 }
  0x61   :  { %583 = vperm.xlu1 %6244, %v505_v48   ;;  %578 = vperm.xlu0 %6243, %v504_v49   ;;  %v981_v58 = vld [vmem:[%s10395_s6 + $0x48] sm:$0xff]  ;;  %v980_v59 = vld [vmem:[%s10395_s6 + $0x40] sm:$0xff]  ;;  %v983_v61 = vld [vmem:[%s10395_s6 + $0x58] sm:$0xff] }
  0x62   :  { %v982_v62 = vld [vmem:[%s10395_s6 + $0x50] sm:$0xff]  ;;  %10926 = vst [vmem:[#allocation6_spill] sm:$0xff] %v6590_v63  ;;  %v985_v0 = vld [vmem:[%s10395_s6 + $0x68] sm:$0xff]  ;;  %v984_v1 = vld [vmem:[%s10395_s6 + $0x60] sm:$0xff]  ;;  %v140_v2 = vsub.s32 1, %v6590_v63  ;;  %v148_v4 = vsub.s32 3, %v6590_v63 }
  0x63   :  { %v10400_v5 = vsub.s32 0, %v6590_v63  ;;  %v987_v6 = vld [vmem:[%s10395_s6 + $0x78] sm:$0xff]  ;;  %v986_v7 = vld [vmem:[%s10395_s6 + $0x70] sm:$0xff]  ;;  %v36_v8 = vld [vmem:[%s10389_s0] sm:$0xf]  ;;  %v144_v9 = vsub.s32 2, %v6590_v63 }
  0x64   :  { %v6611_v10 = vrot.slane %v36_v8, %v140_v2  ;;  %v6613_v11 = vrot.slane %v36_v8, %v148_v4  ;;  %v5937_v13 = vld [vmem:[%s10393_s4 + $0x88] sm:$0xff]  ;;  %v5936_v14 = vld [vmem:[%s10393_s4 + $0x80] sm:$0xff]  ;;  %v5939_v21 = vld [vmem:[%s10393_s4 + $0x98] sm:$0xff] }
  0x65   :  { %995 = vperm.xlu1 %6244, %v973_v50   ;;  %990 = vperm.xlu0 %6243, %v972_v51   ;;  %v6617_v12 = vrot.slane %v36_v8, %v10400_v5  ;;  %v6625_v15 = vrot.slane %v36_v8, %v144_v9  ;;  %v5938_v22 = vld [vmem:[%s10393_s4 + $0x90] sm:$0xff]  ;;  %v5941_v32 = vld [vmem:[%s10393_s4 + $0xa8] sm:$0xff]  ;;  %v5940_v33 = vld [vmem:[%s10393_s4 + $0xa0] sm:$0xff] }
  0x66   :  { %v5943_v50 = vld [vmem:[%s10393_s4 + $0xb8] sm:$0xff]  ;;  %v5942_v51 = vld [vmem:[%s10393_s4 + $0xb0] sm:$0xff]  ;;  %v5945_v9 = vld [vmem:[%s10393_s4 + $0xc8] sm:$0xff] }
  0x67   :  { %v5950_v5 = vld [vmem:[%s10393_s4 + $0xf0] sm:$0xff] }
  0x69   :  { %1005 = vperm.xlu1 %6244, %v975_v52   ;;  %1000 = vperm.xlu0 %6243, %v974_v53  }
  0x6d   :  { %1015 = vperm.xlu1 %6244, %v977_v54   ;;  %1010 = vperm.xlu0 %6243, %v976_v55  }
  0x71   :  { %1025 = vperm.xlu1 %6244, %v979_v56   ;;  %1020 = vperm.xlu0 %6243, %v978_v57  }
  0x75   :  { %1035 = vperm.xlu1 %6244, %v981_v58   ;;  %1030 = vperm.xlu0 %6243, %v980_v59  }
  0x79   :  { %1045 = vperm.xlu1 %6244, %v983_v61   ;;  %1040 = vperm.xlu0 %6243, %v982_v62  }
  0x7d   :  { %1055 = vperm.xlu1 %6244, %v985_v0   ;;  %1050 = vperm.xlu0 %6243, %v984_v1  }
  0x81   :  { %1065 = vperm.xlu1 %6244, %v987_v6   ;;  %1060 = vperm.xlu0 %6243, %v986_v7  }
  0x84   :  { %v237_v16 = vpop.permute.xlu1 %236  ;;  %v56_v17 = vpop.permute.xlu0 %55 }
  0x85   :  { %1543 = vperm.xlu1 %6244, %v5937_v13   ;;  %1538 = vperm.xlu0 %6243, %v5936_v14   ;;  %v155_v18 = vmul.f32 %v6611_v10, %v56_v17  ;;  %v157_v19 = vmul.f32 %v6613_v11, %v56_v17  ;;  %v154_v20 = vmul.f32 %v6617_v12, %v56_v17  ;;  %v5944_v13 = vld [vmem:[%s10393_s4 + $0xc0] sm:$0xff] }
  0x86   :  { %v156_v23 = vmul.f32 %v6625_v15, %v56_v17 }
  0x87   :  { %v6637_v24 = vadd.f32 %v237_v16, %v155_v18  ;;  %v6639_v25 = vadd.f32 %v237_v16, %v157_v19  ;;  %v6641_v28 = vadd.f32 %v237_v16, %v154_v20 }
  0x88   :  { %v242_v26 = vpop.permute.xlu1 %241  ;;  %v61_v27 = vpop.permute.xlu0 %60  ;;  %v6643_v29 = vadd.f32 %v237_v16, %v156_v23 }
  0x89   :  { %1553 = vperm.xlu1 %6244, %v5939_v21   ;;  %1548 = vperm.xlu0 %6243, %v5938_v22   ;;  %v159_v30 = vmul.f32 %v6611_v10, %v61_v27  ;;  %v161_v31 = vmul.f32 %v6613_v11, %v61_v27  ;;  %v158_v34 = vmul.f32 %v6617_v12, %v61_v27  ;;  %v10430_v37 = vmax.f32 %v6637_v24, 0.0 }
  0x8a   :  { %v160_v35 = vmul.f32 %v6625_v15, %v61_v27  ;;  %v10429_v39 = vmax.f32 %v6639_v25, 0.0  ;;  %v10438_v43 = vmax.f32 %v6641_v28, 0.0  ;;  %v10437_v45 = vmax.f32 %v6643_v29, 0.0 }
  0x8b   :  { %v6655_v36 = vadd.f32 %v242_v26, %v159_v30  ;;  %v6658_v38 = vadd.f32 %v242_v26, %v161_v31  ;;  %v6661_v42 = vadd.f32 %v242_v26, %v158_v34 }
  0x8c   :  { %v71_v40 = vpop.permute.xlu1 %70  ;;  %v66_v41 = vpop.permute.xlu0 %65  ;;  %v6664_v44 = vadd.f32 %v242_v26, %v160_v35 }
  0x8d   :  { %1563 = vperm.xlu1 %6244, %v5941_v32   ;;  %1558 = vperm.xlu0 %6243, %v5940_v33   ;;  %v10426_v46 = vmax.f32 %v6655_v36, 0.0  ;;  %v10425_v47 = vmax.f32 %v6658_v38, 0.0  ;;  %v163_v48 = vmul.f32 %v6611_v10, %v66_v41  ;;  %v167_v49 = vmul.f32 %v6611_v10, %v71_v40 }
  0x8e   :  { %v10428_v52 = vmax.f32 %v6661_v42, 0.0  ;;  %v10427_v53 = vmax.f32 %v6664_v44, 0.0  ;;  %v165_v54 = vmul.f32 %v6613_v11, %v66_v41  ;;  %v169_v55 = vmul.f32 %v6613_v11, %v71_v40 }
  0x8f   :  { %v459_v56 = vpack.c.bf16 %v10426_v46, %v10430_v37  ;;  %v461_v57 = vpack.c.bf16 %v10425_v47, %v10429_v39  ;;  %v162_v58 = vmul.f32 %v6617_v12, %v66_v41  ;;  %v166_v59 = vmul.f32 %v6617_v12, %v71_v40 }
  0x90   :  { %v252_v61 = vpop.permute.xlu1 %251  ;;  %v247_v62 = vpop.permute.xlu0 %246  ;;  %v458_v0 = vpack.c.bf16 %v10428_v52, %v10438_v43  ;;  %v460_v1 = vpack.c.bf16 %v10427_v53, %v10437_v45  ;;  %v164_v2 = vmul.f32 %v6625_v15, %v66_v41  ;;  %v168_v4 = vmul.f32 %v6625_v15, %v71_v40 }
  0x91   :  { %1573 = vperm.xlu1 %6244, %v5943_v50   ;;  %1568 = vperm.xlu0 %6243, %v5942_v51   ;;  %v6701_v6 = vadd.f32 %v247_v62, %v163_v48  ;;  %v6703_v7 = vadd.f32 %v252_v61, %v167_v49  ;;  %v6705_v8 = vadd.f32 %v247_v62, %v165_v54  ;;  %v5947_v48 = vld [vmem:[%s10393_s4 + $0xd8] sm:$0xff]  ;;  %v5946_v49 = vld [vmem:[%s10393_s4 + $0xd0] sm:$0xff] }
  0x92   :  { %634 = vmatprep.subr.bf16.mxu0 %v459_v56  ;;  %747 = vmatprep.subr.bf16.mxu1 %v461_v57  ;;  %v6713_v14 = vadd.f32 %v252_v61, %v169_v55  ;;  %v6715_v16 = vadd.f32 %v247_v62, %v162_v58  ;;  %v6717_v17 = vadd.f32 %v252_v61, %v166_v59 }
  0x93   :  { %635 = vmatpush1.bf16.msra.mxu0 %v458_v0  ;;  %748 = vmatpush1.bf16.msra.mxu1 %v460_v1  ;;  %v10414_v18 = vmax.f32 %v6701_v6, 0.0  ;;  %v10410_v19 = vmax.f32 %v6703_v7, 0.0  ;;  %v10413_v20 = vmax.f32 %v6705_v8, 0.0  ;;  %v6722_v21 = vadd.f32 %v247_v62, %v164_v2 }
  0x94   :  { %v81_v22 = vpop.permute.xlu1 %80  ;;  %v76_v23 = vpop.permute.xlu0 %75  ;;  %v10409_v26 = vmax.f32 %v6713_v14, 0.0  ;;  %v10422_v27 = vmax.f32 %v6715_v16, 0.0  ;;  %v10412_v30 = vmax.f32 %v6717_v17, 0.0  ;;  %v6727_v31 = vadd.f32 %v252_v61, %v168_v4  ;;  %v5949_v4 = vld [vmem:[%s10393_s4 + $0xe8] sm:$0xff] }
  0x95   :  { %1583 = vperm.xlu1 %6244, %v5945_v9   ;;  %1578 = vperm.xlu0 %6243, %v5944_v13   ;;  %v463_v32 = vpack.c.bf16 %v10410_v19, %v10414_v18  ;;  %v10421_v33 = vmax.f32 %v6722_v21, 0.0  ;;  %v171_v34 = vmul.f32 %v6611_v10, %v76_v23  ;;  %v175_v50 = vmul.f32 %v6611_v10, %v81_v22  ;;  %v5948_v9 = vld [vmem:[%s10393_s4 + $0xe0] sm:$0xff] }
  0x96   :  { %v465_v35 = vpack.c.bf16 %v10409_v26, %v10413_v20  ;;  %v462_v40 = vpack.c.bf16 %v10412_v30, %v10422_v27  ;;  %v10411_v41 = vmax.f32 %v6727_v31, 0.0  ;;  %v173_v51 = vmul.f32 %v6613_v11, %v76_v23 }
  0x97   :  { %636 = vmatprep.subr.bf16.mxu0 %v463_v32  ;;  %v177_v54 = vmul.f32 %v6613_v11, %v81_v22  ;;  %v170_v55 = vmul.f32 %v6617_v12, %v76_v23  ;;  %v174_v56 = vmul.f32 %v6617_v12, %v81_v22  ;;  %v172_v61 = vmul.f32 %v6625_v15, %v76_v23 }
  0x98   :  { %749 = vmatprep.subr.bf16.mxu1 %v465_v35  ;;  %v262_v57 = vpop.permute.xlu1 %261  ;;  %v257_v58 = vpop.permute.xlu0 %256  ;;  %637 = vmatpush1.bf16.msra.mxu0 %v462_v40  ;;  %v464_v59 = vpack.c.bf16 %v10411_v41, %v10421_v33  ;;  %v176_v62 = vmul.f32 %v6625_v15, %v81_v22 }
  0x99   :  { %1593 = vperm.xlu1 %6244, %v5947_v48   ;;  %1588 = vperm.xlu0 %6243, %v5946_v49   ;;  %v6761_v0 = vadd.f32 %v257_v58, %v171_v34  ;;  %v6763_v1 = vadd.f32 %v262_v57, %v175_v50  ;;  %v6765_v2 = vadd.f32 %v257_v58, %v173_v51 }
  0x9a   :  { %750 = vmatpush1.bf16.msra.mxu1 %v464_v59  ;;  %v6773_v13 = vadd.f32 %v262_v57, %v177_v54  ;;  %v6775_v22 = vadd.f32 %v257_v58, %v170_v55  ;;  %v6777_v23 = vadd.f32 %v262_v57, %v174_v56  ;;  %v6779_v32 = vadd.f32 %v257_v58, %v172_v61 }
  0x9b   :  { %10927 = vst [vmem:[#allocation7_spill] sm:$0xff] %v6761_v0  ;;  %10928 = vst [vmem:[#allocation8_spill] sm:$0xff] %v6763_v1  ;;  %v10405_v34 = vmax.f32 %v6761_v0, 0.0  ;;  %v10402_v35 = vmax.f32 %v6763_v1, 0.0  ;;  %v10404_v40 = vmax.f32 %v6765_v2, 0.0  ;;  %v6784_v48 = vadd.f32 %v262_v57, %v176_v62  ;;  %v5951_v62 = vld [vmem:[%s10393_s4 + $0xf8] sm:$0xff] }
  0x9c   :  { %10929 = vst [vmem:[#allocation9_spill] sm:$0xff] %v6765_v2  ;;  %10930 = vst [vmem:[#allocation10_spill] sm:$0xff] %v6773_v13  ;;  %v91_v49 = vpop.permute.xlu1 %90  ;;  %v86_v50 = vpop.permute.xlu0 %85  ;;  %v10401_v51 = vmax.f32 %v6773_v13, 0.0  ;;  %v10406_v54 = vmax.f32 %v6775_v22, 0.0  ;;  %v10403_v55 = vmax.f32 %v6777_v23, 0.0  ;;  %v10408_v56 = vmax.f32 %v6779_v32, 0.0 }
  0x9d   :  { %10931 = vst [vmem:[#allocation11_spill] sm:$0xff] %v6777_v23  ;;  %10932 = vst [vmem:[#allocation12_spill] sm:$0xff] %v6779_v32  ;;  %1603 = vperm.xlu1 %6244, %v5949_v4   ;;  %1598 = vperm.xlu0 %6243, %v5948_v9   ;;  %v467_v58 = vpack.c.bf16 %v10402_v35, %v10405_v34  ;;  %v10407_v57 = vmax.f32 %v6784_v48, 0.0  ;;  %v179_v4 = vmul.f32 %v6611_v10, %v86_v50  ;;  %v5842_v13 = vld [vmem:[#allocation2] sm:$0x1] }
  0x9e   :  { %10933 = vst [vmem:[#allocation13_spill] sm:$0xff] %v6784_v48  ;;  %v469_v59 = vpack.c.bf16 %v10401_v51, %v10404_v40  ;;  %v466_v61 = vpack.c.bf16 %v10403_v55, %v10406_v54  ;;  %v183_v9 = vmul.f32 %v6611_v10, %v91_v49  ;;  %v181_v51 = vmul.f32 %v6613_v11, %v86_v50 }
  0x9f   :  { %638 = vmatprep.subr.bf16.mxu0 %v467_v58  ;;  %v468_v60 = vpack.c.bf16 %v10407_v57, %v10408_v56  ;;  %v185_v35 = vmul.f32 %v6613_v11, %v91_v49  ;;  %v178_v55 = vmul.f32 %v6617_v12, %v86_v50  ;;  %v182_v58 = vmul.f32 %v6617_v12, %v91_v49 }
  0xa0   :  { %751 = vmatprep.subr.bf16.mxu1 %v469_v59  ;;  %v272_v40 = vpop.permute.xlu1 %271  ;;  %v267_v34 = vpop.permute.xlu0 %266  ;;  %639 = vmatpush1.bf16.msra.mxu0 %v466_v61  ;;  %v180_v54 = vmul.f32 %v6625_v15, %v86_v50  ;;  %v184_v57 = vmul.f32 %v6625_v15, %v91_v49  ;;  %v5977_v59 = vld [vmem:[%s10395_s6 + $0x88] sm:$0xff] }
  0xa1   :  { %752 = vmatpush1.bf16.msra.mxu1 %v468_v60  ;;  %1613 = vperm.xlu1 %6244, %v5951_v62   ;;  %v6821_v56 = vadd.f32 %v267_v34, %v179_v4  ;;  %v6823_v26 = vadd.f32 %v272_v40, %v183_v9  ;;  %v6825_v19 = vadd.f32 %v267_v34, %v181_v51  ;;  %v5976_v60 = vld [vmem:[%s10395_s6 + $0x80] sm:$0xff] }
  0xa2   :  { %1608 = vperm.xlu0 %6243, %v5950_v5   ;;  %v6830_v61 = vadd.f32 %v272_v40, %v185_v35  ;;  %v6832_v41 = vadd.f32 %v267_v34, %v178_v55  ;;  %v6834_v50 = vadd.f32 %v272_v40, %v182_v58  ;;  %v6836_v49 = vadd.f32 %v267_v34, %v180_v54 }
  0xa3   :  { %10934 = vst [vmem:[#allocation14_spill] sm:$0xff] %v6821_v56  ;;  %10935 = vst [vmem:[#allocation15_spill] sm:$0xff] %v6823_v26  ;;  %v10419_v51 = vmax.f32 %v6821_v56, 0.0  ;;  %v10415_v5 = vmax.f32 %v6823_v26, 0.0  ;;  %v10418_v62 = vmax.f32 %v6825_v19, 0.0  ;;  %v6844_v4 = vadd.f32 %v272_v40, %v184_v57 }
  0xa4   :  { %10936 = vst [vmem:[#allocation16_spill] sm:$0xff] %v6825_v19  ;;  %10937 = vst [vmem:[#allocation17_spill] sm:$0xff] %v6830_v61  ;;  %v101_v35 = vpop.permute.xlu1 %100  ;;  %v96_v9 = vpop.permute.xlu0 %95  ;;  %v10416_v55 = vmax.f32 %v6830_v61, 0.0  ;;  %v10420_v58 = vmax.f32 %v6832_v41, 0.0  ;;  %v10417_v34 = vmax.f32 %v6834_v50, 0.0  ;;  %v10424_v54 = vmax.f32 %v6836_v49, 0.0 }
  0xa5   :  { %10938 = vst [vmem:[#allocation18_spill] sm:$0xff] %v6832_v41  ;;  %10939 = vst [vmem:[#allocation19_spill] sm:$0xff] %v6834_v50  ;;  %2027 = vperm.xlu1 %6244, %v5977_v59   ;;  %v471_v30 = vpack.c.bf16 %v10415_v5, %v10419_v51  ;;  %v10423_v20 = vmax.f32 %v6844_v4, 0.0  ;;  %v5979_v59 = vld [vmem:[%s10395_s6 + $0x98] sm:$0xff]  ;;  %v187_v18 = vmul.f32 %v6611_v10, %v96_v9 }
  0xa6   :  { %10940 = vst [vmem:[#allocation20_spill] sm:$0xff] %v6836_v49  ;;  %10941 = vst [vmem:[#allocation21_spill] sm:$0xff] %v6844_v4  ;;  %2022 = vperm.xlu0 %6243, %v5976_v60   ;;  %v473_v40 = vpack.c.bf16 %v10416_v55, %v10418_v62  ;;  %v470_v57 = vpack.c.bf16 %v10417_v34, %v10420_v58  ;;  %v191_v5 = vmul.f32 %v6611_v10, %v101_v35  ;;  %v5978_v55 = vld [vmem:[%s10395_s6 + $0x90] sm:$0xff] }
  0xa7   :  { %640 = vmatprep.subr.bf16.mxu0 %v471_v30  ;;  %v472_v60 = vpack.c.bf16 %v10423_v20, %v10424_v54  ;;  %v189_v34 = vmul.f32 %v6613_v11, %v96_v9  ;;  %v193_v62 = vmul.f32 %v6613_v11, %v101_v35  ;;  %v186_v51 = vmul.f32 %v6617_v12, %v96_v9 }
  0xa8   :  { %753 = vmatprep.subr.bf16.mxu1 %v473_v40  ;;  %v282_v58 = vpop.permute.xlu1 %281  ;;  %v277_v33 = vpop.permute.xlu0 %276  ;;  %641 = vmatpush1.bf16.msra.mxu0 %v470_v57  ;;  %v190_v30 = vmul.f32 %v6617_v12, %v101_v35  ;;  %v188_v27 = vmul.f32 %v6625_v15, %v96_v9  ;;  %v192_v20 = vmul.f32 %v6625_v15, %v101_v35  ;;  %v5981_v40 = vld [vmem:[%s10395_s6 + $0xa8] sm:$0xff] }
  0xa9   :  { %754 = vmatpush1.bf16.msra.mxu1 %v472_v60  ;;  %2037 = vperm.xlu1 %6244, %v5979_v59   ;;  %v6881_v54 = vadd.f32 %v277_v33, %v187_v18  ;;  %v6883_v47 = vadd.f32 %v282_v58, %v191_v5  ;;  %v6885_v46 = vadd.f32 %v277_v33, %v189_v34  ;;  %v5980_v18 = vld [vmem:[%s10395_s6 + $0xa0] sm:$0xff] }
  0xaa   :  { %2032 = vperm.xlu0 %6243, %v5978_v55   ;;  %v6890_v57 = vadd.f32 %v282_v58, %v193_v62  ;;  %v6892_v53 = vadd.f32 %v277_v33, %v186_v51  ;;  %v6894_v9 = vadd.f32 %v282_v58, %v190_v30  ;;  %v6896_v35 = vadd.f32 %v277_v33, %v188_v27 }
  0xab   :  { %10942 = vst [vmem:[#allocation22_spill] sm:$0xff] %v6881_v54  ;;  %10943 = vst [vmem:[#allocation23_spill] sm:$0xff] %v6883_v47  ;;  %v10435_v5 = vmax.f32 %v6881_v54, 0.0  ;;  %v10431_v55 = vmax.f32 %v6883_v47, 0.0  ;;  %v10434_v34 = vmax.f32 %v6885_v46, 0.0  ;;  %v6904_v59 = vadd.f32 %v282_v58, %v192_v20  ;;  %v6070_v54 = vld [vmem:[%s10395_s6 + $0x170] sm:$0xff] }
  0xac   :  { %10944 = vst [vmem:[#allocation24_spill] sm:$0xff] %v6885_v46  ;;  %10945 = vst [vmem:[#allocation25_spill] sm:$0xff] %v6890_v57  ;;  %v111_v62 = vpop.permute.xlu1 %110  ;;  %v106_v60 = vpop.permute.xlu0 %105  ;;  %v10432_v51 = vmax.f32 %v6890_v57, 0.0  ;;  %v10436_v30 = vmax.f32 %v6892_v53, 0.0  ;;  %v10433_v27 = vmax.f32 %v6894_v9, 0.0  ;;  %v10440_v33 = vmax.f32 %v6896_v35, 0.0 }
  0xad   :  { %10946 = vst [vmem:[#allocation26_spill] sm:$0xff] %v6892_v53  ;;  %10947 = vst [vmem:[#allocation27_spill] sm:$0xff] %v6894_v9  ;;  %2047 = vperm.xlu1 %6244, %v5981_v40   ;;  %v475_v52 = vpack.c.bf16 %v10431_v55, %v10435_v5  ;;  %v10439_v39 = vmax.f32 %v6904_v59, 0.0  ;;  %v5983_v40 = vld [vmem:[%s10395_s6 + $0xb8] sm:$0xff]  ;;  %v195_v37 = vmul.f32 %v6611_v10, %v106_v60 }
  0xae   :  { %10948 = vst [vmem:[#allocation28_spill] sm:$0xff] %v6896_v35  ;;  %10949 = vst [vmem:[#allocation29_spill] sm:$0xff] %v6904_v59  ;;  %2042 = vperm.xlu0 %6243, %v5980_v18   ;;  %v477_v20 = vpack.c.bf16 %v10432_v51, %v10434_v34  ;;  %v474_v58 = vpack.c.bf16 %v10433_v27, %v10436_v30  ;;  %v199_v55 = vmul.f32 %v6611_v10, %v111_v62  ;;  %v5982_v51 = vld [vmem:[%s10395_s6 + $0xb0] sm:$0xff] }
  0xaf   :  { %642 = vmatprep.subr.bf16.mxu0 %v475_v52  ;;  %v476_v18 = vpack.c.bf16 %v10439_v39, %v10440_v33  ;;  %v197_v27 = vmul.f32 %v6613_v11, %v106_v60  ;;  %v201_v34 = vmul.f32 %v6613_v11, %v111_v62  ;;  %v194_v5 = vmul.f32 %v6617_v12, %v106_v60 }
  0xb0   :  { %755 = vmatprep.subr.bf16.mxu1 %v477_v20  ;;  %v292_v30 = vpop.permute.xlu1 %291  ;;  %v287_v45 = vpop.permute.xlu0 %286  ;;  %643 = vmatpush1.bf16.msra.mxu0 %v474_v58  ;;  %v198_v52 = vmul.f32 %v6617_v12, %v111_v62  ;;  %v196_v43 = vmul.f32 %v6625_v15, %v106_v60  ;;  %v200_v39 = vmul.f32 %v6625_v15, %v111_v62  ;;  %v5985_v20 = vld [vmem:[%s10395_s6 + $0xc8] sm:$0xff] }
  0xb1   :  { %756 = vmatpush1.bf16.msra.mxu1 %v476_v18  ;;  %2057 = vperm.xlu1 %6244, %v5983_v40   ;;  %v6941_v33 = vadd.f32 %v287_v45, %v195_v37  ;;  %v6943_v3 = vadd.f32 %v292_v30, %v199_v55  ;;  %v6945_v63 = vadd.f32 %v287_v45, %v197_v27  ;;  %v5984_v37 = vld [vmem:[%s10395_s6 + $0xc0] sm:$0xff] }
  0xb2   :  { %2052 = vperm.xlu0 %6243, %v5982_v51   ;;  %v6950_v58 = vadd.f32 %v292_v30, %v201_v34  ;;  %v6952_v57 = vadd.f32 %v287_v45, %v194_v5  ;;  %v6954_v60 = vadd.f32 %v292_v30, %v198_v52  ;;  %v6956_v62 = vadd.f32 %v287_v45, %v196_v43 }
  0xb3   :  { %10950 = vst [vmem:[#allocation30_spill] sm:$0xff] %v6941_v33  ;;  %10951 = vst [vmem:[#allocation31_spill] sm:$0xff] %v6943_v3  ;;  %v10449_v55 = vmax.f32 %v6941_v33, 0.0  ;;  %v10448_v51 = vmax.f32 %v6943_v3, 0.0  ;;  %v6964_v40 = vadd.f32 %v292_v30, %v200_v39  ;;  %v10958_v39 = vmax.f32 %v6945_v63, 0.0 }
  0xb4   :  { %10952 = vst [vmem:[#allocation32_spill] sm:$0xff] %v6945_v63  ;;  %10953 = vst [vmem:[#allocation33_spill] sm:$0xff] %v6950_v58  ;;  %v121_v34 = vpop.permute.xlu1 %120  ;;  %v116_v18 = vpop.permute.xlu0 %115  ;;  %v10450_v5 = vmax.f32 %v6950_v58, 0.0  ;;  %v10452_v52 = vmax.f32 %v6952_v57, 0.0  ;;  %v10451_v43 = vmax.f32 %v6954_v60, 0.0 }
  0xb5   :  { %10954 = vst [vmem:[#allocation34_spill] sm:$0xff] %v6952_v57  ;;  %10955 = vst [vmem:[#allocation35_spill] sm:$0xff] %v6954_v60  ;;  %2067 = vperm.xlu1 %6244, %v5985_v20   ;;  %v479_v47 = vpack.c.bf16 %v10448_v51, %v10449_v55  ;;  %v10456_v27 = vmax.f32 %v6964_v40, 0.0  ;;  %v5987_v20 = vld [vmem:[%s10395_s6 + $0xd8] sm:$0xff]  ;;  %v203_v45 = vmul.f32 %v6611_v10, %v116_v18 }
  0xb6   :  { %10956 = vst [vmem:[#allocation36_spill] sm:$0xff] %v6956_v62  ;;  %10957 = vst [vmem:[#allocation37_spill] sm:$0xff] %v6964_v40  ;;  %2062 = vperm.xlu0 %6243, %v5984_v37   ;;  %v481_v30 = vpack.c.bf16 %v10450_v5, %v10958_v39  ;;  %v478_v59 = vpack.c.bf16 %v10451_v43, %v10452_v52  ;;  %v207_v51 = vmul.f32 %v6611_v10, %v121_v34  ;;  %v5986_v39 = vld [vmem:[%s10395_s6 + $0xd0] sm:$0xff] }
  0xb7   :  { %644 = vmatprep.subr.bf16.mxu0 %v479_v47  ;;  %v10959_v37 = vmax.f32 %v6956_v62, 0.0  ;;  %v205_v5 = vmul.f32 %v6613_v11, %v116_v18  ;;  %v209_v43 = vmul.f32 %v6613_v11, %v121_v34  ;;  %v202_v52 = vmul.f32 %v6617_v12, %v116_v18 }
  0xb8   :  { %757 = vmatprep.subr.bf16.mxu1 %v481_v30  ;;  %v302_v58 = vpop.permute.xlu1 %301  ;;  %v297_v3 = vpop.permute.xlu0 %296  ;;  %645 = vmatpush1.bf16.msra.mxu0 %v478_v59  ;;  %v206_v47 = vmul.f32 %v6617_v12, %v121_v34  ;;  %v204_v60 = vmul.f32 %v6625_v15, %v116_v18  ;;  %v5989_v30 = vld [vmem:[%s10395_s6 + $0xe8] sm:$0xff] }
  0xb9   :  { %v480_v55 = vpack.c.bf16 %v10456_v27, %v10959_v37  ;;  %v208_v37 = vmul.f32 %v6625_v15, %v121_v34  ;;  %2077 = vperm.xlu1 %6244, %v5987_v20   ;;  %v7001_v27 = vadd.f32 %v297_v3, %v203_v45  ;;  %v7003_v40 = vadd.f32 %v302_v58, %v207_v51 }
  0xba   :  { %v7005_v63 = vadd.f32 %v297_v3, %v205_v5  ;;  %2072 = vperm.xlu0 %6243, %v5986_v39   ;;  %v7010_v59 = vadd.f32 %v302_v58, %v209_v43  ;;  %v7012_v33 = vadd.f32 %v297_v3, %v202_v52  ;;  %v7014_v18 = vadd.f32 %v302_v58, %v206_v47 }
  0xbb   :  { %758 = vmatpush1.bf16.msra.mxu1 %v480_v55  ;;  %10960 = vst [vmem:[#allocation38_spill] sm:$0xff] %v7001_v27  ;;  %10961 = vst [vmem:[#allocation39_spill] sm:$0xff] %v7003_v40  ;;  %v7016_v34 = vadd.f32 %v297_v3, %v204_v60  ;;  %v5988_v55 = vld [vmem:[%s10395_s6 + $0xe0] sm:$0xff]  ;;  %v10463_v51 = vmax.f32 %v7001_v27, 0.0  ;;  %v10462_v5 = vmax.f32 %v7003_v40, 0.0  ;;  %v7024_v20 = vadd.f32 %v302_v58, %v208_v37 }
  0xbc   :  { %10962 = vst [vmem:[#allocation40_spill] sm:$0xff] %v7005_v63  ;;  %10963 = vst [vmem:[#allocation41_spill] sm:$0xff] %v7010_v59  ;;  %v131_v43 = vpop.permute.xlu1 %130  ;;  %v126_v39 = vpop.permute.xlu0 %125  ;;  %v10464_v52 = vmax.f32 %v7010_v59, 0.0  ;;  %v10466_v47 = vmax.f32 %v7012_v33, 0.0  ;;  %v10465_v3 = vmax.f32 %v7014_v18, 0.0  ;;  %v10968_v58 = vmax.f32 %v7005_v63, 0.0 }
  0xbd   :  { %10964 = vst [vmem:[#allocation42_spill] sm:$0xff] %v7012_v33  ;;  %10965 = vst [vmem:[#allocation43_spill] sm:$0xff] %v7014_v18  ;;  %2087 = vperm.xlu1 %6244, %v5989_v30   ;;  %v483_v62 = vpack.c.bf16 %v10462_v5, %v10463_v51  ;;  %v10469_v45 = vmax.f32 %v7024_v20, 0.0  ;;  %v5991_v30 = vld [vmem:[%s10395_s6 + $0xf8] sm:$0xff]  ;;  %v211_v60 = vmul.f32 %v6611_v10, %v126_v39  ;;  %v6251_v33 = vld [vmem:[%s10392_s3 + $0x30] sm:$0xff]  }
  0xbe   :  { %10966 = vst [vmem:[#allocation44_spill] sm:$0xff] %v7016_v34  ;;  %10967 = vst [vmem:[#allocation45_spill] sm:$0xff] %v7024_v20  ;;  %2082 = vperm.xlu0 %6243, %v5988_v55   ;;  %v485_v37 = vpack.c.bf16 %v10464_v52, %v10968_v58  ;;  %v482_v57 = vpack.c.bf16 %v10465_v3, %v10466_v47  ;;  %v215_v5 = vmul.f32 %v6611_v10, %v131_v43  ;;  %v5990_v58 = vld [vmem:[%s10395_s6 + $0xf0] sm:$0xff] }
  0xbf   :  { %646 = vmatprep.subr.bf16.mxu0 %v483_v62  ;;  %v10969_v55 = vmax.f32 %v7016_v34, 0.0  ;;  %v213_v52 = vmul.f32 %v6613_v11, %v126_v39  ;;  %v217_v3 = vmul.f32 %v6613_v11, %v131_v43  ;;  %v210_v47 = vmul.f32 %v6617_v12, %v126_v39  ;;  %v6017_v11 = vld [vmem:[%s10393_s4 + $0x108] sm:$0xff]  ;;  %v6064_v34 = vld [vmem:[%s10395_s6 + $0x140] sm:$0xff] }
  0xc0   :  { %759 = vmatprep.subr.bf16.mxu1 %v485_v37  ;;  %v312_v59 = vpop.permute.xlu1 %311  ;;  %v307_v40 = vpop.permute.xlu0 %306  ;;  %647 = vmatpush1.bf16.msra.mxu0 %v482_v57  ;;  %v214_v10 = vmul.f32 %v6617_v12, %v131_v43  ;;  %v212_v62 = vmul.f32 %v6625_v15, %v126_v39 }
  0xc1   :  { %v484_v51 = vpack.c.bf16 %v10469_v45, %v10969_v55  ;;  %v216_v55 = vmul.f32 %v6625_v15, %v131_v43  ;;  %2097 = vperm.xlu1 %6244, %v5991_v30   ;;  %v7061_v45 = vadd.f32 %v307_v40, %v211_v60  ;;  %v7063_v20 = vadd.f32 %v312_v59, %v215_v5 }
  0xc2   :  { %v7065_v18 = vadd.f32 %v307_v40, %v213_v52  ;;  %2092 = vperm.xlu0 %6243, %v5990_v58   ;;  %v7070_v57 = vadd.f32 %v312_v59, %v217_v3  ;;  %v7072_v12 = vadd.f32 %v307_v40, %v210_v47  ;;  %v7074_v39 = vadd.f32 %v312_v59, %v214_v10 }
  0xc3   :  { %760 = vmatpush1.bf16.msra.mxu1 %v484_v51  ;;  %10970 = vst [vmem:[#allocation46_spill] sm:$0xff] %v7061_v45  ;;  %10971 = vst [vmem:[#allocation47_spill] sm:$0xff] %v7063_v20  ;;  %v7076_v15 = vadd.f32 %v307_v40, %v212_v62  ;;  %v6016_v51 = vld [vmem:[%s10393_s4 + $0x100] sm:$0xff]  ;;  %v10478_v5 = vmax.f32 %v7061_v45, 0.0  ;;  %v10472_v43 = vmax.f32 %v7063_v20, 0.0  ;;  %v7084_v60 = vadd.f32 %v312_v59, %v216_v55  ;;  %v6058_v45 = vld [vmem:[%s10395_s6 + $0x110] sm:$0xff] }
  0xc4   :  { %10972 = vst [vmem:[#allocation48_spill] sm:$0xff] %v7065_v18  ;;  %10973 = vst [vmem:[#allocation49_spill] sm:$0xff] %v7070_v57  ;;  %v10475_v52 = vmax.f32 %v7065_v18, 0.0  ;;  %v7086_v3 = vpop.permute.xlu1 %513  ;;  %v7088_v47 = vpop.permute.xlu0 %508  ;;  %v10473_v37 = vmax.f32 %v7070_v57, 0.0  ;;  %v10479_v40 = vmax.f32 %v7072_v12, 0.0  ;;  %v10474_v30 = vmax.f32 %v7074_v39, 0.0 }
  0xc5   :  { %10974 = vst [vmem:[#allocation50_spill] sm:$0xff] %v7072_v12  ;;  %10975 = vst [vmem:[#allocation51_spill] sm:$0xff] %v7074_v39  ;;  %v10477_v58 = vmax.f32 %v7076_v15, 0.0  ;;  %2575 = vperm.xlu1 %6244, %v6017_v11   ;;  %v487_v10 = vpack.c.bf16 %v10472_v43, %v10478_v5  ;;  %v10476_v59 = vmax.f32 %v7084_v60, 0.0  ;;  %v6019_v11 = vld [vmem:[%s10393_s4 + $0x118] sm:$0xff]  ;;  %v6018_v43 = vld [vmem:[%s10393_s4 + $0x110] sm:$0xff] }
  0xc6   :  { %10976 = vst [vmem:[#allocation52_spill] sm:$0xff] %v7076_v15  ;;  %10977 = vst [vmem:[#allocation53_spill] sm:$0xff] %v7084_v60  ;;  %2570 = vperm.xlu0 %6243, %v6016_v51   ;;  %v489_v62 = vpack.c.bf16 %v10473_v37, %v10475_v52  ;;  %v486_v55 = vpack.c.bf16 %v10474_v30, %v10479_v40  ;;  %v6245_v37 = vld [vmem:[%s10392_s3] sm:$0xff]   ;;  %v10978_v5 = vmov 0   ;;  %v6248_v15 = vld [vmem:[%s10392_s3 + $0x18] sm:$0xff]  }
  0xc7   :  { %648 = vmatprep.subr.bf16.mxu0 %v487_v10  ;;  %v488_v51 = vpack.c.bf16 %v10476_v59, %v10477_v58  ;;  %v6021_v10 = vld [vmem:[%s10393_s4 + $0x128] sm:$0xff]  ;;  %v6020_v59 = vld [vmem:[%s10393_s4 + $0x120] sm:$0xff] }
  0xc8   :  { %761 = vmatprep.subr.bf16.mxu1 %v489_v62  ;;  %v7120_v30 = vpop.permute.xlu1 %523  ;;  %v7122_v52 = vpop.permute.xlu0 %518  ;;  %649 = vmatpush1.bf16.msra.mxu0 %v486_v55  ;;  %v6022_v55 = vld [vmem:[%s10393_s4 + $0x130] sm:$0xff]  ;;  %v6028_v60 = vld [vmem:[%s10393_s4 + $0x160] sm:$0xff] }
  0xc9   :  { %762 = vmatpush1.bf16.msra.mxu1 %v488_v51  ;;  %2585 = vperm.xlu1 %6244, %v6019_v11  }
  0xca   :  { %2580 = vperm.xlu0 %6243, %v6018_v43   ;;  %v6023_v43 = vld [vmem:[%s10393_s4 + $0x138] sm:$0xff] }
  0xcb   :  { %667 = vmatmul.mubr.bf16.vlgmr.msra.gmra.mrb[0].mxu0 %v6245_v37 }
  0xcc   :  { %780 = vmatmul.mubr.bf16.vlgmr.msra.gmra.mrb[0].mxu1 %v6245_v37  ;;  %v7130_v58 = vpop.permute.xlu1 %533  ;;  %v7132_v62 = vpop.permute.xlu0 %528  ;;  %676 = vmatprep.mubr.bf16.mxu0 %v10978_v5  ;;  %v6246_v37 = vld [vmem:[%s10392_s3 + $0x8] sm:$0xff]  }
  0xcd   :  { %2595 = vperm.xlu1 %6244, %v6021_v10   ;;  %789 = vmatprep.mubr.bf16.mxu1 %v10978_v5  ;;  %v6024_v10 = vld [vmem:[%s10393_s4 + $0x140] sm:$0xff] }
  0xce   :  { %2590 = vperm.xlu0 %6243, %v6020_v59   ;;  %v6025_v59 = vld [vmem:[%s10393_s4 + $0x148] sm:$0xff] }
  0xd0   :  { %v7145_v11 = vpop.permute.xlu1 %543  ;;  %v7147_v51 = vpop.permute.xlu0 %538 }
  0xd1   :  { %2605 = vperm.xlu1 %6244, %v6023_v43   ;;  %v6027_v43 = vld [vmem:[%s10393_s4 + $0x158] sm:$0xff] }
  0xd2   :  { %2600 = vperm.xlu0 %6243, %v6022_v55   ;;  %v6026_v55 = vld [vmem:[%s10393_s4 + $0x150] sm:$0xff] }
  0xd3   :  { %677 = vmatmul.mubr.bf16.gmra.mrb[4].mxu0 %v6246_v37 }
  0xd4   :  { %790 = vmatmul.mubr.bf16.gmra.mrb[4].mxu1 %v6246_v37  ;;  %v7155_v40 = vpop.permute.xlu0 %548  ;;  %686 = vmatprep.mubr.bf16.mxu0 %v10978_v5  ;;  %v7158_v57 = vpop.permute.xlu1 %553  ;;  %v6247_v37 = vld [vmem:[%s10392_s3 + $0x10] sm:$0xff]  }
  0xd5   :  { %2615 = vperm.xlu1 %6244, %v6025_v59   ;;  %799 = vmatprep.mubr.bf16.mxu1 %v10978_v5  ;;  %v6029_v59 = vld [vmem:[%s10393_s4 + $0x168] sm:$0xff] }
  0xd6   :  { %2610 = vperm.xlu0 %6243, %v6024_v10  }
  0xd8   :  { %v7170_v20 = vpop.permute.xlu0 %558  ;;  %v7175_v10 = vpop.permute.xlu1 %563 }
  0xd9   :  { %2625 = vperm.xlu1 %6244, %v6027_v43   ;;  %v6031_v43 = vld [vmem:[%s10393_s4 + $0x178] sm:$0xff] }
  0xda   :  { %2620 = vperm.xlu0 %6243, %v6026_v55   ;;  %v6030_v55 = vld [vmem:[%s10393_s4 + $0x170] sm:$0xff] }
  0xdb   :  { %687 = vmatmul.mubr.bf16.gmra.mrb[8].mxu0 %v6247_v37 }
  0xdc   :  { %800 = vmatmul.mubr.bf16.gmra.mrb[8].mxu1 %v6247_v37  ;;  %696 = vmatprep.mubr.bf16.mxu0 %v10978_v5  ;;  %v7191_v39 = vpop.permute.xlu0 %568  ;;  %v7193_v37 = vpop.permute.xlu1 %573 }
  0xdd   :  { %2635 = vperm.xlu1 %6244, %v6029_v59   ;;  %809 = vmatprep.mubr.bf16.mxu1 %v10978_v5  ;;  %v6056_v59 = vld [vmem:[%s10395_s6 + $0x100] sm:$0xff] }
  0xde   :  { %2630 = vperm.xlu0 %6243, %v6028_v60   ;;  %v6057_v60 = vld [vmem:[%s10395_s6 + $0x108] sm:$0xff] }
  0xe0   :  { %v7203_v18 = vpop.permute.xlu0 %578 }
  0xe1   :  { %2645 = vperm.xlu1 %6244, %v6031_v43   ;;  %v6059_v43 = vld [vmem:[%s10395_s6 + $0x118] sm:$0xff] }
  0xe2   :  { %2640 = vperm.xlu0 %6243, %v6030_v55   ;;  %v7208_v55 = vpop.permute.xlu1 %583 }
  0xe3   :  { %697 = vmatmul.mubr.bf16.gmra.mrb[12].mxu0 %v6248_v15 }
  0xe4   :  { %810 = vmatmul.mubr.bf16.gmra.mrb[12].mxu1 %v6248_v15  ;;  %706 = vmatprep.mubr.bf16.mxu0 %v10978_v5  ;;  %v6249_v15 = vld [vmem:[%s10392_s3 + $0x20] sm:$0xff]   ;;  %v7222_v12 = vpop.permute.xlu0 %990 }
  0xe5   :  { %3059 = vperm.xlu1 %6244, %v6057_v60   ;;  %819 = vmatprep.mubr.bf16.mxu1 %v10978_v5  ;;  %v6061_v60 = vld [vmem:[%s10395_s6 + $0x128] sm:$0xff] }
  0xe6   :  { %3054 = vperm.xlu0 %6243, %v6056_v59   ;;  %v6060_v59 = vld [vmem:[%s10395_s6 + $0x120] sm:$0xff]  ;;  %v7225_v63 = vpop.permute.xlu1 %995 }
  0xe8   :  { %v7237_v27 = vpop.permute.xlu0 %1000 }
  0xe9   :  { %3069 = vperm.xlu1 %6244, %v6059_v43   ;;  %v6062_v43 = vld [vmem:[%s10395_s6 + $0x130] sm:$0xff] }
  0xea   :  { %3064 = vperm.xlu0 %6243, %v6058_v45   ;;  %v6063_v45 = vld [vmem:[%s10395_s6 + $0x138] sm:$0xff] }
  0xeb   :  { %707 = vmatmul.mubr.bf16.gmra.mrb[16].mxu0 %v6249_v15 }
  0xec   :  { %820 = vmatmul.mubr.bf16.gmra.mrb[16].mxu1 %v6249_v15  ;;  %716 = vmatprep.mubr.bf16.mxu0 %v10978_v5  ;;  %v6250_v15 = vld [vmem:[%s10392_s3 + $0x28] sm:$0xff]   ;;  %v7258_v9 = vpop.permute.xlu0 %1010 }
  0xed   :  { %3079 = vperm.xlu1 %6244, %v6061_v60   ;;  %829 = vmatprep.mubr.bf16.mxu1 %v10978_v5  ;;  %v6065_v60 = vld [vmem:[%s10395_s6 + $0x148] sm:$0xff] }
  0xee   :  { %3074 = vperm.xlu0 %6243, %v6060_v59   ;;  %v7242_v59 = vpop.permute.xlu1 %1005 }
  0xf0   :  { %v7270_v46 = vpop.permute.xlu0 %1020 }
  0xf1   :  { %3089 = vperm.xlu1 %6244, %v6063_v45   ;;  %v6067_v45 = vld [vmem:[%s10395_s6 + $0x158] sm:$0xff]  ;;  %10980 = vst [vmem:[#allocation55_spill] sm:$0xff] %v7270_v46 }
  0xf2   :  { %3084 = vperm.xlu0 %6243, %v6062_v43   ;;  %v6066_v43 = vld [vmem:[%s10395_s6 + $0x150] sm:$0xff] }
  0xf3   :  { %717 = vmatmul.mubr.bf16.gmra.mrb[20].mxu0 %v6250_v15 }
  0xf4   :  { %830 = vmatmul.mubr.bf16.gmra.mrb[20].mxu1 %v6250_v15  ;;  %726 = vmatprep.mubr.bf16.mxu0 %v10978_v5  ;;  %v7260_v15 = vpop.permute.xlu1 %1015  ;;  %v7289_v35 = vpop.permute.xlu0 %1030 }
  0xf5   :  { %3099 = vperm.xlu1 %6244, %v6065_v60   ;;  %839 = vmatprep.mubr.bf16.mxu1 %v10978_v5  ;;  %10979 = vst [vmem:[#allocation54_spill] sm:$0xff] %v7260_v15  ;;  %v6068_v60 = vld [vmem:[%s10395_s6 + $0x160] sm:$0xff]  ;;  %10982 = vst [vmem:[#allocation57_spill] sm:$0xff] %v7289_v35 }
  0xf6   :  { %3094 = vperm.xlu0 %6243, %v6064_v34   ;;  %v6069_v34 = vld [vmem:[%s10395_s6 + $0x168] sm:$0xff] }
  0xf8   :  { %v7301_v61 = vpop.permute.xlu0 %1040 }
  0xf9   :  { %3109 = vperm.xlu1 %6244, %v6067_v45   ;;  %v6071_v45 = vld [vmem:[%s10395_s6 + $0x178] sm:$0xff]  ;;  %10984 = vst [vmem:[#allocation59_spill] sm:$0xff] %v7301_v61 }
  0xfa   :  { %3104 = vperm.xlu0 %6243, %v6066_v43   ;;  %v7275_v43 = vpop.permute.xlu1 %1025 }
  0xfb   :  { %727 = vmatmul.mubr.bf16.gmra.mrb[24].mxu0 %v6251_v33  ;;  %10981 = vst [vmem:[#allocation56_spill] sm:$0xff] %v7275_v43 }
  0xfc   :  { %840 = vmatmul.mubr.bf16.gmra.mrb[24].mxu1 %v6251_v33  ;;  %736 = vmatprep.mubr.bf16.mxu0 %v10978_v5  ;;  %v6252_v33 = vld [vmem:[%s10392_s3 + $0x38] sm:$0xff]  }
  0xfd   :  { %3119 = vperm.xlu1 %6244, %v6069_v34   ;;  %849 = vmatprep.mubr.bf16.mxu1 %v10978_v5  ;;  %v6097_v34 = vld [vmem:[%s10393_s4 + $0x188] sm:$0xff] }
  0xfe   :  { %3114 = vperm.xlu0 %6243, %v6068_v60   ;;  %v6096_v60 = vld [vmem:[%s10393_s4 + $0x180] sm:$0xff]  ;;  %v7292_v53 = vpop.permute.xlu1 %1035 }
  0xff   :  { %10983 = vst [vmem:[#allocation58_spill] sm:$0xff] %v7292_v53  ;;  %v6103_v53 = vld [vmem:[%s10393_s4 + $0x1b8] sm:$0xff] }
 0x101   :  { %3129 = vperm.xlu1 %6244, %v6071_v45   ;;  %v6098_v45 = vld [vmem:[%s10393_s4 + $0x190] sm:$0xff] }
 0x102   :  { %3124 = vperm.xlu0 %6243, %v6070_v54   ;;  %v6099_v54 = vld [vmem:[%s10393_s4 + $0x198] sm:$0xff] }
 0x103   :  { %737 = vmatmul.mubr.bf16.gmra.mrb[28].mxu0 %v6252_v33 }
 0x104   :  { %850 = vmatmul.mubr.bf16.gmra.mrb[28].mxu1 %v6252_v33  ;;  %1148 = vmatprep.mubr.bf16.mxu0 %v10978_v5  ;;  %v6101_v33 = vld [vmem:[%s10393_s4 + $0x1a8] sm:$0xff] }
 0x105   :  { %3607 = vperm.xlu1 %6244, %v6097_v34   ;;  %1261 = vmatprep.mubr.bf16.mxu1 %v10978_v5  ;;  %v7306_v34 = vpop.permute.xlu1 %1045 }
 0x106   :  { %3602 = vperm.xlu0 %6243, %v6096_v60   ;;  %10985 = vst [vmem:[#allocation60_spill] sm:$0xff] %v7306_v34  ;;  %v6100_v60 = vld [vmem:[%s10393_s4 + $0x1a0] sm:$0xff]  ;;  %v6105_v34 = vld [vmem:[%s10393_s4 + $0x1c8] sm:$0xff] }
 0x109   :  { %3617 = vperm.xlu1 %6244, %v6099_v54   ;;  %v6102_v54 = vld [vmem:[%s10393_s4 + $0x1b0] sm:$0xff]  ;;  %v7319_v61 = vpop.permute.xlu1 %1055 }
 0x10a   :  { %3612 = vperm.xlu0 %6243, %v6098_v45   ;;  %v7317_v45 = vpop.permute.xlu0 %1050  ;;  %10987 = vst [vmem:[#allocation62_spill] sm:$0xff] %v7319_v61 }
 0x10b   :  { %10986 = vst [vmem:[#allocation61_spill] sm:$0xff] %v7317_v45  ;;  %v6107_v45 = vld [vmem:[%s10393_s4 + $0x1d8] sm:$0xff] }
 0x10d   :  { %3627 = vperm.xlu1 %6244, %v6101_v33   ;;  %v6104_v33 = vld [vmem:[%s10393_s4 + $0x1c0] sm:$0xff]  ;;  %v7332_v35 = vpop.permute.xlu1 %1065 }
 0x10e   :  { %3622 = vperm.xlu0 %6243, %v6100_v60   ;;  %v7327_v60 = vpop.permute.xlu0 %1060  ;;  %10989 = vst [vmem:[#allocation64_spill] sm:$0xff] %v7332_v35  ;;  %v6111_v35 = vld [vmem:[%s10393_s4 + $0x1f8] sm:$0xff] }
 0x10f   :  { %10988 = vst [vmem:[#allocation63_spill] sm:$0xff] %v7327_v60 }
 0x111   :  { %3637 = vperm.xlu1 %6244, %v6103_v53   ;;  %v6106_v53 = vld [vmem:[%s10393_s4 + $0x1d0] sm:$0xff]  ;;  %v7345_v60 = vpop.permute.xlu1 %1543 }
 0x112   :  { %3632 = vperm.xlu0 %6243, %v6102_v54   ;;  %v6109_v54 = vld [vmem:[%s10393_s4 + $0x1e8] sm:$0xff]  ;;  %10991 = vst [vmem:[#allocation66_spill] sm:$0xff] %v7345_v60 }
 0x115   :  { %3647 = vperm.xlu1 %6244, %v6105_v34   ;;  %v6108_v34 = vld [vmem:[%s10393_s4 + $0x1e0] sm:$0xff]  ;;  %v7358_v61 = vpop.permute.xlu1 %1553 }
 0x116   :  { %3642 = vperm.xlu0 %6243, %v6104_v33   ;;  %v7343_v33 = vpop.permute.xlu0 %1538  ;;  %10993 = vst [vmem:[#allocation68_spill] sm:$0xff] %v7358_v61  ;;  %v6141_v61 = vld [vmem:[%s10395_s6 + $0x1a8] sm:$0xff] }
 0x117   :  { %10990 = vst [vmem:[#allocation65_spill] sm:$0xff] %v7343_v33  ;;  %v6137_v33 = vld [vmem:[%s10395_s6 + $0x188] sm:$0xff] }
 0x119   :  { %3657 = vperm.xlu1 %6244, %v6107_v45   ;;  %v6110_v45 = vld [vmem:[%s10393_s4 + $0x1f0] sm:$0xff] }
 0x11a   :  { %3652 = vperm.xlu0 %6243, %v6106_v53   ;;  %v7353_v53 = vpop.permute.xlu0 %1548 }
 0x11b   :  { %10992 = vst [vmem:[#allocation67_spill] sm:$0xff] %v7353_v53  ;;  %v7371_v53 = vpop.permute.xlu1 %1563 }
 0x11c   :  { %10995 = vst [vmem:[#allocation70_spill] sm:$0xff] %v7371_v53 }
 0x11d   :  { %3667 = vperm.xlu1 %6244, %v6109_v54   ;;  %v6136_v54 = vld [vmem:[%s10395_s6 + $0x180] sm:$0xff] }
 0x11e   :  { %3662 = vperm.xlu0 %6243, %v6108_v34   ;;  %v6139_v34 = vld [vmem:[%s10395_s6 + $0x198] sm:$0xff] }
 0x11f   :  { %v7384_v60 = vpop.permute.xlu1 %1573 }
 0x120   :  { %10997 = vst [vmem:[#allocation72_spill] sm:$0xff] %v7384_v60  ;;  %v6147_v60 = vld [vmem:[%s10395_s6 + $0x1d8] sm:$0xff] }
 0x121   :  { %3677 = vperm.xlu1 %6244, %v6111_v35   ;;  %v6138_v35 = vld [vmem:[%s10395_s6 + $0x190] sm:$0xff] }
 0x122   :  { %3672 = vperm.xlu0 %6243, %v6110_v45   ;;  %v7369_v45 = vpop.permute.xlu0 %1558 }
 0x123   :  { %10994 = vst [vmem:[#allocation69_spill] sm:$0xff] %v7369_v45  ;;  %v6143_v45 = vld [vmem:[%s10395_s6 + $0x1b8] sm:$0xff] }
 0x125   :  { %4091 = vperm.xlu1 %6244, %v6137_v33   ;;  %v6140_v33 = vld [vmem:[%s10395_s6 + $0x1a0] sm:$0xff] }
 0x126   :  { %4086 = vperm.xlu0 %6243, %v6136_v54   ;;  %v7379_v54 = vpop.permute.xlu0 %1568 }
 0x127   :  { %10996 = vst [vmem:[#allocation71_spill] sm:$0xff] %v7379_v54  ;;  %v7397_v54 = vpop.permute.xlu1 %1583 }
 0x128   :  { %10999 = vst [vmem:[#allocation74_spill] sm:$0xff] %v7397_v54 }
 0x129   :  { %4101 = vperm.xlu1 %6244, %v6139_v34   ;;  %v6142_v34 = vld [vmem:[%s10395_s6 + $0x1b0] sm:$0xff] }
 0x12a   :  { %4096 = vperm.xlu0 %6243, %v6138_v35   ;;  %v6145_v35 = vld [vmem:[%s10395_s6 + $0x1c8] sm:$0xff] }
 0x12b   :  { %v7410_v53 = vpop.permute.xlu1 %1593 }
 0x12c   :  { %11001 = vst [vmem:[#allocation76_spill] sm:$0xff] %v7410_v53  ;;  %v6177_v53 = vld [vmem:[%s10393_s4 + $0x208] sm:$0xff] }
 0x12d   :  { %4111 = vperm.xlu1 %6244, %v6141_v61   ;;  %v6144_v61 = vld [vmem:[%s10395_s6 + $0x1c0] sm:$0xff] }
 0x12e   :  { %4106 = vperm.xlu0 %6243, %v6140_v33   ;;  %v7395_v33 = vpop.permute.xlu0 %1578 }
 0x12f   :  { %10998 = vst [vmem:[#allocation73_spill] sm:$0xff] %v7395_v33  ;;  %v6149_v33 = vld [vmem:[%s10395_s6 + $0x1e8] sm:$0xff] }
 0x131   :  { %4121 = vperm.xlu1 %6244, %v6143_v45   ;;  %v6146_v45 = vld [vmem:[%s10395_s6 + $0x1d0] sm:$0xff] }
 0x132   :  { %4116 = vperm.xlu0 %6243, %v6142_v34   ;;  %v7405_v34 = vpop.permute.xlu0 %1588 }
 0x133   :  { %11000 = vst [vmem:[#allocation75_spill] sm:$0xff] %v7405_v34  ;;  %v7423_v34 = vpop.permute.xlu1 %1603 }
 0x134   :  { %11003 = vst [vmem:[#allocation78_spill] sm:$0xff] %v7423_v34 }
 0x135   :  { %4131 = vperm.xlu1 %6244, %v6145_v35   ;;  %v6148_v35 = vld [vmem:[%s10395_s6 + $0x1e0] sm:$0xff] }
 0x136   :  { %4126 = vperm.xlu0 %6243, %v6144_v61   ;;  %v6151_v61 = vld [vmem:[%s10395_s6 + $0x1f8] sm:$0xff] }
 0x137   :  { %v7436_v54 = vpop.permute.xlu1 %1613 }
 0x138   :  { %11005 = vst [vmem:[#allocation80_spill] sm:$0xff] %v7436_v54  ;;  %v6183_v54 = vld [vmem:[%s10393_s4 + $0x238] sm:$0xff] }
 0x139   :  { %4141 = vperm.xlu1 %6244, %v6147_v60   ;;  %v6150_v60 = vld [vmem:[%s10395_s6 + $0x1f0] sm:$0xff] }
 0x13a   :  { %4136 = vperm.xlu0 %6243, %v6146_v45   ;;  %v7421_v45 = vpop.permute.xlu0 %1598 }
 0x13b   :  { %11002 = vst [vmem:[#allocation77_spill] sm:$0xff] %v7421_v45  ;;  %v6179_v45 = vld [vmem:[%s10393_s4 + $0x218] sm:$0xff] }
 0x13d   :  { %4151 = vperm.xlu1 %6244, %v6149_v33   ;;  %v6176_v33 = vld [vmem:[%s10393_s4 + $0x200] sm:$0xff] }
 0x13e   :  { %4146 = vperm.xlu0 %6243, %v6148_v35   ;;  %v7431_v35 = vpop.permute.xlu0 %1608 }
 0x13f   :  { %11004 = vst [vmem:[#allocation79_spill] sm:$0xff] %v7431_v35  ;;  %v7449_v35 = vpop.permute.xlu1 %2027 }
 0x140   :  { %11007 = vst [vmem:[#allocation82_spill] sm:$0xff] %v7449_v35 }
 0x141   :  { %4161 = vperm.xlu1 %6244, %v6151_v61   ;;  %v6178_v61 = vld [vmem:[%s10393_s4 + $0x210] sm:$0xff] }
 0x142   :  { %4156 = vperm.xlu0 %6243, %v6150_v60   ;;  %v6181_v60 = vld [vmem:[%s10393_s4 + $0x228] sm:$0xff] }
 0x143   :  { %v7462_v34 = vpop.permute.xlu1 %2037 }
 0x144   :  { %11009 = vst [vmem:[#allocation84_spill] sm:$0xff] %v7462_v34  ;;  %v6189_v34 = vld [vmem:[%s10393_s4 + $0x268] sm:$0xff] }
 0x145   :  { %4639 = vperm.xlu1 %6244, %v6177_v53   ;;  %v6180_v53 = vld [vmem:[%s10393_s4 + $0x220] sm:$0xff] }
 0x146   :  { %4634 = vperm.xlu0 %6243, %v6176_v33   ;;  %v7447_v33 = vpop.permute.xlu0 %2022 }
 0x147   :  { %11006 = vst [vmem:[#allocation81_spill] sm:$0xff] %v7447_v33  ;;  %v6185_v33 = vld [vmem:[%s10393_s4 + $0x248] sm:$0xff] }
 0x149   :  { %4649 = vperm.xlu1 %6244, %v6179_v45   ;;  %v6182_v45 = vld [vmem:[%s10393_s4 + $0x230] sm:$0xff] }
 0x14a   :  { %4644 = vperm.xlu0 %6243, %v6178_v61   ;;  %v7457_v61 = vpop.permute.xlu0 %2032 }
 0x14b   :  { %11008 = vst [vmem:[#allocation83_spill] sm:$0xff] %v7457_v61  ;;  %v7475_v61 = vpop.permute.xlu1 %2047 }
 0x14c   :  { %11011 = vst [vmem:[#allocation86_spill] sm:$0xff] %v7475_v61 }
 0x14d   :  { %4659 = vperm.xlu1 %6244, %v6181_v60   ;;  %v6184_v60 = vld [vmem:[%s10393_s4 + $0x240] sm:$0xff] }
 0x14e   :  { %4654 = vperm.xlu0 %6243, %v6180_v53   ;;  %v6187_v53 = vld [vmem:[%s10393_s4 + $0x258] sm:$0xff] }
 0x14f   :  { %v7488_v35 = vpop.permute.xlu1 %2057 }
 0x150   :  { %11013 = vst [vmem:[#allocation88_spill] sm:$0xff] %v7488_v35  ;;  %v6219_v35 = vld [vmem:[%s10395_s6 + $0x218] sm:$0xff] }
 0x151   :  { %4669 = vperm.xlu1 %6244, %v6183_v54   ;;  %v6186_v54 = vld [vmem:[%s10393_s4 + $0x250] sm:$0xff] }
 0x152   :  { %4664 = vperm.xlu0 %6243, %v6182_v45   ;;  %v7473_v45 = vpop.permute.xlu0 %2042 }
 0x153   :  { %11010 = vst [vmem:[#allocation85_spill] sm:$0xff] %v7473_v45  ;;  %v6191_v45 = vld [vmem:[%s10393_s4 + $0x278] sm:$0xff] }
 0x155   :  { %4679 = vperm.xlu1 %6244, %v6185_v33   ;;  %v6188_v33 = vld [vmem:[%s10393_s4 + $0x260] sm:$0xff] }
 0x156   :  { %4674 = vperm.xlu0 %6243, %v6184_v60   ;;  %v7483_v60 = vpop.permute.xlu0 %2052 }
 0x157   :  { %11012 = vst [vmem:[#allocation87_spill] sm:$0xff] %v7483_v60  ;;  %v7501_v60 = vpop.permute.xlu1 %2067 }
 0x158   :  { %11015 = vst [vmem:[#allocation90_spill] sm:$0xff] %v7501_v60 }
 0x159   :  { %4689 = vperm.xlu1 %6244, %v6187_v53   ;;  %v6190_v53 = vld [vmem:[%s10393_s4 + $0x270] sm:$0xff] }
 0x15a   :  { %4684 = vperm.xlu0 %6243, %v6186_v54   ;;  %v6217_v54 = vld [vmem:[%s10395_s6 + $0x208] sm:$0xff] }
 0x15b   :  { %v7514_v61 = vpop.permute.xlu1 %2077 }
 0x15c   :  { %11017 = vst [vmem:[#allocation92_spill] sm:$0xff] %v7514_v61  ;;  %v6222_v61 = vld [vmem:[%s10395_s6 + $0x230] sm:$0xff] }
 0x15d   :  { %4699 = vperm.xlu1 %6244, %v6189_v34   ;;  %v6216_v34 = vld [vmem:[%s10395_s6 + $0x200] sm:$0xff] }
 0x15e   :  { %4694 = vperm.xlu0 %6243, %v6188_v33   ;;  %v7499_v33 = vpop.permute.xlu0 %2062 }
 0x15f   :  { %11014 = vst [vmem:[#allocation89_spill] sm:$0xff] %v7499_v33  ;;  %v5598_v33 = vld [vmem:[%s10396_s7] sm:$0xff] }
 0x161   :  { %4709 = vperm.xlu1 %6244, %v6191_v45   ;;  %v6218_v45 = vld [vmem:[%s10395_s6 + $0x210] sm:$0xff] }
 0x162   :  { %4704 = vperm.xlu0 %6243, %v6190_v53   ;;  %v7509_v53 = vpop.permute.xlu0 %2072 }
 0x163   :  { %11016 = vst [vmem:[#allocation91_spill] sm:$0xff] %v7509_v53  ;;  %v7527_v53 = vpop.permute.xlu1 %2087 }
 0x164   :  { %11019 = vst [vmem:[#allocation94_spill] sm:$0xff] %v7527_v53 }
 0x165   :  { %5123 = vperm.xlu1 %6244, %v6217_v54   ;;  %v6220_v54 = vld [vmem:[%s10395_s6 + $0x220] sm:$0xff] }
 0x166   :  { %5118 = vperm.xlu0 %6243, %v6216_v34   ;;  %v6221_v34 = vld [vmem:[%s10395_s6 + $0x228] sm:$0xff] }
 0x167   :  { %v7540_v60 = vpop.permute.xlu1 %2097 }
 0x168   :  { %11021 = vst [vmem:[#allocation96_spill] sm:$0xff] %v7540_v60  ;;  %v6225_v60 = vld [vmem:[%s10395_s6 + $0x248] sm:$0xff] }
 0x169   :  { %5133 = vperm.xlu1 %6244, %v6219_v35   ;;  %v5599_v35 = vld [vmem:[%s10396_s7 + $0x8] sm:$0xff] }
 0x16a   :  { %5128 = vperm.xlu0 %6243, %v6218_v45   ;;  %v7525_v45 = vpop.permute.xlu0 %2082 }
 0x16b   :  { %11018 = vst [vmem:[#allocation93_spill] sm:$0xff] %v7525_v45  ;;  %v6223_v45 = vld [vmem:[%s10395_s6 + $0x238] sm:$0xff] }
 0x16d   :  { %5616 = vperm.xlu1 %6244, %v5598_v33   ;;  %v5600_v33 = vld [vmem:[%s10396_s7 + $0x10] sm:$0xff] }
 0x16e   :  { %5138 = vperm.xlu0 %6243, %v6220_v54   ;;  %v7535_v54 = vpop.permute.xlu0 %2092 }
 0x16f   :  { %11020 = vst [vmem:[#allocation95_spill] sm:$0xff] %v7535_v54  ;;  %v7553_v54 = vpop.permute.xlu1 %2575 }
 0x170   :  { %11023 = vst [vmem:[#allocation98_spill] sm:$0xff] %v7553_v54 }
 0x171   :  { %5143 = vperm.xlu1 %6244, %v6221_v34   ;;  %v5601_v34 = vld [vmem:[%s10396_s7 + $0x18] sm:$0xff] }
 0x172   :  { %5621 = vperm.xlu0 %6243, %v5599_v35   ;;  %v6224_v35 = vld [vmem:[%s10395_s6 + $0x240] sm:$0xff] }
 0x173   :  { %v7566_v53 = vpop.permute.xlu1 %2585 }
 0x174   :  { %11025 = vst [vmem:[#allocation100_spill] sm:$0xff] %v7566_v53  ;;  %v6228_v53 = vld [vmem:[%s10395_s6 + $0x260] sm:$0xff] }
 0x175   :  { %5148 = vperm.xlu1 %6244, %v6222_v61   ;;  %v5602_v61 = vld [vmem:[%s10396_s7 + $0x20] sm:$0xff] }
 0x176   :  { %5626 = vperm.xlu0 %6243, %v5600_v33   ;;  %v7551_v33 = vpop.permute.xlu0 %2570 }
 0x177   :  { %11022 = vst [vmem:[#allocation97_spill] sm:$0xff] %v7551_v33  ;;  %v6226_v33 = vld [vmem:[%s10395_s6 + $0x250] sm:$0xff] }
 0x179   :  { %5153 = vperm.xlu1 %6244, %v6223_v45   ;;  %v5603_v45 = vld [vmem:[%s10396_s7 + $0x28] sm:$0xff] }
 0x17a   :  { %5631 = vperm.xlu0 %6243, %v5601_v34   ;;  %v7561_v34 = vpop.permute.xlu0 %2580 }
 0x17b   :  { %11024 = vst [vmem:[#allocation99_spill] sm:$0xff] %v7561_v34  ;;  %v7579_v34 = vpop.permute.xlu1 %2595 }
 0x17c   :  { %11027 = vst [vmem:[#allocation102_spill] sm:$0xff] %v7579_v34 }
 0x17d   :  { %5158 = vperm.xlu1 %6244, %v6224_v35   ;;  %v5604_v35 = vld [vmem:[%s10396_s7 + $0x30] sm:$0xff] }
 0x17e   :  { %5636 = vperm.xlu0 %6243, %v5602_v61   ;;  %v6227_v61 = vld [vmem:[%s10395_s6 + $0x258] sm:$0xff] }
 0x17f   :  { %v7592_v54 = vpop.permute.xlu1 %2605 }
 0x180   :  { %11029 = vst [vmem:[#allocation104_spill] sm:$0xff] %v7592_v54  ;;  %v6231_v54 = vld [vmem:[%s10395_s6 + $0x278] sm:$0xff] }
 0x181   :  { %5163 = vperm.xlu1 %6244, %v6225_v60   ;;  %v5605_v60 = vld [vmem:[%s10396_s7 + $0x38] sm:$0xff] }
 0x182   :  { %5641 = vperm.xlu0 %6243, %v5603_v45   ;;  %v7577_v45 = vpop.permute.xlu0 %2590 }
 0x183   :  { %11026 = vst [vmem:[#allocation101_spill] sm:$0xff] %v7577_v45  ;;  %v6229_v45 = vld [vmem:[%s10395_s6 + $0x268] sm:$0xff] }
 0x185   :  { %5168 = vperm.xlu1 %6244, %v6226_v33   ;;  %v5606_v33 = vld [vmem:[%s10396_s7 + $0x40] sm:$0xff] }
 0x186   :  { %5646 = vperm.xlu0 %6243, %v5604_v35   ;;  %v7587_v35 = vpop.permute.xlu0 %2600 }
 0x187   :  { %11028 = vst [vmem:[#allocation103_spill] sm:$0xff] %v7587_v35  ;;  %v7605_v35 = vpop.permute.xlu1 %2615 }
 0x188   :  { %11031 = vst [vmem:[#allocation106_spill] sm:$0xff] %v7605_v35 }
 0x189   :  { %5173 = vperm.xlu1 %6244, %v6227_v61   ;;  %v5607_v61 = vld [vmem:[%s10396_s7 + $0x48] sm:$0xff] }
 0x18a   :  { %5651 = vperm.xlu0 %6243, %v5605_v60   ;;  %v6230_v60 = vld [vmem:[%s10395_s6 + $0x270] sm:$0xff] }
 0x18b   :  { %v7618_v34 = vpop.permute.xlu1 %2625 }
 0x18c   :  { %11033 = vst [vmem:[#allocation108_spill] sm:$0xff] %v7618_v34 }
 0x18d   :  { %5178 = vperm.xlu1 %6244, %v6228_v53   ;;  %v5608_v53 = vld [vmem:[%s10396_s7 + $0x50] sm:$0xff] }
 0x18e   :  { %5656 = vperm.xlu0 %6243, %v5606_v33   ;;  %v7603_v33 = vpop.permute.xlu0 %2610 }
 0x18f   :  { %11030 = vst [vmem:[#allocation105_spill] sm:$0xff] %v7603_v33  ;;  %v5611_v33 = vld [vmem:[%s10396_s7 + $0x68] sm:$0xff]  ;;  %v7632_v50 = vpop.permute.xlu1 %2635 }
 0x190   :  { %11035 = vst [vmem:[#allocation110_spill] sm:$0xff] %v7632_v50 }
 0x191   :  { %5183 = vperm.xlu1 %6244, %v6229_v45   ;;  %v5609_v45 = vld [vmem:[%s10396_s7 + $0x58] sm:$0xff] }
 0x192   :  { %5661 = vperm.xlu0 %6243, %v5607_v61   ;;  %v7613_v61 = vpop.permute.xlu0 %2620 }
 0x193   :  { %11032 = vst [vmem:[#allocation107_spill] sm:$0xff] %v7613_v61 }
 0x195   :  { %5188 = vperm.xlu1 %6244, %v6230_v60   ;;  %v5610_v60 = vld [vmem:[%s10396_s7 + $0x60] sm:$0xff] }
 0x196   :  { %5666 = vperm.xlu0 %6243, %v5608_v53   ;;  %v7629_v26 = vpop.permute.xlu0 %2630 }
 0x197   :  { %11034 = vst [vmem:[#allocation109_spill] sm:$0xff] %v7629_v26 }
 0x199   :  { %5193 = vperm.xlu1 %6244, %v6231_v54   ;;  %v5613_v54 = vld [vmem:[%s10396_s7 + $0x78] sm:$0xff] }
 0x19a   :  { %5671 = vperm.xlu0 %6243, %v5609_v45   ;;  %v5612_v45 = vld [vmem:[%s10396_s7 + $0x70] sm:$0xff] }
 0x19d   :  { %5681 = vperm.xlu1 %6244, %v5611_v33  }
 0x19e   :  { %5676 = vperm.xlu0 %6243, %v5610_v60   ;;  %v668_v53 = vpop.f32.mrb[0].mxu0 }
 0x19f   :  { %v781_v35 = vpop.f32.mrb[0].mxu1  ;;  %v670_v61 = vpop.f32.mrb[1].mxu0  ;;  %v669_v34 = vadd.f32 %v668_v53, %v7088_v47 }
 0x1a0   :  { %v783_v4 = vpop.f32.mrb[1].mxu1  ;;  %v782_v33 = vadd.f32 %v781_v35, %v7088_v47  ;;  %v671_v60 = vadd.f32 %v670_v61, %v7088_v47  ;;  %v672_v19 = vpop.f32.mrb[2].mxu0 }
 0x1a1   :  { %5691 = vperm.xlu1 %6244, %v5613_v54   ;;  %v784_v56 = vadd.f32 %v783_v4, %v7088_v47  ;;  %v673_v49 = vadd.f32 %v672_v19, %v7086_v3  ;;  %v785_v43 = vpop.f32.mrb[2].mxu1  ;;  %v674_v41 = vpop.f32.mrb[3].mxu0  ;;  %v860_v50 = vmax.f32 %v669_v34, 0.0 }
 0x1a2   :  { %5686 = vperm.xlu0 %6243, %v5612_v45   ;;  %v786_v26 = vadd.f32 %v785_v43, %v7086_v3  ;;  %v675_v53 = vadd.f32 %v674_v41, %v7086_v3  ;;  %v787_v46 = vpop.f32.mrb[3].mxu1  ;;  %v862_v61 = vmax.f32 %v782_v33, 0.0  ;;  %v861_v48 = vmax.f32 %v671_v60, 0.0  ;;  %v7641_v4 = vpop.permute.xlu0 %2640 }
 0x1a3   :  { %v864_v1 = vmax.f32 %v673_v49, 0.0  ;;  %v788_v35 = vadd.f32 %v787_v46, %v7086_v3  ;;  %11036 = vst [vmem:[#allocation111_spill] sm:$0xff] %v7641_v4  ;;  %v863_v19 = vmax.f32 %v784_v56, 0.0 }
 0x1a4   :  { %v866_v54 = vmax.f32 %v786_v26, 0.0  ;;  %v865_v23 = vmax.f32 %v675_v53, 0.0 }
 0x1a5   :  { %v940_v47 = vpack.c.bf16 %v864_v1, %v860_v50  ;;  %v867_v45 = vmax.f32 %v788_v35, 0.0 }
 0x1a6   :  { %5845 = vperm.xlu0 %6243, %v5842_v13   ;;  %v678_v2 = vpop.f32.mrb[4].mxu0  ;;  %v942_v43 = vpack.c.bf16 %v866_v54, %v862_v61  ;;  %v941_v32 = vpack.c.bf16 %v865_v23, %v861_v48 }
 0x1a7   :  { %v791_v0 = vpop.f32.mrb[4].mxu1  ;;  %v680_v41 = vpop.f32.mrb[5].mxu0  ;;  %v679_v34 = vadd.f32 %v678_v2, %v7122_v52  ;;  %v943_v15 = vpack.c.bf16 %v867_v45, %v863_v19 }
 0x1a8   :  { %v793_v49 = vpop.f32.mrb[5].mxu1  ;;  %v792_v46 = vadd.f32 %v791_v0, %v7122_v52  ;;  %v681_v26 = vadd.f32 %v680_v41, %v7122_v52  ;;  %v682_v3 = vpop.f32.mrb[6].mxu0  ;;  %1116 = vmatprep.subr.bf16.mxu0 %v941_v32 }
 0x1a9   :  { %v794_v56 = vadd.f32 %v793_v49, %v7122_v52  ;;  %v683_v1 = vadd.f32 %v682_v3, %v7120_v30  ;;  %v795_v13 = vpop.f32.mrb[6].mxu1  ;;  %1229 = vmatprep.subr.bf16.mxu1 %v943_v15  ;;  %v684_v50 = vpop.f32.mrb[7].mxu0  ;;  %1117 = vmatpush1.bf16.msra.mxu0 %v940_v47  ;;  %v868_v33 = vmax.f32 %v679_v34, 0.0 }
 0x1aa   :  { %v796_v23 = vadd.f32 %v795_v13, %v7120_v30  ;;  %v685_v2 = vadd.f32 %v684_v50, %v7120_v30  ;;  %v797_v48 = vpop.f32.mrb[7].mxu1  ;;  %1230 = vmatpush1.bf16.msra.mxu1 %v942_v43  ;;  %v870_v53 = vmax.f32 %v792_v46, 0.0  ;;  %v869_v32 = vmax.f32 %v681_v26, 0.0 }
 0x1ab   :  { %v872_v0 = vmax.f32 %v683_v1, 0.0  ;;  %v798_v60 = vadd.f32 %v797_v48, %v7120_v30  ;;  %v871_v61 = vmax.f32 %v794_v56, 0.0 }
 0x1ac   :  { %v874_v35 = vmax.f32 %v796_v23, 0.0  ;;  %v873_v52 = vmax.f32 %v685_v2, 0.0 }
 0x1ad   :  { %v944_v54 = vpack.c.bf16 %v872_v0, %v868_v33  ;;  %v875_v19 = vmax.f32 %v798_v60, 0.0 }
 0x1ae   :  { %v688_v15 = vpop.f32.mrb[8].mxu0  ;;  %v946_v45 = vpack.c.bf16 %v874_v35, %v870_v53  ;;  %v945_v49 = vpack.c.bf16 %v873_v52, %v869_v32 }
 0x1af   :  { %v801_v47 = vpop.f32.mrb[8].mxu1  ;;  %v690_v41 = vpop.f32.mrb[9].mxu0  ;;  %v689_v3 = vadd.f32 %v688_v15, %v7132_v62  ;;  %v947_v43 = vpack.c.bf16 %v875_v19, %v871_v61 }
 0x1b0   :  { %v803_v13 = vpop.f32.mrb[9].mxu1  ;;  %v802_v34 = vadd.f32 %v801_v47, %v7132_v62  ;;  %v691_v30 = vadd.f32 %v690_v41, %v7132_v62  ;;  %v692_v46 = vpop.f32.mrb[10].mxu0  ;;  %1118 = vmatprep.subr.bf16.mxu0 %v945_v49 }
 0x1b1   :  { %v804_v26 = vadd.f32 %v803_v13, %v7132_v62  ;;  %v693_v56 = vadd.f32 %v692_v46, %v7130_v58  ;;  %v805_v1 = vpop.f32.mrb[10].mxu1  ;;  %1231 = vmatprep.subr.bf16.mxu1 %v947_v43  ;;  %v694_v50 = vpop.f32.mrb[11].mxu0  ;;  %1119 = vmatpush1.bf16.msra.mxu0 %v944_v54  ;;  %v876_v33 = vmax.f32 %v689_v3, 0.0 }
 0x1b2   :  { %v806_v23 = vadd.f32 %v805_v1, %v7130_v58  ;;  %v695_v2 = vadd.f32 %v694_v50, %v7130_v58  ;;  %v807_v48 = vpop.f32.mrb[11].mxu1  ;;  %1232 = vmatpush1.bf16.msra.mxu1 %v946_v45  ;;  %v878_v53 = vmax.f32 %v802_v34, 0.0  ;;  %v877_v32 = vmax.f32 %v691_v30, 0.0 }
 0x1b3   :  { %v880_v0 = vmax.f32 %v693_v56, 0.0  ;;  %v808_v60 = vadd.f32 %v807_v48, %v7130_v58  ;;  %v879_v52 = vmax.f32 %v804_v26, 0.0 }
 0x1b4   :  { %v882_v35 = vmax.f32 %v806_v23, 0.0  ;;  %v881_v62 = vmax.f32 %v695_v2, 0.0 }
 0x1b5   :  { %v948_v61 = vpack.c.bf16 %v880_v0, %v876_v33  ;;  %v883_v19 = vmax.f32 %v808_v60, 0.0 }
 0x1b6   :  { %v698_v15 = vpop.f32.mrb[12].mxu0  ;;  %v950_v47 = vpack.c.bf16 %v882_v35, %v878_v53  ;;  %v949_v49 = vpack.c.bf16 %v881_v62, %v877_v32 }
 0x1b7   :  { %v811_v54 = vpop.f32.mrb[12].mxu1  ;;  %v700_v41 = vpop.f32.mrb[13].mxu0  ;;  %v699_v13 = vadd.f32 %v698_v15, %v7147_v51  ;;  %v951_v45 = vpack.c.bf16 %v883_v19, %v879_v52 }
 0x1b8   :  { %v813_v43 = vpop.f32.mrb[13].mxu1  ;;  %v812_v3 = vadd.f32 %v811_v54, %v7147_v51  ;;  %v701_v58 = vadd.f32 %v700_v41, %v7147_v51  ;;  %v702_v34 = vpop.f32.mrb[14].mxu0  ;;  %1120 = vmatprep.subr.bf16.mxu0 %v949_v49 }
 0x1b9   :  { %v814_v30 = vadd.f32 %v813_v43, %v7147_v51  ;;  %v703_v46 = vadd.f32 %v702_v34, %v7145_v11  ;;  %v815_v26 = vpop.f32.mrb[14].mxu1  ;;  %1233 = vmatprep.subr.bf16.mxu1 %v951_v45  ;;  %v704_v56 = vpop.f32.mrb[15].mxu0  ;;  %1121 = vmatpush1.bf16.msra.mxu0 %v948_v61  ;;  %v884_v2 = vmax.f32 %v699_v13, 0.0 }
 0x1ba   :  { %v816_v1 = vadd.f32 %v815_v26, %v7145_v11  ;;  %v705_v50 = vadd.f32 %v704_v56, %v7145_v11  ;;  %v817_v23 = vpop.f32.mrb[15].mxu1  ;;  %1234 = vmatpush1.bf16.msra.mxu1 %v950_v47  ;;  %v886_v0 = vmax.f32 %v812_v3, 0.0  ;;  %v885_v60 = vmax.f32 %v701_v58, 0.0 }
 0x1bb   :  { %v888_v48 = vmax.f32 %v703_v46, 0.0  ;;  %v818_v33 = vadd.f32 %v817_v23, %v7145_v11  ;;  %v887_v32 = vmax.f32 %v814_v30, 0.0 }
 0x1bc   :  { %v890_v53 = vmax.f32 %v816_v1, 0.0  ;;  %v889_v51 = vmax.f32 %v705_v50, 0.0 }
 0x1bd   :  { %v952_v35 = vpack.c.bf16 %v888_v48, %v884_v2  ;;  %v891_v62 = vmax.f32 %v818_v33, 0.0 }
 0x1be   :  { %v708_v52 = vpop.f32.mrb[16].mxu0  ;;  %v954_v19 = vpack.c.bf16 %v890_v53, %v886_v0  ;;  %v953_v54 = vpack.c.bf16 %v889_v51, %v885_v60 }
 0x1bf   :  { %v821_v61 = vpop.f32.mrb[16].mxu1  ;;  %v710_v15 = vpop.f32.mrb[17].mxu0  ;;  %v709_v41 = vadd.f32 %v708_v52, %v7155_v40  ;;  %v955_v47 = vpack.c.bf16 %v891_v62, %v887_v32 }
 0x1c0   :  { %v823_v49 = vpop.f32.mrb[17].mxu1  ;;  %v822_v13 = vadd.f32 %v821_v61, %v7155_v40  ;;  %v711_v11 = vadd.f32 %v710_v15, %v7155_v40  ;;  %v712_v43 = vpop.f32.mrb[18].mxu0  ;;  %1122 = vmatprep.subr.bf16.mxu0 %v953_v54 }
 0x1c1   :  { %v824_v45 = vadd.f32 %v823_v49, %v7155_v40  ;;  %v713_v3 = vadd.f32 %v712_v43, %v7158_v57  ;;  %v825_v58 = vpop.f32.mrb[18].mxu1  ;;  %1235 = vmatprep.subr.bf16.mxu1 %v955_v47  ;;  %v714_v34 = vpop.f32.mrb[19].mxu0  ;;  %1123 = vmatpush1.bf16.msra.mxu0 %v952_v35  ;;  %v892_v56 = vmax.f32 %v709_v41, 0.0 }
 0x1c2   :  { %v826_v30 = vadd.f32 %v825_v58, %v7158_v57  ;;  %v715_v46 = vadd.f32 %v714_v34, %v7158_v57  ;;  %v827_v26 = vpop.f32.mrb[19].mxu1  ;;  %1236 = vmatpush1.bf16.msra.mxu1 %v954_v19  ;;  %v894_v23 = vmax.f32 %v822_v13, 0.0  ;;  %v893_v2 = vmax.f32 %v711_v11, 0.0 }
 0x1c3   :  { %v896_v1 = vmax.f32 %v713_v3, 0.0  ;;  %v828_v50 = vadd.f32 %v827_v26, %v7158_v57  ;;  %v895_v33 = vmax.f32 %v824_v45, 0.0 }
 0x1c4   :  { %v898_v48 = vmax.f32 %v826_v30, 0.0  ;;  %v897_v40 = vmax.f32 %v715_v46, 0.0 }
 0x1c5   :  { %v956_v0 = vpack.c.bf16 %v896_v1, %v892_v56  ;;  %v899_v60 = vmax.f32 %v828_v50, 0.0 }
 0x1c6   :  { %v718_v53 = vpop.f32.mrb[20].mxu0  ;;  %v958_v51 = vpack.c.bf16 %v898_v48, %v894_v23  ;;  %v957_v62 = vpack.c.bf16 %v897_v40, %v893_v2 }
 0x1c7   :  { %v831_v32 = vpop.f32.mrb[20].mxu1  ;;  %v720_v35 = vpop.f32.mrb[21].mxu0  ;;  %v719_v52 = vadd.f32 %v718_v53, %v7170_v20  ;;  %v959_v19 = vpack.c.bf16 %v899_v60, %v895_v33 }
 0x1c8   :  { %v833_v61 = vpop.f32.mrb[21].mxu1  ;;  %v832_v15 = vadd.f32 %v831_v32, %v7170_v20  ;;  %v721_v57 = vadd.f32 %v720_v35, %v7170_v20  ;;  %v722_v54 = vpop.f32.mrb[22].mxu0  ;;  %1124 = vmatprep.subr.bf16.mxu0 %v957_v62 }
 0x1c9   :  { %v834_v41 = vadd.f32 %v833_v61, %v7170_v20  ;;  %v723_v49 = vadd.f32 %v722_v54, %v7175_v10  ;;  %v835_v47 = vpop.f32.mrb[22].mxu1  ;;  %1237 = vmatprep.subr.bf16.mxu1 %v959_v19  ;;  %v724_v13 = vpop.f32.mrb[23].mxu0  ;;  %1125 = vmatpush1.bf16.msra.mxu0 %v956_v0  ;;  %v900_v3 = vmax.f32 %v719_v52, 0.0 }
 0x1ca   :  { %v836_v11 = vadd.f32 %v835_v47, %v7175_v10  ;;  %v725_v43 = vadd.f32 %v724_v13, %v7175_v10  ;;  %v837_v45 = vpop.f32.mrb[23].mxu1  ;;  %1238 = vmatpush1.bf16.msra.mxu1 %v958_v51  ;;  %v902_v30 = vmax.f32 %v832_v15, 0.0  ;;  %v901_v46 = vmax.f32 %v721_v57, 0.0 }
 0x1cb   :  { %v904_v58 = vmax.f32 %v723_v49, 0.0  ;;  %v838_v34 = vadd.f32 %v837_v45, %v7175_v10  ;;  %v903_v56 = vmax.f32 %v834_v41, 0.0 }
 0x1cc   :  { %v906_v26 = vmax.f32 %v836_v11, 0.0  ;;  %v905_v20 = vmax.f32 %v725_v43, 0.0 }
 0x1cd   :  { %v960_v1 = vpack.c.bf16 %v904_v58, %v900_v3  ;;  %v907_v50 = vmax.f32 %v838_v34, 0.0 }
 0x1ce   :  { %v728_v23 = vpop.f32.mrb[24].mxu0  ;;  %v962_v2 = vpack.c.bf16 %v906_v26, %v902_v30  ;;  %v961_v33 = vpack.c.bf16 %v905_v20, %v901_v46 }
 0x1cf   :  { %v841_v48 = vpop.f32.mrb[24].mxu1  ;;  %v730_v40 = vpop.f32.mrb[25].mxu0  ;;  %v729_v0 = vadd.f32 %v728_v23, %v7191_v39  ;;  %v963_v53 = vpack.c.bf16 %v907_v50, %v903_v56 }
 0x1d0   :  { %v843_v60 = vpop.f32.mrb[25].mxu1  ;;  %v842_v51 = vadd.f32 %v841_v48, %v7191_v39  ;;  %v731_v10 = vadd.f32 %v730_v40, %v7191_v39  ;;  %v732_v32 = vpop.f32.mrb[26].mxu0  ;;  %1126 = vmatprep.subr.bf16.mxu0 %v961_v33 }
 0x1d1   :  { %v844_v35 = vadd.f32 %v843_v60, %v7191_v39  ;;  %v733_v62 = vadd.f32 %v732_v32, %v7193_v37  ;;  %v845_v52 = vpop.f32.mrb[26].mxu1  ;;  %1239 = vmatprep.subr.bf16.mxu1 %v963_v53  ;;  %v734_v61 = vpop.f32.mrb[27].mxu0  ;;  %1127 = vmatpush1.bf16.msra.mxu0 %v960_v1  ;;  %v908_v54 = vmax.f32 %v729_v0, 0.0 }
 0x1d2   :  { %v846_v19 = vadd.f32 %v845_v52, %v7193_v37  ;;  %v735_v15 = vadd.f32 %v734_v61, %v7193_v37  ;;  %v847_v57 = vpop.f32.mrb[27].mxu1  ;;  %1240 = vmatpush1.bf16.msra.mxu1 %v962_v2  ;;  %v910_v47 = vmax.f32 %v842_v51, 0.0  ;;  %v909_v13 = vmax.f32 %v731_v10, 0.0 }
 0x1d3   :  { %v912_v41 = vmax.f32 %v733_v62, 0.0  ;;  %v848_v49 = vadd.f32 %v847_v57, %v7193_v37  ;;  %v911_v43 = vmax.f32 %v844_v35, 0.0 }
 0x1d4   :  { %v914_v11 = vmax.f32 %v846_v19, 0.0  ;;  %v913_v39 = vmax.f32 %v735_v15, 0.0 }
 0x1d5   :  { %v964_v45 = vpack.c.bf16 %v912_v41, %v908_v54  ;;  %v915_v3 = vmax.f32 %v848_v49, 0.0  ;;  %v6253_v49 = vld [vmem:[%s10394_s5] sm:$0xff]  }
 0x1d6   :  { %v738_v58 = vpop.f32.mrb[28].mxu0  ;;  %v966_v34 = vpack.c.bf16 %v914_v11, %v910_v47  ;;  %v965_v26 = vpack.c.bf16 %v913_v39, %v909_v13  ;;  %v6255_v47 = vld [vmem:[%s10394_s5 + $0x10] sm:$0xff]   ;;  %v6256_v13 = vld [vmem:[%s10394_s5 + $0x18] sm:$0xff]   ;;  %v6257_v11 = vld [vmem:[%s10394_s5 + $0x20] sm:$0xff]  }
 0x1d7   :  { %v851_v30 = vpop.f32.mrb[28].mxu1  ;;  %v740_v46 = vpop.f32.mrb[29].mxu0  ;;  %v739_v20 = vadd.f32 %v738_v58, %v7203_v18  ;;  %v967_v1 = vpack.c.bf16 %v915_v3, %v911_v43  ;;  %v6258_v39 = vld [vmem:[%s10394_s5 + $0x28] sm:$0xff]   ;;  %v6259_v43 = vld [vmem:[%s10394_s5 + $0x30] sm:$0xff]  }
 0x1d8   :  { %v853_v56 = vpop.f32.mrb[29].mxu1  ;;  %v852_v50 = vadd.f32 %v851_v30, %v7203_v18  ;;  %v741_v37 = vadd.f32 %v740_v46, %v7203_v18  ;;  %v742_v23 = vpop.f32.mrb[30].mxu0  ;;  %1128 = vmatprep.subr.bf16.mxu0 %v965_v26 }
 0x1d9   :  { %v854_v2 = vadd.f32 %v853_v56, %v7203_v18  ;;  %v743_v48 = vadd.f32 %v742_v23, %v7208_v55  ;;  %v855_v40 = vpop.f32.mrb[30].mxu1  ;;  %1241 = vmatprep.subr.bf16.mxu1 %v967_v1  ;;  %v744_v33 = vpop.f32.mrb[31].mxu0  ;;  %1129 = vmatpush1.bf16.msra.mxu0 %v964_v45  ;;  %v916_v51 = vmax.f32 %v739_v20, 0.0  ;;  %v6260_v45 = vld [vmem:[%s10394_s5 + $0x38] sm:$0xff]   ;;  %v11037_v1 = vmax.f32 %v6641_v28, 0.0 }
 0x1da   :  { %v856_v0 = vadd.f32 %v855_v40, %v7208_v55  ;;  %v745_v60 = vadd.f32 %v744_v33, %v7208_v55  ;;  %v857_v53 = vpop.f32.mrb[31].mxu1  ;;  %1242 = vmatpush1.bf16.msra.mxu1 %v966_v34  ;;  %v918_v35 = vmax.f32 %v852_v50, 0.0  ;;  %v917_v62 = vmax.f32 %v741_v37, 0.0 }
 0x1db   :  { %v920_v10 = vmax.f32 %v743_v48, 0.0  ;;  %v858_v32 = vadd.f32 %v857_v53, %v7208_v55  ;;  %v919_v61 = vmax.f32 %v854_v2, 0.0  ;;  %v6254_v55 = vld [vmem:[%s10394_s5 + $0x8] sm:$0xff]   ;;  %v11038_v40 = vmax.f32 %v6643_v29, 0.0 }
 0x1dc   :  { %v922_v52 = vmax.f32 %v856_v0, 0.0  ;;  %v921_v18 = vmax.f32 %v745_v60, 0.0  ;;  %v11039_v0 = vmax.f32 %v6637_v24, 0.0 }
 0x1dd   :  { %v968_v19 = vpack.c.bf16 %v920_v10, %v916_v51  ;;  %v923_v15 = vmax.f32 %v858_v32, 0.0  ;;  %v11040_v10 = vmax.f32 %v6639_v25, 0.0  ;;  %v11041_v32 = vmax.f32 %v6661_v42, 0.0 }
 0x1de   :  { %v970_v57 = vpack.c.bf16 %v922_v52, %v918_v35  ;;  %v969_v54 = vpack.c.bf16 %v921_v18, %v917_v62  ;;  %v11042_v62 = vmax.f32 %v6664_v44, 0.0  ;;  %v11043_v52 = vmax.f32 %v6655_v36, 0.0 }
 0x1df   :  { %v971_v41 = vpack.c.bf16 %v923_v15, %v919_v61 }
 0x1e0   :  { %1130 = vmatprep.subr.bf16.mxu0 %v969_v54 }
 0x1e1   :  { %1243 = vmatprep.subr.bf16.mxu1 %v971_v41  ;;  %1131 = vmatpush1.bf16.msra.mxu0 %v968_v19  ;;  %v11044_v19 = vmax.f32 %v6658_v38, 0.0 }
 0x1e2   :  { %1244 = vmatpush1.bf16.msra.mxu1 %v970_v57 }
 0x1e4   :  { %1149 = vmatmul.mubr.bf16.vlgmr.msra.gmra.mrb[32].mxu0 %v6253_v49 }
 0x1e5   :  { %1262 = vmatmul.mubr.bf16.vlgmr.msra.gmra.mrb[32].mxu1 %v6253_v49  ;;  %1158 = vmatprep.mubr.bf16.mxu0 %v10978_v5 }
 0x1e6   :  { %1271 = vmatprep.mubr.bf16.mxu1 %v10978_v5 }
 0x1ec   :  { %1159 = vmatmul.mubr.bf16.gmra.mrb[36].mxu0 %v6254_v55 }
 0x1ed   :  { %1272 = vmatmul.mubr.bf16.gmra.mrb[36].mxu1 %v6254_v55  ;;  %1168 = vmatprep.mubr.bf16.mxu0 %v10978_v5 }
 0x1ee   :  { %1281 = vmatprep.mubr.bf16.mxu1 %v10978_v5 }
 0x1f4   :  { %1169 = vmatmul.mubr.bf16.gmra.mrb[40].mxu0 %v6255_v47 }
 0x1f5   :  { %1282 = vmatmul.mubr.bf16.gmra.mrb[40].mxu1 %v6255_v47  ;;  %1178 = vmatprep.mubr.bf16.mxu0 %v10978_v5 }
 0x1f6   :  { %1291 = vmatprep.mubr.bf16.mxu1 %v10978_v5 }
 0x1fc   :  { %1179 = vmatmul.mubr.bf16.gmra.mrb[44].mxu0 %v6256_v13 }
 0x1fd   :  { %1292 = vmatmul.mubr.bf16.gmra.mrb[44].mxu1 %v6256_v13  ;;  %1188 = vmatprep.mubr.bf16.mxu0 %v10978_v5 }
 0x1fe   :  { %1301 = vmatprep.mubr.bf16.mxu1 %v10978_v5 }
 0x204   :  { %1189 = vmatmul.mubr.bf16.gmra.mrb[48].mxu0 %v6257_v11 }
 0x205   :  { %1302 = vmatmul.mubr.bf16.gmra.mrb[48].mxu1 %v6257_v11  ;;  %1198 = vmatprep.mubr.bf16.mxu0 %v10978_v5 }
 0x206   :  { %1311 = vmatprep.mubr.bf16.mxu1 %v10978_v5 }
 0x20c   :  { %1199 = vmatmul.mubr.bf16.gmra.mrb[52].mxu0 %v6258_v39 }
 0x20d   :  { %1312 = vmatmul.mubr.bf16.gmra.mrb[52].mxu1 %v6258_v39  ;;  %1208 = vmatprep.mubr.bf16.mxu0 %v10978_v5 }
 0x20e   :  { %1321 = vmatprep.mubr.bf16.mxu1 %v10978_v5 }
 0x214   :  { %1209 = vmatmul.mubr.bf16.gmra.mrb[56].mxu0 %v6259_v43 }
 0x215   :  { %1322 = vmatmul.mubr.bf16.gmra.mrb[56].mxu1 %v6259_v43  ;;  %1218 = vmatprep.mubr.bf16.mxu0 %v10978_v5 }
 0x216   :  { %1331 = vmatprep.mubr.bf16.mxu1 %v10978_v5 }
 0x21c   :  { %1219 = vmatmul.mubr.bf16.gmra.mrb[60].mxu0 %v6260_v45 }
 0x21d   :  { %1332 = vmatmul.mubr.bf16.gmra.mrb[60].mxu1 %v6260_v45  ;;  %1696 = vmatprep.mubr.bf16.mxu0 %v10978_v5 }
 0x21e   :  { %1809 = vmatprep.mubr.bf16.mxu1 %v10978_v5 }
 0x2b7   :  { %v1150_v3 = vpop.f32.mrb[32].mxu0 }
 0x2b8   :  { %v1151_v58 = vadd.f32 %v1150_v3, %v7222_v12  ;;  %v1263_v34 = vpop.f32.mrb[32].mxu1  ;;  %v1152_v30 = vpop.f32.mrb[33].mxu0 }
 0x2b9   :  { %v1264_v46 = vadd.f32 %v1263_v34, %v7222_v12  ;;  %v1153_v26 = vadd.f32 %v1152_v30, %v7222_v12  ;;  %v1265_v20 = vpop.f32.mrb[33].mxu1  ;;  %v1154_v56 = vpop.f32.mrb[34].mxu0 }
 0x2ba   :  { %v7744_v50 = vadd.f32 %v1151_v58, %v11037_v1  ;;  %v1266_v37 = vadd.f32 %v1265_v20, %v7222_v12  ;;  %v1155_v23 = vadd.f32 %v1154_v56, %v7225_v63  ;;  %v1267_v2 = vpop.f32.mrb[34].mxu1  ;;  %v1156_v48 = vpop.f32.mrb[35].mxu0  ;;  %v11045_v58 = vmax.f32 %v6715_v16, 0.0 }
 0x2bb   :  { %v7750_v33 = vadd.f32 %v1264_v46, %v11038_v40  ;;  %v7754_v60 = vadd.f32 %v1153_v26, %v11039_v0  ;;  %v1268_v53 = vadd.f32 %v1267_v2, %v7225_v63  ;;  %v1157_v28 = vadd.f32 %v1156_v48, %v7225_v63  ;;  %v1269_v51 = vpop.f32.mrb[35].mxu1 }
 0x2bc   :  { %v7760_v12 = vadd.f32 %v1266_v37, %v11040_v10  ;;  %v7764_v35 = vadd.f32 %v1155_v23, %v11041_v32  ;;  %v1270_v29 = vadd.f32 %v1269_v51, %v7225_v63  ;;  %v10600_v61 = vmax.f32 %v7744_v50, 0.0 }
 0x2bd   :  { %v7769_v24 = vadd.f32 %v1268_v53, %v11042_v62  ;;  %v7773_v18 = vadd.f32 %v1157_v28, %v11043_v52  ;;  %v10599_v42 = vmax.f32 %v7750_v33, 0.0  ;;  %v10598_v44 = vmax.f32 %v7754_v60, 0.0 }
 0x2be   :  { %v10594_v25 = vmax.f32 %v7764_v35, 0.0  ;;  %v7779_v15 = vadd.f32 %v1270_v29, %v11044_v19  ;;  %v10595_v55 = vmax.f32 %v7760_v12, 0.0  ;;  %v11046_v1 = vmax.f32 %v6722_v21, 0.0 }
 0x2bf   :  { %v10591_v63 = vmax.f32 %v7769_v24, 0.0  ;;  %v1160_v57 = vpop.f32.mrb[36].mxu0  ;;  %v10590_v54 = vmax.f32 %v7773_v18, 0.0  ;;  %v11047_v23 = vmax.f32 %v6701_v6, 0.0  ;;  %v11048_v40 = vmax.f32 %v6705_v8, 0.0 }
 0x2c0   :  { %v1161_v36 = vadd.f32 %v1160_v57, %v7237_v27  ;;  %v1273_v41 = vpop.f32.mrb[36].mxu1  ;;  %v1162_v49 = vpop.f32.mrb[37].mxu0  ;;  %v10587_v47 = vmax.f32 %v7779_v15, 0.0  ;;  %v1487_v38 = vpack.c.bf16 %v10594_v25, %v10600_v61  ;;  %v11049_v53 = vmax.f32 %v6717_v17, 0.0 }
 0x2c1   :  { %v1274_v13 = vadd.f32 %v1273_v41, %v7237_v27  ;;  %v1163_v11 = vadd.f32 %v1162_v49, %v7237_v27  ;;  %v1275_v39 = vpop.f32.mrb[37].mxu1  ;;  %v1164_v43 = vpop.f32.mrb[38].mxu0  ;;  %v1488_v45 = vpack.c.bf16 %v10590_v54, %v10598_v44  ;;  %v1489_v3 = vpack.c.bf16 %v10591_v63, %v10599_v42  ;;  %v11111_v44 = vld [vmem:[#allocation34_spill] sm:$0xff] }
 0x2c2   :  { %v7804_v34 = vadd.f32 %v1161_v36, %v11045_v58  ;;  %v1276_v30 = vadd.f32 %v1275_v39, %v7237_v27  ;;  %v1165_v46 = vadd.f32 %v1164_v43, %v7242_v59  ;;  %v1277_v26 = vpop.f32.mrb[38].mxu1  ;;  %v1166_v20 = vpop.f32.mrb[39].mxu0  ;;  %v1490_v56 = vpack.c.bf16 %v10587_v47, %v10595_v55  ;;  %v11098_v55 = vld [vmem:[#allocation27_spill] sm:$0xff] }
 0x2c3   :  { %v7814_v37 = vadd.f32 %v1274_v13, %v11046_v1  ;;  %v7818_v16 = vadd.f32 %v1163_v11, %v11047_v23  ;;  %v1278_v2 = vadd.f32 %v1277_v26, %v7242_v59  ;;  %v1167_v27 = vadd.f32 %v1166_v20, %v7242_v59  ;;  %v1279_v48 = vpop.f32.mrb[39].mxu1  ;;  %1664 = vmatprep.subr.bf16.mxu0 %v1488_v45  ;;  %v11054_v26 = vld [vmem:[#allocation54_spill] sm:$0xff] }
 0x2c4   :  { %v7824_v0 = vadd.f32 %v1276_v30, %v11048_v40  ;;  %v7828_v28 = vadd.f32 %v1165_v46, %v11049_v53  ;;  %v1280_v21 = vadd.f32 %v1279_v48, %v7242_v59  ;;  %1777 = vmatprep.subr.bf16.mxu1 %v1490_v56  ;;  %1665 = vmatpush1.bf16.msra.mxu0 %v1487_v38  ;;  %v11050_v6 = vmax.f32 %v6727_v31, 0.0  ;;  %v11057_v40 = vld [vmem:[#allocation7_spill] sm:$0xff] }
 0x2c5   :  { %v11051_v10 = vmax.f32 %v6703_v7, 0.0  ;;  %1778 = vmatpush1.bf16.msra.mxu1 %v1489_v3  ;;  %v10584_v8 = vmax.f32 %v7804_v34, 0.0  ;;  %v11052_v17 = vmax.f32 %v6713_v14, 0.0  ;;  %v10583_v59 = vmax.f32 %v7814_v37, 0.0 }
 0x2c6   :  { %v7833_v51 = vadd.f32 %v1278_v2, %v11050_v6  ;;  %v10578_v29 = vmax.f32 %v7828_v28, 0.0  ;;  %v10582_v19 = vmax.f32 %v7818_v16, 0.0  ;;  %v10579_v49 = vmax.f32 %v7824_v0, 0.0  ;;  %v11055_v2 = vld [vmem:[#allocation12_spill] sm:$0xff] }
 0x2c7   :  { %v7837_v32 = vadd.f32 %v1167_v27, %v11051_v10  ;;  %v7843_v62 = vadd.f32 %v1280_v21, %v11052_v17  ;;  %v1170_v31 = vpop.f32.mrb[40].mxu0  ;;  %v11053_v58 = vmax.f32 %v6775_v22, 0.0  ;;  %v11056_v27 = vmax.f32 %v11055_v2, 0.0  ;;  %v11059_v10 = vld [vmem:[#allocation9_spill] sm:$0xff]  ;;  %v11067_v2 = vld [vmem:[#allocation10_spill] sm:$0xff] }
 0x2c8   :  { %v10575_v52 = vmax.f32 %v7833_v51, 0.0  ;;  %v1171_v57 = vadd.f32 %v1170_v31, %v7258_v9  ;;  %v1283_v36 = vpop.f32.mrb[40].mxu1  ;;  %v1172_v41 = vpop.f32.mrb[41].mxu0  ;;  %v1491_v14 = vpack.c.bf16 %v10578_v29, %v10584_v8  ;;  %v11058_v53 = vmax.f32 %v11057_v40, 0.0 }
 0x2c9   :  { %v10574_v7 = vmax.f32 %v7837_v32, 0.0  ;;  %v10571_v38 = vmax.f32 %v7843_v62, 0.0  ;;  %v1284_v13 = vadd.f32 %v1283_v36, %v7258_v9  ;;  %v1173_v11 = vadd.f32 %v1172_v41, %v7258_v9  ;;  %v1285_v39 = vpop.f32.mrb[41].mxu1  ;;  %v1174_v43 = vpop.f32.mrb[42].mxu0 }
 0x2ca   :  { %v1493_v3 = vpack.c.bf16 %v10575_v52, %v10583_v59  ;;  %v7868_v30 = vadd.f32 %v1171_v57, %v11053_v58  ;;  %v1286_v46 = vadd.f32 %v1285_v39, %v7258_v9  ;;  %v1175_v20 = vadd.f32 %v1174_v43, %v11054_v26  ;;  %v1287_v56 = vpop.f32.mrb[42].mxu1  ;;  %v1176_v1 = vpop.f32.mrb[43].mxu0  ;;  %v11061_v57 = vld [vmem:[#allocation11_spill] sm:$0xff]  ;;  %v11065_v58 = vld [vmem:[#allocation8_spill] sm:$0xff] }
 0x2cb   :  { %v1492_v45 = vpack.c.bf16 %v10574_v7, %v10582_v19  ;;  %v1494_v23 = vpack.c.bf16 %v10571_v38, %v10579_v49  ;;  %v7878_v48 = vadd.f32 %v1284_v13, %v11056_v27  ;;  %v7882_v22 = vadd.f32 %v1173_v11, %v11058_v53  ;;  %v1289_v6 = vpop.f32.mrb[43].mxu1  ;;  %v11063_v11 = vld [vmem:[#allocation13_spill] sm:$0xff]  ;;  %v11079_v49 = vld [vmem:[#allocation19_spill] sm:$0xff]  ;;  %v11088_v19 = vld [vmem:[#allocation26_spill] sm:$0xff] }
 0x2cc   :  { %v1288_v21 = vadd.f32 %v1287_v56, %v11054_v26  ;;  %v1177_v9 = vadd.f32 %v1176_v1, %v11054_v26  ;;  %v11060_v17 = vmax.f32 %v11059_v10, 0.0  ;;  %v11062_v36 = vmax.f32 %v11061_v57, 0.0 }
 0x2cd   :  { %1666 = vmatprep.subr.bf16.mxu0 %v1492_v45  ;;  %v1290_v13 = vadd.f32 %v1289_v6, %v11054_v26  ;;  %1779 = vmatprep.subr.bf16.mxu1 %v1494_v23  ;;  %v11064_v39 = vmax.f32 %v11063_v11, 0.0  ;;  %v11066_v56 = vmax.f32 %v11065_v58, 0.0  ;;  %v10570_v45 = vmax.f32 %v7868_v30, 0.0 }
 0x2ce   :  { %v7888_v31 = vadd.f32 %v1286_v46, %v11060_v17  ;;  %v7892_v41 = vadd.f32 %v1175_v20, %v11062_v36  ;;  %1667 = vmatpush1.bf16.msra.mxu0 %v1491_v14  ;;  %1780 = vmatpush1.bf16.msra.mxu1 %v1493_v3  ;;  %v11068_v20 = vmax.f32 %v11067_v2, 0.0  ;;  %v10577_v26 = vmax.f32 %v7878_v48, 0.0  ;;  %v11070_v2 = vld [vmem:[#allocation18_spill] sm:$0xff] }
 0x2cf   :  { %v7897_v43 = vadd.f32 %v1288_v21, %v11064_v39  ;;  %v7901_v1 = vadd.f32 %v1177_v9, %v11066_v56  ;;  %v1180_v23 = vpop.f32.mrb[44].mxu0  ;;  %v10573_v40 = vmax.f32 %v7882_v22, 0.0  ;;  %v11069_v21 = vld [vmem:[#allocation55_spill] sm:$0xff]  ;;  %v11089_v59 = vmax.f32 %v11088_v19, 0.0 }
 0x2d0   :  { %v10569_v46 = vmax.f32 %v7892_v41, 0.0  ;;  %v7907_v27 = vadd.f32 %v1290_v13, %v11068_v20  ;;  %v1181_v9 = vadd.f32 %v1180_v23, %v11069_v21  ;;  %v1293_v3 = vpop.f32.mrb[44].mxu1  ;;  %v1182_v6 = vpop.f32.mrb[45].mxu0  ;;  %v10581_v10 = vmax.f32 %v7888_v31, 0.0 }
 0x2d1   :  { %v10576_v14 = vmax.f32 %v7897_v43, 0.0  ;;  %v10572_v53 = vmax.f32 %v7901_v1, 0.0  ;;  %v1294_v36 = vadd.f32 %v1293_v3, %v11069_v21  ;;  %v1183_v13 = vadd.f32 %v1182_v6, %v11069_v21  ;;  %v1295_v11 = vpop.f32.mrb[45].mxu1  ;;  %v1184_v39 = vpop.f32.mrb[46].mxu0 }
 0x2d2   :  { %v10580_v17 = vmax.f32 %v7907_v27, 0.0  ;;  %v1495_v57 = vpack.c.bf16 %v10569_v46, %v10570_v45  ;;  %v11071_v20 = vmax.f32 %v11070_v2, 0.0  ;;  %v1296_v3 = vadd.f32 %v1295_v11, %v11069_v21  ;;  %v11072_v46 = vld [vmem:[#allocation56_spill] sm:$0xff]  ;;  %v1297_v45 = vpop.f32.mrb[46].mxu1  ;;  %v1186_v38 = vpop.f32.mrb[47].mxu0 }
 0x2d3   :  { %v1496_v58 = vpack.c.bf16 %v10572_v53, %v10573_v40  ;;  %v1497_v56 = vpack.c.bf16 %v10576_v14, %v10577_v26  ;;  %v1185_v6 = vadd.f32 %v1184_v39, %v11072_v46  ;;  %v11073_v40 = vld [vmem:[#allocation20_spill] sm:$0xff]  ;;  %v11075_v14 = vld [vmem:[#allocation14_spill] sm:$0xff]  ;;  %v1187_v21 = vadd.f32 %v1186_v38, %v11072_v46  ;;  %v1299_v11 = vpop.f32.mrb[47].mxu1 }
 0x2d4   :  { %v7932_v23 = vadd.f32 %v1181_v9, %v11071_v20  ;;  %v1498_v53 = vpack.c.bf16 %v10580_v17, %v10581_v10  ;;  %v11074_v7 = vmax.f32 %v11073_v40, 0.0  ;;  %v11076_v26 = vmax.f32 %v11075_v14, 0.0  ;;  %v11077_v39 = vld [vmem:[#allocation16_spill] sm:$0xff] }
 0x2d5   :  { %v1298_v9 = vadd.f32 %v1297_v45, %v11072_v46  ;;  %1668 = vmatprep.subr.bf16.mxu0 %v1496_v58  ;;  %v11078_v20 = vmax.f32 %v11077_v39, 0.0  ;;  %v11080_v17 = vmax.f32 %v11079_v49, 0.0  ;;  %v11083_v45 = vld [vmem:[#allocation15_spill] sm:$0xff]  ;;  %v11085_v49 = vld [vmem:[#allocation17_spill] sm:$0xff]  ;;  %v11112_v42 = vmax.f32 %v11111_v44, 0.0 }
 0x2d6   :  { %v7942_v52 = vadd.f32 %v1294_v36, %v11074_v7  ;;  %v7946_v2 = vadd.f32 %v1183_v13, %v11076_v26  ;;  %v1300_v7 = vadd.f32 %v1299_v11, %v11072_v46  ;;  %1781 = vmatprep.subr.bf16.mxu1 %v1498_v53  ;;  %1669 = vmatpush1.bf16.msra.mxu0 %v1495_v57  ;;  %v11081_v26 = vld [vmem:[#allocation21_spill] sm:$0xff]  ;;  %v11084_v38 = vmax.f32 %v11083_v45, 0.0 }
 0x2d7   :  { %v7952_v29 = vadd.f32 %v1296_v3, %v11078_v20  ;;  %v7956_v10 = vadd.f32 %v1185_v6, %v11080_v17  ;;  %v11082_v14 = vmax.f32 %v11081_v26, 0.0  ;;  %1782 = vmatpush1.bf16.msra.mxu1 %v1497_v56  ;;  %v10586_v13 = vmax.f32 %v7932_v23, 0.0  ;;  %v1190_v57 = vpop.f32.mrb[48].mxu0 }
 0x2d8   :  { %v7965_v36 = vadd.f32 %v1187_v21, %v11084_v38  ;;  %v11086_v17 = vmax.f32 %v11085_v49, 0.0  ;;  %v10593_v46 = vmax.f32 %v7942_v52, 0.0  ;;  %v10589_v6 = vmax.f32 %v7946_v2, 0.0  ;;  %v11087_v21 = vld [vmem:[#allocation57_spill] sm:$0xff]  ;;  %v1303_v56 = vpop.f32.mrb[48].mxu1  ;;  %v1192_v39 = vpop.f32.mrb[49].mxu0 }
 0x2d9   :  { %v7961_v40 = vadd.f32 %v1298_v9, %v11082_v14  ;;  %v10585_v58 = vmax.f32 %v7956_v10, 0.0  ;;  %v1191_v11 = vadd.f32 %v1190_v57, %v11087_v21  ;;  %v10597_v20 = vmax.f32 %v7952_v29, 0.0  ;;  %v1305_v38 = vpop.f32.mrb[49].mxu1  ;;  %v1194_v49 = vpop.f32.mrb[50].mxu0 }
 0x2da   :  { %v7971_v3 = vadd.f32 %v1300_v7, %v11086_v17  ;;  %v10588_v9 = vmax.f32 %v7965_v36, 0.0  ;;  %v1304_v14 = vadd.f32 %v1303_v56, %v11087_v21  ;;  %v1193_v45 = vadd.f32 %v1192_v39, %v11087_v21  ;;  %v1196_v47 = vpop.f32.mrb[51].mxu0 }
 0x2db   :  { %v10592_v53 = vmax.f32 %v7961_v40, 0.0  ;;  %v1499_v7 = vpack.c.bf16 %v10585_v58, %v10586_v13  ;;  %v7996_v8 = vadd.f32 %v1191_v11, %v11089_v59  ;;  %v1306_v56 = vadd.f32 %v1305_v38, %v11087_v21  ;;  %v11090_v58 = vld [vmem:[#allocation58_spill] sm:$0xff]  ;;  %v1307_v13 = vpop.f32.mrb[50].mxu1  ;;  %v11095_v38 = vld [vmem:[#allocation24_spill] sm:$0xff] }
 0x2dc   :  { %v10596_v26 = vmax.f32 %v7971_v3, 0.0  ;;  %v1500_v17 = vpack.c.bf16 %v10588_v9, %v10589_v6  ;;  %v1195_v39 = vadd.f32 %v1194_v49, %v11090_v58  ;;  %v11091_v6 = vld [vmem:[#allocation28_spill] sm:$0xff]  ;;  %v1308_v59 = vadd.f32 %v1307_v13, %v11090_v58  ;;  %v1309_v11 = vpop.f32.mrb[51].mxu1  ;;  %v11104_v13 = vld [vmem:[#allocation23_spill] sm:$0xff] }
 0x2dd   :  { %v1501_v57 = vpack.c.bf16 %v10592_v53, %v10593_v46  ;;  %v11092_v54 = vmax.f32 %v11091_v6, 0.0  ;;  %v11093_v53 = vld [vmem:[#allocation22_spill] sm:$0xff]  ;;  %v1197_v21 = vadd.f32 %v1196_v47, %v11090_v58  ;;  %v11096_v49 = vmax.f32 %v11095_v38, 0.0 }
 0x2de   :  { %v1502_v9 = vpack.c.bf16 %v10596_v26, %v10597_v20  ;;  %v11094_v46 = vmax.f32 %v11093_v53, 0.0  ;;  %1670 = vmatprep.subr.bf16.mxu0 %v1500_v17  ;;  %v11099_v26 = vmax.f32 %v11098_v55, 0.0  ;;  %v11105_v47 = vmax.f32 %v11104_v13, 0.0  ;;  %v11107_v55 = vld [vmem:[#allocation25_spill] sm:$0xff] }
 0x2df   :  { %v8006_v63 = vadd.f32 %v1304_v14, %v11092_v54  ;;  %v8016_v25 = vadd.f32 %v1306_v56, %v11096_v49  ;;  %v1310_v54 = vadd.f32 %v1309_v11, %v11090_v58  ;;  %1671 = vmatpush1.bf16.msra.mxu0 %v1499_v7  ;;  %v1200_v7 = vpop.f32.mrb[52].mxu0 }
 0x2e0   :  { %v8010_v19 = vadd.f32 %v1193_v45, %v11094_v46  ;;  %v8020_v20 = vadd.f32 %v1195_v39, %v11099_v26  ;;  %1783 = vmatprep.subr.bf16.mxu1 %v1502_v9  ;;  %v11101_v46 = vld [vmem:[#allocation29_spill] sm:$0xff]  ;;  %v8029_v14 = vadd.f32 %v1197_v21, %v11105_v47  ;;  %v10602_v45 = vmax.f32 %v7996_v8, 0.0  ;;  %v11110_v21 = vld [vmem:[#allocation59_spill] sm:$0xff]  ;;  %v1202_v38 = vpop.f32.mrb[53].mxu0 }
 0x2e1   :  { %11097 = vst [vmem:[#allocation54_spill] sm:$0xff] %v8016_v25  ;;  %v11102_v53 = vmax.f32 %v11101_v46, 0.0  ;;  %1784 = vmatpush1.bf16.msra.mxu1 %v1501_v57  ;;  %v11108_v26 = vmax.f32 %v11107_v55, 0.0  ;;  %v10609_v58 = vmax.f32 %v8006_v63, 0.0  ;;  %v1201_v11 = vadd.f32 %v1200_v7, %v11110_v21  ;;  %v1313_v57 = vpop.f32.mrb[52].mxu1  ;;  %v1204_v55 = vpop.f32.mrb[54].mxu0 }
 0x2e2   :  { %11100 = vst [vmem:[#allocation12_spill] sm:$0xff] %v8020_v20  ;;  %11106 = vst [vmem:[#allocation9_spill] sm:$0xff] %v8029_v14  ;;  %v10601_v17 = vmax.f32 %v8020_v20, 0.0  ;;  %v10605_v39 = vmax.f32 %v8010_v19, 0.0  ;;  %v10612_v49 = vmax.f32 %v8016_v25, 0.0  ;;  %v1203_v13 = vadd.f32 %v1202_v38, %v11110_v21  ;;  %v1315_v47 = vpop.f32.mrb[53].mxu1 }
 0x2e3   :  { %v8025_v6 = vadd.f32 %v1308_v59, %v11102_v53  ;;  %v8035_v56 = vadd.f32 %v1310_v54, %v11108_v26  ;;  %v10604_v59 = vmax.f32 %v8029_v14, 0.0  ;;  %v1314_v53 = vadd.f32 %v1313_v57, %v11110_v21  ;;  %v1206_v46 = vpop.f32.mrb[55].mxu0 }
 0x2e4   :  { %v1503_v54 = vpack.c.bf16 %v10601_v17, %v10602_v45  ;;  %v8060_v61 = vadd.f32 %v1201_v11, %v11112_v42  ;;  %v1316_v57 = vadd.f32 %v1315_v47, %v11110_v21  ;;  %v11114_v17 = vld [vmem:[#allocation60_spill] sm:$0xff]  ;;  %v1317_v45 = vpop.f32.mrb[54].mxu1 }
 0x2e5   :  { %11103 = vst [vmem:[#allocation7_spill] sm:$0xff] %v8025_v6  ;;  %11109 = vst [vmem:[#allocation11_spill] sm:$0xff] %v8035_v56  ;;  %v10608_v9 = vmax.f32 %v8025_v6, 0.0  ;;  %v1504_v26 = vpack.c.bf16 %v10604_v59, %v10605_v39  ;;  %v1205_v38 = vadd.f32 %v1204_v55, %v11114_v17  ;;  %v11115_v4 = vmax.f32 %v8035_v56, 0.0  ;;  %v11116_v39 = vld [vmem:[#allocation36_spill] sm:$0xff]  ;;  %v1319_v11 = vpop.f32.mrb[55].mxu1 }
 0x2e6   :  { %11113 = vst [vmem:[#allocation13_spill] sm:$0xff] %v8060_v61  ;;  %v11117_v14 = vmax.f32 %v11116_v39, 0.0  ;;  %v1318_v42 = vadd.f32 %v1317_v45, %v11114_v17  ;;  %v1207_v21 = vadd.f32 %v1206_v46, %v11114_v17  ;;  %v11122_v47 = vld [vmem:[#allocation32_spill] sm:$0xff]  ;;  %v11125_v56 = vld [vmem:[#allocation35_spill] sm:$0xff] }
 0x2e7   :  { %v1505_v7 = vpack.c.bf16 %v10608_v9, %v10609_v58  ;;  %v1506_v59 = vpack.c.bf16 %v11115_v4, %v10612_v49  ;;  %v11119_v9 = vld [vmem:[#allocation30_spill] sm:$0xff]  ;;  %1672 = vmatprep.subr.bf16.mxu0 %v1504_v26  ;;  %v11123_v55 = vmax.f32 %v11122_v47, 0.0  ;;  %v11126_v4 = vmax.f32 %v11125_v56, 0.0  ;;  %v11131_v45 = vld [vmem:[#allocation31_spill] sm:$0xff]  ;;  %v11134_v56 = vld [vmem:[#allocation33_spill] sm:$0xff] }
 0x2e8   :  { %v8070_v20 = vadd.f32 %v1314_v53, %v11117_v14  ;;  %v11120_v58 = vmax.f32 %v11119_v9, 0.0  ;;  %v1320_v14 = vadd.f32 %v1319_v11, %v11114_v17  ;;  %1673 = vmatpush1.bf16.msra.mxu0 %v1503_v54  ;;  %v11132_v46 = vmax.f32 %v11131_v45, 0.0  ;;  %v1210_v54 = vpop.f32.mrb[56].mxu0 }
 0x2e9   :  { %v8080_v6 = vadd.f32 %v1316_v57, %v11123_v55  ;;  %v8084_v49 = vadd.f32 %v1205_v38, %v11126_v4  ;;  %1785 = vmatprep.subr.bf16.mxu1 %v1506_v59  ;;  %v11135_v57 = vmax.f32 %v11134_v56, 0.0  ;;  %v1212_v55 = vpop.f32.mrb[57].mxu0 }
 0x2ea   :  { %11118 = vst [vmem:[#allocation8_spill] sm:$0xff] %v8070_v20  ;;  %v8074_v44 = vadd.f32 %v1203_v13, %v11120_v58  ;;  %v11128_v58 = vld [vmem:[#allocation37_spill] sm:$0xff]  ;;  %v8093_v53 = vadd.f32 %v1207_v21, %v11132_v46  ;;  %1786 = vmatpush1.bf16.msra.mxu1 %v1505_v7  ;;  %v10615_v13 = vmax.f32 %v8060_v61, 0.0  ;;  %v10624_v17 = vmax.f32 %v8070_v20, 0.0  ;;  %v1323_v7 = vpop.f32.mrb[56].mxu1  ;;  %v1214_v56 = vpop.f32.mrb[58].mxu0 }
 0x2eb   :  { %11124 = vst [vmem:[#allocation55_spill] sm:$0xff] %v8080_v6  ;;  %11127 = vst [vmem:[#allocation18_spill] sm:$0xff] %v8084_v49  ;;  %v11129_v9 = vmax.f32 %v11128_v58, 0.0  ;;  %v10614_v26 = vmax.f32 %v8084_v49, 0.0  ;;  %v8099_v38 = vadd.f32 %v1320_v14, %v11135_v57  ;;  %v11137_v21 = vld [vmem:[#allocation61_spill] sm:$0xff]  ;;  %v1325_v46 = vpop.f32.mrb[57].mxu1 }
 0x2ec   :  { %11121 = vst [vmem:[#allocation10_spill] sm:$0xff] %v8074_v44  ;;  %11133 = vst [vmem:[#allocation20_spill] sm:$0xff] %v8093_v53  ;;  %v10619_v11 = vmax.f32 %v8093_v53, 0.0  ;;  %v1211_v47 = vadd.f32 %v1210_v54, %v11137_v21  ;;  %v1213_v45 = vadd.f32 %v1212_v55, %v11137_v21  ;;  %v11138_v58 = vld [vmem:[#allocation42_spill] sm:$0xff]  ;;  %v1216_v61 = vpop.f32.mrb[59].mxu0 }
 0x2ed   :  { %v8089_v39 = vadd.f32 %v1318_v42, %v11129_v9  ;;  %11136 = vst [vmem:[#allocation14_spill] sm:$0xff] %v8099_v38  ;;  %v10620_v42 = vmax.f32 %v8074_v44, 0.0  ;;  %v1507_v14 = vpack.c.bf16 %v10614_v26, %v10615_v13  ;;  %v1324_v9 = vadd.f32 %v1323_v7, %v11137_v21  ;;  %v11141_v26 = vld [vmem:[#allocation62_spill] sm:$0xff]  ;;  %v1327_v13 = vpop.f32.mrb[58].mxu1 }
 0x2ee   :  { %v11139_v4 = vmax.f32 %v11138_v58, 0.0  ;;  %v1326_v7 = vadd.f32 %v1325_v46, %v11137_v21  ;;  %v1215_v55 = vadd.f32 %v1214_v56, %v11141_v26  ;;  %v11142_v44 = vmax.f32 %v8080_v6, 0.0  ;;  %v11150_v46 = vld [vmem:[#allocation40_spill] sm:$0xff] }
 0x2ef   :  { %11130 = vst [vmem:[#allocation56_spill] sm:$0xff] %v8089_v39  ;;  %v10623_v59 = vmax.f32 %v8089_v39, 0.0  ;;  %v1508_v57 = vpack.c.bf16 %v10619_v11, %v10620_v42  ;;  %v11143_v53 = vmax.f32 %v8099_v38, 0.0  ;;  %v11144_v42 = vld [vmem:[#allocation44_spill] sm:$0xff]  ;;  %v1217_v21 = vadd.f32 %v1216_v61, %v11141_v26  ;;  %v11153_v38 = vld [vmem:[#allocation43_spill] sm:$0xff] }
 0x2f0   :  { %v8124_v49 = vadd.f32 %v1211_v47, %v11139_v4  ;;  %v11145_v20 = vmax.f32 %v11144_v42, 0.0  ;;  %v1328_v47 = vadd.f32 %v1327_v13, %v11141_v26  ;;  %v1329_v4 = vpop.f32.mrb[59].mxu1  ;;  %v11151_v56 = vmax.f32 %v11150_v46, 0.0  ;;  %v11159_v13 = vld [vmem:[#allocation39_spill] sm:$0xff] }
 0x2f1   :  { %v1509_v54 = vpack.c.bf16 %v10623_v59, %v10624_v17  ;;  %v1510_v11 = vpack.c.bf16 %v11143_v53, %v11142_v44  ;;  %v11147_v59 = vld [vmem:[#allocation38_spill] sm:$0xff]  ;;  %1674 = vmatprep.subr.bf16.mxu0 %v1508_v57  ;;  %v11154_v44 = vmax.f32 %v11153_v38, 0.0  ;;  %v11160_v61 = vmax.f32 %v11159_v13, 0.0  ;;  %v11162_v57 = vld [vmem:[#allocation41_spill] sm:$0xff] }
 0x2f2   :  { %11140 = vst [vmem:[#allocation16_spill] sm:$0xff] %v8124_v49  ;;  %v8134_v25 = vadd.f32 %v1324_v9, %v11145_v20  ;;  %v11148_v17 = vmax.f32 %v11147_v59, 0.0  ;;  %v8144_v39 = vadd.f32 %v1326_v7, %v11151_v56  ;;  %v1330_v20 = vadd.f32 %v1329_v4, %v11141_v26  ;;  %1675 = vmatpush1.bf16.msra.mxu0 %v1507_v14  ;;  %v11166_v26 = vld [vmem:[#allocation64_spill] sm:$0xff] }
 0x2f3   :  { %v8148_v53 = vadd.f32 %v1215_v55, %v11154_v44  ;;  %1787 = vmatprep.subr.bf16.mxu1 %v1510_v11  ;;  %v8157_v9 = vadd.f32 %v1217_v21, %v11160_v61  ;;  %v11163_v7 = vmax.f32 %v11162_v57, 0.0  ;;  %v10635_v55 = vmax.f32 %v8124_v49, 0.0  ;;  %v1220_v11 = vpop.f32.mrb[60].mxu0  ;;  %v11165_v21 = vld [vmem:[#allocation63_spill] sm:$0xff] }
 0x2f4   :  { %11146 = vst [vmem:[#allocation19_spill] sm:$0xff] %v8134_v25  ;;  %v8138_v58 = vadd.f32 %v1213_v45, %v11148_v17  ;;  %11152 = vst [vmem:[#allocation15_spill] sm:$0xff] %v8144_v39  ;;  %v11156_v17 = vld [vmem:[#allocation45_spill] sm:$0xff]  ;;  %1788 = vmatpush1.bf16.msra.mxu1 %v1509_v54  ;;  %v1221_v46 = vadd.f32 %v1220_v11, %v11165_v21  ;;  %v1333_v54 = vpop.f32.mrb[60].mxu1  ;;  %v1222_v56 = vpop.f32.mrb[61].mxu0  ;;  %v10637_v44 = vmax.f32 %v8144_v39, 0.0 }
 0x2f5   :  { %11155 = vst [vmem:[#allocation17_spill] sm:$0xff] %v8148_v53  ;;  %v11157_v59 = vmax.f32 %v11156_v17, 0.0  ;;  %11161 = vst [vmem:[#allocation26_spill] sm:$0xff] %v8157_v9  ;;  %v10634_v45 = vmax.f32 %v8148_v53, 0.0  ;;  %v8162_v38 = vadd.f32 %v1330_v20, %v11163_v7  ;;  %v1334_v17 = vadd.f32 %v1333_v54, %v11165_v21  ;;  %v1335_v13 = vpop.f32.mrb[61].mxu1  ;;  %v1224_v61 = vpop.f32.mrb[62].mxu0 }
 0x2f6   :  { %11149 = vst [vmem:[#allocation21_spill] sm:$0xff] %v8138_v58  ;;  %v10630_v14 = vmax.f32 %v8138_v58, 0.0  ;;  %v1336_v11 = vadd.f32 %v1335_v13, %v11165_v21  ;;  %v1225_v4 = vadd.f32 %v1224_v61, %v11166_v26  ;;  %v1337_v20 = vpop.f32.mrb[62].mxu1  ;;  %v1226_v54 = vpop.f32.mrb[63].mxu0  ;;  %v11168_v58 = vmax.f32 %v8134_v25, 0.0 }
 0x2f7   :  { %v8153_v42 = vadd.f32 %v1328_v47, %v11157_v59  ;;  %11164 = vst [vmem:[#allocation58_spill] sm:$0xff] %v8162_v38  ;;  %v10629_v47 = vmax.f32 %v8157_v9, 0.0  ;;  %v1223_v59 = vadd.f32 %v1222_v56, %v11165_v21  ;;  %v1511_v7 = vpack.c.bf16 %v10634_v45, %v10635_v55  ;;  %v11170_v9 = vld [vmem:[#allocation50_spill] sm:$0xff]  ;;  %v1339_v39 = vpop.f32.mrb[63].mxu1 }
 0x2f8   :  { %v11167_v56 = vmax.f32 %v8162_v38, 0.0  ;;  %v11171_v49 = vmax.f32 %v11170_v9, 0.0  ;;  %v11173_v45 = vld [vmem:[#allocation46_spill] sm:$0xff]  ;;  %v1338_v61 = vadd.f32 %v1337_v20, %v11166_v26  ;;  %v1227_v55 = vadd.f32 %v1226_v54, %v11166_v26  ;;  %v11182_v9 = vld [vmem:[#allocation52_spill] sm:$0xff]  ;;  %v11185_v20 = vld [vmem:[#allocation53_spill] sm:$0xff] }
 0x2f9   :  { %11158 = vst [vmem:[#allocation57_spill] sm:$0xff] %v8153_v42  ;;  %v1512_v57 = vpack.c.bf16 %v10629_v47, %v10630_v14  ;;  %v11169_v47 = vmax.f32 %v8153_v42, 0.0  ;;  %v11174_v21 = vmax.f32 %v11173_v45, 0.0  ;;  %v11179_v42 = vld [vmem:[#allocation51_spill] sm:$0xff]  ;;  %v11183_v45 = vmax.f32 %v11182_v9, 0.0 }
 0x2fa   :  { %v1514_v6 = vpack.c.bf16 %v11167_v56, %v10637_v44  ;;  %v8194_v53 = vadd.f32 %v1221_v46, %v11171_v49  ;;  %v11176_v56 = vld [vmem:[#allocation48_spill] sm:$0xff]  ;;  %v1340_v49 = vadd.f32 %v1339_v39, %v11166_v26 }
 0x2fb   :  { %v1513_v14 = vpack.c.bf16 %v11169_v47, %v11168_v58  ;;  %v8198_v13 = vadd.f32 %v1223_v59, %v11174_v21  ;;  %1676 = vmatprep.subr.bf16.mxu0 %v1512_v57  ;;  %v11177_v44 = vmax.f32 %v11176_v56, 0.0  ;;  %v11180_v58 = vmax.f32 %v11179_v42, 0.0  ;;  %v11188_v57 = vld [vmem:[#allocation47_spill] sm:$0xff] }
 0x2fc   :  { %11172 = vst [vmem:[#allocation28_spill] sm:$0xff] %v8194_v53  ;;  %1789 = vmatprep.subr.bf16.mxu1 %v1514_v6  ;;  %1677 = vmatpush1.bf16.msra.mxu0 %v1511_v7  ;;  %v8213_v46 = vadd.f32 %v1334_v17, %v11183_v45  ;;  %v11186_v59 = vmax.f32 %v11185_v20, 0.0  ;;  %v11189_v21 = vmax.f32 %v11188_v57, 0.0  ;;  %v10647_v7 = vmax.f32 %v8194_v53, 0.0  ;;  %v6261_v45 = vld [vmem:[%s10392_s3 + $0x40] sm:$0xff]   ;;  %v6262_v20 = vld [vmem:[%s10392_s3 + $0x48] sm:$0xff]  }
 0x2fd   :  { %11175 = vst [vmem:[#allocation22_spill] sm:$0xff] %v8198_v13  ;;  %v8204_v38 = vadd.f32 %v1336_v11, %v11177_v44  ;;  %v8208_v47 = vadd.f32 %v1225_v4, %v11180_v58  ;;  %1790 = vmatpush1.bf16.msra.mxu1 %v1513_v14  ;;  %v11191_v4 = vld [vmem:[#allocation49_spill] sm:$0xff]  ;;  %v10646_v26 = vmax.f32 %v8198_v13, 0.0  ;;  %v11196_v13 = vld [vmem:[#allocation67_spill] sm:$0xff] }
 0x2fe   :  { %11184 = vst [vmem:[#allocation29_spill] sm:$0xff] %v8213_v46  ;;  %v8217_v54 = vadd.f32 %v1338_v61, %v11186_v59  ;;  %v8221_v44 = vadd.f32 %v1227_v55, %v11189_v21  ;;  %v11192_v11 = vmax.f32 %v11191_v4, 0.0  ;;  %v10643_v14 = vmax.f32 %v8213_v46, 0.0  ;;  %v6263_v59 = vld [vmem:[%s10392_s3 + $0x50] sm:$0xff]   ;;  %v6264_v57 = vld [vmem:[%s10392_s3 + $0x58] sm:$0xff]   ;;  %v6265_v21 = vld [vmem:[%s10392_s3 + $0x60] sm:$0xff]  }
 0x2ff   :  { %11178 = vst [vmem:[#allocation24_spill] sm:$0xff] %v8204_v38  ;;  %11181 = vst [vmem:[#allocation27_spill] sm:$0xff] %v8208_v47  ;;  %v10644_v42 = vmax.f32 %v8208_v47, 0.0  ;;  %v10645_v61 = vmax.f32 %v8204_v38, 0.0  ;;  %v6266_v4 = vld [vmem:[%s10392_s3 + $0x68] sm:$0xff]  }
 0x300   :  { %11187 = vst [vmem:[#allocation23_spill] sm:$0xff] %v8217_v54  ;;  %11190 = vst [vmem:[#allocation25_spill] sm:$0xff] %v8221_v44  ;;  %v8226_v39 = vadd.f32 %v1340_v49, %v11192_v11  ;;  %v10642_v6 = vmax.f32 %v8217_v54, 0.0  ;;  %v10641_v17 = vmax.f32 %v8221_v44, 0.0  ;;  %v6267_v11 = vld [vmem:[%s10392_s3 + $0x70] sm:$0xff]  }
 0x301   :  { %v1515_v49 = vpack.c.bf16 %v10644_v42, %v10647_v7 }
 0x302   :  { %11193 = vst [vmem:[#allocation59_spill] sm:$0xff] %v8226_v39  ;;  %v10640_v55 = vmax.f32 %v8226_v39, 0.0  ;;  %v1516_v56 = vpack.c.bf16 %v10641_v17, %v10646_v26  ;;  %v1517_v9 = vpack.c.bf16 %v10642_v6, %v10643_v14 }
 0x304   :  { %v1518_v58 = vpack.c.bf16 %v10640_v55, %v10645_v61  ;;  %1678 = vmatprep.subr.bf16.mxu0 %v1516_v56  ;;  %v6268_v56 = vld [vmem:[%s10392_s3 + $0x78] sm:$0xff]   ;;  %v11195_v55 = vld [vmem:[#allocation66_spill] sm:$0xff] }
 0x305   :  { %1679 = vmatpush1.bf16.msra.mxu0 %v1515_v49  ;;  %v11194_v49 = vld [vmem:[#allocation65_spill] sm:$0xff] }
 0x306   :  { %1791 = vmatprep.subr.bf16.mxu1 %v1518_v58 }
 0x307   :  { %1792 = vmatpush1.bf16.msra.mxu1 %v1517_v9 }
 0x308   :  { %1697 = vmatmul.mubr.bf16.vlgmr.msra.gmra.mrb[64].mxu0 %v6261_v45 }
 0x309   :  { %1706 = vmatprep.mubr.bf16.mxu0 %v10978_v5 }
 0x30a   :  { %1810 = vmatmul.mubr.bf16.vlgmr.msra.gmra.mrb[64].mxu1 %v6261_v45 }
 0x30b   :  { %1819 = vmatprep.mubr.bf16.mxu1 %v10978_v5 }
 0x310   :  { %1707 = vmatmul.mubr.bf16.gmra.mrb[68].mxu0 %v6262_v20 }
 0x311   :  { %1716 = vmatprep.mubr.bf16.mxu0 %v10978_v5 }
 0x312   :  { %1820 = vmatmul.mubr.bf16.gmra.mrb[68].mxu1 %v6262_v20 }
 0x313   :  { %1829 = vmatprep.mubr.bf16.mxu1 %v10978_v5 }
 0x318   :  { %1717 = vmatmul.mubr.bf16.gmra.mrb[72].mxu0 %v6263_v59 }
 0x319   :  { %1726 = vmatprep.mubr.bf16.mxu0 %v10978_v5 }
 0x31a   :  { %1830 = vmatmul.mubr.bf16.gmra.mrb[72].mxu1 %v6263_v59 }
 0x31b   :  { %1839 = vmatprep.mubr.bf16.mxu1 %v10978_v5 }
 0x320   :  { %1727 = vmatmul.mubr.bf16.gmra.mrb[76].mxu0 %v6264_v57 }
 0x321   :  { %1736 = vmatprep.mubr.bf16.mxu0 %v10978_v5 }
 0x322   :  { %1840 = vmatmul.mubr.bf16.gmra.mrb[76].mxu1 %v6264_v57 }
 0x323   :  { %1849 = vmatprep.mubr.bf16.mxu1 %v10978_v5 }
 0x328   :  { %1737 = vmatmul.mubr.bf16.gmra.mrb[80].mxu0 %v6265_v21 }
 0x329   :  { %1746 = vmatprep.mubr.bf16.mxu0 %v10978_v5 }
 0x32a   :  { %1850 = vmatmul.mubr.bf16.gmra.mrb[80].mxu1 %v6265_v21 }
 0x32b   :  { %1859 = vmatprep.mubr.bf16.mxu1 %v10978_v5 }
 0x330   :  { %1747 = vmatmul.mubr.bf16.gmra.mrb[84].mxu0 %v6266_v4 }
 0x331   :  { %1756 = vmatprep.mubr.bf16.mxu0 %v10978_v5 }
 0x332   :  { %1860 = vmatmul.mubr.bf16.gmra.mrb[84].mxu1 %v6266_v4 }
 0x333   :  { %1869 = vmatprep.mubr.bf16.mxu1 %v10978_v5 }
 0x338   :  { %1757 = vmatmul.mubr.bf16.gmra.mrb[88].mxu0 %v6267_v11 }
 0x339   :  { %1766 = vmatprep.mubr.bf16.mxu0 %v10978_v5 }
 0x33a   :  { %1870 = vmatmul.mubr.bf16.gmra.mrb[88].mxu1 %v6267_v11 }
 0x33b   :  { %1879 = vmatprep.mubr.bf16.mxu1 %v10978_v5 }
 0x340   :  { %1767 = vmatmul.mubr.bf16.gmra.mrb[92].mxu0 %v6268_v56 }
 0x341   :  { %2180 = vmatprep.mubr.bf16.mxu0 %v10978_v5 }
 0x342   :  { %1880 = vmatmul.mubr.bf16.gmra.mrb[92].mxu1 %v6268_v56 }
 0x343   :  { %2293 = vmatprep.mubr.bf16.mxu1 %v10978_v5 }
 0x3db   :  { %v1698_v58 = vpop.f32.mrb[64].mxu0 }
 0x3dc   :  { %v1699_v9 = vadd.f32 %v1698_v58, %v11194_v49  ;;  %v1700_v20 = vpop.f32.mrb[65].mxu0 }
 0x3dd   :  { %v1811_v45 = vpop.f32.mrb[64].mxu1  ;;  %v1701_v57 = vadd.f32 %v1700_v20, %v11194_v49  ;;  %v1702_v4 = vpop.f32.mrb[66].mxu0 }
 0x3de   :  { %v1812_v59 = vadd.f32 %v1811_v45, %v11194_v49  ;;  %v1813_v21 = vpop.f32.mrb[65].mxu1  ;;  %v1703_v17 = vadd.f32 %v1702_v4, %v11195_v55  ;;  %v1704_v6 = vpop.f32.mrb[67].mxu0  ;;  %v1890_v58 = vmax.f32 %v1699_v9, 0.0 }
 0x3df   :  { %v1814_v11 = vadd.f32 %v1813_v21, %v11194_v49  ;;  %v1815_v56 = vpop.f32.mrb[66].mxu1  ;;  %v1705_v42 = vadd.f32 %v1704_v6, %v11195_v55  ;;  %v1891_v39 = vmax.f32 %v1701_v57, 0.0 }
 0x3e0   :  { %v1816_v14 = vadd.f32 %v1815_v56, %v11195_v55  ;;  %v1817_v61 = vpop.f32.mrb[67].mxu1  ;;  %v1894_v26 = vmax.f32 %v1703_v17, 0.0  ;;  %v1892_v45 = vmax.f32 %v1812_v59, 0.0 }
 0x3e1   :  { %v1818_v7 = vadd.f32 %v1817_v61, %v11195_v55  ;;  %v1895_v44 = vmax.f32 %v1705_v42, 0.0  ;;  %v1893_v54 = vmax.f32 %v1814_v11, 0.0 }
 0x3e2   :  { %v1896_v20 = vmax.f32 %v1816_v14, 0.0  ;;  %v1971_v46 = vpack.c.bf16 %v1894_v26, %v1890_v58  ;;  %v11197_v14 = vld [vmem:[#allocation68_spill] sm:$0xff] }
 0x3e3   :  { %v1897_v49 = vmax.f32 %v1818_v7, 0.0  ;;  %v1972_v4 = vpack.c.bf16 %v1895_v44, %v1891_v39  ;;  %v1708_v47 = vpop.f32.mrb[68].mxu0 }
 0x3e4   :  { %v1973_v21 = vpack.c.bf16 %v1896_v20, %v1892_v45  ;;  %v1709_v56 = vadd.f32 %v1708_v47, %v11196_v13  ;;  %v1710_v6 = vpop.f32.mrb[69].mxu0 }
 0x3e5   :  { %v1974_v38 = vpack.c.bf16 %v1897_v49, %v1893_v54  ;;  %v1821_v53 = vpop.f32.mrb[68].mxu1  ;;  %v1711_v17 = vadd.f32 %v1710_v6, %v11196_v13  ;;  %v1712_v55 = vpop.f32.mrb[70].mxu0  ;;  %2148 = vmatprep.subr.bf16.mxu0 %v1972_v4 }
 0x3e6   :  { %v1822_v9 = vadd.f32 %v1821_v53, %v11196_v13  ;;  %v1823_v61 = vpop.f32.mrb[69].mxu1  ;;  %v1713_v26 = vadd.f32 %v1712_v55, %v11197_v14  ;;  %v1714_v44 = vpop.f32.mrb[71].mxu0  ;;  %2149 = vmatpush1.bf16.msra.mxu0 %v1971_v46  ;;  %v1898_v53 = vmax.f32 %v1709_v56, 0.0  ;;  %v11198_v55 = vld [vmem:[#allocation69_spill] sm:$0xff] }
 0x3e7   :  { %v1824_v42 = vadd.f32 %v1823_v61, %v11196_v13  ;;  %v1825_v7 = vpop.f32.mrb[70].mxu1  ;;  %2261 = vmatprep.subr.bf16.mxu1 %v1974_v38  ;;  %v1715_v47 = vadd.f32 %v1714_v44, %v11197_v14  ;;  %v1899_v58 = vmax.f32 %v1711_v17, 0.0 }
 0x3e8   :  { %v1826_v54 = vadd.f32 %v1825_v7, %v11197_v14  ;;  %v1827_v39 = vpop.f32.mrb[71].mxu1  ;;  %2262 = vmatpush1.bf16.msra.mxu1 %v1973_v21  ;;  %v1902_v59 = vmax.f32 %v1713_v26, 0.0  ;;  %v1900_v11 = vmax.f32 %v1822_v9, 0.0 }
 0x3e9   :  { %v1828_v57 = vadd.f32 %v1827_v39, %v11197_v14  ;;  %v1903_v13 = vmax.f32 %v1715_v47, 0.0  ;;  %v1901_v20 = vmax.f32 %v1824_v42, 0.0  ;;  %v11199_v42 = vld [vmem:[#allocation70_spill] sm:$0xff] }
 0x3ea   :  { %v1904_v45 = vmax.f32 %v1826_v54, 0.0  ;;  %v1975_v49 = vpack.c.bf16 %v1902_v59, %v1898_v53 }
 0x3eb   :  { %v1905_v4 = vmax.f32 %v1828_v57, 0.0  ;;  %v1976_v6 = vpack.c.bf16 %v1903_v13, %v1899_v58  ;;  %v1718_v46 = vpop.f32.mrb[72].mxu0 }
 0x3ec   :  { %v1977_v38 = vpack.c.bf16 %v1904_v45, %v1900_v11  ;;  %v1719_v7 = vadd.f32 %v1718_v46, %v11198_v55  ;;  %v1720_v25 = vpop.f32.mrb[73].mxu0 }
 0x3ed   :  { %v1978_v61 = vpack.c.bf16 %v1905_v4, %v1901_v20  ;;  %v1831_v44 = vpop.f32.mrb[72].mxu1  ;;  %v1721_v56 = vadd.f32 %v1720_v25, %v11198_v55  ;;  %v1722_v9 = vpop.f32.mrb[74].mxu0  ;;  %2150 = vmatprep.subr.bf16.mxu0 %v1976_v6 }
 0x3ee   :  { %v1832_v21 = vadd.f32 %v1831_v44, %v11198_v55  ;;  %v1833_v14 = vpop.f32.mrb[73].mxu1  ;;  %v1723_v26 = vadd.f32 %v1722_v9, %v11199_v42  ;;  %v1724_v47 = vpop.f32.mrb[75].mxu0  ;;  %2151 = vmatpush1.bf16.msra.mxu0 %v1975_v49  ;;  %v1906_v57 = vmax.f32 %v1719_v7, 0.0 }
 0x3ef   :  { %v1834_v17 = vadd.f32 %v1833_v14, %v11198_v55  ;;  %v1835_v54 = vpop.f32.mrb[74].mxu1  ;;  %2263 = vmatprep.subr.bf16.mxu1 %v1978_v61  ;;  %v1725_v53 = vadd.f32 %v1724_v47, %v11199_v42  ;;  %v1907_v45 = vmax.f32 %v1721_v56, 0.0  ;;  %v11200_v14 = vld [vmem:[#allocation71_spill] sm:$0xff] }
 0x3f0   :  { %v1836_v39 = vadd.f32 %v1835_v54, %v11199_v42  ;;  %v1837_v59 = vpop.f32.mrb[75].mxu1  ;;  %2264 = vmatpush1.bf16.msra.mxu1 %v1977_v38  ;;  %v1910_v11 = vmax.f32 %v1723_v26, 0.0  ;;  %v1908_v58 = vmax.f32 %v1832_v21, 0.0 }
 0x3f1   :  { %v1838_v25 = vadd.f32 %v1837_v59, %v11199_v42  ;;  %v1911_v20 = vmax.f32 %v1725_v53, 0.0  ;;  %v1909_v4 = vmax.f32 %v1834_v17, 0.0  ;;  %v11201_v17 = vld [vmem:[#allocation72_spill] sm:$0xff] }
 0x3f2   :  { %v1912_v13 = vmax.f32 %v1836_v39, 0.0  ;;  %v1979_v6 = vpack.c.bf16 %v1910_v11, %v1906_v57 }
 0x3f3   :  { %v1913_v46 = vmax.f32 %v1838_v25, 0.0  ;;  %v1980_v55 = vpack.c.bf16 %v1911_v20, %v1907_v45  ;;  %v1728_v49 = vpop.f32.mrb[76].mxu0 }
 0x3f4   :  { %v1981_v61 = vpack.c.bf16 %v1912_v13, %v1908_v58  ;;  %v1729_v9 = vadd.f32 %v1728_v49, %v11200_v14  ;;  %v1730_v47 = vpop.f32.mrb[77].mxu0 }
 0x3f5   :  { %v1982_v44 = vpack.c.bf16 %v1913_v46, %v1909_v4  ;;  %v1841_v54 = vpop.f32.mrb[76].mxu1  ;;  %v1731_v7 = vadd.f32 %v1730_v47, %v11200_v14  ;;  %v1732_v21 = vpop.f32.mrb[78].mxu0  ;;  %2152 = vmatprep.subr.bf16.mxu0 %v1980_v55 }
 0x3f6   :  { %v1842_v38 = vadd.f32 %v1841_v54, %v11200_v14  ;;  %v1843_v42 = vpop.f32.mrb[77].mxu1  ;;  %v1733_v26 = vadd.f32 %v1732_v21, %v11201_v17  ;;  %v1734_v53 = vpop.f32.mrb[79].mxu0  ;;  %2153 = vmatpush1.bf16.msra.mxu0 %v1979_v6  ;;  %v1914_v25 = vmax.f32 %v1729_v9, 0.0 }
 0x3f7   :  { %v1844_v56 = vadd.f32 %v1843_v42, %v11200_v14  ;;  %v1845_v39 = vpop.f32.mrb[78].mxu1  ;;  %2265 = vmatprep.subr.bf16.mxu1 %v1982_v44  ;;  %v1735_v57 = vadd.f32 %v1734_v53, %v11201_v17  ;;  %v1915_v20 = vmax.f32 %v1731_v7, 0.0  ;;  %v11202_v42 = vld [vmem:[#allocation73_spill] sm:$0xff] }
 0x3f8   :  { %v1846_v59 = vadd.f32 %v1845_v39, %v11201_v17  ;;  %v1847_v11 = vpop.f32.mrb[79].mxu1  ;;  %2266 = vmatpush1.bf16.msra.mxu1 %v1981_v61  ;;  %v1918_v58 = vmax.f32 %v1733_v26, 0.0  ;;  %v1916_v13 = vmax.f32 %v1842_v38, 0.0 }
 0x3f9   :  { %v1848_v45 = vadd.f32 %v1847_v11, %v11201_v17  ;;  %v1919_v46 = vmax.f32 %v1735_v57, 0.0  ;;  %v1917_v55 = vmax.f32 %v1844_v56, 0.0  ;;  %v11203_v56 = vld [vmem:[#allocation74_spill] sm:$0xff] }
 0x3fa   :  { %v1920_v4 = vmax.f32 %v1846_v59, 0.0  ;;  %v1983_v49 = vpack.c.bf16 %v1918_v58, %v1914_v25 }
 0x3fb   :  { %v1921_v14 = vmax.f32 %v1848_v45, 0.0  ;;  %v1984_v54 = vpack.c.bf16 %v1919_v46, %v1915_v20  ;;  %v1738_v6 = vpop.f32.mrb[80].mxu0 }
 0x3fc   :  { %v1985_v44 = vpack.c.bf16 %v1920_v4, %v1916_v13  ;;  %v1739_v21 = vadd.f32 %v1738_v6, %v11202_v42  ;;  %v1740_v53 = vpop.f32.mrb[81].mxu0 }
 0x3fd   :  { %v1986_v47 = vpack.c.bf16 %v1921_v14, %v1917_v55  ;;  %v1851_v39 = vpop.f32.mrb[80].mxu1  ;;  %v1741_v9 = vadd.f32 %v1740_v53, %v11202_v42  ;;  %v1742_v38 = vpop.f32.mrb[82].mxu0  ;;  %2154 = vmatprep.subr.bf16.mxu0 %v1984_v54 }
 0x3fe   :  { %v1852_v61 = vadd.f32 %v1851_v39, %v11202_v42  ;;  %v1853_v17 = vpop.f32.mrb[81].mxu1  ;;  %v1743_v26 = vadd.f32 %v1742_v38, %v11203_v56  ;;  %v1744_v57 = vpop.f32.mrb[83].mxu0  ;;  %2155 = vmatpush1.bf16.msra.mxu0 %v1983_v49  ;;  %v1922_v45 = vmax.f32 %v1739_v21, 0.0 }
 0x3ff   :  { %v1854_v7 = vadd.f32 %v1853_v17, %v11202_v42  ;;  %v1855_v59 = vpop.f32.mrb[82].mxu1  ;;  %2267 = vmatprep.subr.bf16.mxu1 %v1986_v47  ;;  %v1745_v25 = vadd.f32 %v1744_v57, %v11203_v56  ;;  %v1923_v46 = vmax.f32 %v1741_v9, 0.0  ;;  %v11204_v17 = vld [vmem:[#allocation75_spill] sm:$0xff] }
 0x400   :  { %v1856_v11 = vadd.f32 %v1855_v59, %v11203_v56  ;;  %v1857_v58 = vpop.f32.mrb[83].mxu1  ;;  %2268 = vmatpush1.bf16.msra.mxu1 %v1985_v44  ;;  %v1926_v13 = vmax.f32 %v1743_v26, 0.0  ;;  %v1924_v4 = vmax.f32 %v1852_v61, 0.0 }
 0x401   :  { %v1858_v20 = vadd.f32 %v1857_v58, %v11203_v56  ;;  %v1927_v14 = vmax.f32 %v1745_v25, 0.0  ;;  %v1925_v54 = vmax.f32 %v1854_v7, 0.0  ;;  %v11205_v7 = vld [vmem:[#allocation76_spill] sm:$0xff] }
 0x402   :  { %v1928_v55 = vmax.f32 %v1856_v11, 0.0  ;;  %v1987_v6 = vpack.c.bf16 %v1926_v13, %v1922_v45 }
 0x403   :  { %v1929_v42 = vmax.f32 %v1858_v20, 0.0  ;;  %v1988_v39 = vpack.c.bf16 %v1927_v14, %v1923_v46  ;;  %v1748_v49 = vpop.f32.mrb[84].mxu0 }
 0x404   :  { %v1989_v47 = vpack.c.bf16 %v1928_v55, %v1924_v4  ;;  %v1749_v38 = vadd.f32 %v1748_v49, %v11204_v17  ;;  %v1750_v57 = vpop.f32.mrb[85].mxu0 }
 0x405   :  { %v1990_v53 = vpack.c.bf16 %v1929_v42, %v1925_v54  ;;  %v1861_v59 = vpop.f32.mrb[84].mxu1  ;;  %v1751_v21 = vadd.f32 %v1750_v57, %v11204_v17  ;;  %v1752_v61 = vpop.f32.mrb[86].mxu0  ;;  %2156 = vmatprep.subr.bf16.mxu0 %v1988_v39 }
 0x406   :  { %v1862_v44 = vadd.f32 %v1861_v59, %v11204_v17  ;;  %v1863_v56 = vpop.f32.mrb[85].mxu1  ;;  %v1753_v26 = vadd.f32 %v1752_v61, %v11205_v7  ;;  %v1754_v25 = vpop.f32.mrb[87].mxu0  ;;  %2157 = vmatpush1.bf16.msra.mxu0 %v1987_v6  ;;  %v1930_v20 = vmax.f32 %v1749_v38, 0.0 }
 0x407   :  { %v1864_v9 = vadd.f32 %v1863_v56, %v11204_v17  ;;  %v1865_v11 = vpop.f32.mrb[86].mxu1  ;;  %2269 = vmatprep.subr.bf16.mxu1 %v1990_v53  ;;  %v1755_v45 = vadd.f32 %v1754_v25, %v11205_v7  ;;  %v1931_v14 = vmax.f32 %v1751_v21, 0.0  ;;  %v11206_v56 = vld [vmem:[#allocation77_spill] sm:$0xff] }
 0x408   :  { %v1866_v58 = vadd.f32 %v1865_v11, %v11205_v7  ;;  %v1867_v13 = vpop.f32.mrb[87].mxu1  ;;  %2270 = vmatpush1.bf16.msra.mxu1 %v1989_v47  ;;  %v1934_v4 = vmax.f32 %v1753_v26, 0.0  ;;  %v1932_v55 = vmax.f32 %v1862_v44, 0.0 }
 0x409   :  { %v1868_v46 = vadd.f32 %v1867_v13, %v11205_v7  ;;  %v1935_v42 = vmax.f32 %v1755_v45, 0.0  ;;  %v1933_v39 = vmax.f32 %v1864_v9, 0.0  ;;  %v11207_v9 = vld [vmem:[#allocation78_spill] sm:$0xff] }
 0x40a   :  { %v1936_v54 = vmax.f32 %v1866_v58, 0.0  ;;  %v1991_v49 = vpack.c.bf16 %v1934_v4, %v1930_v20 }
 0x40b   :  { %v1937_v17 = vmax.f32 %v1868_v46, 0.0  ;;  %v1992_v59 = vpack.c.bf16 %v1935_v42, %v1931_v14  ;;  %v1758_v6 = vpop.f32.mrb[88].mxu0 }
 0x40c   :  { %v1993_v53 = vpack.c.bf16 %v1936_v54, %v1932_v55  ;;  %v1759_v61 = vadd.f32 %v1758_v6, %v11206_v56  ;;  %v1760_v25 = vpop.f32.mrb[89].mxu0 }
 0x40d   :  { %v1994_v57 = vpack.c.bf16 %v1937_v17, %v1933_v39  ;;  %v1871_v11 = vpop.f32.mrb[88].mxu1  ;;  %v1761_v38 = vadd.f32 %v1760_v25, %v11206_v56  ;;  %v1762_v44 = vpop.f32.mrb[90].mxu0  ;;  %2158 = vmatprep.subr.bf16.mxu0 %v1992_v59 }
 0x40e   :  { %v1872_v47 = vadd.f32 %v1871_v11, %v11206_v56  ;;  %v1873_v7 = vpop.f32.mrb[89].mxu1  ;;  %v1763_v26 = vadd.f32 %v1762_v44, %v11207_v9  ;;  %v1764_v45 = vpop.f32.mrb[91].mxu0  ;;  %2159 = vmatpush1.bf16.msra.mxu0 %v1991_v49  ;;  %v1938_v46 = vmax.f32 %v1759_v61, 0.0 }
 0x40f   :  { %v1874_v21 = vadd.f32 %v1873_v7, %v11206_v56  ;;  %v1875_v58 = vpop.f32.mrb[90].mxu1  ;;  %2271 = vmatprep.subr.bf16.mxu1 %v1994_v57  ;;  %v1765_v20 = vadd.f32 %v1764_v45, %v11207_v9  ;;  %v1939_v42 = vmax.f32 %v1761_v38, 0.0  ;;  %v11208_v7 = vld [vmem:[#allocation79_spill] sm:$0xff] }
 0x410   :  { %v1876_v13 = vadd.f32 %v1875_v58, %v11207_v9  ;;  %v1877_v4 = vpop.f32.mrb[91].mxu1  ;;  %2272 = vmatpush1.bf16.msra.mxu1 %v1993_v53  ;;  %v1942_v55 = vmax.f32 %v1763_v26, 0.0  ;;  %v1940_v54 = vmax.f32 %v1872_v47, 0.0 }
 0x411   :  { %v1878_v14 = vadd.f32 %v1877_v4, %v11207_v9  ;;  %v1943_v17 = vmax.f32 %v1765_v20, 0.0  ;;  %v1941_v59 = vmax.f32 %v1874_v21, 0.0  ;;  %v11209_v21 = vld [vmem:[#allocation80_spill] sm:$0xff] }
 0x412   :  { %v1944_v39 = vmax.f32 %v1876_v13, 0.0  ;;  %v1995_v6 = vpack.c.bf16 %v1942_v55, %v1938_v46 }
 0x413   :  { %v1945_v56 = vmax.f32 %v1878_v14, 0.0  ;;  %v1996_v11 = vpack.c.bf16 %v1943_v17, %v1939_v42  ;;  %v1768_v49 = vpop.f32.mrb[92].mxu0 }
 0x414   :  { %v1997_v57 = vpack.c.bf16 %v1944_v39, %v1940_v54  ;;  %v1769_v44 = vadd.f32 %v1768_v49, %v11208_v7  ;;  %v1770_v45 = vpop.f32.mrb[93].mxu0 }
 0x415   :  { %v1998_v25 = vpack.c.bf16 %v1945_v56, %v1941_v59  ;;  %v1881_v58 = vpop.f32.mrb[92].mxu1  ;;  %v1771_v61 = vadd.f32 %v1770_v45, %v11208_v7  ;;  %v1772_v47 = vpop.f32.mrb[94].mxu0  ;;  %2160 = vmatprep.subr.bf16.mxu0 %v1996_v11  ;;  %v6269_v45 = vld [vmem:[%s10394_s5 + $0x40] sm:$0xff]  }
 0x416   :  { %v1882_v53 = vadd.f32 %v1881_v58, %v11208_v7  ;;  %v1883_v9 = vpop.f32.mrb[93].mxu1  ;;  %v1773_v26 = vadd.f32 %v1772_v47, %v11209_v21  ;;  %v1774_v20 = vpop.f32.mrb[95].mxu0  ;;  %2161 = vmatpush1.bf16.msra.mxu0 %v1995_v6  ;;  %v1946_v14 = vmax.f32 %v1769_v44, 0.0  ;;  %v6271_v44 = vld [vmem:[%s10394_s5 + $0x50] sm:$0xff]  }
 0x417   :  { %v1884_v38 = vadd.f32 %v1883_v9, %v11208_v7  ;;  %v1885_v13 = vpop.f32.mrb[94].mxu1  ;;  %2273 = vmatprep.subr.bf16.mxu1 %v1998_v25  ;;  %v1775_v46 = vadd.f32 %v1774_v20, %v11209_v21  ;;  %v1947_v17 = vmax.f32 %v1771_v61, 0.0  ;;  %v6273_v61 = vld [vmem:[%s10394_s5 + $0x60] sm:$0xff]   ;;  %v6274_v9 = vld [vmem:[%s10394_s5 + $0x68] sm:$0xff]   ;;  %v6275_v47 = vld [vmem:[%s10394_s5 + $0x70] sm:$0xff]  }
 0x418   :  { %v1886_v4 = vadd.f32 %v1885_v13, %v11209_v21  ;;  %v1887_v55 = vpop.f32.mrb[95].mxu1  ;;  %2274 = vmatpush1.bf16.msra.mxu1 %v1997_v57  ;;  %v1950_v54 = vmax.f32 %v1773_v26, 0.0  ;;  %v1948_v39 = vmax.f32 %v1882_v53, 0.0  ;;  %v6270_v57 = vld [vmem:[%s10394_s5 + $0x48] sm:$0xff]   ;;  %v6272_v53 = vld [vmem:[%s10394_s5 + $0x58] sm:$0xff]  }
 0x419   :  { %v1888_v42 = vadd.f32 %v1887_v55, %v11209_v21  ;;  %v1951_v56 = vmax.f32 %v1775_v46, 0.0  ;;  %v1949_v11 = vmax.f32 %v1884_v38, 0.0  ;;  %v6276_v38 = vld [vmem:[%s10394_s5 + $0x78] sm:$0xff]  }
 0x41a   :  { %v1952_v59 = vmax.f32 %v1886_v4, 0.0  ;;  %v1999_v49 = vpack.c.bf16 %v1950_v54, %v1946_v14  ;;  %v11210_v26 = vld [vmem:[#allocation81_spill] sm:$0xff] }
 0x41b   :  { %v1953_v7 = vmax.f32 %v1888_v42, 0.0  ;;  %v2000_v58 = vpack.c.bf16 %v1951_v56, %v1947_v17  ;;  %v11211_v42 = vmax.f32 %v7744_v50, 0.0 }
 0x41c   :  { %v2001_v25 = vpack.c.bf16 %v1952_v59, %v1948_v39  ;;  %v11212_v59 = vld [vmem:[#allocation82_spill] sm:$0xff] }
 0x41d   :  { %v2002_v6 = vpack.c.bf16 %v1953_v7, %v1949_v11  ;;  %2162 = vmatprep.subr.bf16.mxu0 %v2000_v58  ;;  %v11213_v7 = vmax.f32 %v7750_v33, 0.0  ;;  %v11214_v58 = vmax.f32 %v7754_v60, 0.0 }
 0x41e   :  { %2163 = vmatpush1.bf16.msra.mxu0 %v1999_v49 }
 0x41f   :  { %2275 = vmatprep.subr.bf16.mxu1 %v2002_v6 }
 0x420   :  { %2276 = vmatpush1.bf16.msra.mxu1 %v2001_v25 }
 0x421   :  { %2181 = vmatmul.mubr.bf16.vlgmr.msra.gmra.mrb[96].mxu0 %v6269_v45 }
 0x422   :  { %2190 = vmatprep.mubr.bf16.mxu0 %v10978_v5 }
 0x423   :  { %2294 = vmatmul.mubr.bf16.vlgmr.msra.gmra.mrb[96].mxu1 %v6269_v45 }
 0x424   :  { %2303 = vmatprep.mubr.bf16.mxu1 %v10978_v5 }
 0x429   :  { %2191 = vmatmul.mubr.bf16.gmra.mrb[100].mxu0 %v6270_v57 }
 0x42a   :  { %2200 = vmatprep.mubr.bf16.mxu0 %v10978_v5 }
 0x42b   :  { %2304 = vmatmul.mubr.bf16.gmra.mrb[100].mxu1 %v6270_v57 }
 0x42c   :  { %2313 = vmatprep.mubr.bf16.mxu1 %v10978_v5 }
 0x431   :  { %2201 = vmatmul.mubr.bf16.gmra.mrb[104].mxu0 %v6271_v44 }
 0x432   :  { %2210 = vmatprep.mubr.bf16.mxu0 %v10978_v5 }
 0x433   :  { %2314 = vmatmul.mubr.bf16.gmra.mrb[104].mxu1 %v6271_v44  ;;  %v11215_v44 = vmax.f32 %v7760_v12, 0.0 }
 0x434   :  { %2323 = vmatprep.mubr.bf16.mxu1 %v10978_v5 }
 0x439   :  { %2211 = vmatmul.mubr.bf16.gmra.mrb[108].mxu0 %v6272_v53 }
 0x43a   :  { %2220 = vmatprep.mubr.bf16.mxu0 %v10978_v5 }
 0x43b   :  { %2324 = vmatmul.mubr.bf16.gmra.mrb[108].mxu1 %v6272_v53 }
 0x43c   :  { %2333 = vmatprep.mubr.bf16.mxu1 %v10978_v5 }
 0x441   :  { %2221 = vmatmul.mubr.bf16.gmra.mrb[112].mxu0 %v6273_v61 }
 0x442   :  { %2230 = vmatprep.mubr.bf16.mxu0 %v10978_v5 }
 0x443   :  { %2334 = vmatmul.mubr.bf16.gmra.mrb[112].mxu1 %v6273_v61  ;;  %v11216_v61 = vmax.f32 %v7764_v35, 0.0 }
 0x444   :  { %2343 = vmatprep.mubr.bf16.mxu1 %v10978_v5 }
 0x449   :  { %2231 = vmatmul.mubr.bf16.gmra.mrb[116].mxu0 %v6274_v9 }
 0x44a   :  { %2240 = vmatprep.mubr.bf16.mxu0 %v10978_v5 }
 0x44b   :  { %2344 = vmatmul.mubr.bf16.gmra.mrb[116].mxu1 %v6274_v9 }
 0x44c   :  { %2353 = vmatprep.mubr.bf16.mxu1 %v10978_v5 }
 0x451   :  { %2241 = vmatmul.mubr.bf16.gmra.mrb[120].mxu0 %v6275_v47 }
 0x452   :  { %2250 = vmatprep.mubr.bf16.mxu0 %v10978_v5 }
 0x453   :  { %2354 = vmatmul.mubr.bf16.gmra.mrb[120].mxu1 %v6275_v47  ;;  %v11217_v47 = vmax.f32 %v7769_v24, 0.0 }
 0x454   :  { %2363 = vmatprep.mubr.bf16.mxu1 %v10978_v5 }
 0x459   :  { %2251 = vmatmul.mubr.bf16.gmra.mrb[124].mxu0 %v6276_v38 }
 0x45a   :  { %2728 = vmatprep.mubr.bf16.mxu0 %v10978_v5 }
 0x45b   :  { %2364 = vmatmul.mubr.bf16.gmra.mrb[124].mxu1 %v6276_v38  ;;  %v11218_v38 = vmax.f32 %v7773_v18, 0.0 }
 0x45c   :  { %2841 = vmatprep.mubr.bf16.mxu1 %v10978_v5 }
 0x4f4   :  { %v2182_v21 = vpop.f32.mrb[96].mxu0 }
 0x4f5   :  { %v2183_v13 = vadd.f32 %v2182_v21, %v11210_v26  ;;  %v2184_v4 = vpop.f32.mrb[97].mxu0 }
 0x4f6   :  { %v2295_v20 = vpop.f32.mrb[96].mxu1  ;;  %v2185_v55 = vadd.f32 %v2184_v4, %v11210_v26  ;;  %v2186_v54 = vpop.f32.mrb[98].mxu0 }
 0x4f7   :  { %v2296_v46 = vadd.f32 %v2295_v20, %v11210_v26  ;;  %v2297_v14 = vpop.f32.mrb[97].mxu1  ;;  %v8400_v39 = vadd.f32 %v2183_v13, %v11211_v42  ;;  %v2187_v56 = vadd.f32 %v2186_v54, %v11212_v59  ;;  %v2188_v49 = vpop.f32.mrb[99].mxu0  ;;  %v11219_v13 = vmax.f32 %v7779_v15, 0.0  ;;  %v11220_v54 = vld [vmem:[#allocation83_spill] sm:$0xff] }
 0x4f8   :  { %v2298_v17 = vadd.f32 %v2297_v14, %v11210_v26  ;;  %v2299_v11 = vpop.f32.mrb[98].mxu1  ;;  %v8410_v6 = vadd.f32 %v2185_v55, %v11214_v58  ;;  %v2189_v50 = vadd.f32 %v2188_v49, %v11212_v59 }
 0x4f9   :  { %v8406_v25 = vadd.f32 %v2296_v46, %v11213_v7  ;;  %v2300_v45 = vadd.f32 %v2299_v11, %v11212_v59  ;;  %v2301_v57 = vpop.f32.mrb[99].mxu1  ;;  %v8420_v9 = vadd.f32 %v2187_v56, %v11216_v61  ;;  %v10690_v26 = vmax.f32 %v8400_v39, 0.0  ;;  %v11222_v61 = vld [vmem:[#allocation84_spill] sm:$0xff] }
 0x4fa   :  { %v8416_v53 = vadd.f32 %v2298_v17, %v11215_v44  ;;  %v2302_v33 = vadd.f32 %v2301_v57, %v11212_v59  ;;  %v8429_v21 = vadd.f32 %v2189_v50, %v11218_v38  ;;  %v10688_v4 = vmax.f32 %v8410_v6, 0.0 }
 0x4fb   :  { %v8425_v60 = vadd.f32 %v2300_v45, %v11217_v47  ;;  %v10682_v12 = vmax.f32 %v8420_v9, 0.0  ;;  %v10689_v35 = vmax.f32 %v8406_v25, 0.0  ;;  %v11221_v50 = vmax.f32 %v7804_v34, 0.0 }
 0x4fc   :  { %v8435_v20 = vadd.f32 %v2302_v33, %v11219_v13  ;;  %v10658_v46 = vmax.f32 %v8429_v21, 0.0  ;;  %v2192_v55 = vpop.f32.mrb[100].mxu0  ;;  %v10687_v18 = vmax.f32 %v8416_v53, 0.0 }
 0x4fd   :  { %v10663_v24 = vmax.f32 %v8425_v60, 0.0  ;;  %v2519_v14 = vpack.c.bf16 %v10682_v12, %v10690_v26  ;;  %v2193_v42 = vadd.f32 %v2192_v55, %v11220_v54  ;;  %v2194_v59 = vpop.f32.mrb[101].mxu0  ;;  %v11223_v55 = vmax.f32 %v7814_v37, 0.0  ;;  %v11258_v12 = vld [vmem:[#allocation12_spill] sm:$0xff] }
 0x4fe   :  { %v10657_v15 = vmax.f32 %v8435_v20, 0.0  ;;  %v2305_v17 = vpop.f32.mrb[100].mxu1  ;;  %v2195_v49 = vadd.f32 %v2194_v59, %v11220_v54  ;;  %v2196_v58 = vpop.f32.mrb[102].mxu0  ;;  %v2520_v45 = vpack.c.bf16 %v10658_v46, %v10688_v4  ;;  %v11224_v59 = vmax.f32 %v7818_v16, 0.0 }
 0x4ff   :  { %v2521_v56 = vpack.c.bf16 %v10663_v24, %v10689_v35  ;;  %v2306_v11 = vadd.f32 %v2305_v17, %v11220_v54  ;;  %v2307_v7 = vpop.f32.mrb[101].mxu1  ;;  %v8460_v57 = vadd.f32 %v2193_v42, %v11221_v50  ;;  %v2197_v33 = vadd.f32 %v2196_v58, %v11222_v61  ;;  %v2198_v38 = vpop.f32.mrb[103].mxu0  ;;  %v11274_v35 = vld [vmem:[#allocation92_spill] sm:$0xff] }
 0x500   :  { %v2308_v44 = vadd.f32 %v2307_v7, %v11220_v54  ;;  %v2309_v47 = vpop.f32.mrb[102].mxu1  ;;  %v2522_v13 = vpack.c.bf16 %v10657_v15, %v10687_v18  ;;  %v8474_v34 = vadd.f32 %v2195_v49, %v11224_v59  ;;  %v2199_v54 = vadd.f32 %v2198_v38, %v11222_v61  ;;  %2696 = vmatprep.subr.bf16.mxu0 %v2520_v45  ;;  %v11230_v38 = vld [vmem:[#allocation85_spill] sm:$0xff] }
 0x501   :  { %v8470_v17 = vadd.f32 %v2306_v11, %v11223_v55  ;;  %v2310_v42 = vadd.f32 %v2309_v47, %v11222_v61  ;;  %v2311_v7 = vpop.f32.mrb[103].mxu1  ;;  %v11225_v58 = vmax.f32 %v7824_v0, 0.0  ;;  %v11226_v15 = vmax.f32 %v7828_v28, 0.0  ;;  %2697 = vmatpush1.bf16.msra.mxu0 %v2519_v14 }
 0x502   :  { %v2312_v37 = vadd.f32 %v2311_v7, %v11222_v61  ;;  %2809 = vmatprep.subr.bf16.mxu1 %v2522_v13  ;;  %v11227_v16 = vmax.f32 %v7833_v51, 0.0  ;;  %v11228_v49 = vmax.f32 %v7837_v32, 0.0  ;;  %v10660_v0 = vmax.f32 %v8460_v57, 0.0 }
 0x503   :  { %v8480_v50 = vadd.f32 %v2308_v44, %v11225_v58  ;;  %v8484_v46 = vadd.f32 %v2197_v33, %v11226_v15  ;;  %2810 = vmatpush1.bf16.msra.mxu1 %v2521_v56  ;;  %v11229_v28 = vmax.f32 %v7843_v62, 0.0  ;;  %v10662_v44 = vmax.f32 %v8470_v17, 0.0 }
 0x504   :  { %v8489_v11 = vadd.f32 %v2310_v42, %v11227_v16  ;;  %v8493_v47 = vadd.f32 %v2199_v54, %v11228_v49  ;;  %v10671_v14 = vmax.f32 %v8474_v34, 0.0  ;;  %v2202_v32 = vpop.f32.mrb[104].mxu0  ;;  %v11231_v49 = vmax.f32 %v7868_v30, 0.0 }
 0x505   :  { %v10659_v45 = vmax.f32 %v8484_v46, 0.0  ;;  %v8499_v15 = vadd.f32 %v2312_v37, %v11229_v28  ;;  %v10666_v33 = vmax.f32 %v8480_v50, 0.0  ;;  %v2203_v13 = vadd.f32 %v2202_v32, %v11230_v38  ;;  %v2204_v59 = vpop.f32.mrb[105].mxu0 }
 0x506   :  { %v10661_v51 = vmax.f32 %v8489_v11, 0.0  ;;  %v10664_v61 = vmax.f32 %v8493_v47, 0.0  ;;  %v2315_v55 = vpop.f32.mrb[104].mxu1  ;;  %v2205_v7 = vadd.f32 %v2204_v59, %v11230_v38  ;;  %v2206_v37 = vpop.f32.mrb[106].mxu0  ;;  %v11233_v59 = vmax.f32 %v7878_v48, 0.0 }
 0x507   :  { %v2523_v56 = vpack.c.bf16 %v10659_v45, %v10660_v0  ;;  %v10665_v62 = vmax.f32 %v8499_v15, 0.0  ;;  %v2316_v54 = vadd.f32 %v2315_v55, %v11230_v38  ;;  %v2317_v58 = vpop.f32.mrb[105].mxu1  ;;  %v8524_v28 = vadd.f32 %v2203_v13, %v11231_v49  ;;  %v11232_v45 = vld [vmem:[#allocation86_spill] sm:$0xff] }
 0x508   :  { %v2525_v42 = vpack.c.bf16 %v10661_v51, %v10662_v44  ;;  %v2524_v16 = vpack.c.bf16 %v10664_v61, %v10671_v14  ;;  %v2318_v32 = vadd.f32 %v2317_v58, %v11230_v38  ;;  %v2207_v0 = vadd.f32 %v2206_v37, %v11232_v45  ;;  %v2319_v51 = vpop.f32.mrb[106].mxu1  ;;  %v2208_v44 = vpop.f32.mrb[107].mxu0 }
 0x509   :  { %v2526_v55 = vpack.c.bf16 %v10665_v62, %v10666_v33  ;;  %v8534_v24 = vadd.f32 %v2316_v54, %v11233_v59  ;;  %v11234_v61 = vmax.f32 %v7882_v22, 0.0  ;;  %v2320_v13 = vadd.f32 %v2319_v51, %v11232_v45  ;;  %v2321_v58 = vpop.f32.mrb[107].mxu1 }
 0x50a   :  { %v2209_v38 = vadd.f32 %v2208_v44, %v11232_v45  ;;  %2698 = vmatprep.subr.bf16.mxu0 %v2524_v16  ;;  %v11235_v37 = vmax.f32 %v7888_v31, 0.0  ;;  %v11236_v62 = vmax.f32 %v7892_v41, 0.0  ;;  %v2322_v48 = vadd.f32 %v2321_v58, %v11232_v45  ;;  %v11240_v16 = vld [vmem:[#allocation87_spill] sm:$0xff] }
 0x50b   :  { %v8538_v30 = vadd.f32 %v2205_v7, %v11234_v61  ;;  %2811 = vmatprep.subr.bf16.mxu1 %v2526_v55  ;;  %2699 = vmatpush1.bf16.msra.mxu0 %v2523_v56  ;;  %v11237_v22 = vmax.f32 %v7897_v43, 0.0  ;;  %v11238_v44 = vmax.f32 %v7901_v1, 0.0  ;;  %v10668_v31 = vmax.f32 %v8524_v28, 0.0 }
 0x50c   :  { %v8544_v49 = vadd.f32 %v2318_v32, %v11235_v37  ;;  %v8548_v33 = vadd.f32 %v2207_v0, %v11236_v62  ;;  %2812 = vmatpush1.bf16.msra.mxu1 %v2525_v42  ;;  %v11239_v41 = vmax.f32 %v7907_v27, 0.0  ;;  %v10670_v45 = vmax.f32 %v8534_v24, 0.0  ;;  %v2212_v1 = vpop.f32.mrb[108].mxu0 }
 0x50d   :  { %v8553_v61 = vadd.f32 %v2320_v13, %v11237_v22  ;;  %v8557_v51 = vadd.f32 %v2209_v38, %v11238_v44  ;;  %v10679_v56 = vmax.f32 %v8538_v30, 0.0  ;;  %v2213_v32 = vadd.f32 %v2212_v1, %v11240_v16  ;;  %v2214_v59 = vpop.f32.mrb[109].mxu0 }
 0x50e   :  { %v10667_v54 = vmax.f32 %v8548_v33, 0.0  ;;  %v8563_v0 = vadd.f32 %v2322_v48, %v11239_v41  ;;  %v10674_v7 = vmax.f32 %v8544_v49, 0.0  ;;  %v2325_v55 = vpop.f32.mrb[108].mxu1  ;;  %v2215_v58 = vadd.f32 %v2214_v59, %v11240_v16  ;;  %v2216_v48 = vpop.f32.mrb[110].mxu0 }
 0x50f   :  { %v10669_v43 = vmax.f32 %v8553_v61, 0.0  ;;  %v10672_v62 = vmax.f32 %v8557_v51, 0.0  ;;  %v2326_v38 = vadd.f32 %v2325_v55, %v11240_v16  ;;  %v2327_v37 = vpop.f32.mrb[109].mxu1  ;;  %v11241_v44 = vmax.f32 %v7932_v23, 0.0 }
 0x510   :  { %v2527_v42 = vpack.c.bf16 %v10667_v54, %v10668_v31  ;;  %v10673_v27 = vmax.f32 %v8563_v0, 0.0  ;;  %v2328_v1 = vadd.f32 %v2327_v37, %v11240_v16  ;;  %v11242_v54 = vld [vmem:[#allocation88_spill] sm:$0xff]  ;;  %v11243_v59 = vmax.f32 %v7942_v52, 0.0 }
 0x511   :  { %v2529_v13 = vpack.c.bf16 %v10669_v43, %v10670_v45  ;;  %v2528_v22 = vpack.c.bf16 %v10672_v62, %v10679_v56  ;;  %v8588_v41 = vadd.f32 %v2213_v32, %v11241_v44  ;;  %v2217_v31 = vadd.f32 %v2216_v48, %v11242_v54  ;;  %v2329_v43 = vpop.f32.mrb[110].mxu1  ;;  %v2218_v45 = vpop.f32.mrb[111].mxu0 }
 0x512   :  { %v2530_v55 = vpack.c.bf16 %v10673_v27, %v10674_v7  ;;  %v8598_v14 = vadd.f32 %v2326_v38, %v11243_v59  ;;  %v11244_v62 = vmax.f32 %v7946_v2, 0.0  ;;  %v2330_v32 = vadd.f32 %v2329_v43, %v11242_v54  ;;  %v2331_v37 = vpop.f32.mrb[111].mxu1 }
 0x513   :  { %v2219_v16 = vadd.f32 %v2218_v45, %v11242_v54  ;;  %2700 = vmatprep.subr.bf16.mxu0 %v2528_v22  ;;  %v11245_v48 = vmax.f32 %v7952_v29, 0.0  ;;  %v11246_v27 = vmax.f32 %v7956_v10, 0.0  ;;  %v2332_v52 = vadd.f32 %v2331_v37, %v11242_v54  ;;  %v11250_v22 = vld [vmem:[#allocation89_spill] sm:$0xff] }
 0x514   :  { %v8602_v23 = vadd.f32 %v2215_v58, %v11244_v62  ;;  %2813 = vmatprep.subr.bf16.mxu1 %v2530_v55  ;;  %2701 = vmatpush1.bf16.msra.mxu0 %v2527_v42  ;;  %v11247_v2 = vmax.f32 %v7961_v40, 0.0  ;;  %v11248_v45 = vmax.f32 %v7965_v36, 0.0  ;;  %v10676_v29 = vmax.f32 %v8588_v41, 0.0  ;;  %v2222_v36 = vpop.f32.mrb[112].mxu0 }
 0x515   :  { %v8608_v44 = vadd.f32 %v2328_v1, %v11245_v48  ;;  %v8612_v7 = vadd.f32 %v2217_v31, %v11246_v27  ;;  %2814 = vmatpush1.bf16.msra.mxu1 %v2529_v13  ;;  %v11249_v10 = vmax.f32 %v7971_v3, 0.0  ;;  %v10678_v54 = vmax.f32 %v8598_v14, 0.0  ;;  %v2224_v59 = vpop.f32.mrb[113].mxu0 }
 0x516   :  { %v8617_v62 = vadd.f32 %v2330_v32, %v11247_v2  ;;  %v8621_v43 = vadd.f32 %v2219_v16, %v11248_v45  ;;  %v10681_v42 = vmax.f32 %v8602_v23, 0.0  ;;  %v2223_v1 = vadd.f32 %v2222_v36, %v11250_v22  ;;  %v2335_v55 = vpop.f32.mrb[112].mxu1 }
 0x517   :  { %v10675_v38 = vmax.f32 %v8612_v7, 0.0  ;;  %v8627_v31 = vadd.f32 %v2332_v52, %v11249_v10  ;;  %v10684_v58 = vmax.f32 %v8608_v44, 0.0  ;;  %v2336_v16 = vadd.f32 %v2335_v55, %v11250_v22  ;;  %v2337_v48 = vpop.f32.mrb[113].mxu1  ;;  %v2226_v52 = vpop.f32.mrb[114].mxu0 }
 0x518   :  { %v10677_v40 = vmax.f32 %v8617_v62, 0.0  ;;  %v10680_v27 = vmax.f32 %v8621_v43, 0.0  ;;  %v2225_v37 = vadd.f32 %v2224_v59, %v11250_v22  ;;  %v11251_v45 = vmax.f32 %v7996_v8, 0.0 }
 0x519   :  { %v2531_v13 = vpack.c.bf16 %v10675_v38, %v10676_v29  ;;  %v10683_v3 = vmax.f32 %v8627_v31, 0.0  ;;  %v2338_v36 = vadd.f32 %v2337_v48, %v11250_v22  ;;  %v11252_v38 = vld [vmem:[#allocation90_spill] sm:$0xff]  ;;  %v11253_v59 = vmax.f32 %v8006_v63, 0.0 }
 0x51a   :  { %v2533_v32 = vpack.c.bf16 %v10677_v40, %v10678_v54  ;;  %v2532_v2 = vpack.c.bf16 %v10680_v27, %v10681_v42  ;;  %v8652_v10 = vadd.f32 %v2223_v1, %v11251_v45  ;;  %v2227_v29 = vadd.f32 %v2226_v52, %v11252_v38  ;;  %v2339_v40 = vpop.f32.mrb[114].mxu1  ;;  %v2228_v54 = vpop.f32.mrb[115].mxu0  ;;  %v11255_v52 = vld [vmem:[#allocation54_spill] sm:$0xff] }
 0x51b   :  { %v2534_v55 = vpack.c.bf16 %v10683_v3, %v10684_v58  ;;  %v8662_v56 = vadd.f32 %v2336_v16, %v11253_v59  ;;  %v11254_v27 = vmax.f32 %v8010_v19, 0.0  ;;  %v2340_v1 = vadd.f32 %v2339_v40, %v11252_v38  ;;  %v2341_v48 = vpop.f32.mrb[115].mxu1  ;;  %v11261_v19 = vld [vmem:[#allocation7_spill] sm:$0xff]  ;;  %v11264_v40 = vld [vmem:[#allocation9_spill] sm:$0xff] }
 0x51c   :  { %v2229_v22 = vadd.f32 %v2228_v54, %v11252_v38  ;;  %2702 = vmatprep.subr.bf16.mxu0 %v2532_v2  ;;  %v11256_v45 = vmax.f32 %v11255_v52, 0.0  ;;  %v11259_v3 = vmax.f32 %v11258_v12, 0.0  ;;  %v2342_v63 = vadd.f32 %v2341_v48, %v11252_v38  ;;  %v11267_v12 = vld [vmem:[#allocation11_spill] sm:$0xff] }
 0x51d   :  { %v8666_v8 = vadd.f32 %v2225_v37, %v11254_v27  ;;  %2815 = vmatprep.subr.bf16.mxu1 %v2534_v55  ;;  %2703 = vmatpush1.bf16.msra.mxu0 %v2531_v13  ;;  %v11262_v27 = vmax.f32 %v11261_v19, 0.0  ;;  %v11265_v54 = vmax.f32 %v11264_v40, 0.0  ;;  %v10686_v2 = vmax.f32 %v8652_v10, 0.0  ;;  %v11270_v52 = vld [vmem:[#allocation91_spill] sm:$0xff] }
 0x51e   :  { %v8672_v42 = vadd.f32 %v2338_v36, %v11256_v45  ;;  %v8676_v58 = vadd.f32 %v2227_v29, %v11259_v3  ;;  %2816 = vmatpush1.bf16.msra.mxu1 %v2533_v32  ;;  %v11268_v29 = vmax.f32 %v11267_v12, 0.0  ;;  %v10692_v38 = vmax.f32 %v8662_v56, 0.0 }
 0x51f   :  { %v8681_v16 = vadd.f32 %v2340_v1, %v11262_v27  ;;  %v8685_v37 = vadd.f32 %v2229_v22, %v11265_v54  ;;  %v10696_v13 = vmax.f32 %v8666_v8, 0.0  ;;  %v2232_v1 = vpop.f32.mrb[116].mxu0 }
 0x520   :  { %11257 = vst [vmem:[#allocation34_spill] sm:$0xff] %v8672_v42  ;;  %11260 = vst [vmem:[#allocation60_spill] sm:$0xff] %v8676_v58  ;;  %v10685_v36 = vmax.f32 %v8676_v58, 0.0  ;;  %v8691_v3 = vadd.f32 %v2342_v63, %v11268_v29  ;;  %v10700_v22 = vmax.f32 %v8672_v42, 0.0  ;;  %v2233_v45 = vadd.f32 %v2232_v1, %v11270_v52  ;;  %v2345_v63 = vpop.f32.mrb[116].mxu1  ;;  %v2234_v19 = vpop.f32.mrb[117].mxu0 }
 0x521   :  { %11263 = vst [vmem:[#allocation36_spill] sm:$0xff] %v8681_v16  ;;  %11266 = vst [vmem:[#allocation30_spill] sm:$0xff] %v8685_v37  ;;  %v10691_v55 = vmax.f32 %v8681_v16, 0.0  ;;  %v10695_v59 = vmax.f32 %v8685_v37, 0.0  ;;  %v2346_v40 = vadd.f32 %v2345_v63, %v11270_v52  ;;  %v2235_v54 = vadd.f32 %v2234_v19, %v11270_v52  ;;  %v2347_v12 = vpop.f32.mrb[117].mxu1  ;;  %v2236_v29 = vpop.f32.mrb[118].mxu0 }
 0x522   :  { %11269 = vst [vmem:[#allocation32_spill] sm:$0xff] %v8691_v3  ;;  %v2535_v32 = vpack.c.bf16 %v10685_v36, %v10686_v2  ;;  %v10699_v48 = vmax.f32 %v8691_v3, 0.0  ;;  %v11271_v2 = vld [vmem:[#allocation13_spill] sm:$0xff]  ;;  %v2348_v4 = vadd.f32 %v2347_v12, %v11270_v52  ;;  %v2237_v26 = vadd.f32 %v2236_v29, %v11274_v35  ;;  %v11275_v19 = vld [vmem:[#allocation8_spill] sm:$0xff]  ;;  %v11281_v29 = vld [vmem:[#allocation55_spill] sm:$0xff] }
 0x523   :  { %v2537_v27 = vpack.c.bf16 %v10691_v55, %v10692_v38  ;;  %v2536_v36 = vpack.c.bf16 %v10695_v59, %v10696_v13  ;;  %v11272_v1 = vmax.f32 %v11271_v2, 0.0  ;;  %v2349_v55 = vpop.f32.mrb[118].mxu1  ;;  %v2238_v38 = vpop.f32.mrb[119].mxu0  ;;  %v11276_v16 = vmax.f32 %v11275_v19, 0.0  ;;  %v11278_v59 = vld [vmem:[#allocation10_spill] sm:$0xff] }
 0x524   :  { %v2538_v63 = vpack.c.bf16 %v10699_v48, %v10700_v22  ;;  %v11279_v13 = vmax.f32 %v11278_v59, 0.0  ;;  %v2239_v52 = vadd.f32 %v2238_v38, %v11274_v35  ;;  %v2351_v12 = vpop.f32.mrb[119].mxu1  ;;  %v11284_v3 = vld [vmem:[#allocation18_spill] sm:$0xff] }
 0x525   :  { %v8716_v18 = vadd.f32 %v2233_v45, %v11272_v1  ;;  %v8726_v58 = vadd.f32 %v2346_v40, %v11276_v16  ;;  %v2350_v45 = vadd.f32 %v2349_v55, %v11274_v35  ;;  %2704 = vmatprep.subr.bf16.mxu0 %v2536_v36  ;;  %v11282_v1 = vmax.f32 %v11281_v29, 0.0  ;;  %v11290_v55 = vld [vmem:[#allocation20_spill] sm:$0xff]  ;;  %v11296_v29 = vld [vmem:[#allocation93_spill] sm:$0xff] }
 0x526   :  { %v8730_v2 = vadd.f32 %v2235_v54, %v11279_v13  ;;  %v11285_v48 = vmax.f32 %v11284_v3, 0.0  ;;  %v2352_v16 = vadd.f32 %v2351_v12, %v11274_v35  ;;  %2817 = vmatprep.subr.bf16.mxu1 %v2538_v63  ;;  %2705 = vmatpush1.bf16.msra.mxu0 %v2535_v32  ;;  %v11287_v13 = vld [vmem:[#allocation56_spill] sm:$0xff]  ;;  %v11291_v38 = vmax.f32 %v11290_v55, 0.0  ;;  %v11293_v3 = vld [vmem:[#allocation14_spill] sm:$0xff] }
 0x527   :  { %11273 = vst [vmem:[#allocation35_spill] sm:$0xff] %v8716_v18  ;;  %11277 = vst [vmem:[#allocation37_spill] sm:$0xff] %v8726_v58  ;;  %v8736_v37 = vadd.f32 %v2348_v4, %v11282_v1  ;;  %v11288_v59 = vmax.f32 %v11287_v13, 0.0  ;;  %2818 = vmatpush1.bf16.msra.mxu1 %v2537_v27  ;;  %v10702_v4 = vmax.f32 %v8716_v18, 0.0  ;;  %v10706_v35 = vmax.f32 %v8726_v58, 0.0  ;;  %v11303_v18 = vld [vmem:[#allocation19_spill] sm:$0xff] }
 0x528   :  { %11280 = vst [vmem:[#allocation31_spill] sm:$0xff] %v8730_v2  ;;  %v8740_v22 = vadd.f32 %v2237_v26, %v11285_v48  ;;  %v8749_v54 = vadd.f32 %v2239_v52, %v11291_v38  ;;  %v11294_v26 = vmax.f32 %v11293_v3, 0.0  ;;  %v10712_v32 = vmax.f32 %v8730_v2, 0.0 }
 0x529   :  { %11283 = vst [vmem:[#allocation33_spill] sm:$0xff] %v8736_v37  ;;  %v8745_v40 = vadd.f32 %v2350_v45, %v11288_v59  ;;  %v2242_v45 = vpop.f32.mrb[120].mxu0  ;;  %v11304_v2 = vmax.f32 %v11303_v18, 0.0 }
 0x52a   :  { %11286 = vst [vmem:[#allocation61_spill] sm:$0xff] %v8740_v22  ;;  %11292 = vst [vmem:[#allocation62_spill] sm:$0xff] %v8749_v54  ;;  %v10701_v36 = vmax.f32 %v8740_v22, 0.0  ;;  %v8755_v48 = vadd.f32 %v2352_v16, %v11294_v26  ;;  %v10711_v19 = vmax.f32 %v8749_v54, 0.0  ;;  %v2243_v1 = vadd.f32 %v2242_v45, %v11296_v29  ;;  %v2355_v16 = vpop.f32.mrb[120].mxu1  ;;  %v2244_v13 = vpop.f32.mrb[121].mxu0 }
 0x52b   :  { %11289 = vst [vmem:[#allocation42_spill] sm:$0xff] %v8745_v40  ;;  %v10705_v63 = vmax.f32 %v8745_v40, 0.0  ;;  %v2356_v55 = vadd.f32 %v2355_v16, %v11296_v29  ;;  %v2245_v38 = vadd.f32 %v2244_v13, %v11296_v29  ;;  %v2357_v3 = vpop.f32.mrb[121].mxu1  ;;  %v2246_v26 = vpop.f32.mrb[122].mxu0  ;;  %v11300_v22 = vld [vmem:[#allocation94_spill] sm:$0xff]  ;;  %v11301_v16 = vmax.f32 %v8736_v37, 0.0 }
 0x52c   :  { %11295 = vst [vmem:[#allocation44_spill] sm:$0xff] %v8755_v48  ;;  %v2539_v27 = vpack.c.bf16 %v10701_v36, %v10702_v4  ;;  %v2540_v36 = vpack.c.bf16 %v10711_v19, %v10712_v32  ;;  %v11297_v4 = vld [vmem:[#allocation16_spill] sm:$0xff]  ;;  %v2358_v52 = vadd.f32 %v2357_v3, %v11296_v29  ;;  %v2247_v40 = vadd.f32 %v2246_v26, %v11300_v22  ;;  %v11306_v19 = vld [vmem:[#allocation21_spill] sm:$0xff]  ;;  %v11309_v26 = vld [vmem:[#allocation15_spill] sm:$0xff] }
 0x52d   :  { %v2541_v59 = vpack.c.bf16 %v10705_v63, %v10706_v35  ;;  %v11298_v45 = vmax.f32 %v11297_v4, 0.0  ;;  %v2359_v63 = vpop.f32.mrb[122].mxu1  ;;  %v2248_v35 = vpop.f32.mrb[123].mxu0  ;;  %v11302_v13 = vmax.f32 %v8755_v48, 0.0  ;;  %v8790_v42 = vadd.f32 %v2356_v55, %v11304_v2  ;;  %v11312_v48 = vld [vmem:[#allocation17_spill] sm:$0xff] }
 0x52e   :  { %v11307_v32 = vmax.f32 %v11306_v19, 0.0  ;;  %v2249_v29 = vadd.f32 %v2248_v35, %v11300_v22  ;;  %v2361_v3 = vpop.f32.mrb[123].mxu1  ;;  %2706 = vmatprep.subr.bf16.mxu0 %v2540_v36  ;;  %v11315_v2 = vld [vmem:[#allocation57_spill] sm:$0xff] }
 0x52f   :  { %v8780_v12 = vadd.f32 %v2243_v1, %v11298_v45  ;;  %v2542_v58 = vpack.c.bf16 %v11302_v13, %v11301_v16  ;;  %11305 = vst [vmem:[#allocation40_spill] sm:$0xff] %v8790_v42  ;;  %v2360_v1 = vadd.f32 %v2359_v63, %v11300_v22  ;;  %v11310_v45 = vmax.f32 %v11309_v26, 0.0  ;;  %2707 = vmatpush1.bf16.msra.mxu0 %v2539_v27  ;;  %v11318_v63 = vld [vmem:[#allocation26_spill] sm:$0xff]  ;;  %v11324_v26 = vld [vmem:[#allocation95_spill] sm:$0xff] }
 0x530   :  { %v8794_v4 = vadd.f32 %v2245_v38, %v11307_v32  ;;  %v11313_v16 = vmax.f32 %v11312_v48, 0.0  ;;  %v2362_v18 = vadd.f32 %v2361_v3, %v11300_v22  ;;  %v11316_v32 = vmax.f32 %v11315_v2, 0.0 }
 0x531   :  { %11299 = vst [vmem:[#allocation38_spill] sm:$0xff] %v8780_v12  ;;  %v8800_v54 = vadd.f32 %v2358_v52, %v11310_v45  ;;  %2819 = vmatprep.subr.bf16.mxu1 %v2542_v58  ;;  %v11319_v35 = vmax.f32 %v11318_v63, 0.0  ;;  %v11321_v52 = vld [vmem:[#allocation58_spill] sm:$0xff]  ;;  %v10726_v3 = vmax.f32 %v8790_v42, 0.0 }
 0x532   :  { %11308 = vst [vmem:[#allocation43_spill] sm:$0xff] %v8794_v4  ;;  %v8804_v13 = vadd.f32 %v2247_v40, %v11313_v16  ;;  %v8809_v19 = vadd.f32 %v2360_v1, %v11316_v32  ;;  %2820 = vmatpush1.bf16.msra.mxu1 %v2541_v59  ;;  %v11322_v38 = vmax.f32 %v11321_v52, 0.0  ;;  %v10716_v40 = vmax.f32 %v8780_v12, 0.0  ;;  %v2252_v1 = vpop.f32.mrb[124].mxu0  ;;  %v2365_v16 = vpop.f32.mrb[124].mxu1 }
 0x533   :  { %11311 = vst [vmem:[#allocation45_spill] sm:$0xff] %v8800_v54  ;;  %v8813_v55 = vadd.f32 %v2249_v29, %v11319_v35  ;;  %v10723_v58 = vmax.f32 %v8794_v4, 0.0  ;;  %v2253_v45 = vadd.f32 %v2252_v1, %v11324_v26  ;;  %v2366_v32 = vadd.f32 %v2365_v16, %v11324_v26  ;;  %v2367_v35 = vpop.f32.mrb[125].mxu1  ;;  %v11325_v29 = vld [vmem:[#allocation96_spill] sm:$0xff] }
 0x534   :  { %11314 = vst [vmem:[#allocation39_spill] sm:$0xff] %v8804_v13  ;;  %11317 = vst [vmem:[#allocation41_spill] sm:$0xff] %v8809_v19  ;;  %v10715_v36 = vmax.f32 %v8804_v13, 0.0  ;;  %v8818_v48 = vadd.f32 %v2362_v18, %v11322_v38  ;;  %v10725_v22 = vmax.f32 %v8809_v19, 0.0  ;;  %v2254_v18 = vpop.f32.mrb[125].mxu0  ;;  %v2368_v59 = vadd.f32 %v2367_v35, %v11324_v26  ;;  %v11328_v4 = vld [vmem:[#allocation28_spill] sm:$0xff] }
 0x535   :  { %11320 = vst [vmem:[#allocation63_spill] sm:$0xff] %v8813_v55  ;;  %v10722_v27 = vmax.f32 %v8813_v55, 0.0  ;;  %v2255_v63 = vadd.f32 %v2254_v18, %v11324_v26  ;;  %v2256_v52 = vpop.f32.mrb[126].mxu0  ;;  %v11326_v18 = vmax.f32 %v8800_v54, 0.0  ;;  %v11329_v37 = vmax.f32 %v11328_v4, 0.0  ;;  %v11340_v4 = vld [vmem:[#allocation29_spill] sm:$0xff] }
 0x536   :  { %11323 = vst [vmem:[#allocation64_spill] sm:$0xff] %v8818_v48  ;;  %v2543_v2 = vpack.c.bf16 %v10715_v36, %v10716_v40  ;;  %v2545_v1 = vpack.c.bf16 %v10725_v22, %v10726_v3  ;;  %v2257_v36 = vadd.f32 %v2256_v52, %v11325_v29  ;;  %v2369_v40 = vpop.f32.mrb[126].mxu1  ;;  %v2258_v16 = vpop.f32.mrb[127].mxu0  ;;  %v11327_v13 = vmax.f32 %v8818_v48, 0.0  ;;  %v11334_v52 = vld [vmem:[#allocation24_spill] sm:$0xff]  ;;  %v11337_v48 = vld [vmem:[#allocation27_spill] sm:$0xff] }
 0x537   :  { %v2544_v38 = vpack.c.bf16 %v10722_v27, %v10723_v58  ;;  %v8850_v55 = vadd.f32 %v2253_v45, %v11329_v37  ;;  %v11331_v27 = vld [vmem:[#allocation22_spill] sm:$0xff]  ;;  %v2370_v22 = vadd.f32 %v2369_v40, %v11325_v29  ;;  %v2259_v26 = vadd.f32 %v2258_v16, %v11325_v29  ;;  %v2371_v35 = vpop.f32.mrb[127].mxu1  ;;  %v11343_v40 = vld [vmem:[#allocation23_spill] sm:$0xff] }
 0x538   :  { %v2546_v12 = vpack.c.bf16 %v11327_v13, %v11326_v18  ;;  %v11332_v58 = vmax.f32 %v11331_v27, 0.0  ;;  %v11335_v3 = vmax.f32 %v11334_v52, 0.0  ;;  %v11338_v13 = vmax.f32 %v11337_v48, 0.0  ;;  %v11349_v48 = vld [vmem:[#allocation59_spill] sm:$0xff] }
 0x539   :  { %11330 = vst [vmem:[#allocation50_spill] sm:$0xff] %v8850_v55  ;;  %2708 = vmatprep.subr.bf16.mxu0 %v2544_v38  ;;  %v2372_v37 = vadd.f32 %v2371_v35, %v11325_v29  ;;  %v11344_v45 = vmax.f32 %v11343_v40, 0.0  ;;  %v11346_v38 = vld [vmem:[#allocation25_spill] sm:$0xff]  ;;  %v6278_v40 = vld [vmem:[%s10392_s3 + $0x88] sm:$0xff]  }
 0x53a   :  { %v8854_v42 = vadd.f32 %v2255_v63, %v11332_v58  ;;  %v8860_v19 = vadd.f32 %v2368_v59, %v11335_v3  ;;  %v8864_v18 = vadd.f32 %v2257_v36, %v11338_v13  ;;  %2821 = vmatprep.subr.bf16.mxu1 %v2546_v12  ;;  %2709 = vmatpush1.bf16.msra.mxu0 %v2543_v2  ;;  %v11341_v58 = vmax.f32 %v11340_v4, 0.0 }
 0x53b   :  { %v8873_v63 = vadd.f32 %v2370_v22, %v11344_v45  ;;  %v11347_v16 = vmax.f32 %v11346_v38, 0.0  ;;  %2822 = vmatpush1.bf16.msra.mxu1 %v2545_v1  ;;  %v11350_v59 = vmax.f32 %v11349_v48, 0.0  ;;  %v10736_v22 = vmax.f32 %v8850_v55, 0.0  ;;  %v6279_v45 = vld [vmem:[%s10392_s3 + $0x90] sm:$0xff]   ;;  %v6280_v38 = vld [vmem:[%s10392_s3 + $0x98] sm:$0xff]   ;;  %v6282_v48 = vld [vmem:[%s10392_s3 + $0xa8] sm:$0xff]  }
 0x53c   :  { %11333 = vst [vmem:[#allocation46_spill] sm:$0xff] %v8854_v42  ;;  %11336 = vst [vmem:[#allocation48_spill] sm:$0xff] %v8860_v19  ;;  %v8869_v27 = vadd.f32 %v2366_v32, %v11341_v58  ;;  %v10733_v36 = vmax.f32 %v8864_v18, 0.0  ;;  %v10735_v12 = vmax.f32 %v8854_v42, 0.0  ;;  %v10734_v35 = vmax.f32 %v8860_v19, 0.0  ;;  %v6277_v58 = vld [vmem:[%s10392_s3 + $0x80] sm:$0xff]  }
 0x53d   :  { %11339 = vst [vmem:[#allocation51_spill] sm:$0xff] %v8864_v18  ;;  %11345 = vst [vmem:[#allocation53_spill] sm:$0xff] %v8873_v63  ;;  %v8877_v3 = vadd.f32 %v2259_v26, %v11347_v16  ;;  %v8882_v29 = vadd.f32 %v2372_v37, %v11350_v59  ;;  %v10731_v2 = vmax.f32 %v8873_v63, 0.0  ;;  %v6281_v16 = vld [vmem:[%s10392_s3 + $0xa0] sm:$0xff]   ;;  %v6283_v59 = vld [vmem:[%s10392_s3 + $0xb0] sm:$0xff]  }
 0x53e   :  { %11342 = vst [vmem:[#allocation52_spill] sm:$0xff] %v8869_v27  ;;  %v10732_v1 = vmax.f32 %v8869_v27, 0.0  ;;  %v2547_v13 = vpack.c.bf16 %v10733_v36, %v10736_v22  ;;  %v11354_v42 = vld [vmem:[#allocation99_spill] sm:$0xff] }
 0x53f   :  { %11348 = vst [vmem:[#allocation47_spill] sm:$0xff] %v8877_v3  ;;  %11351 = vst [vmem:[#allocation49_spill] sm:$0xff] %v8882_v29  ;;  %v10730_v32 = vmax.f32 %v8877_v3, 0.0  ;;  %v10729_v26 = vmax.f32 %v8882_v29, 0.0 }
 0x540   :  { %v2549_v4 = vpack.c.bf16 %v10731_v2, %v10732_v1 }
 0x541   :  { %v2548_v52 = vpack.c.bf16 %v10730_v32, %v10735_v12  ;;  %v2550_v37 = vpack.c.bf16 %v10729_v26, %v10734_v35  ;;  %v11353_v26 = vld [vmem:[#allocation98_spill] sm:$0xff] }
 0x543   :  { %2710 = vmatprep.subr.bf16.mxu0 %v2548_v52  ;;  %2823 = vmatprep.subr.bf16.mxu1 %v2550_v37  ;;  %v6284_v52 = vld [vmem:[%s10392_s3 + $0xb8] sm:$0xff]  }
 0x544   :  { %2711 = vmatpush1.bf16.msra.mxu0 %v2547_v13  ;;  %2824 = vmatpush1.bf16.msra.mxu1 %v2549_v4  ;;  %v11352_v37 = vld [vmem:[#allocation97_spill] sm:$0xff] }
 0x547   :  { %2729 = vmatmul.mubr.bf16.vlgmr.msra.gmra.mrb[128].mxu0 %v6277_v58  ;;  %2842 = vmatmul.mubr.bf16.vlgmr.msra.gmra.mrb[128].mxu1 %v6277_v58 }
 0x548   :  { %2738 = vmatprep.mubr.bf16.mxu0 %v10978_v5  ;;  %2851 = vmatprep.mubr.bf16.mxu1 %v10978_v5 }
 0x54f   :  { %2739 = vmatmul.mubr.bf16.gmra.mrb[132].mxu0 %v6278_v40  ;;  %2852 = vmatmul.mubr.bf16.gmra.mrb[132].mxu1 %v6278_v40 }
 0x550   :  { %2748 = vmatprep.mubr.bf16.mxu0 %v10978_v5  ;;  %2861 = vmatprep.mubr.bf16.mxu1 %v10978_v5 }
 0x557   :  { %2749 = vmatmul.mubr.bf16.gmra.mrb[136].mxu0 %v6279_v45  ;;  %2862 = vmatmul.mubr.bf16.gmra.mrb[136].mxu1 %v6279_v45 }
 0x558   :  { %2758 = vmatprep.mubr.bf16.mxu0 %v10978_v5  ;;  %2871 = vmatprep.mubr.bf16.mxu1 %v10978_v5 }
 0x55f   :  { %2759 = vmatmul.mubr.bf16.gmra.mrb[140].mxu0 %v6280_v38  ;;  %2872 = vmatmul.mubr.bf16.gmra.mrb[140].mxu1 %v6280_v38 }
 0x560   :  { %2768 = vmatprep.mubr.bf16.mxu0 %v10978_v5  ;;  %2881 = vmatprep.mubr.bf16.mxu1 %v10978_v5 }
 0x567   :  { %2769 = vmatmul.mubr.bf16.gmra.mrb[144].mxu0 %v6281_v16  ;;  %2882 = vmatmul.mubr.bf16.gmra.mrb[144].mxu1 %v6281_v16 }
 0x568   :  { %2778 = vmatprep.mubr.bf16.mxu0 %v10978_v5  ;;  %2891 = vmatprep.mubr.bf16.mxu1 %v10978_v5 }
 0x56f   :  { %2779 = vmatmul.mubr.bf16.gmra.mrb[148].mxu0 %v6282_v48  ;;  %2892 = vmatmul.mubr.bf16.gmra.mrb[148].mxu1 %v6282_v48 }
 0x570   :  { %2788 = vmatprep.mubr.bf16.mxu0 %v10978_v5  ;;  %2901 = vmatprep.mubr.bf16.mxu1 %v10978_v5 }
 0x577   :  { %2789 = vmatmul.mubr.bf16.gmra.mrb[152].mxu0 %v6283_v59  ;;  %2902 = vmatmul.mubr.bf16.gmra.mrb[152].mxu1 %v6283_v59 }
 0x578   :  { %2798 = vmatprep.mubr.bf16.mxu0 %v10978_v5  ;;  %2911 = vmatprep.mubr.bf16.mxu1 %v10978_v5 }
 0x57f   :  { %2799 = vmatmul.mubr.bf16.gmra.mrb[156].mxu0 %v6284_v52  ;;  %2912 = vmatmul.mubr.bf16.gmra.mrb[156].mxu1 %v6284_v52 }
 0x580   :  { %3212 = vmatprep.mubr.bf16.mxu0 %v10978_v5  ;;  %3325 = vmatprep.mubr.bf16.mxu1 %v10978_v5 }
 0x61a   :  { %v2730_v13 = vpop.f32.mrb[128].mxu0  ;;  %v2843_v58 = vpop.f32.mrb[128].mxu1 }
 0x61b   :  { %v2731_v4 = vadd.f32 %v2730_v13, %v11352_v37  ;;  %v2732_v40 = vpop.f32.mrb[129].mxu0  ;;  %v2844_v45 = vadd.f32 %v2843_v58, %v11352_v37  ;;  %v2845_v16 = vpop.f32.mrb[129].mxu1 }
 0x61c   :  { %v2733_v38 = vadd.f32 %v2732_v40, %v11352_v37  ;;  %v2734_v48 = vpop.f32.mrb[130].mxu0  ;;  %v2846_v59 = vadd.f32 %v2845_v16, %v11352_v37  ;;  %v2847_v52 = vpop.f32.mrb[130].mxu1 }
 0x61d   :  { %v2735_v32 = vadd.f32 %v2734_v48, %v11353_v26  ;;  %v2736_v2 = vpop.f32.mrb[131].mxu0  ;;  %v2848_v1 = vadd.f32 %v2847_v52, %v11353_v26  ;;  %v2849_v35 = vpop.f32.mrb[131].mxu1  ;;  %v2922_v13 = vmax.f32 %v2731_v4, 0.0  ;;  %v2924_v58 = vmax.f32 %v2844_v45, 0.0 }
 0x61e   :  { %v2737_v36 = vadd.f32 %v2736_v2, %v11353_v26  ;;  %v2850_v22 = vadd.f32 %v2849_v35, %v11353_v26  ;;  %v2923_v29 = vmax.f32 %v2733_v38, 0.0  ;;  %v2925_v63 = vmax.f32 %v2846_v59, 0.0 }
 0x61f   :  { %v2926_v12 = vmax.f32 %v2735_v32, 0.0  ;;  %v2928_v40 = vmax.f32 %v2848_v1, 0.0  ;;  %v11355_v1 = vld [vmem:[#allocation100_spill] sm:$0xff] }
 0x620   :  { %v2927_v3 = vmax.f32 %v2737_v36, 0.0  ;;  %v2929_v37 = vmax.f32 %v2850_v22, 0.0 }
 0x621   :  { %v3003_v27 = vpack.c.bf16 %v2926_v12, %v2922_v13  ;;  %v3005_v16 = vpack.c.bf16 %v2928_v40, %v2924_v58 }
 0x622   :  { %v3004_v48 = vpack.c.bf16 %v2927_v3, %v2923_v29  ;;  %v2740_v18 = vpop.f32.mrb[132].mxu0  ;;  %v3006_v19 = vpack.c.bf16 %v2929_v37, %v2925_v63  ;;  %v2853_v55 = vpop.f32.mrb[132].mxu1 }
 0x623   :  { %v2741_v52 = vadd.f32 %v2740_v18, %v11354_v42  ;;  %v2742_v2 = vpop.f32.mrb[133].mxu0  ;;  %v2854_v4 = vadd.f32 %v2853_v55, %v11354_v42  ;;  %v2855_v35 = vpop.f32.mrb[133].mxu1 }
 0x624   :  { %v2743_v32 = vadd.f32 %v2742_v2, %v11354_v42  ;;  %v2744_v26 = vpop.f32.mrb[134].mxu0  ;;  %3180 = vmatprep.subr.bf16.mxu0 %v3004_v48  ;;  %v2856_v36 = vadd.f32 %v2855_v35, %v11354_v42  ;;  %v2857_v22 = vpop.f32.mrb[134].mxu1  ;;  %3293 = vmatprep.subr.bf16.mxu1 %v3006_v19 }
 0x625   :  { %v2745_v12 = vadd.f32 %v2744_v26, %v11355_v1  ;;  %v2746_v3 = vpop.f32.mrb[135].mxu0  ;;  %3181 = vmatpush1.bf16.msra.mxu0 %v3003_v27  ;;  %v2858_v63 = vadd.f32 %v2857_v22, %v11355_v1  ;;  %v2859_v29 = vpop.f32.mrb[135].mxu1  ;;  %3294 = vmatpush1.bf16.msra.mxu1 %v3005_v16  ;;  %v2930_v55 = vmax.f32 %v2741_v52, 0.0  ;;  %v2932_v59 = vmax.f32 %v2854_v4, 0.0  ;;  %v11356_v26 = vld [vmem:[#allocation101_spill] sm:$0xff] }
 0x626   :  { %v2747_v18 = vadd.f32 %v2746_v3, %v11355_v1  ;;  %v2860_v38 = vadd.f32 %v2859_v29, %v11355_v1  ;;  %v2931_v13 = vmax.f32 %v2743_v32, 0.0  ;;  %v2933_v40 = vmax.f32 %v2856_v36, 0.0  ;;  %v11357_v36 = vld [vmem:[#allocation102_spill] sm:$0xff] }
 0x627   :  { %v2934_v45 = vmax.f32 %v2745_v12, 0.0  ;;  %v2936_v58 = vmax.f32 %v2858_v63, 0.0 }
 0x628   :  { %v2935_v42 = vmax.f32 %v2747_v18, 0.0  ;;  %v2937_v48 = vmax.f32 %v2860_v38, 0.0 }
 0x629   :  { %v3007_v37 = vpack.c.bf16 %v2934_v45, %v2930_v55  ;;  %v3009_v19 = vpack.c.bf16 %v2936_v58, %v2932_v59 }
 0x62a   :  { %v3008_v2 = vpack.c.bf16 %v2935_v42, %v2931_v13  ;;  %v2750_v27 = vpop.f32.mrb[136].mxu0  ;;  %v3010_v35 = vpack.c.bf16 %v2937_v48, %v2933_v40  ;;  %v2863_v3 = vpop.f32.mrb[136].mxu1 }
 0x62b   :  { %v2751_v22 = vadd.f32 %v2750_v27, %v11356_v26  ;;  %v2752_v54 = vpop.f32.mrb[137].mxu0  ;;  %v2864_v16 = vadd.f32 %v2863_v3, %v11356_v26  ;;  %v2865_v1 = vpop.f32.mrb[137].mxu1 }
 0x62c   :  { %v2753_v52 = vadd.f32 %v2752_v54, %v11356_v26  ;;  %v2754_v4 = vpop.f32.mrb[138].mxu0  ;;  %3182 = vmatprep.subr.bf16.mxu0 %v3008_v2  ;;  %v2866_v32 = vadd.f32 %v2865_v1, %v11356_v26  ;;  %v2867_v63 = vpop.f32.mrb[138].mxu1  ;;  %3295 = vmatprep.subr.bf16.mxu1 %v3010_v35  ;;  %v11358_v1 = vld [vmem:[#allocation103_spill] sm:$0xff] }
 0x62d   :  { %v2755_v12 = vadd.f32 %v2754_v4, %v11357_v36  ;;  %v2756_v18 = vpop.f32.mrb[139].mxu0  ;;  %3183 = vmatpush1.bf16.msra.mxu0 %v3007_v37  ;;  %v2868_v29 = vadd.f32 %v2867_v63, %v11357_v36  ;;  %v2869_v45 = vpop.f32.mrb[139].mxu1  ;;  %3296 = vmatpush1.bf16.msra.mxu1 %v3009_v19  ;;  %v2938_v38 = vmax.f32 %v2751_v22, 0.0  ;;  %v2940_v13 = vmax.f32 %v2864_v16, 0.0 }
 0x62e   :  { %v2757_v55 = vadd.f32 %v2756_v18, %v11357_v36  ;;  %v2870_v54 = vadd.f32 %v2869_v45, %v11357_v36  ;;  %v2939_v58 = vmax.f32 %v2753_v52, 0.0  ;;  %v2941_v48 = vmax.f32 %v2866_v32, 0.0  ;;  %v11359_v32 = vld [vmem:[#allocation104_spill] sm:$0xff] }
 0x62f   :  { %v2942_v59 = vmax.f32 %v2755_v12, 0.0  ;;  %v2944_v42 = vmax.f32 %v2868_v29, 0.0 }
 0x630   :  { %v2943_v40 = vmax.f32 %v2757_v55, 0.0  ;;  %v2945_v27 = vmax.f32 %v2870_v54, 0.0 }
 0x631   :  { %v3011_v2 = vpack.c.bf16 %v2942_v59, %v2938_v38  ;;  %v3013_v35 = vpack.c.bf16 %v2944_v42, %v2940_v13 }
 0x632   :  { %v3012_v26 = vpack.c.bf16 %v2943_v40, %v2939_v58  ;;  %v2760_v37 = vpop.f32.mrb[140].mxu0  ;;  %v3014_v3 = vpack.c.bf16 %v2945_v27, %v2941_v48  ;;  %v2873_v63 = vpop.f32.mrb[140].mxu1 }
 0x633   :  { %v2761_v4 = vadd.f32 %v2760_v37, %v11358_v1  ;;  %v2762_v18 = vpop.f32.mrb[141].mxu0  ;;  %v2874_v19 = vadd.f32 %v2873_v63, %v11358_v1  ;;  %v2875_v36 = vpop.f32.mrb[141].mxu1 }
 0x634   :  { %v2763_v22 = vadd.f32 %v2762_v18, %v11358_v1  ;;  %v2764_v16 = vpop.f32.mrb[142].mxu0  ;;  %3184 = vmatprep.subr.bf16.mxu0 %v3012_v26  ;;  %v2876_v52 = vadd.f32 %v2875_v36, %v11358_v1  ;;  %v2877_v29 = vpop.f32.mrb[142].mxu1  ;;  %3297 = vmatprep.subr.bf16.mxu1 %v3014_v3  ;;  %v11360_v36 = vld [vmem:[#allocation105_spill] sm:$0xff] }
 0x635   :  { %v2765_v12 = vadd.f32 %v2764_v16, %v11359_v32  ;;  %v2766_v55 = vpop.f32.mrb[143].mxu0  ;;  %3185 = vmatpush1.bf16.msra.mxu0 %v3011_v2  ;;  %v2878_v45 = vadd.f32 %v2877_v29, %v11359_v32  ;;  %v2879_v59 = vpop.f32.mrb[143].mxu1  ;;  %3298 = vmatpush1.bf16.msra.mxu1 %v3013_v35  ;;  %v2946_v54 = vmax.f32 %v2761_v4, 0.0  ;;  %v2948_v42 = vmax.f32 %v2874_v19, 0.0 }
 0x636   :  { %v2767_v38 = vadd.f32 %v2766_v55, %v11359_v32  ;;  %v2880_v58 = vadd.f32 %v2879_v59, %v11359_v32  ;;  %v2947_v40 = vmax.f32 %v2763_v22, 0.0  ;;  %v2949_v26 = vmax.f32 %v2876_v52, 0.0  ;;  %v11361_v52 = vld [vmem:[#allocation106_spill] sm:$0xff] }
 0x637   :  { %v2950_v13 = vmax.f32 %v2765_v12, 0.0  ;;  %v2952_v48 = vmax.f32 %v2878_v45, 0.0 }
 0x638   :  { %v2951_v27 = vmax.f32 %v2767_v38, 0.0  ;;  %v2953_v1 = vmax.f32 %v2880_v58, 0.0 }
 0x639   :  { %v3015_v37 = vpack.c.bf16 %v2950_v13, %v2946_v54  ;;  %v3017_v3 = vpack.c.bf16 %v2952_v48, %v2948_v42 }
 0x63a   :  { %v3016_v63 = vpack.c.bf16 %v2951_v27, %v2947_v40  ;;  %v2770_v2 = vpop.f32.mrb[144].mxu0  ;;  %v3018_v18 = vpack.c.bf16 %v2953_v1, %v2949_v26  ;;  %v2883_v29 = vpop.f32.mrb[144].mxu1 }
 0x63b   :  { %v2771_v16 = vadd.f32 %v2770_v2, %v11360_v36  ;;  %v2772_v55 = vpop.f32.mrb[145].mxu0  ;;  %v2884_v35 = vadd.f32 %v2883_v29, %v11360_v36  ;;  %v2885_v32 = vpop.f32.mrb[145].mxu1 }
 0x63c   :  { %v2773_v4 = vadd.f32 %v2772_v55, %v11360_v36  ;;  %v2774_v19 = vpop.f32.mrb[146].mxu0  ;;  %3186 = vmatprep.subr.bf16.mxu0 %v3016_v63  ;;  %v2886_v22 = vadd.f32 %v2885_v32, %v11360_v36  ;;  %v2887_v45 = vpop.f32.mrb[146].mxu1  ;;  %3299 = vmatprep.subr.bf16.mxu1 %v3018_v18  ;;  %v11362_v32 = vld [vmem:[#allocation107_spill] sm:$0xff] }
 0x63d   :  { %v2775_v12 = vadd.f32 %v2774_v19, %v11361_v52  ;;  %v2776_v38 = vpop.f32.mrb[147].mxu0  ;;  %3187 = vmatpush1.bf16.msra.mxu0 %v3015_v37  ;;  %v2888_v59 = vadd.f32 %v2887_v45, %v11361_v52  ;;  %v2889_v13 = vpop.f32.mrb[147].mxu1  ;;  %3300 = vmatpush1.bf16.msra.mxu1 %v3017_v3  ;;  %v2954_v58 = vmax.f32 %v2771_v16, 0.0  ;;  %v2956_v48 = vmax.f32 %v2884_v35, 0.0 }
 0x63e   :  { %v2777_v54 = vadd.f32 %v2776_v38, %v11361_v52  ;;  %v2890_v40 = vadd.f32 %v2889_v13, %v11361_v52  ;;  %v2955_v27 = vmax.f32 %v2773_v4, 0.0  ;;  %v2957_v63 = vmax.f32 %v2886_v22, 0.0  ;;  %v11363_v22 = vld [vmem:[#allocation108_spill] sm:$0xff] }
 0x63f   :  { %v2958_v42 = vmax.f32 %v2775_v12, 0.0  ;;  %v2960_v26 = vmax.f32 %v2888_v59, 0.0 }
 0x640   :  { %v2959_v1 = vmax.f32 %v2777_v54, 0.0  ;;  %v2961_v36 = vmax.f32 %v2890_v40, 0.0 }
 0x641   :  { %v3019_v2 = vpack.c.bf16 %v2958_v42, %v2954_v58  ;;  %v3021_v18 = vpack.c.bf16 %v2960_v26, %v2956_v48 }
 0x642   :  { %v3020_v29 = vpack.c.bf16 %v2959_v1, %v2955_v27  ;;  %v2780_v37 = vpop.f32.mrb[148].mxu0  ;;  %v3022_v55 = vpack.c.bf16 %v2961_v36, %v2957_v63  ;;  %v2893_v45 = vpop.f32.mrb[148].mxu1 }
 0x643   :  { %v2781_v19 = vadd.f32 %v2780_v37, %v11362_v32  ;;  %v2782_v38 = vpop.f32.mrb[149].mxu0  ;;  %v2894_v3 = vadd.f32 %v2893_v45, %v11362_v32  ;;  %v2895_v52 = vpop.f32.mrb[149].mxu1 }
 0x644   :  { %v2783_v16 = vadd.f32 %v2782_v38, %v11362_v32  ;;  %v2784_v35 = vpop.f32.mrb[150].mxu0  ;;  %3188 = vmatprep.subr.bf16.mxu0 %v3020_v29  ;;  %v2896_v4 = vadd.f32 %v2895_v52, %v11362_v32  ;;  %v2897_v59 = vpop.f32.mrb[150].mxu1  ;;  %3301 = vmatprep.subr.bf16.mxu1 %v3022_v55  ;;  %v11364_v52 = vld [vmem:[#allocation109_spill] sm:$0xff] }
 0x645   :  { %v2785_v12 = vadd.f32 %v2784_v35, %v11363_v22  ;;  %v2786_v54 = vpop.f32.mrb[151].mxu0  ;;  %3189 = vmatpush1.bf16.msra.mxu0 %v3019_v2  ;;  %v2898_v13 = vadd.f32 %v2897_v59, %v11363_v22  ;;  %v2899_v42 = vpop.f32.mrb[151].mxu1  ;;  %3302 = vmatpush1.bf16.msra.mxu1 %v3021_v18  ;;  %v2962_v40 = vmax.f32 %v2781_v19, 0.0  ;;  %v2964_v26 = vmax.f32 %v2894_v3, 0.0 }
 0x646   :  { %v2787_v58 = vadd.f32 %v2786_v54, %v11363_v22  ;;  %v2900_v27 = vadd.f32 %v2899_v42, %v11363_v22  ;;  %v2963_v1 = vmax.f32 %v2783_v16, 0.0  ;;  %v2965_v29 = vmax.f32 %v2896_v4, 0.0  ;;  %v11365_v4 = vld [vmem:[#allocation110_spill] sm:$0xff] }
 0x647   :  { %v2966_v48 = vmax.f32 %v2785_v12, 0.0  ;;  %v2968_v63 = vmax.f32 %v2898_v13, 0.0 }
 0x648   :  { %v2967_v36 = vmax.f32 %v2787_v58, 0.0  ;;  %v2969_v32 = vmax.f32 %v2900_v27, 0.0 }
 0x649   :  { %v3023_v37 = vpack.c.bf16 %v2966_v48, %v2962_v40  ;;  %v3025_v55 = vpack.c.bf16 %v2968_v63, %v2964_v26 }
 0x64a   :  { %v3024_v45 = vpack.c.bf16 %v2967_v36, %v2963_v1  ;;  %v2790_v2 = vpop.f32.mrb[152].mxu0  ;;  %v3026_v38 = vpack.c.bf16 %v2969_v32, %v2965_v29  ;;  %v2903_v59 = vpop.f32.mrb[152].mxu1 }
 0x64b   :  { %v2791_v35 = vadd.f32 %v2790_v2, %v11364_v52  ;;  %v2792_v54 = vpop.f32.mrb[153].mxu0  ;;  %v2904_v18 = vadd.f32 %v2903_v59, %v11364_v52  ;;  %v2905_v22 = vpop.f32.mrb[153].mxu1 }
 0x64c   :  { %v2793_v19 = vadd.f32 %v2792_v54, %v11364_v52  ;;  %v2794_v3 = vpop.f32.mrb[154].mxu0  ;;  %3190 = vmatprep.subr.bf16.mxu0 %v3024_v45  ;;  %v2906_v16 = vadd.f32 %v2905_v22, %v11364_v52  ;;  %v2907_v13 = vpop.f32.mrb[154].mxu1  ;;  %3303 = vmatprep.subr.bf16.mxu1 %v3026_v38 }
 0x64d   :  { %v2795_v12 = vadd.f32 %v2794_v3, %v11365_v4  ;;  %v2796_v58 = vpop.f32.mrb[155].mxu0  ;;  %3191 = vmatpush1.bf16.msra.mxu0 %v3023_v37  ;;  %v2908_v42 = vadd.f32 %v2907_v13, %v11365_v4  ;;  %v2909_v48 = vpop.f32.mrb[155].mxu1  ;;  %3304 = vmatpush1.bf16.msra.mxu1 %v3025_v55  ;;  %v2970_v27 = vmax.f32 %v2791_v35, 0.0  ;;  %v2972_v63 = vmax.f32 %v2904_v18, 0.0  ;;  %v11366_v3 = vld [vmem:[#allocation111_spill] sm:$0xff] }
 0x64e   :  { %v2797_v40 = vadd.f32 %v2796_v58, %v11365_v4  ;;  %v2910_v1 = vadd.f32 %v2909_v48, %v11365_v4  ;;  %v2971_v36 = vmax.f32 %v2793_v19, 0.0  ;;  %v2973_v45 = vmax.f32 %v2906_v16, 0.0  ;;  %v2646_v38 = vpop.permute.xlu1 %2645 }
 0x64f   :  { %v2974_v26 = vmax.f32 %v2795_v12, 0.0  ;;  %v2976_v29 = vmax.f32 %v2908_v42, 0.0 }
 0x650   :  { %v2975_v32 = vmax.f32 %v2797_v40, 0.0  ;;  %v2977_v52 = vmax.f32 %v2910_v1, 0.0 }
 0x651   :  { %v3027_v2 = vpack.c.bf16 %v2974_v26, %v2970_v27  ;;  %v3029_v59 = vpack.c.bf16 %v2976_v29, %v2972_v63 }
 0x652   :  { %v3028_v37 = vpack.c.bf16 %v2975_v32, %v2971_v36  ;;  %v2800_v54 = vpop.f32.mrb[156].mxu0  ;;  %v3030_v22 = vpack.c.bf16 %v2977_v52, %v2973_v45  ;;  %v2913_v58 = vpop.f32.mrb[156].mxu1 }
 0x653   :  { %v2801_v13 = vadd.f32 %v2800_v54, %v11366_v3  ;;  %v2802_v55 = vpop.f32.mrb[157].mxu0  ;;  %v2914_v35 = vadd.f32 %v2913_v58, %v11366_v3  ;;  %v2915_v18 = vpop.f32.mrb[157].mxu1 }
 0x654   :  { %v2803_v4 = vadd.f32 %v2802_v55, %v11366_v3  ;;  %v2804_v19 = vpop.f32.mrb[158].mxu0  ;;  %3192 = vmatprep.subr.bf16.mxu0 %v3028_v37  ;;  %v2916_v16 = vadd.f32 %v2915_v18, %v11366_v3  ;;  %v2917_v42 = vpop.f32.mrb[158].mxu1  ;;  %3305 = vmatprep.subr.bf16.mxu1 %v3030_v22  ;;  %v6288_v22 = vld [vmem:[%s10394_s5 + $0x98] sm:$0xff]  }
 0x655   :  { %v2805_v12 = vadd.f32 %v2804_v19, %v2646_v38  ;;  %v2806_v40 = vpop.f32.mrb[159].mxu0  ;;  %3193 = vmatpush1.bf16.msra.mxu0 %v3027_v2  ;;  %v2918_v48 = vadd.f32 %v2917_v42, %v2646_v38  ;;  %v2919_v26 = vpop.f32.mrb[159].mxu1  ;;  %3306 = vmatpush1.bf16.msra.mxu1 %v3029_v59  ;;  %v2978_v1 = vmax.f32 %v2801_v13, 0.0  ;;  %v2980_v29 = vmax.f32 %v2914_v35, 0.0  ;;  %v6285_v2 = vld [vmem:[%s10394_s5 + $0x80] sm:$0xff]   ;;  %v6287_v59 = vld [vmem:[%s10394_s5 + $0x90] sm:$0xff]  }
 0x656   :  { %v2807_v27 = vadd.f32 %v2806_v40, %v2646_v38  ;;  %v2920_v36 = vadd.f32 %v2919_v26, %v2646_v38  ;;  %v2979_v32 = vmax.f32 %v2803_v4, 0.0  ;;  %v2981_v54 = vmax.f32 %v2916_v16, 0.0  ;;  %v6286_v38 = vld [vmem:[%s10394_s5 + $0x88] sm:$0xff]   ;;  %v6289_v13 = vld [vmem:[%s10394_s5 + $0xa0] sm:$0xff]   ;;  %v6291_v4 = vld [vmem:[%s10394_s5 + $0xb0] sm:$0xff]   ;;  %v3060_v16 = vpop.permute.xlu1 %3059 }
 0x657   :  { %v2982_v63 = vmax.f32 %v2805_v12, 0.0  ;;  %v2984_v45 = vmax.f32 %v2918_v48, 0.0  ;;  %v6290_v35 = vld [vmem:[%s10394_s5 + $0xa8] sm:$0xff]   ;;  %v6292_v19 = vld [vmem:[%s10394_s5 + $0xb8] sm:$0xff]   ;;  %v3055_v12 = vpop.permute.xlu0 %3054 }
 0x658   :  { %v2983_v52 = vmax.f32 %v2807_v27, 0.0  ;;  %v2985_v58 = vmax.f32 %v2920_v36, 0.0 }
 0x659   :  { %v3031_v37 = vpack.c.bf16 %v2982_v63, %v2978_v1  ;;  %v3033_v3 = vpack.c.bf16 %v2984_v45, %v2980_v29  ;;  %v11367_v29 = vmax.f32 %v8400_v39, 0.0 }
 0x65a   :  { %v3032_v55 = vpack.c.bf16 %v2983_v52, %v2979_v32  ;;  %v3034_v18 = vpack.c.bf16 %v2985_v58, %v2981_v54  ;;  %v11368_v58 = vmax.f32 %v8406_v25, 0.0  ;;  %v11372_v25 = vmax.f32 %v8425_v60, 0.0 }
 0x65c   :  { %3194 = vmatprep.subr.bf16.mxu0 %v3032_v55  ;;  %3307 = vmatprep.subr.bf16.mxu1 %v3034_v18  ;;  %v11369_v55 = vmax.f32 %v8410_v6, 0.0  ;;  %v11373_v6 = vmax.f32 %v8429_v21, 0.0 }
 0x65d   :  { %3195 = vmatpush1.bf16.msra.mxu0 %v3031_v37  ;;  %3308 = vmatpush1.bf16.msra.mxu1 %v3033_v3 }
 0x660   :  { %3213 = vmatmul.mubr.bf16.vlgmr.msra.gmra.mrb[160].mxu0 %v6285_v2  ;;  %3326 = vmatmul.mubr.bf16.vlgmr.msra.gmra.mrb[160].mxu1 %v6285_v2 }
 0x661   :  { %3222 = vmatprep.mubr.bf16.mxu0 %v10978_v5  ;;  %3335 = vmatprep.mubr.bf16.mxu1 %v10978_v5 }
 0x668   :  { %3223 = vmatmul.mubr.bf16.gmra.mrb[164].mxu0 %v6286_v38  ;;  %3336 = vmatmul.mubr.bf16.gmra.mrb[164].mxu1 %v6286_v38 }
 0x669   :  { %3232 = vmatprep.mubr.bf16.mxu0 %v10978_v5  ;;  %3345 = vmatprep.mubr.bf16.mxu1 %v10978_v5 }
 0x670   :  { %3233 = vmatmul.mubr.bf16.gmra.mrb[168].mxu0 %v6287_v59  ;;  %3346 = vmatmul.mubr.bf16.gmra.mrb[168].mxu1 %v6287_v59 }
 0x671   :  { %3242 = vmatprep.mubr.bf16.mxu0 %v10978_v5  ;;  %3355 = vmatprep.mubr.bf16.mxu1 %v10978_v5 }
 0x678   :  { %3243 = vmatmul.mubr.bf16.gmra.mrb[172].mxu0 %v6288_v22  ;;  %3356 = vmatmul.mubr.bf16.gmra.mrb[172].mxu1 %v6288_v22  ;;  %v11370_v22 = vmax.f32 %v8416_v53, 0.0 }
 0x679   :  { %3252 = vmatprep.mubr.bf16.mxu0 %v10978_v5  ;;  %3365 = vmatprep.mubr.bf16.mxu1 %v10978_v5 }
 0x680   :  { %3253 = vmatmul.mubr.bf16.gmra.mrb[176].mxu0 %v6289_v13  ;;  %3366 = vmatmul.mubr.bf16.gmra.mrb[176].mxu1 %v6289_v13  ;;  %v11371_v13 = vmax.f32 %v8420_v9, 0.0  ;;  %v3065_v9 = vpop.permute.xlu0 %3064 }
 0x681   :  { %3262 = vmatprep.mubr.bf16.mxu0 %v10978_v5  ;;  %3375 = vmatprep.mubr.bf16.mxu1 %v10978_v5 }
 0x688   :  { %3263 = vmatmul.mubr.bf16.gmra.mrb[180].mxu0 %v6290_v35  ;;  %3376 = vmatmul.mubr.bf16.gmra.mrb[180].mxu1 %v6290_v35 }
 0x689   :  { %3272 = vmatprep.mubr.bf16.mxu0 %v10978_v5  ;;  %3385 = vmatprep.mubr.bf16.mxu1 %v10978_v5 }
 0x690   :  { %3273 = vmatmul.mubr.bf16.gmra.mrb[184].mxu0 %v6291_v4  ;;  %3386 = vmatmul.mubr.bf16.gmra.mrb[184].mxu1 %v6291_v4 }
 0x691   :  { %3282 = vmatprep.mubr.bf16.mxu0 %v10978_v5  ;;  %3395 = vmatprep.mubr.bf16.mxu1 %v10978_v5 }
 0x698   :  { %3283 = vmatmul.mubr.bf16.gmra.mrb[188].mxu0 %v6292_v19  ;;  %3396 = vmatmul.mubr.bf16.gmra.mrb[188].mxu1 %v6292_v19 }
 0x699   :  { %3760 = vmatprep.mubr.bf16.mxu0 %v10978_v5  ;;  %3873 = vmatprep.mubr.bf16.mxu1 %v10978_v5 }
 0x733   :  { %v3214_v42 = vpop.f32.mrb[160].mxu0  ;;  %v3327_v48 = vpop.f32.mrb[160].mxu1 }
 0x734   :  { %v3215_v40 = vadd.f32 %v3214_v42, %v3055_v12  ;;  %v3216_v27 = vpop.f32.mrb[161].mxu0  ;;  %v3328_v26 = vadd.f32 %v3327_v48, %v3055_v12  ;;  %v3329_v63 = vpop.f32.mrb[161].mxu1  ;;  %v11374_v48 = vmax.f32 %v8435_v20, 0.0 }
 0x735   :  { %v3217_v1 = vadd.f32 %v3216_v27, %v3055_v12  ;;  %v3218_v36 = vpop.f32.mrb[162].mxu0  ;;  %v3330_v45 = vadd.f32 %v3329_v63, %v3055_v12  ;;  %v3331_v54 = vpop.f32.mrb[162].mxu1 }
 0x736   :  { %v9049_v32 = vadd.f32 %v3215_v40, %v11367_v29  ;;  %v3219_v52 = vadd.f32 %v3218_v36, %v3060_v16  ;;  %v3220_v37 = vpop.f32.mrb[163].mxu0  ;;  %v9053_v3 = vadd.f32 %v3328_v26, %v11368_v58  ;;  %v3332_v2 = vadd.f32 %v3331_v54, %v3060_v16  ;;  %v3333_v59 = vpop.f32.mrb[163].mxu1 }
 0x737   :  { %v9057_v18 = vadd.f32 %v3217_v1, %v11369_v55  ;;  %v3221_v38 = vadd.f32 %v3220_v37, %v3060_v16  ;;  %v9061_v39 = vadd.f32 %v3330_v45, %v11370_v22  ;;  %v3334_v4 = vadd.f32 %v3333_v59, %v3060_v16  ;;  %v3070_v42 = vpop.permute.xlu1 %3069 }
 0x738   :  { %v9065_v35 = vadd.f32 %v3219_v52, %v11371_v13  ;;  %v9069_v19 = vadd.f32 %v3332_v2, %v11372_v25  ;;  %v10779_v40 = vmax.f32 %v9049_v32, 0.0  ;;  %v10778_v16 = vmax.f32 %v9053_v3, 0.0 }
 0x739   :  { %v9073_v12 = vadd.f32 %v3221_v38, %v11373_v6  ;;  %v9079_v27 = vadd.f32 %v3334_v4, %v11374_v48  ;;  %v10773_v60 = vmax.f32 %v9057_v18, 0.0  ;;  %v10772_v63 = vmax.f32 %v9061_v39, 0.0 }
 0x73a   :  { %v10751_v53 = vmax.f32 %v9065_v35, 0.0  ;;  %v10747_v26 = vmax.f32 %v9069_v19, 0.0  ;;  %v11375_v59 = vmax.f32 %v8460_v57, 0.0 }
 0x73b   :  { %v10746_v21 = vmax.f32 %v9073_v12, 0.0  ;;  %v3224_v1 = vpop.f32.mrb[164].mxu0  ;;  %v10748_v20 = vmax.f32 %v9079_v27, 0.0  ;;  %v3337_v45 = vpop.f32.mrb[164].mxu1 }
 0x73c   :  { %v3551_v36 = vpack.c.bf16 %v10751_v53, %v10779_v40  ;;  %v3225_v29 = vadd.f32 %v3224_v1, %v3065_v9  ;;  %v3226_v52 = vpop.f32.mrb[165].mxu0  ;;  %v3553_v54 = vpack.c.bf16 %v10747_v26, %v10778_v16  ;;  %v3338_v37 = vadd.f32 %v3337_v45, %v3065_v9  ;;  %v3339_v55 = vpop.f32.mrb[165].mxu1 }
 0x73d   :  { %v3227_v58 = vadd.f32 %v3226_v52, %v3065_v9  ;;  %v3228_v2 = vpop.f32.mrb[166].mxu0  ;;  %v3552_v38 = vpack.c.bf16 %v10746_v21, %v10773_v60  ;;  %v3340_v13 = vadd.f32 %v3339_v55, %v3065_v9  ;;  %v3341_v25 = vpop.f32.mrb[166].mxu1  ;;  %v3554_v48 = vpack.c.bf16 %v10748_v20, %v10772_v63 }
 0x73e   :  { %v9101_v22 = vadd.f32 %v3225_v29, %v11375_v59  ;;  %v3229_v4 = vadd.f32 %v3228_v2, %v3070_v42  ;;  %v3230_v6 = vpop.f32.mrb[167].mxu0  ;;  %v11376_v1 = vmax.f32 %v8470_v17, 0.0  ;;  %v11377_v52 = vmax.f32 %v8474_v34, 0.0  ;;  %v3343_v59 = vpop.f32.mrb[167].mxu1 }
 0x73f   :  { %v3342_v57 = vadd.f32 %v3341_v25, %v3070_v42  ;;  %v3231_v29 = vadd.f32 %v3230_v6, %v3070_v42  ;;  %3728 = vmatprep.subr.bf16.mxu0 %v3552_v38  ;;  %v11378_v9 = vmax.f32 %v8480_v50, 0.0  ;;  %v11379_v2 = vmax.f32 %v8484_v46, 0.0  ;;  %3841 = vmatprep.subr.bf16.mxu1 %v3554_v48  ;;  %v3080_v38 = vpop.permute.xlu1 %3079 }
 0x740   :  { %v9109_v45 = vadd.f32 %v3338_v37, %v11376_v1  ;;  %v9113_v21 = vadd.f32 %v3227_v58, %v11377_v52  ;;  %v3344_v20 = vadd.f32 %v3343_v59, %v3070_v42  ;;  %3729 = vmatpush1.bf16.msra.mxu0 %v3551_v36  ;;  %v11380_v17 = vmax.f32 %v8489_v11, 0.0  ;;  %3842 = vmatpush1.bf16.msra.mxu1 %v3553_v54  ;;  %v3075_v42 = vpop.permute.xlu0 %3074 }
 0x741   :  { %v9117_v55 = vadd.f32 %v3340_v13, %v11378_v9  ;;  %v9121_v26 = vadd.f32 %v3229_v4, %v11379_v2  ;;  %v11381_v37 = vmax.f32 %v8493_v47, 0.0  ;;  %v10750_v50 = vmax.f32 %v9101_v22, 0.0 }
 0x742   :  { %v9125_v34 = vadd.f32 %v3342_v57, %v11380_v17  ;;  %v11382_v46 = vmax.f32 %v8499_v15, 0.0  ;;  %v10753_v36 = vmax.f32 %v9109_v45, 0.0  ;;  %v10755_v11 = vmax.f32 %v9113_v21, 0.0 }
 0x743   :  { %v9129_v58 = vadd.f32 %v3231_v29, %v11381_v37  ;;  %v10749_v13 = vmax.f32 %v9121_v26, 0.0  ;;  %v3234_v6 = vpop.f32.mrb[168].mxu0  ;;  %v10759_v54 = vmax.f32 %v9117_v55, 0.0  ;;  %v3347_v1 = vpop.f32.mrb[168].mxu1  ;;  %v11383_v37 = vmax.f32 %v8524_v28, 0.0 }
 0x744   :  { %v9135_v4 = vadd.f32 %v3344_v20, %v11382_v46  ;;  %v10752_v25 = vmax.f32 %v9125_v34, 0.0  ;;  %v3235_v20 = vadd.f32 %v3234_v6, %v3075_v42  ;;  %v3236_v52 = vpop.f32.mrb[169].mxu0  ;;  %v3348_v29 = vadd.f32 %v3347_v1, %v3075_v42  ;;  %v3349_v9 = vpop.f32.mrb[169].mxu1 }
 0x745   :  { %v10754_v47 = vmax.f32 %v9129_v58, 0.0  ;;  %v3555_v48 = vpack.c.bf16 %v10749_v13, %v10750_v50  ;;  %v3237_v59 = vadd.f32 %v3236_v52, %v3075_v42  ;;  %v3238_v2 = vpop.f32.mrb[170].mxu0  ;;  %v3350_v6 = vadd.f32 %v3349_v9, %v3075_v42  ;;  %v3351_v50 = vpop.f32.mrb[170].mxu1 }
 0x746   :  { %v10756_v15 = vmax.f32 %v9135_v4, 0.0  ;;  %v3557_v57 = vpack.c.bf16 %v10752_v25, %v10753_v36  ;;  %v9157_v46 = vadd.f32 %v3235_v20, %v11383_v37  ;;  %v3239_v13 = vadd.f32 %v3238_v2, %v3080_v38  ;;  %v3240_v53 = vpop.f32.mrb[171].mxu0  ;;  %v3353_v37 = vpop.f32.mrb[171].mxu1 }
 0x747   :  { %v3556_v17 = vpack.c.bf16 %v10754_v47, %v10755_v11  ;;  %v11384_v52 = vmax.f32 %v8534_v24, 0.0  ;;  %v11385_v36 = vmax.f32 %v8538_v30, 0.0  ;;  %v3352_v28 = vadd.f32 %v3351_v50, %v3080_v38 }
 0x748   :  { %v3558_v1 = vpack.c.bf16 %v10756_v15, %v10759_v54  ;;  %v3241_v20 = vadd.f32 %v3240_v53, %v3080_v38  ;;  %v11386_v42 = vmax.f32 %v8544_v49, 0.0  ;;  %v11387_v2 = vmax.f32 %v8548_v33, 0.0 }
 0x749   :  { %v9165_v25 = vadd.f32 %v3348_v29, %v11384_v52  ;;  %v9169_v47 = vadd.f32 %v3237_v59, %v11385_v36  ;;  %3730 = vmatprep.subr.bf16.mxu0 %v3556_v17  ;;  %v3354_v15 = vadd.f32 %v3353_v37, %v3080_v38  ;;  %v11388_v24 = vmax.f32 %v8553_v61, 0.0  ;;  %v3090_v36 = vpop.permute.xlu1 %3089  ;;  %v3085_v38 = vpop.permute.xlu0 %3084 }
 0x74a   :  { %v9173_v9 = vadd.f32 %v3350_v6, %v11386_v42  ;;  %v9177_v11 = vadd.f32 %v3239_v13, %v11387_v2  ;;  %3843 = vmatprep.subr.bf16.mxu1 %v3558_v1  ;;  %3731 = vmatpush1.bf16.msra.mxu0 %v3555_v48  ;;  %v11389_v50 = vmax.f32 %v8557_v51, 0.0  ;;  %v10758_v49 = vmax.f32 %v9157_v46, 0.0 }
 0x74b   :  { %v9181_v30 = vadd.f32 %v3352_v28, %v11388_v24  ;;  %3844 = vmatpush1.bf16.msra.mxu1 %v3557_v57  ;;  %v11390_v33 = vmax.f32 %v8563_v0, 0.0  ;;  %v10761_v48 = vmax.f32 %v9165_v25, 0.0  ;;  %v10763_v61 = vmax.f32 %v9169_v47, 0.0  ;;  %v3244_v17 = vpop.f32.mrb[172].mxu0  ;;  %v3357_v1 = vpop.f32.mrb[172].mxu1 }
 0x74c   :  { %v9185_v53 = vadd.f32 %v3241_v20, %v11389_v50  ;;  %v10757_v29 = vmax.f32 %v9177_v11, 0.0  ;;  %v10767_v57 = vmax.f32 %v9173_v9, 0.0  ;;  %v3246_v52 = vpop.f32.mrb[173].mxu0  ;;  %v3358_v20 = vadd.f32 %v3357_v1, %v3085_v38  ;;  %v3359_v42 = vpop.f32.mrb[173].mxu1 }
 0x74d   :  { %v9191_v13 = vadd.f32 %v3354_v15, %v11390_v33  ;;  %v10760_v59 = vmax.f32 %v9181_v30, 0.0  ;;  %v3245_v15 = vadd.f32 %v3244_v17, %v3085_v38  ;;  %v3247_v37 = vadd.f32 %v3246_v52, %v3085_v38  ;;  %v3248_v2 = vpop.f32.mrb[174].mxu0 }
 0x74e   :  { %v10762_v51 = vmax.f32 %v9185_v53, 0.0  ;;  %v3559_v6 = vpack.c.bf16 %v10757_v29, %v10758_v49  ;;  %v11391_v50 = vmax.f32 %v8588_v41, 0.0  ;;  %v3360_v17 = vadd.f32 %v3359_v42, %v3085_v38  ;;  %v3361_v49 = vpop.f32.mrb[174].mxu1  ;;  %v3250_v54 = vpop.f32.mrb[175].mxu0 }
 0x74f   :  { %v10764_v0 = vmax.f32 %v9191_v13, 0.0  ;;  %v3561_v28 = vpack.c.bf16 %v10760_v59, %v10761_v48  ;;  %v3249_v29 = vadd.f32 %v3248_v2, %v3090_v36  ;;  %v11392_v52 = vmax.f32 %v8598_v14, 0.0 }
 0x750   :  { %v3560_v24 = vpack.c.bf16 %v10762_v51, %v10763_v61  ;;  %v9213_v33 = vadd.f32 %v3245_v15, %v11391_v50  ;;  %v11393_v48 = vmax.f32 %v8602_v23, 0.0  ;;  %v3362_v41 = vadd.f32 %v3361_v49, %v3090_v36  ;;  %v3363_v50 = vpop.f32.mrb[175].mxu1 }
 0x751   :  { %v3562_v1 = vpack.c.bf16 %v10764_v0, %v10767_v57  ;;  %v9221_v59 = vadd.f32 %v3358_v20, %v11392_v52  ;;  %v3251_v15 = vadd.f32 %v3250_v54, %v3090_v36  ;;  %v11394_v38 = vmax.f32 %v8608_v44, 0.0 }
 0x752   :  { %v9225_v51 = vadd.f32 %v3247_v37, %v11393_v48  ;;  %3732 = vmatprep.subr.bf16.mxu0 %v3560_v24  ;;  %v11395_v2 = vmax.f32 %v8612_v7, 0.0  ;;  %v3364_v0 = vadd.f32 %v3363_v50, %v3090_v36  ;;  %v11396_v14 = vmax.f32 %v8617_v62, 0.0  ;;  %v3100_v48 = vpop.permute.xlu1 %3099  ;;  %v3095_v36 = vpop.permute.xlu0 %3094 }
 0x753   :  { %v9229_v42 = vadd.f32 %v3360_v17, %v11394_v38  ;;  %3845 = vmatprep.subr.bf16.mxu1 %v3562_v1  ;;  %3733 = vmatpush1.bf16.msra.mxu0 %v3559_v6  ;;  %v11397_v49 = vmax.f32 %v8621_v43, 0.0  ;;  %v10766_v44 = vmax.f32 %v9213_v33, 0.0  ;;  %v11398_v7 = vmax.f32 %v8627_v31, 0.0  ;;  %v3254_v24 = vpop.f32.mrb[176].mxu0  ;;  %v3367_v1 = vpop.f32.mrb[176].mxu1 }
 0x754   :  { %v9233_v61 = vadd.f32 %v3249_v29, %v11395_v2  ;;  %v9237_v23 = vadd.f32 %v3362_v41, %v11396_v14  ;;  %3846 = vmatpush1.bf16.msra.mxu1 %v3561_v28  ;;  %v10769_v6 = vmax.f32 %v9221_v59, 0.0  ;;  %v10771_v62 = vmax.f32 %v9225_v51, 0.0  ;;  %v3256_v52 = vpop.f32.mrb[177].mxu0  ;;  %v3369_v38 = vpop.f32.mrb[177].mxu1 }
 0x755   :  { %v9241_v54 = vadd.f32 %v3251_v15, %v11397_v49  ;;  %v9247_v29 = vadd.f32 %v3364_v0, %v11398_v7  ;;  %v10775_v28 = vmax.f32 %v9229_v42, 0.0  ;;  %v3255_v0 = vadd.f32 %v3254_v24, %v3095_v36  ;;  %v3258_v2 = vpop.f32.mrb[178].mxu0 }
 0x756   :  { %v10765_v20 = vmax.f32 %v9233_v61, 0.0  ;;  %v10768_v37 = vmax.f32 %v9237_v23, 0.0  ;;  %v3368_v15 = vadd.f32 %v3367_v1, %v3095_v36  ;;  %v3257_v50 = vadd.f32 %v3256_v52, %v3095_v36  ;;  %v3260_v57 = vpop.f32.mrb[179].mxu0 }
 0x757   :  { %v10770_v43 = vmax.f32 %v9241_v54, 0.0  ;;  %v10774_v31 = vmax.f32 %v9247_v29, 0.0  ;;  %v11399_v49 = vmax.f32 %v8652_v10, 0.0  ;;  %v3370_v24 = vadd.f32 %v3369_v38, %v3095_v36  ;;  %v11403_v36 = vld [vmem:[#allocation34_spill] sm:$0xff] }
 0x758   :  { %v3563_v17 = vpack.c.bf16 %v10765_v20, %v10766_v44  ;;  %v3565_v41 = vpack.c.bf16 %v10768_v37, %v10769_v6  ;;  %v3259_v20 = vadd.f32 %v3258_v2, %v3100_v48  ;;  %v3371_v44 = vpop.f32.mrb[178].mxu1  ;;  %v11400_v52 = vmax.f32 %v8662_v56, 0.0  ;;  %v11409_v56 = vld [vmem:[#allocation36_spill] sm:$0xff] }
 0x759   :  { %v3564_v14 = vpack.c.bf16 %v10770_v43, %v10771_v62  ;;  %v9269_v7 = vadd.f32 %v3255_v0, %v11399_v49  ;;  %v3566_v1 = vpack.c.bf16 %v10774_v31, %v10775_v28  ;;  %v11401_v6 = vmax.f32 %v8666_v8, 0.0  ;;  %v3373_v49 = vpop.f32.mrb[179].mxu1  ;;  %v11406_v62 = vld [vmem:[#allocation60_spill] sm:$0xff] }
 0x75a   :  { %v9277_v37 = vadd.f32 %v3368_v15, %v11400_v52  ;;  %v3372_v10 = vadd.f32 %v3371_v44, %v3100_v48  ;;  %v3261_v0 = vadd.f32 %v3260_v57, %v3100_v48  ;;  %v11404_v38 = vmax.f32 %v11403_v36, 0.0 }
 0x75b   :  { %v9281_v43 = vadd.f32 %v3257_v50, %v11401_v6  ;;  %3734 = vmatprep.subr.bf16.mxu0 %v3564_v14  ;;  %v11407_v63 = vmax.f32 %v11406_v62, 0.0  ;;  %v3374_v31 = vadd.f32 %v3373_v49, %v3100_v48  ;;  %3847 = vmatprep.subr.bf16.mxu1 %v3566_v1  ;;  %v11410_v15 = vmax.f32 %v11409_v56, 0.0  ;;  %v11412_v6 = vld [vmem:[#allocation30_spill] sm:$0xff]  ;;  %v3110_v50 = vpop.permute.xlu1 %3109  ;;  %v11415_v62 = vld [vmem:[#allocation32_spill] sm:$0xff]  ;;  %v3105_v48 = vpop.permute.xlu0 %3104 }
 0x75c   :  { %v9285_v2 = vadd.f32 %v3370_v24, %v11404_v38  ;;  %3735 = vmatpush1.bf16.msra.mxu0 %v3563_v17  ;;  %v11413_v44 = vmax.f32 %v11412_v6, 0.0  ;;  %3848 = vmatpush1.bf16.msra.mxu1 %v3565_v41  ;;  %v10777_v14 = vmax.f32 %v9269_v7, 0.0  ;;  %v10782_v17 = vmax.f32 %v9277_v37, 0.0  ;;  %v3377_v38 = vpop.f32.mrb[180].mxu1 }
 0x75d   :  { %11402 = vst [vmem:[#allocation65_spill] sm:$0xff] %v9281_v43  ;;  %v9289_v60 = vadd.f32 %v3259_v20, %v11407_v63  ;;  %v9293_v8 = vadd.f32 %v3372_v10, %v11410_v15  ;;  %v11416_v63 = vmax.f32 %v11415_v62, 0.0  ;;  %v10787_v1 = vmax.f32 %v9281_v43, 0.0  ;;  %v3379_v62 = vpop.f32.mrb[181].mxu1  ;;  %v11426_v43 = vld [vmem:[#allocation31_spill] sm:$0xff] }
 0x75e   :  { %11405 = vst [vmem:[#allocation66_spill] sm:$0xff] %v9285_v2  ;;  %v9297_v57 = vadd.f32 %v3261_v0, %v11413_v44  ;;  %v3264_v0 = vpop.f32.mrb[180].mxu0  ;;  %v3378_v6 = vadd.f32 %v3377_v38, %v3105_v48 }
 0x75f   :  { %11408 = vst [vmem:[#allocation67_spill] sm:$0xff] %v9289_v60  ;;  %11411 = vst [vmem:[#allocation68_spill] sm:$0xff] %v9293_v8  ;;  %v10776_v24 = vmax.f32 %v9289_v60, 0.0  ;;  %v9303_v20 = vadd.f32 %v3374_v31, %v11416_v63  ;;  %v10781_v52 = vmax.f32 %v9293_v8, 0.0  ;;  %v3265_v36 = vadd.f32 %v3264_v0, %v3105_v48  ;;  %v3266_v56 = vpop.f32.mrb[181].mxu0  ;;  %v3381_v31 = vpop.f32.mrb[182].mxu1 }
 0x760   :  { %11414 = vst [vmem:[#allocation69_spill] sm:$0xff] %v9297_v57  ;;  %v10786_v10 = vmax.f32 %v9297_v57, 0.0  ;;  %v3267_v44 = vadd.f32 %v3266_v56, %v3105_v48  ;;  %v3268_v63 = vpop.f32.mrb[182].mxu0  ;;  %v3380_v0 = vadd.f32 %v3379_v62, %v3105_v48  ;;  %v11421_v8 = vmax.f32 %v9285_v2, 0.0  ;;  %v11429_v48 = vld [vmem:[#allocation33_spill] sm:$0xff] }
 0x761   :  { %11417 = vst [vmem:[#allocation70_spill] sm:$0xff] %v9303_v20  ;;  %v3567_v49 = vpack.c.bf16 %v10776_v24, %v10777_v14  ;;  %v3569_v15 = vpack.c.bf16 %v10781_v52, %v10782_v17  ;;  %v11418_v24 = vld [vmem:[#allocation35_spill] sm:$0xff]  ;;  %v3269_v40 = vadd.f32 %v3268_v63, %v3110_v50  ;;  %v3270_v41 = vpop.f32.mrb[183].mxu0  ;;  %v11422_v38 = vmax.f32 %v9303_v20, 0.0  ;;  %v11423_v52 = vld [vmem:[#allocation37_spill] sm:$0xff] }
 0x762   :  { %v3568_v28 = vpack.c.bf16 %v10786_v10, %v10787_v1  ;;  %v11419_v14 = vmax.f32 %v11418_v24, 0.0  ;;  %v11424_v17 = vmax.f32 %v11423_v52, 0.0  ;;  %v11427_v57 = vmax.f32 %v11426_v43, 0.0  ;;  %v11432_v1 = vld [vmem:[#allocation61_spill] sm:$0xff] }
 0x763   :  { %v3570_v56 = vpack.c.bf16 %v11422_v38, %v11421_v8  ;;  %v3382_v24 = vadd.f32 %v3381_v31, %v3110_v50  ;;  %v11430_v62 = vmax.f32 %v11429_v48, 0.0  ;;  %v11433_v2 = vmax.f32 %v11432_v1, 0.0  ;;  %v11441_v1 = vld [vmem:[#allocation44_spill] sm:$0xff] }
 0x764   :  { %v9325_v16 = vadd.f32 %v3265_v36, %v11419_v14  ;;  %v9333_v60 = vadd.f32 %v3378_v6, %v11424_v17  ;;  %v9337_v10 = vadd.f32 %v3267_v44, %v11427_v57  ;;  %v3271_v14 = vadd.f32 %v3270_v41, %v3110_v50  ;;  %v3383_v36 = vpop.f32.mrb[183].mxu1  ;;  %3736 = vmatprep.subr.bf16.mxu0 %v3568_v28  ;;  %v11435_v17 = vld [vmem:[#allocation42_spill] sm:$0xff]  ;;  %v3120_v28 = vpop.permute.xlu1 %3119 }
 0x765   :  { %v9341_v63 = vadd.f32 %v3380_v0, %v11430_v62  ;;  %v9345_v20 = vadd.f32 %v3269_v40, %v11433_v2  ;;  %v3384_v8 = vadd.f32 %v3383_v36, %v3110_v50  ;;  %3849 = vmatprep.subr.bf16.mxu1 %v3570_v56  ;;  %3737 = vmatpush1.bf16.msra.mxu0 %v3567_v49  ;;  %v11436_v52 = vmax.f32 %v11435_v17, 0.0  ;;  %v11438_v57 = vld [vmem:[#allocation62_spill] sm:$0xff]  ;;  %v3115_v50 = vpop.permute.xlu0 %3114  ;;  %v3387_v62 = vpop.f32.mrb[184].mxu1 }
 0x766   :  { %11420 = vst [vmem:[#allocation71_spill] sm:$0xff] %v9325_v16  ;;  %11425 = vst [vmem:[#allocation72_spill] sm:$0xff] %v9333_v60  ;;  %v11439_v31 = vmax.f32 %v11438_v57, 0.0  ;;  %3850 = vmatpush1.bf16.msra.mxu1 %v3569_v15  ;;  %v10791_v6 = vmax.f32 %v9325_v16, 0.0  ;;  %v11442_v40 = vmax.f32 %v11441_v1, 0.0  ;;  %v10796_v49 = vmax.f32 %v9333_v60, 0.0 }
 0x767   :  { %11428 = vst [vmem:[#allocation73_spill] sm:$0xff] %v9337_v10  ;;  %11431 = vst [vmem:[#allocation74_spill] sm:$0xff] %v9341_v63  ;;  %v9349_v43 = vadd.f32 %v3382_v24, %v11436_v52  ;;  %v10790_v44 = vmax.f32 %v9345_v20, 0.0  ;;  %v10801_v0 = vmax.f32 %v9337_v10, 0.0  ;;  %v3274_v24 = vpop.f32.mrb[184].mxu0  ;;  %v3388_v52 = vadd.f32 %v3387_v62, %v3115_v50  ;;  %v11452_v10 = vld [vmem:[#allocation43_spill] sm:$0xff] }
 0x768   :  { %11434 = vst [vmem:[#allocation75_spill] sm:$0xff] %v9345_v20  ;;  %v9353_v41 = vadd.f32 %v3271_v14, %v11439_v31  ;;  %v9359_v2 = vadd.f32 %v3384_v8, %v11442_v40  ;;  %v3275_v48 = vadd.f32 %v3274_v24, %v3115_v50  ;;  %v3276_v8 = vpop.f32.mrb[185].mxu0  ;;  %v3389_v31 = vpop.f32.mrb[185].mxu1 }
 0x769   :  { %11437 = vst [vmem:[#allocation76_spill] sm:$0xff] %v9349_v43  ;;  %v10795_v38 = vmax.f32 %v9349_v43, 0.0  ;;  %v3571_v14 = vpack.c.bf16 %v10790_v44, %v10791_v6  ;;  %v3277_v57 = vadd.f32 %v3276_v8, %v3115_v50  ;;  %v3278_v1 = vpop.f32.mrb[186].mxu0  ;;  %v11444_v44 = vld [vmem:[#allocation38_spill] sm:$0xff]  ;;  %v3390_v24 = vadd.f32 %v3389_v31, %v3115_v50  ;;  %v3391_v20 = vpop.f32.mrb[186].mxu1  ;;  %v11455_v50 = vld [vmem:[#allocation45_spill] sm:$0xff] }
 0x76a   :  { %11440 = vst [vmem:[#allocation77_spill] sm:$0xff] %v9353_v41  ;;  %11443 = vst [vmem:[#allocation78_spill] sm:$0xff] %v9359_v2  ;;  %v10800_v56 = vmax.f32 %v9353_v41, 0.0  ;;  %v11445_v6 = vmax.f32 %v11444_v44, 0.0  ;;  %v3279_v15 = vadd.f32 %v3278_v1, %v3120_v28  ;;  %v3280_v60 = vpop.f32.mrb[187].mxu0  ;;  %v11447_v43 = vmax.f32 %v9341_v63, 0.0 }
 0x76b   :  { %v3573_v17 = vpack.c.bf16 %v10795_v38, %v10796_v49  ;;  %v11448_v62 = vmax.f32 %v9359_v2, 0.0  ;;  %v11449_v38 = vld [vmem:[#allocation40_spill] sm:$0xff]  ;;  %v11453_v41 = vmax.f32 %v11452_v10, 0.0  ;;  %v3392_v44 = vadd.f32 %v3391_v20, %v3120_v28 }
 0x76c   :  { %v3572_v40 = vpack.c.bf16 %v10800_v56, %v10801_v0  ;;  %v9381_v36 = vadd.f32 %v3275_v48, %v11445_v6  ;;  %v11450_v49 = vmax.f32 %v11449_v38, 0.0  ;;  %v3281_v6 = vadd.f32 %v3280_v60, %v3120_v28  ;;  %v3393_v48 = vpop.f32.mrb[187].mxu1  ;;  %v11458_v0 = vld [vmem:[#allocation39_spill] sm:$0xff] }
 0x76d   :  { %v3574_v8 = vpack.c.bf16 %v11448_v62, %v11447_v43  ;;  %v9393_v56 = vadd.f32 %v3277_v57, %v11453_v41  ;;  %v11456_v31 = vmax.f32 %v11455_v50, 0.0  ;;  %v11459_v63 = vmax.f32 %v11458_v0, 0.0  ;;  %v11464_v41 = vld [vmem:[#allocation63_spill] sm:$0xff]  ;;  %v3397_v50 = vpop.f32.mrb[188].mxu1 }
 0x76e   :  { %11446 = vst [vmem:[#allocation79_spill] sm:$0xff] %v9381_v36  ;;  %v9389_v16 = vadd.f32 %v3388_v52, %v11450_v49  ;;  %3738 = vmatprep.subr.bf16.mxu0 %v3572_v40  ;;  %v3394_v43 = vadd.f32 %v3393_v48, %v3120_v28  ;;  %v11461_v49 = vld [vmem:[#allocation41_spill] sm:$0xff]  ;;  %v11465_v20 = vmax.f32 %v11464_v41, 0.0  ;;  %v3130_v52 = vpop.permute.xlu1 %3129  ;;  %v11467_v40 = vld [vmem:[#allocation64_spill] sm:$0xff]  ;;  %v10806_v28 = vmax.f32 %v9381_v36, 0.0  ;;  %v3399_v41 = vpop.f32.mrb[189].mxu1 }
 0x76f   :  { %11454 = vst [vmem:[#allocation81_spill] sm:$0xff] %v9393_v56  ;;  %v9397_v1 = vadd.f32 %v3390_v24, %v11456_v31  ;;  %v9401_v2 = vadd.f32 %v3279_v15, %v11459_v63  ;;  %3851 = vmatprep.subr.bf16.mxu1 %v3574_v8  ;;  %3739 = vmatpush1.bf16.msra.mxu0 %v3571_v14  ;;  %v11462_v38 = vmax.f32 %v11461_v49, 0.0  ;;  %v11468_v24 = vmax.f32 %v11467_v40, 0.0  ;;  %v3125_v63 = vpop.permute.xlu0 %3124  ;;  %v3284_v8 = vpop.f32.mrb[188].mxu0 }
 0x770   :  { %11451 = vst [vmem:[#allocation80_spill] sm:$0xff] %v9389_v16  ;;  %v9409_v60 = vadd.f32 %v3281_v6, %v11465_v20  ;;  %3852 = vmatpush1.bf16.msra.mxu1 %v3573_v17  ;;  %v10811_v15 = vmax.f32 %v9393_v56, 0.0  ;;  %v3285_v48 = vadd.f32 %v3284_v8, %v3125_v63  ;;  %v3286_v31 = vpop.f32.mrb[189].mxu0  ;;  %v3398_v49 = vadd.f32 %v3397_v50, %v3125_v63  ;;  %v3401_v17 = vpop.f32.mrb[190].mxu1 }
 0x771   :  { %11457 = vst [vmem:[#allocation82_spill] sm:$0xff] %v9397_v1  ;;  %11460 = vst [vmem:[#allocation83_spill] sm:$0xff] %v9401_v2  ;;  %v9405_v10 = vadd.f32 %v3392_v44, %v11462_v38  ;;  %v10805_v57 = vmax.f32 %v9401_v2, 0.0  ;;  %v9414_v0 = vadd.f32 %v3394_v43, %v11468_v24  ;;  %v10815_v44 = vmax.f32 %v9389_v16, 0.0  ;;  %v3288_v20 = vpop.f32.mrb[190].mxu0 }
 0x772   :  { %11466 = vst [vmem:[#allocation85_spill] sm:$0xff] %v9409_v60  ;;  %v10810_v62 = vmax.f32 %v9409_v60, 0.0  ;;  %v3287_v38 = vadd.f32 %v3286_v31, %v3125_v63  ;;  %v3400_v8 = vadd.f32 %v3399_v41, %v3125_v63  ;;  %v3289_v6 = vadd.f32 %v3288_v20, %v3130_v52  ;;  %v3290_v36 = vpop.f32.mrb[191].mxu0  ;;  %v11475_v60 = vld [vmem:[#allocation46_spill] sm:$0xff]  ;;  %v11478_v63 = vld [vmem:[#allocation48_spill] sm:$0xff] }
 0x773   :  { %11463 = vst [vmem:[#allocation84_spill] sm:$0xff] %v9405_v10  ;;  %11469 = vst [vmem:[#allocation86_spill] sm:$0xff] %v9414_v0  ;;  %v10814_v14 = vmax.f32 %v9405_v10, 0.0  ;;  %v3575_v43 = vpack.c.bf16 %v10805_v57, %v10806_v28  ;;  %v11470_v57 = vmax.f32 %v9397_v1, 0.0  ;;  %v11471_v50 = vmax.f32 %v9414_v0, 0.0  ;;  %v11472_v28 = vld [vmem:[#allocation50_spill] sm:$0xff] }
 0x774   :  { %v3576_v40 = vpack.c.bf16 %v10810_v62, %v10811_v15  ;;  %v11473_v2 = vmax.f32 %v11472_v28, 0.0  ;;  %v11476_v62 = vmax.f32 %v11475_v60, 0.0  ;;  %v3402_v16 = vadd.f32 %v3401_v17, %v3130_v52 }
 0x775   :  { %v3577_v24 = vpack.c.bf16 %v10814_v14, %v10815_v44  ;;  %v3578_v31 = vpack.c.bf16 %v11471_v50, %v11470_v57  ;;  %v3291_v10 = vadd.f32 %v3290_v36, %v3130_v52  ;;  %v3403_v14 = vpop.f32.mrb[191].mxu1  ;;  %v11479_v41 = vmax.f32 %v11478_v63, 0.0  ;;  %v11481_v44 = vld [vmem:[#allocation51_spill] sm:$0xff] }
 0x776   :  { %v9441_v56 = vadd.f32 %v3285_v48, %v11473_v2  ;;  %v9445_v15 = vadd.f32 %v3287_v38, %v11476_v62  ;;  %3740 = vmatprep.subr.bf16.mxu0 %v3576_v40  ;;  %v11482_v1 = vmax.f32 %v11481_v44, 0.0  ;;  %v3404_v57 = vadd.f32 %v3403_v14, %v3130_v52  ;;  %v11484_v2 = vld [vmem:[#allocation52_spill] sm:$0xff]  ;;  %v11487_v62 = vld [vmem:[#allocation53_spill] sm:$0xff]  ;;  %v11490_v48 = vld [vmem:[#allocation47_spill] sm:$0xff] }
 0x777   :  { %v9449_v20 = vadd.f32 %v3400_v8, %v11479_v41  ;;  %3853 = vmatprep.subr.bf16.mxu1 %v3578_v31  ;;  %3741 = vmatpush1.bf16.msra.mxu0 %v3575_v43  ;;  %v11485_v28 = vmax.f32 %v11484_v2, 0.0  ;;  %v11488_v17 = vmax.f32 %v11487_v62, 0.0  ;;  %v11491_v38 = vmax.f32 %v11490_v48, 0.0  ;;  %v6294_v2 = vld [vmem:[%s10392_s3 + $0xc8] sm:$0xff]   ;;  %v6296_v62 = vld [vmem:[%s10392_s3 + $0xd8] sm:$0xff]  }
 0x778   :  { %11474 = vst [vmem:[#allocation87_spill] sm:$0xff] %v9441_v56  ;;  %11477 = vst [vmem:[#allocation88_spill] sm:$0xff] %v9445_v15  ;;  %v9453_v0 = vadd.f32 %v3289_v6, %v11482_v1  ;;  %3854 = vmatpush1.bf16.msra.mxu1 %v3577_v24  ;;  %v11493_v1 = vld [vmem:[#allocation49_spill] sm:$0xff]  ;;  %v10824_v14 = vmax.f32 %v9445_v15, 0.0  ;;  %v6298_v48 = vld [vmem:[%s10392_s3 + $0xe8] sm:$0xff]  }
 0x779   :  { %11480 = vst [vmem:[#allocation89_spill] sm:$0xff] %v9449_v20  ;;  %v9457_v60 = vadd.f32 %v3398_v49, %v11485_v28  ;;  %v9461_v36 = vadd.f32 %v3402_v16, %v11488_v17  ;;  %v9465_v40 = vadd.f32 %v3291_v10, %v11491_v38  ;;  %v11494_v6 = vmax.f32 %v11493_v1, 0.0  ;;  %v6295_v28 = vld [vmem:[%s10392_s3 + $0xd0] sm:$0xff]   ;;  %v6297_v17 = vld [vmem:[%s10392_s3 + $0xe0] sm:$0xff]   ;;  %v6300_v1 = vld [vmem:[%s10392_s3 + $0xf8] sm:$0xff]  }
 0x77a   :  { %11483 = vst [vmem:[#allocation90_spill] sm:$0xff] %v9453_v0  ;;  %v10822_v44 = vmax.f32 %v9453_v0, 0.0  ;;  %v10825_v16 = vmax.f32 %v9441_v56, 0.0  ;;  %v10823_v8 = vmax.f32 %v9449_v20, 0.0  ;;  %v6299_v38 = vld [vmem:[%s10392_s3 + $0xf0] sm:$0xff]  }
 0x77b   :  { %11486 = vst [vmem:[#allocation54_spill] sm:$0xff] %v9457_v60  ;;  %11489 = vst [vmem:[#allocation12_spill] sm:$0xff] %v9461_v36  ;;  %v9470_v52 = vadd.f32 %v3404_v57, %v11494_v6  ;;  %v10820_v43 = vmax.f32 %v9461_v36, 0.0  ;;  %v10819_v49 = vmax.f32 %v9465_v40, 0.0  ;;  %v10821_v24 = vmax.f32 %v9457_v60, 0.0  ;;  %v6293_v57 = vld [vmem:[%s10392_s3 + $0xc0] sm:$0xff]   ;;  %v3608_v6 = vpop.permute.xlu1 %3607 }
 0x77c   :  { %11492 = vst [vmem:[#allocation7_spill] sm:$0xff] %v9465_v40  ;;  %v3579_v31 = vpack.c.bf16 %v10822_v44, %v10825_v16 }
 0x77d   :  { %11495 = vst [vmem:[#allocation9_spill] sm:$0xff] %v9470_v52  ;;  %v10818_v10 = vmax.f32 %v9470_v52, 0.0  ;;  %v3580_v50 = vpack.c.bf16 %v10819_v49, %v10824_v14  ;;  %v3581_v41 = vpack.c.bf16 %v10820_v43, %v10821_v24 }
 0x77f   :  { %v3582_v63 = vpack.c.bf16 %v10818_v10, %v10823_v8  ;;  %3742 = vmatprep.subr.bf16.mxu0 %v3580_v50  ;;  %v3603_v50 = vpop.permute.xlu0 %3602  ;;  %v3618_v36 = vpop.permute.xlu1 %3617 }
 0x780   :  { %3743 = vmatpush1.bf16.msra.mxu0 %v3579_v31 }
 0x781   :  { %3855 = vmatprep.subr.bf16.mxu1 %v3582_v63 }
 0x782   :  { %3856 = vmatpush1.bf16.msra.mxu1 %v3581_v41 }
 0x783   :  { %3761 = vmatmul.mubr.bf16.vlgmr.msra.gmra.mrb[192].mxu0 %v6293_v57  ;;  %v3613_v0 = vpop.permute.xlu0 %3612 }
 0x784   :  { %3770 = vmatprep.mubr.bf16.mxu0 %v10978_v5 }
 0x785   :  { %3874 = vmatmul.mubr.bf16.vlgmr.msra.gmra.mrb[192].mxu1 %v6293_v57 }
 0x786   :  { %3883 = vmatprep.mubr.bf16.mxu1 %v10978_v5 }
 0x78b   :  { %3771 = vmatmul.mubr.bf16.gmra.mrb[196].mxu0 %v6294_v2 }
 0x78c   :  { %3780 = vmatprep.mubr.bf16.mxu0 %v10978_v5 }
 0x78d   :  { %3884 = vmatmul.mubr.bf16.gmra.mrb[196].mxu1 %v6294_v2 }
 0x78e   :  { %3893 = vmatprep.mubr.bf16.mxu1 %v10978_v5 }
 0x793   :  { %3781 = vmatmul.mubr.bf16.gmra.mrb[200].mxu0 %v6295_v28 }
 0x794   :  { %3790 = vmatprep.mubr.bf16.mxu0 %v10978_v5 }
 0x795   :  { %3894 = vmatmul.mubr.bf16.gmra.mrb[200].mxu1 %v6295_v28 }
 0x796   :  { %3903 = vmatprep.mubr.bf16.mxu1 %v10978_v5 }
 0x79b   :  { %3791 = vmatmul.mubr.bf16.gmra.mrb[204].mxu0 %v6296_v62 }
 0x79c   :  { %3800 = vmatprep.mubr.bf16.mxu0 %v10978_v5 }
 0x79d   :  { %3904 = vmatmul.mubr.bf16.gmra.mrb[204].mxu1 %v6296_v62 }
 0x79e   :  { %3913 = vmatprep.mubr.bf16.mxu1 %v10978_v5 }
 0x7a3   :  { %3801 = vmatmul.mubr.bf16.gmra.mrb[208].mxu0 %v6297_v17 }
 0x7a4   :  { %3810 = vmatprep.mubr.bf16.mxu0 %v10978_v5 }
 0x7a5   :  { %3914 = vmatmul.mubr.bf16.gmra.mrb[208].mxu1 %v6297_v17 }
 0x7a6   :  { %3923 = vmatprep.mubr.bf16.mxu1 %v10978_v5 }
 0x7ab   :  { %3811 = vmatmul.mubr.bf16.gmra.mrb[212].mxu0 %v6298_v48 }
 0x7ac   :  { %3820 = vmatprep.mubr.bf16.mxu0 %v10978_v5 }
 0x7ad   :  { %3924 = vmatmul.mubr.bf16.gmra.mrb[212].mxu1 %v6298_v48 }
 0x7ae   :  { %3933 = vmatprep.mubr.bf16.mxu1 %v10978_v5 }
 0x7b3   :  { %3821 = vmatmul.mubr.bf16.gmra.mrb[216].mxu0 %v6299_v38 }
 0x7b4   :  { %3830 = vmatprep.mubr.bf16.mxu0 %v10978_v5 }
 0x7b5   :  { %3934 = vmatmul.mubr.bf16.gmra.mrb[216].mxu1 %v6299_v38 }
 0x7b6   :  { %3943 = vmatprep.mubr.bf16.mxu1 %v10978_v5 }
 0x7bb   :  { %3831 = vmatmul.mubr.bf16.gmra.mrb[220].mxu0 %v6300_v1 }
 0x7bc   :  { %4244 = vmatprep.mubr.bf16.mxu0 %v10978_v5 }
 0x7bd   :  { %3944 = vmatmul.mubr.bf16.gmra.mrb[220].mxu1 %v6300_v1 }
 0x7be   :  { %4357 = vmatprep.mubr.bf16.mxu1 %v10978_v5 }
 0x856   :  { %v3762_v31 = vpop.f32.mrb[192].mxu0 }
 0x857   :  { %v3763_v63 = vadd.f32 %v3762_v31, %v3603_v50  ;;  %v3764_v57 = vpop.f32.mrb[193].mxu0 }
 0x858   :  { %v3875_v41 = vpop.f32.mrb[192].mxu1  ;;  %v3765_v28 = vadd.f32 %v3764_v57, %v3603_v50  ;;  %v3766_v17 = vpop.f32.mrb[194].mxu0 }
 0x859   :  { %v3876_v2 = vadd.f32 %v3875_v41, %v3603_v50  ;;  %v3877_v62 = vpop.f32.mrb[193].mxu1  ;;  %v3767_v38 = vadd.f32 %v3766_v17, %v3608_v6  ;;  %v3768_v49 = vpop.f32.mrb[195].mxu0  ;;  %v3954_v44 = vmax.f32 %v3763_v63, 0.0 }
 0x85a   :  { %v3878_v48 = vadd.f32 %v3877_v62, %v3603_v50  ;;  %v3879_v10 = vpop.f32.mrb[194].mxu1  ;;  %v3769_v1 = vadd.f32 %v3768_v49, %v3608_v6  ;;  %v3955_v52 = vmax.f32 %v3765_v28, 0.0 }
 0x85b   :  { %v3880_v43 = vadd.f32 %v3879_v10, %v3608_v6  ;;  %v3881_v24 = vpop.f32.mrb[195].mxu1  ;;  %v3958_v8 = vmax.f32 %v3767_v38, 0.0  ;;  %v3956_v16 = vmax.f32 %v3876_v2, 0.0 }
 0x85c   :  { %v3882_v14 = vadd.f32 %v3881_v24, %v3608_v6  ;;  %v3959_v31 = vmax.f32 %v3769_v1, 0.0  ;;  %v3957_v60 = vmax.f32 %v3878_v48, 0.0 }
 0x85d   :  { %v3960_v40 = vmax.f32 %v3880_v43, 0.0  ;;  %v4035_v41 = vpack.c.bf16 %v3958_v8, %v3954_v44 }
 0x85e   :  { %v3961_v57 = vmax.f32 %v3882_v14, 0.0  ;;  %v4036_v50 = vpack.c.bf16 %v3959_v31, %v3955_v52  ;;  %v3772_v62 = vpop.f32.mrb[196].mxu0 }
 0x85f   :  { %v4037_v20 = vpack.c.bf16 %v3960_v40, %v3956_v16  ;;  %v3773_v15 = vadd.f32 %v3772_v62, %v3613_v0  ;;  %v3774_v49 = vpop.f32.mrb[197].mxu0 }
 0x860   :  { %v4038_v17 = vpack.c.bf16 %v3961_v57, %v3957_v60  ;;  %v3885_v10 = vpop.f32.mrb[196].mxu1  ;;  %v3775_v63 = vadd.f32 %v3774_v49, %v3613_v0  ;;  %v3776_v24 = vpop.f32.mrb[198].mxu0  ;;  %4212 = vmatprep.subr.bf16.mxu0 %v4036_v50 }
 0x861   :  { %v3886_v56 = vadd.f32 %v3885_v10, %v3613_v0  ;;  %v3887_v38 = vpop.f32.mrb[197].mxu1  ;;  %v3777_v43 = vadd.f32 %v3776_v24, %v3618_v36  ;;  %v3778_v28 = vpop.f32.mrb[199].mxu0  ;;  %4213 = vmatpush1.bf16.msra.mxu0 %v4035_v41  ;;  %v3962_v52 = vmax.f32 %v3773_v15, 0.0 }
 0x862   :  { %v3888_v6 = vadd.f32 %v3887_v38, %v3613_v0  ;;  %v3889_v2 = vpop.f32.mrb[198].mxu1  ;;  %4325 = vmatprep.subr.bf16.mxu1 %v4038_v17  ;;  %v3779_v14 = vadd.f32 %v3778_v28, %v3618_v36  ;;  %v3963_v48 = vmax.f32 %v3775_v63, 0.0  ;;  %v3628_v57 = vpop.permute.xlu1 %3627 }
 0x863   :  { %v3890_v44 = vadd.f32 %v3889_v2, %v3618_v36  ;;  %v3891_v40 = vpop.f32.mrb[199].mxu1  ;;  %4326 = vmatpush1.bf16.msra.mxu1 %v4037_v20  ;;  %v3966_v60 = vmax.f32 %v3777_v43, 0.0  ;;  %v3964_v8 = vmax.f32 %v3886_v56, 0.0  ;;  %v3623_v10 = vpop.permute.xlu0 %3622 }
 0x864   :  { %v3892_v16 = vadd.f32 %v3891_v40, %v3618_v36  ;;  %v3967_v31 = vmax.f32 %v3779_v14, 0.0  ;;  %v3965_v62 = vmax.f32 %v3888_v6, 0.0 }
 0x865   :  { %v3968_v1 = vmax.f32 %v3890_v44, 0.0  ;;  %v4039_v50 = vpack.c.bf16 %v3966_v60, %v3962_v52 }
 0x866   :  { %v3969_v0 = vmax.f32 %v3892_v16, 0.0  ;;  %v4040_v17 = vpack.c.bf16 %v3967_v31, %v3963_v48  ;;  %v3782_v38 = vpop.f32.mrb[200].mxu0 }
 0x867   :  { %v4041_v49 = vpack.c.bf16 %v3968_v1, %v3964_v8  ;;  %v3783_v24 = vadd.f32 %v3782_v38, %v3623_v10  ;;  %v3784_v28 = vpop.f32.mrb[201].mxu0 }
 0x868   :  { %v4042_v41 = vpack.c.bf16 %v3969_v0, %v3965_v62  ;;  %v3895_v2 = vpop.f32.mrb[200].mxu1  ;;  %v3785_v15 = vadd.f32 %v3784_v28, %v3623_v10  ;;  %v3786_v36 = vpop.f32.mrb[202].mxu0  ;;  %4214 = vmatprep.subr.bf16.mxu0 %v4040_v17 }
 0x869   :  { %v3896_v20 = vadd.f32 %v3895_v2, %v3623_v10  ;;  %v3897_v43 = vpop.f32.mrb[201].mxu1  ;;  %v3787_v63 = vadd.f32 %v3786_v36, %v3628_v57  ;;  %v3788_v6 = vpop.f32.mrb[203].mxu0  ;;  %4215 = vmatpush1.bf16.msra.mxu0 %v4039_v50  ;;  %v3970_v60 = vmax.f32 %v3783_v24, 0.0 }
 0x86a   :  { %v3898_v56 = vadd.f32 %v3897_v43, %v3623_v10  ;;  %v3899_v44 = vpop.f32.mrb[202].mxu1  ;;  %4327 = vmatprep.subr.bf16.mxu1 %v4042_v41  ;;  %v3789_v40 = vadd.f32 %v3788_v6, %v3628_v57  ;;  %v3971_v1 = vmax.f32 %v3785_v15, 0.0  ;;  %v3638_v0 = vpop.permute.xlu1 %3637 }
 0x86b   :  { %v3900_v14 = vadd.f32 %v3899_v44, %v3628_v57  ;;  %v3901_v52 = vpop.f32.mrb[203].mxu1  ;;  %4328 = vmatpush1.bf16.msra.mxu1 %v4041_v49  ;;  %v3974_v16 = vmax.f32 %v3787_v63, 0.0  ;;  %v3972_v48 = vmax.f32 %v3896_v20, 0.0  ;;  %v3633_v2 = vpop.permute.xlu0 %3632 }
 0x86c   :  { %v3902_v8 = vadd.f32 %v3901_v52, %v3628_v57  ;;  %v3975_v62 = vmax.f32 %v3789_v40, 0.0  ;;  %v3973_v38 = vmax.f32 %v3898_v56, 0.0 }
 0x86d   :  { %v3976_v31 = vmax.f32 %v3900_v14, 0.0  ;;  %v4043_v17 = vpack.c.bf16 %v3974_v16, %v3970_v60 }
 0x86e   :  { %v3977_v10 = vmax.f32 %v3902_v8, 0.0  ;;  %v4044_v41 = vpack.c.bf16 %v3975_v62, %v3971_v1  ;;  %v3792_v43 = vpop.f32.mrb[204].mxu0 }
 0x86f   :  { %v4045_v28 = vpack.c.bf16 %v3976_v31, %v3972_v48  ;;  %v3793_v36 = vadd.f32 %v3792_v43, %v3633_v2  ;;  %v3794_v6 = vpop.f32.mrb[205].mxu0 }
 0x870   :  { %v4046_v50 = vpack.c.bf16 %v3977_v10, %v3973_v38  ;;  %v3905_v44 = vpop.f32.mrb[204].mxu1  ;;  %v3795_v24 = vadd.f32 %v3794_v6, %v3633_v2  ;;  %v3796_v57 = vpop.f32.mrb[206].mxu0  ;;  %4216 = vmatprep.subr.bf16.mxu0 %v4044_v41 }
 0x871   :  { %v3906_v49 = vadd.f32 %v3905_v44, %v3633_v2  ;;  %v3907_v63 = vpop.f32.mrb[205].mxu1  ;;  %v3797_v15 = vadd.f32 %v3796_v57, %v3638_v0  ;;  %v3798_v56 = vpop.f32.mrb[207].mxu0  ;;  %4217 = vmatpush1.bf16.msra.mxu0 %v4043_v17  ;;  %v3978_v16 = vmax.f32 %v3793_v36, 0.0 }
 0x872   :  { %v3908_v20 = vadd.f32 %v3907_v63, %v3633_v2  ;;  %v3909_v14 = vpop.f32.mrb[206].mxu1  ;;  %4329 = vmatprep.subr.bf16.mxu1 %v4046_v50  ;;  %v3799_v52 = vadd.f32 %v3798_v56, %v3638_v0  ;;  %v3979_v31 = vmax.f32 %v3795_v24, 0.0  ;;  %v3648_v10 = vpop.permute.xlu1 %3647 }
 0x873   :  { %v3910_v40 = vadd.f32 %v3909_v14, %v3638_v0  ;;  %v3911_v60 = vpop.f32.mrb[207].mxu1  ;;  %4330 = vmatpush1.bf16.msra.mxu1 %v4045_v28  ;;  %v3982_v8 = vmax.f32 %v3797_v15, 0.0  ;;  %v3980_v1 = vmax.f32 %v3906_v49, 0.0  ;;  %v3643_v44 = vpop.permute.xlu0 %3642 }
 0x874   :  { %v3912_v48 = vadd.f32 %v3911_v60, %v3638_v0  ;;  %v3983_v38 = vmax.f32 %v3799_v52, 0.0  ;;  %v3981_v43 = vmax.f32 %v3908_v20, 0.0 }
 0x875   :  { %v3984_v62 = vmax.f32 %v3910_v40, 0.0  ;;  %v4047_v41 = vpack.c.bf16 %v3982_v8, %v3978_v16 }
 0x876   :  { %v3985_v2 = vmax.f32 %v3912_v48, 0.0  ;;  %v4048_v50 = vpack.c.bf16 %v3983_v38, %v3979_v31  ;;  %v3802_v63 = vpop.f32.mrb[208].mxu0 }
 0x877   :  { %v4049_v6 = vpack.c.bf16 %v3984_v62, %v3980_v1  ;;  %v3803_v57 = vadd.f32 %v3802_v63, %v3643_v44  ;;  %v3804_v56 = vpop.f32.mrb[209].mxu0 }
 0x878   :  { %v4050_v17 = vpack.c.bf16 %v3985_v2, %v3981_v43  ;;  %v3915_v14 = vpop.f32.mrb[208].mxu1  ;;  %v3805_v36 = vadd.f32 %v3804_v56, %v3643_v44  ;;  %v3806_v0 = vpop.f32.mrb[210].mxu0  ;;  %4218 = vmatprep.subr.bf16.mxu0 %v4048_v50 }
 0x879   :  { %v3916_v28 = vadd.f32 %v3915_v14, %v3643_v44  ;;  %v3917_v15 = vpop.f32.mrb[209].mxu1  ;;  %v3807_v24 = vadd.f32 %v3806_v0, %v3648_v10  ;;  %v3808_v20 = vpop.f32.mrb[211].mxu0  ;;  %4219 = vmatpush1.bf16.msra.mxu0 %v4047_v41  ;;  %v3986_v8 = vmax.f32 %v3803_v57, 0.0 }
 0x87a   :  { %v3918_v49 = vadd.f32 %v3917_v15, %v3643_v44  ;;  %v3919_v40 = vpop.f32.mrb[210].mxu1  ;;  %4331 = vmatprep.subr.bf16.mxu1 %v4050_v17  ;;  %v3809_v60 = vadd.f32 %v3808_v20, %v3648_v10  ;;  %v3987_v62 = vmax.f32 %v3805_v36, 0.0  ;;  %v3658_v2 = vpop.permute.xlu1 %3657 }
 0x87b   :  { %v3920_v52 = vadd.f32 %v3919_v40, %v3648_v10  ;;  %v3921_v16 = vpop.f32.mrb[211].mxu1  ;;  %4332 = vmatpush1.bf16.msra.mxu1 %v4049_v6  ;;  %v3990_v48 = vmax.f32 %v3807_v24, 0.0  ;;  %v3988_v31 = vmax.f32 %v3916_v28, 0.0  ;;  %v3653_v14 = vpop.permute.xlu0 %3652 }
 0x87c   :  { %v3922_v1 = vadd.f32 %v3921_v16, %v3648_v10  ;;  %v3991_v43 = vmax.f32 %v3809_v60, 0.0  ;;  %v3989_v63 = vmax.f32 %v3918_v49, 0.0 }
 0x87d   :  { %v3992_v38 = vmax.f32 %v3920_v52, 0.0  ;;  %v4051_v50 = vpack.c.bf16 %v3990_v48, %v3986_v8 }
 0x87e   :  { %v3993_v44 = vmax.f32 %v3922_v1, 0.0  ;;  %v4052_v17 = vpack.c.bf16 %v3991_v43, %v3987_v62  ;;  %v3812_v15 = vpop.f32.mrb[212].mxu0 }
 0x87f   :  { %v4053_v56 = vpack.c.bf16 %v3992_v38, %v3988_v31  ;;  %v3813_v0 = vadd.f32 %v3812_v15, %v3653_v14  ;;  %v3814_v20 = vpop.f32.mrb[213].mxu0 }
 0x880   :  { %v4054_v41 = vpack.c.bf16 %v3993_v44, %v3989_v63  ;;  %v3925_v40 = vpop.f32.mrb[212].mxu1  ;;  %v3815_v57 = vadd.f32 %v3814_v20, %v3653_v14  ;;  %v3816_v10 = vpop.f32.mrb[214].mxu0  ;;  %4220 = vmatprep.subr.bf16.mxu0 %v4052_v17 }
 0x881   :  { %v3926_v6 = vadd.f32 %v3925_v40, %v3653_v14  ;;  %v3927_v24 = vpop.f32.mrb[213].mxu1  ;;  %v3817_v36 = vadd.f32 %v3816_v10, %v3658_v2  ;;  %v3818_v49 = vpop.f32.mrb[215].mxu0  ;;  %4221 = vmatpush1.bf16.msra.mxu0 %v4051_v50  ;;  %v3994_v48 = vmax.f32 %v3813_v0, 0.0 }
 0x882   :  { %v3928_v28 = vadd.f32 %v3927_v24, %v3653_v14  ;;  %v3929_v52 = vpop.f32.mrb[214].mxu1  ;;  %4333 = vmatprep.subr.bf16.mxu1 %v4054_v41  ;;  %v3819_v16 = vadd.f32 %v3818_v49, %v3658_v2  ;;  %v3995_v38 = vmax.f32 %v3815_v57, 0.0  ;;  %v3668_v44 = vpop.permute.xlu1 %3667 }
 0x883   :  { %v3930_v60 = vadd.f32 %v3929_v52, %v3658_v2  ;;  %v3931_v8 = vpop.f32.mrb[215].mxu1  ;;  %4334 = vmatpush1.bf16.msra.mxu1 %v4053_v56  ;;  %v3998_v1 = vmax.f32 %v3817_v36, 0.0  ;;  %v3996_v62 = vmax.f32 %v3926_v6, 0.0  ;;  %v3663_v40 = vpop.permute.xlu0 %3662 }
 0x884   :  { %v3932_v31 = vadd.f32 %v3931_v8, %v3658_v2  ;;  %v3999_v63 = vmax.f32 %v3819_v16, 0.0  ;;  %v3997_v15 = vmax.f32 %v3928_v28, 0.0 }
 0x885   :  { %v4000_v43 = vmax.f32 %v3930_v60, 0.0  ;;  %v4055_v17 = vpack.c.bf16 %v3998_v1, %v3994_v48 }
 0x886   :  { %v4001_v14 = vmax.f32 %v3932_v31, 0.0  ;;  %v4056_v41 = vpack.c.bf16 %v3999_v63, %v3995_v38  ;;  %v3822_v24 = vpop.f32.mrb[216].mxu0 }
 0x887   :  { %v4057_v20 = vpack.c.bf16 %v4000_v43, %v3996_v62  ;;  %v3823_v10 = vadd.f32 %v3822_v24, %v3663_v40  ;;  %v3824_v49 = vpop.f32.mrb[217].mxu0 }
 0x888   :  { %v4058_v50 = vpack.c.bf16 %v4001_v14, %v3997_v15  ;;  %v3935_v52 = vpop.f32.mrb[216].mxu1  ;;  %v3825_v0 = vadd.f32 %v3824_v49, %v3663_v40  ;;  %v3826_v2 = vpop.f32.mrb[218].mxu0  ;;  %4222 = vmatprep.subr.bf16.mxu0 %v4056_v41 }
 0x889   :  { %v3936_v56 = vadd.f32 %v3935_v52, %v3663_v40  ;;  %v3937_v36 = vpop.f32.mrb[217].mxu1  ;;  %v3827_v57 = vadd.f32 %v3826_v2, %v3668_v44  ;;  %v3828_v28 = vpop.f32.mrb[219].mxu0  ;;  %4223 = vmatpush1.bf16.msra.mxu0 %v4055_v17  ;;  %v4002_v1 = vmax.f32 %v3823_v10, 0.0 }
 0x88a   :  { %v3938_v6 = vadd.f32 %v3937_v36, %v3663_v40  ;;  %v3939_v60 = vpop.f32.mrb[218].mxu1  ;;  %4335 = vmatprep.subr.bf16.mxu1 %v4058_v50  ;;  %v3829_v8 = vadd.f32 %v3828_v28, %v3668_v44  ;;  %v4003_v43 = vmax.f32 %v3825_v0, 0.0  ;;  %v3678_v14 = vpop.permute.xlu1 %3677 }
 0x88b   :  { %v3940_v16 = vadd.f32 %v3939_v60, %v3668_v44  ;;  %v3941_v48 = vpop.f32.mrb[219].mxu1  ;;  %4336 = vmatpush1.bf16.msra.mxu1 %v4057_v20  ;;  %v4006_v31 = vmax.f32 %v3827_v57, 0.0  ;;  %v4004_v38 = vmax.f32 %v3936_v56, 0.0  ;;  %v3673_v52 = vpop.permute.xlu0 %3672 }
 0x88c   :  { %v3942_v62 = vadd.f32 %v3941_v48, %v3668_v44  ;;  %v4007_v15 = vmax.f32 %v3829_v8, 0.0  ;;  %v4005_v24 = vmax.f32 %v3938_v6, 0.0 }
 0x88d   :  { %v4008_v63 = vmax.f32 %v3940_v16, 0.0  ;;  %v4059_v41 = vpack.c.bf16 %v4006_v31, %v4002_v1 }
 0x88e   :  { %v4009_v40 = vmax.f32 %v3942_v62, 0.0  ;;  %v4060_v50 = vpack.c.bf16 %v4007_v15, %v4003_v43  ;;  %v3832_v36 = vpop.f32.mrb[220].mxu0 }
 0x88f   :  { %v4061_v49 = vpack.c.bf16 %v4008_v63, %v4004_v38  ;;  %v3833_v2 = vadd.f32 %v3832_v36, %v3673_v52  ;;  %v3834_v28 = vpop.f32.mrb[221].mxu0 }
 0x890   :  { %v4062_v17 = vpack.c.bf16 %v4009_v40, %v4005_v24  ;;  %v3945_v60 = vpop.f32.mrb[220].mxu1  ;;  %v3835_v10 = vadd.f32 %v3834_v28, %v3673_v52  ;;  %v3836_v44 = vpop.f32.mrb[222].mxu0  ;;  %4224 = vmatprep.subr.bf16.mxu0 %v4060_v50 }
 0x891   :  { %v3946_v20 = vadd.f32 %v3945_v60, %v3673_v52  ;;  %v3947_v57 = vpop.f32.mrb[221].mxu1  ;;  %v3837_v0 = vadd.f32 %v3836_v44, %v3678_v14  ;;  %v3838_v6 = vpop.f32.mrb[223].mxu0  ;;  %4225 = vmatpush1.bf16.msra.mxu0 %v4059_v41  ;;  %v4010_v31 = vmax.f32 %v3833_v2, 0.0  ;;  %v6301_v41 = vld [vmem:[%s10394_s5 + $0xc0] sm:$0xff]  }
 0x892   :  { %v3948_v56 = vadd.f32 %v3947_v57, %v3673_v52  ;;  %v3949_v16 = vpop.f32.mrb[222].mxu1  ;;  %4337 = vmatprep.subr.bf16.mxu1 %v4062_v17  ;;  %v3839_v48 = vadd.f32 %v3838_v6, %v3678_v14  ;;  %v4011_v63 = vmax.f32 %v3835_v10, 0.0  ;;  %v6304_v17 = vld [vmem:[%s10394_s5 + $0xd8] sm:$0xff]   ;;  %v6305_v2 = vld [vmem:[%s10394_s5 + $0xe0] sm:$0xff]   ;;  %v6307_v10 = vld [vmem:[%s10394_s5 + $0xf0] sm:$0xff]   ;;  %v4092_v44 = vpop.permute.xlu1 %4091 }
 0x893   :  { %v3950_v8 = vadd.f32 %v3949_v16, %v3678_v14  ;;  %v3951_v1 = vpop.f32.mrb[223].mxu1  ;;  %4338 = vmatpush1.bf16.msra.mxu1 %v4061_v49  ;;  %v4014_v62 = vmax.f32 %v3837_v0, 0.0  ;;  %v4012_v43 = vmax.f32 %v3946_v20, 0.0  ;;  %v6303_v49 = vld [vmem:[%s10394_s5 + $0xd0] sm:$0xff]   ;;  %v6306_v20 = vld [vmem:[%s10394_s5 + $0xe8] sm:$0xff]   ;;  %v6308_v57 = vld [vmem:[%s10394_s5 + $0xf8] sm:$0xff]  }
 0x894   :  { %v3952_v38 = vadd.f32 %v3951_v1, %v3678_v14  ;;  %v4015_v24 = vmax.f32 %v3839_v48, 0.0  ;;  %v4013_v40 = vmax.f32 %v3948_v56, 0.0  ;;  %v6302_v14 = vld [vmem:[%s10394_s5 + $0xc8] sm:$0xff]   ;;  %v4087_v56 = vpop.permute.xlu0 %4086 }
 0x895   :  { %v4016_v15 = vmax.f32 %v3950_v8, 0.0  ;;  %v4063_v36 = vpack.c.bf16 %v4014_v62, %v4010_v31 }
 0x896   :  { %v4017_v50 = vmax.f32 %v3952_v38, 0.0  ;;  %v4064_v60 = vpack.c.bf16 %v4015_v24, %v4011_v63  ;;  %v11496_v38 = vmax.f32 %v9049_v32, 0.0 }
 0x897   :  { %v4065_v52 = vpack.c.bf16 %v4016_v15, %v4012_v43 }
 0x898   :  { %v4066_v28 = vpack.c.bf16 %v4017_v50, %v4013_v40  ;;  %4226 = vmatprep.subr.bf16.mxu0 %v4064_v60 }
 0x899   :  { %4227 = vmatpush1.bf16.msra.mxu0 %v4063_v36  ;;  %v11497_v36 = vmax.f32 %v9053_v3, 0.0  ;;  %v11501_v3 = vmax.f32 %v9069_v19, 0.0 }
 0x89a   :  { %4339 = vmatprep.subr.bf16.mxu1 %v4066_v28 }
 0x89b   :  { %4340 = vmatpush1.bf16.msra.mxu1 %v4065_v52  ;;  %v11498_v52 = vmax.f32 %v9057_v18, 0.0  ;;  %v11502_v18 = vmax.f32 %v9073_v12, 0.0 }
 0x89c   :  { %4245 = vmatmul.mubr.bf16.vlgmr.msra.gmra.mrb[224].mxu0 %v6301_v41 }
 0x89d   :  { %4254 = vmatprep.mubr.bf16.mxu0 %v10978_v5 }
 0x89e   :  { %4358 = vmatmul.mubr.bf16.vlgmr.msra.gmra.mrb[224].mxu1 %v6301_v41 }
 0x89f   :  { %4367 = vmatprep.mubr.bf16.mxu1 %v10978_v5 }
 0x8a4   :  { %4255 = vmatmul.mubr.bf16.gmra.mrb[228].mxu0 %v6302_v14 }
 0x8a5   :  { %4264 = vmatprep.mubr.bf16.mxu0 %v10978_v5 }
 0x8a6   :  { %4368 = vmatmul.mubr.bf16.gmra.mrb[228].mxu1 %v6302_v14 }
 0x8a7   :  { %4377 = vmatprep.mubr.bf16.mxu1 %v10978_v5 }
 0x8ac   :  { %4265 = vmatmul.mubr.bf16.gmra.mrb[232].mxu0 %v6303_v49 }
 0x8ad   :  { %4274 = vmatprep.mubr.bf16.mxu0 %v10978_v5 }
 0x8ae   :  { %4378 = vmatmul.mubr.bf16.gmra.mrb[232].mxu1 %v6303_v49  ;;  %v11499_v49 = vmax.f32 %v9061_v39, 0.0 }
 0x8af   :  { %4387 = vmatprep.mubr.bf16.mxu1 %v10978_v5 }
 0x8b4   :  { %4275 = vmatmul.mubr.bf16.gmra.mrb[236].mxu0 %v6304_v17 }
 0x8b5   :  { %4284 = vmatprep.mubr.bf16.mxu0 %v10978_v5 }
 0x8b6   :  { %4388 = vmatmul.mubr.bf16.gmra.mrb[236].mxu1 %v6304_v17  ;;  %v11500_v17 = vmax.f32 %v9065_v35, 0.0  ;;  %v4097_v35 = vpop.permute.xlu0 %4096 }
 0x8b7   :  { %4397 = vmatprep.mubr.bf16.mxu1 %v10978_v5 }
 0x8bc   :  { %4285 = vmatmul.mubr.bf16.gmra.mrb[240].mxu0 %v6305_v2 }
 0x8bd   :  { %4294 = vmatprep.mubr.bf16.mxu0 %v10978_v5 }
 0x8be   :  { %4398 = vmatmul.mubr.bf16.gmra.mrb[240].mxu1 %v6305_v2 }
 0x8bf   :  { %4407 = vmatprep.mubr.bf16.mxu1 %v10978_v5 }
 0x8c4   :  { %4295 = vmatmul.mubr.bf16.gmra.mrb[244].mxu0 %v6306_v20 }
 0x8c5   :  { %4304 = vmatprep.mubr.bf16.mxu0 %v10978_v5 }
 0x8c6   :  { %4408 = vmatmul.mubr.bf16.gmra.mrb[244].mxu1 %v6306_v20 }
 0x8c7   :  { %4417 = vmatprep.mubr.bf16.mxu1 %v10978_v5 }
 0x8cc   :  { %4305 = vmatmul.mubr.bf16.gmra.mrb[248].mxu0 %v6307_v10 }
 0x8cd   :  { %4314 = vmatprep.mubr.bf16.mxu0 %v10978_v5 }
 0x8ce   :  { %4418 = vmatmul.mubr.bf16.gmra.mrb[248].mxu1 %v6307_v10 }
 0x8cf   :  { %4427 = vmatprep.mubr.bf16.mxu1 %v10978_v5 }
 0x8d4   :  { %4315 = vmatmul.mubr.bf16.gmra.mrb[252].mxu0 %v6308_v57 }
 0x8d5   :  { %4792 = vmatprep.mubr.bf16.mxu0 %v10978_v5 }
 0x8d6   :  { %4428 = vmatmul.mubr.bf16.gmra.mrb[252].mxu1 %v6308_v57 }
 0x8d7   :  { %4905 = vmatprep.mubr.bf16.mxu1 %v10978_v5 }
 0x96f   :  { %v4246_v0 = vpop.f32.mrb[224].mxu0 }
 0x970   :  { %v4247_v16 = vadd.f32 %v4246_v0, %v4087_v56  ;;  %v4248_v8 = vpop.f32.mrb[225].mxu0 }
 0x971   :  { %v4359_v6 = vpop.f32.mrb[224].mxu1  ;;  %v4249_v1 = vadd.f32 %v4248_v8, %v4087_v56  ;;  %v4250_v62 = vpop.f32.mrb[226].mxu0 }
 0x972   :  { %v4360_v48 = vadd.f32 %v4359_v6, %v4087_v56  ;;  %v4361_v31 = vpop.f32.mrb[225].mxu1  ;;  %v9577_v43 = vadd.f32 %v4247_v16, %v11496_v38  ;;  %v4251_v15 = vadd.f32 %v4250_v62, %v4092_v44  ;;  %v4252_v40 = vpop.f32.mrb[227].mxu0  ;;  %v11503_v16 = vmax.f32 %v9079_v27, 0.0 }
 0x973   :  { %v4362_v63 = vadd.f32 %v4361_v31, %v4087_v56  ;;  %v4363_v24 = vpop.f32.mrb[226].mxu1  ;;  %v9585_v60 = vadd.f32 %v4249_v1, %v11498_v52  ;;  %v4253_v41 = vadd.f32 %v4252_v40, %v4092_v44  ;;  %v4102_v56 = vpop.permute.xlu1 %4101 }
 0x974   :  { %v9581_v50 = vadd.f32 %v4360_v48, %v11497_v36  ;;  %v4364_v28 = vadd.f32 %v4363_v24, %v4092_v44  ;;  %v4365_v14 = vpop.f32.mrb[227].mxu1  ;;  %v9593_v2 = vadd.f32 %v4251_v15, %v11500_v17  ;;  %v10867_v0 = vmax.f32 %v9577_v43, 0.0 }
 0x975   :  { %v9589_v32 = vadd.f32 %v4362_v63, %v11499_v49  ;;  %v4366_v20 = vadd.f32 %v4365_v14, %v4092_v44  ;;  %v9601_v57 = vadd.f32 %v4253_v41, %v11502_v18  ;;  %v10861_v19 = vmax.f32 %v9585_v60, 0.0 }
 0x976   :  { %v9597_v10 = vadd.f32 %v4364_v28, %v11501_v3  ;;  %v10857_v39 = vmax.f32 %v9593_v2, 0.0  ;;  %v10866_v44 = vmax.f32 %v9581_v50, 0.0  ;;  %v11504_v41 = vmax.f32 %v9101_v22, 0.0 }
 0x977   :  { %v9607_v6 = vadd.f32 %v4366_v20, %v11503_v16  ;;  %v10834_v12 = vmax.f32 %v9601_v57, 0.0  ;;  %v4256_v48 = vpop.f32.mrb[228].mxu0  ;;  %v10860_v1 = vmax.f32 %v9589_v32, 0.0  ;;  %v11505_v16 = vmax.f32 %v9109_v45, 0.0 }
 0x978   :  { %v10838_v8 = vmax.f32 %v9597_v10, 0.0  ;;  %v4583_v31 = vpack.c.bf16 %v10857_v39, %v10867_v0  ;;  %v4257_v62 = vadd.f32 %v4256_v48, %v4097_v35  ;;  %v4258_v63 = vpop.f32.mrb[229].mxu0  ;;  %v11509_v45 = vmax.f32 %v9125_v34, 0.0 }
 0x979   :  { %v10835_v27 = vmax.f32 %v9607_v6, 0.0  ;;  %v4369_v38 = vpop.f32.mrb[228].mxu1  ;;  %v4259_v40 = vadd.f32 %v4258_v63, %v4097_v35  ;;  %v4260_v52 = vpop.f32.mrb[230].mxu0  ;;  %v4584_v28 = vpack.c.bf16 %v10834_v12, %v10861_v19 }
 0x97a   :  { %v4585_v15 = vpack.c.bf16 %v10838_v8, %v10866_v44  ;;  %v4370_v24 = vadd.f32 %v4369_v38, %v4097_v35  ;;  %v4371_v36 = vpop.f32.mrb[229].mxu1  ;;  %v9629_v14 = vadd.f32 %v4257_v62, %v11504_v41  ;;  %v4261_v17 = vadd.f32 %v4260_v52, %v4102_v56  ;;  %v4262_v3 = vpop.f32.mrb[231].mxu0 }
 0x97b   :  { %v4372_v49 = vadd.f32 %v4371_v36, %v4097_v35  ;;  %v4373_v20 = vpop.f32.mrb[230].mxu1  ;;  %v4586_v18 = vpack.c.bf16 %v10835_v27, %v10860_v1  ;;  %v11506_v38 = vmax.f32 %v9113_v21, 0.0  ;;  %v4263_v62 = vadd.f32 %v4262_v3, %v4102_v56  ;;  %4760 = vmatprep.subr.bf16.mxu0 %v4584_v28  ;;  %v4112_v28 = vpop.permute.xlu1 %4111 }
 0x97c   :  { %v9637_v48 = vadd.f32 %v4370_v24, %v11505_v16  ;;  %v4374_v22 = vadd.f32 %v4373_v20, %v4102_v56  ;;  %v4375_v41 = vpop.f32.mrb[231].mxu1  ;;  %v11507_v35 = vmax.f32 %v9117_v55, 0.0  ;;  %v11508_v52 = vmax.f32 %v9121_v26, 0.0  ;;  %4761 = vmatpush1.bf16.msra.mxu0 %v4583_v31 }
 0x97d   :  { %v9641_v63 = vadd.f32 %v4259_v40, %v11506_v38  ;;  %v4376_v27 = vadd.f32 %v4375_v41, %v4102_v56  ;;  %4873 = vmatprep.subr.bf16.mxu1 %v4586_v18  ;;  %v11510_v24 = vmax.f32 %v9129_v58, 0.0  ;;  %v10837_v55 = vmax.f32 %v9629_v14, 0.0  ;;  %v4107_v56 = vpop.permute.xlu0 %4106 }
 0x97e   :  { %v9645_v36 = vadd.f32 %v4372_v49, %v11507_v35  ;;  %v9649_v12 = vadd.f32 %v4261_v17, %v11508_v52  ;;  %v9653_v21 = vadd.f32 %v4374_v22, %v11509_v45  ;;  %4874 = vmatpush1.bf16.msra.mxu1 %v4585_v15  ;;  %v11511_v26 = vmax.f32 %v9135_v4, 0.0 }
 0x97f   :  { %v9657_v40 = vadd.f32 %v4263_v62, %v11510_v24  ;;  %v10840_v31 = vmax.f32 %v9637_v48, 0.0  ;;  %v10842_v34 = vmax.f32 %v9641_v63, 0.0  ;;  %v4266_v3 = vpop.f32.mrb[232].mxu0  ;;  %v11512_v24 = vmax.f32 %v9157_v46, 0.0 }
 0x980   :  { %v10836_v49 = vmax.f32 %v9649_v12, 0.0  ;;  %v9663_v17 = vadd.f32 %v4376_v27, %v11511_v26  ;;  %v10839_v20 = vmax.f32 %v9653_v21, 0.0  ;;  %v10846_v15 = vmax.f32 %v9645_v36, 0.0  ;;  %v4268_v38 = vpop.f32.mrb[233].mxu0 }
 0x981   :  { %v10841_v58 = vmax.f32 %v9657_v40, 0.0  ;;  %v4267_v27 = vadd.f32 %v4266_v3, %v4107_v56  ;;  %v4379_v16 = vpop.f32.mrb[232].mxu1  ;;  %v4269_v41 = vadd.f32 %v4268_v38, %v4107_v56  ;;  %v4270_v52 = vpop.f32.mrb[234].mxu0  ;;  %v11513_v38 = vmax.f32 %v9165_v25, 0.0 }
 0x982   :  { %v4587_v18 = vpack.c.bf16 %v10836_v49, %v10837_v55  ;;  %v10843_v4 = vmax.f32 %v9663_v17, 0.0  ;;  %v4589_v22 = vpack.c.bf16 %v10839_v20, %v10840_v31  ;;  %v4380_v62 = vadd.f32 %v4379_v16, %v4107_v56  ;;  %v4381_v35 = vpop.f32.mrb[233].mxu1  ;;  %v4272_v8 = vpop.f32.mrb[235].mxu0 }
 0x983   :  { %v4588_v45 = vpack.c.bf16 %v10841_v58, %v10842_v34  ;;  %v9685_v26 = vadd.f32 %v4267_v27, %v11512_v24  ;;  %v4382_v3 = vadd.f32 %v4381_v35, %v4107_v56  ;;  %v4271_v49 = vadd.f32 %v4270_v52, %v4112_v28  ;;  %v4383_v55 = vpop.f32.mrb[234].mxu1 }
 0x984   :  { %v4590_v16 = vpack.c.bf16 %v10843_v4, %v10846_v15  ;;  %v9693_v20 = vadd.f32 %v4380_v62, %v11513_v38  ;;  %v11514_v31 = vmax.f32 %v9169_v47, 0.0  ;;  %v4384_v46 = vadd.f32 %v4383_v55, %v4112_v28  ;;  %v4385_v24 = vpop.f32.mrb[235].mxu1 }
 0x985   :  { %v4273_v27 = vadd.f32 %v4272_v8, %v4112_v28  ;;  %4762 = vmatprep.subr.bf16.mxu0 %v4588_v45  ;;  %v11515_v56 = vmax.f32 %v9173_v9, 0.0  ;;  %v11516_v52 = vmax.f32 %v9177_v11, 0.0  ;;  %v4386_v4 = vadd.f32 %v4385_v24, %v4112_v28  ;;  %v4117_v28 = vpop.permute.xlu0 %4116 }
 0x986   :  { %v9697_v58 = vadd.f32 %v4269_v41, %v11514_v31  ;;  %4875 = vmatprep.subr.bf16.mxu1 %v4590_v16  ;;  %4763 = vmatpush1.bf16.msra.mxu0 %v4587_v18  ;;  %v11517_v25 = vmax.f32 %v9181_v30, 0.0  ;;  %v11518_v55 = vmax.f32 %v9185_v53, 0.0  ;;  %v4122_v31 = vpop.permute.xlu1 %4121  ;;  %v10845_v9 = vmax.f32 %v9685_v26, 0.0 }
 0x987   :  { %v9701_v35 = vadd.f32 %v4382_v3, %v11515_v56  ;;  %v9705_v34 = vadd.f32 %v4271_v49, %v11516_v52  ;;  %4876 = vmatpush1.bf16.msra.mxu1 %v4589_v22  ;;  %v11519_v11 = vmax.f32 %v9191_v13, 0.0  ;;  %v10848_v18 = vmax.f32 %v9693_v20, 0.0  ;;  %v4276_v45 = vpop.f32.mrb[236].mxu0 }
 0x988   :  { %v9709_v47 = vadd.f32 %v4384_v46, %v11517_v25  ;;  %v9713_v8 = vadd.f32 %v4273_v27, %v11518_v55  ;;  %v10850_v30 = vmax.f32 %v9697_v58, 0.0  ;;  %v4278_v38 = vpop.f32.mrb[237].mxu0  ;;  %v11520_v55 = vmax.f32 %v9213_v33, 0.0 }
 0x989   :  { %v10844_v62 = vmax.f32 %v9705_v34, 0.0  ;;  %v9719_v49 = vadd.f32 %v4386_v4, %v11519_v11  ;;  %v10854_v22 = vmax.f32 %v9701_v35, 0.0  ;;  %v4277_v4 = vadd.f32 %v4276_v45, %v4117_v28  ;;  %v4389_v16 = vpop.f32.mrb[236].mxu1  ;;  %v4280_v52 = vpop.f32.mrb[238].mxu0 }
 0x98a   :  { %v10847_v41 = vmax.f32 %v9709_v47, 0.0  ;;  %v10849_v53 = vmax.f32 %v9713_v8, 0.0  ;;  %v4390_v27 = vadd.f32 %v4389_v16, %v4117_v28  ;;  %v4279_v24 = vadd.f32 %v4278_v38, %v4117_v28  ;;  %v4391_v56 = vpop.f32.mrb[237].mxu1  ;;  %v4282_v15 = vpop.f32.mrb[239].mxu0 }
 0x98b   :  { %v4591_v3 = vpack.c.bf16 %v10844_v62, %v10845_v9  ;;  %v10851_v13 = vmax.f32 %v9719_v49, 0.0  ;;  %v9741_v11 = vadd.f32 %v4277_v4, %v11520_v55  ;;  %v4392_v45 = vadd.f32 %v4391_v56, %v4117_v28  ;;  %v4393_v9 = vpop.f32.mrb[238].mxu1 }
 0x98c   :  { %v4593_v46 = vpack.c.bf16 %v10847_v41, %v10848_v18  ;;  %v4592_v25 = vpack.c.bf16 %v10849_v53, %v10850_v30  ;;  %v4281_v62 = vadd.f32 %v4280_v52, %v4122_v31  ;;  %v11521_v38 = vmax.f32 %v9221_v59, 0.0  ;;  %v4395_v55 = vpop.f32.mrb[239].mxu1 }
 0x98d   :  { %v4594_v16 = vpack.c.bf16 %v10851_v13, %v10854_v22  ;;  %v11522_v18 = vmax.f32 %v9225_v51, 0.0  ;;  %v4394_v33 = vadd.f32 %v4393_v9, %v4122_v31  ;;  %v4283_v4 = vadd.f32 %v4282_v15, %v4122_v31 }
 0x98e   :  { %v9749_v41 = vadd.f32 %v4390_v27, %v11521_v38  ;;  %4764 = vmatprep.subr.bf16.mxu0 %v4592_v25  ;;  %v11523_v28 = vmax.f32 %v9229_v42, 0.0  ;;  %v11524_v52 = vmax.f32 %v9233_v61, 0.0  ;;  %v4396_v13 = vadd.f32 %v4395_v55, %v4122_v31  ;;  %v4127_v31 = vpop.permute.xlu0 %4126 }
 0x98f   :  { %v9753_v53 = vadd.f32 %v4279_v24, %v11522_v18  ;;  %4877 = vmatprep.subr.bf16.mxu1 %v4594_v16  ;;  %4765 = vmatpush1.bf16.msra.mxu0 %v4591_v3  ;;  %v11525_v59 = vmax.f32 %v9237_v23, 0.0  ;;  %v11526_v9 = vmax.f32 %v9241_v54, 0.0  ;;  %v4132_v18 = vpop.permute.xlu1 %4131  ;;  %v10853_v42 = vmax.f32 %v9741_v11, 0.0  ;;  %v4286_v25 = vpop.f32.mrb[240].mxu0 }
 0x990   :  { %v9757_v56 = vadd.f32 %v4392_v45, %v11523_v28  ;;  %v9761_v30 = vadd.f32 %v4281_v62, %v11524_v52  ;;  %4878 = vmatpush1.bf16.msra.mxu1 %v4593_v46  ;;  %v11528_v61 = vmax.f32 %v9247_v29, 0.0  ;;  %v10856_v3 = vmax.f32 %v9749_v41, 0.0  ;;  %v4288_v38 = vpop.f32.mrb[241].mxu0 }
 0x991   :  { %v9765_v51 = vadd.f32 %v4394_v33, %v11525_v59  ;;  %v9769_v15 = vadd.f32 %v4283_v4, %v11526_v9  ;;  %v10859_v23 = vmax.f32 %v9753_v53, 0.0  ;;  %v4399_v16 = vpop.f32.mrb[240].mxu1  ;;  %v4289_v55 = vadd.f32 %v4288_v38, %v4127_v31  ;;  %v4290_v52 = vpop.f32.mrb[242].mxu0 }
 0x992   :  { %v10852_v27 = vmax.f32 %v9761_v30, 0.0  ;;  %v9775_v62 = vadd.f32 %v4396_v13, %v11528_v61  ;;  %v10863_v46 = vmax.f32 %v9757_v56, 0.0  ;;  %v4287_v13 = vadd.f32 %v4286_v25, %v4127_v31  ;;  %v4401_v28 = vpop.f32.mrb[241].mxu1  ;;  %v4292_v22 = vpop.f32.mrb[243].mxu0 }
 0x993   :  { %11527 = vst [vmem:[#allocation11_spill] sm:$0xff] %v9769_v15  ;;  %v10855_v24 = vmax.f32 %v9765_v51, 0.0  ;;  %v10858_v54 = vmax.f32 %v9769_v15, 0.0  ;;  %v4400_v4 = vadd.f32 %v4399_v16, %v4127_v31  ;;  %v11530_v9 = vmax.f32 %v9269_v7, 0.0 }
 0x994   :  { %11529 = vst [vmem:[#allocation91_spill] sm:$0xff] %v9775_v62  ;;  %v4595_v45 = vpack.c.bf16 %v10852_v27, %v10853_v42  ;;  %v10862_v29 = vmax.f32 %v9775_v62, 0.0  ;;  %v4402_v25 = vadd.f32 %v4401_v28, %v4127_v31  ;;  %v4291_v27 = vadd.f32 %v4290_v52, %v4132_v18  ;;  %v4403_v42 = vpop.f32.mrb[242].mxu1  ;;  %v11537_v31 = vld [vmem:[#allocation66_spill] sm:$0xff] }
 0x995   :  { %v4597_v33 = vpack.c.bf16 %v10855_v24, %v10856_v3  ;;  %v4596_v59 = vpack.c.bf16 %v10858_v54, %v10859_v23  ;;  %v9797_v61 = vadd.f32 %v4287_v13, %v11530_v9  ;;  %v11532_v38 = vmax.f32 %v9277_v37, 0.0  ;;  %v11534_v3 = vld [vmem:[#allocation65_spill] sm:$0xff]  ;;  %v4405_v9 = vpop.f32.mrb[243].mxu1  ;;  %v11540_v23 = vld [vmem:[#allocation67_spill] sm:$0xff]  ;;  %v11543_v37 = vld [vmem:[#allocation68_spill] sm:$0xff] }
 0x996   :  { %v4598_v16 = vpack.c.bf16 %v10862_v29, %v10863_v46  ;;  %v11535_v39 = vmax.f32 %v11534_v3, 0.0  ;;  %v4404_v7 = vadd.f32 %v4403_v42, %v4132_v18  ;;  %v4293_v13 = vadd.f32 %v4292_v22, %v4132_v18 }
 0x997   :  { %11531 = vst [vmem:[#allocation13_spill] sm:$0xff] %v9797_v61  ;;  %v9805_v24 = vadd.f32 %v4400_v4, %v11532_v38  ;;  %4766 = vmatprep.subr.bf16.mxu0 %v4596_v59  ;;  %v11538_v28 = vmax.f32 %v11537_v31, 0.0  ;;  %v11541_v1 = vmax.f32 %v11540_v23, 0.0  ;;  %v4406_v29 = vadd.f32 %v4405_v9, %v4132_v18  ;;  %v11549_v23 = vld [vmem:[#allocation70_spill] sm:$0xff]  ;;  %v4137_v18 = vpop.permute.xlu0 %4136 }
 0x998   :  { %v9809_v54 = vadd.f32 %v4289_v55, %v11535_v39  ;;  %4879 = vmatprep.subr.bf16.mxu1 %v4598_v16  ;;  %4767 = vmatpush1.bf16.msra.mxu0 %v4595_v45  ;;  %v11544_v4 = vmax.f32 %v11543_v37, 0.0  ;;  %v11546_v39 = vld [vmem:[#allocation69_spill] sm:$0xff]  ;;  %v4142_v55 = vpop.permute.xlu1 %4141  ;;  %v10865_v59 = vmax.f32 %v9797_v61, 0.0 }
 0x999   :  { %11533 = vst [vmem:[#allocation92_spill] sm:$0xff] %v9805_v24  ;;  %v9813_v52 = vadd.f32 %v4402_v25, %v11538_v28  ;;  %v9817_v19 = vadd.f32 %v4291_v27, %v11541_v1  ;;  %v11547_v42 = vmax.f32 %v11546_v39, 0.0  ;;  %4880 = vmatpush1.bf16.msra.mxu1 %v4597_v33  ;;  %v11550_v1 = vmax.f32 %v11549_v23, 0.0  ;;  %v4409_v28 = vpop.f32.mrb[244].mxu1 }
 0x99a   :  { %11536 = vst [vmem:[#allocation8_spill] sm:$0xff] %v9809_v54  ;;  %v9821_v3 = vadd.f32 %v4404_v7, %v11544_v4  ;;  %v10870_v45 = vmax.f32 %v9805_v24, 0.0  ;;  %v10875_v16 = vmax.f32 %v9809_v54, 0.0  ;;  %v4410_v39 = vadd.f32 %v4409_v28, %v4137_v18  ;;  %v4411_v23 = vpop.f32.mrb[245].mxu1  ;;  %v11560_v54 = vld [vmem:[#allocation73_spill] sm:$0xff] }
 0x99b   :  { %11539 = vst [vmem:[#allocation10_spill] sm:$0xff] %v9813_v52  ;;  %11542 = vst [vmem:[#allocation55_spill] sm:$0xff] %v9817_v19  ;;  %v9825_v22 = vadd.f32 %v4293_v13, %v11547_v42  ;;  %v10864_v25 = vmax.f32 %v9817_v19, 0.0  ;;  %v9831_v27 = vadd.f32 %v4406_v29, %v11550_v1  ;;  %v4296_v13 = vpop.f32.mrb[244].mxu0  ;;  %v4413_v29 = vpop.f32.mrb[246].mxu1 }
 0x99c   :  { %11545 = vst [vmem:[#allocation18_spill] sm:$0xff] %v9821_v3  ;;  %v10869_v38 = vmax.f32 %v9821_v3, 0.0  ;;  %v4297_v31 = vadd.f32 %v4296_v13, %v4137_v18  ;;  %v4298_v37 = vpop.f32.mrb[245].mxu0  ;;  %v4412_v13 = vadd.f32 %v4411_v23, %v4137_v18  ;;  %v11555_v3 = vmax.f32 %v9813_v52, 0.0 }
 0x99d   :  { %11548 = vst [vmem:[#allocation56_spill] sm:$0xff] %v9825_v22  ;;  %11551 = vst [vmem:[#allocation20_spill] sm:$0xff] %v9831_v27  ;;  %v10874_v7 = vmax.f32 %v9825_v22, 0.0  ;;  %v4599_v9 = vpack.c.bf16 %v10864_v25, %v10865_v59  ;;  %v4299_v42 = vadd.f32 %v4298_v37, %v4137_v18  ;;  %v4300_v1 = vpop.f32.mrb[246].mxu0  ;;  %v11552_v25 = vld [vmem:[#allocation71_spill] sm:$0xff]  ;;  %v11556_v28 = vmax.f32 %v9831_v27, 0.0 }
 0x99e   :  { %v4601_v4 = vpack.c.bf16 %v10869_v38, %v10870_v45  ;;  %v11553_v59 = vmax.f32 %v11552_v25, 0.0  ;;  %v4301_v0 = vadd.f32 %v4300_v1, %v4142_v55  ;;  %v4302_v33 = vpop.f32.mrb[247].mxu0  ;;  %v11557_v38 = vld [vmem:[#allocation72_spill] sm:$0xff]  ;;  %v11561_v22 = vmax.f32 %v11560_v54, 0.0  ;;  %v11563_v18 = vld [vmem:[#allocation74_spill] sm:$0xff] }
 0x99f   :  { %v4600_v46 = vpack.c.bf16 %v10874_v7, %v10875_v16  ;;  %v4602_v37 = vpack.c.bf16 %v11556_v28, %v11555_v3  ;;  %v11558_v45 = vmax.f32 %v11557_v38, 0.0  ;;  %v4414_v25 = vadd.f32 %v4413_v29, %v4142_v55  ;;  %v11566_v16 = vld [vmem:[#allocation75_spill] sm:$0xff] }
 0x9a0   :  { %v9853_v44 = vadd.f32 %v4297_v31, %v11553_v59  ;;  %v9865_v7 = vadd.f32 %v4299_v42, %v11561_v22  ;;  %v4303_v59 = vadd.f32 %v4302_v33, %v4142_v55  ;;  %v4415_v31 = vpop.f32.mrb[247].mxu1  ;;  %v11564_v23 = vmax.f32 %v11563_v18, 0.0  ;;  %v11572_v22 = vld [vmem:[#allocation77_spill] sm:$0xff] }
 0x9a1   :  { %v9861_v19 = vadd.f32 %v4410_v39, %v11558_v45  ;;  %4768 = vmatprep.subr.bf16.mxu0 %v4600_v46  ;;  %v11567_v52 = vmax.f32 %v11566_v16, 0.0  ;;  %v4416_v3 = vadd.f32 %v4415_v31, %v4142_v55  ;;  %4881 = vmatprep.subr.bf16.mxu1 %v4602_v37  ;;  %v11569_v45 = vld [vmem:[#allocation76_spill] sm:$0xff]  ;;  %v11573_v29 = vmax.f32 %v11572_v22, 0.0  ;;  %v4152_v46 = vpop.permute.xlu1 %4151  ;;  %v11575_v16 = vld [vmem:[#allocation78_spill] sm:$0xff]  ;;  %v4147_v55 = vpop.permute.xlu0 %4146 }
 0x9a2   :  { %11554 = vst [vmem:[#allocation14_spill] sm:$0xff] %v9853_v44  ;;  %11562 = vst [vmem:[#allocation16_spill] sm:$0xff] %v9865_v7  ;;  %v9869_v1 = vadd.f32 %v4412_v13, %v11564_v23  ;;  %4769 = vmatpush1.bf16.msra.mxu0 %v4599_v9  ;;  %v11570_v38 = vmax.f32 %v11569_v45, 0.0  ;;  %4882 = vmatpush1.bf16.msra.mxu1 %v4601_v4  ;;  %v10879_v39 = vmax.f32 %v9853_v44, 0.0  ;;  %v10889_v13 = vmax.f32 %v9865_v7, 0.0  ;;  %v4419_v23 = vpop.f32.mrb[248].mxu1 }
 0x9a3   :  { %11559 = vst [vmem:[#allocation93_spill] sm:$0xff] %v9861_v19  ;;  %v9873_v27 = vadd.f32 %v4301_v0, %v11567_v52  ;;  %v9881_v33 = vadd.f32 %v4303_v59, %v11573_v29  ;;  %v11576_v0 = vmax.f32 %v11575_v16, 0.0  ;;  %v10884_v9 = vmax.f32 %v9861_v19, 0.0  ;;  %v4421_v29 = vpop.f32.mrb[249].mxu1  ;;  %v11586_v7 = vld [vmem:[#allocation81_spill] sm:$0xff] }
 0x9a4   :  { %11565 = vst [vmem:[#allocation94_spill] sm:$0xff] %v9869_v1  ;;  %v9877_v54 = vadd.f32 %v4414_v25, %v11570_v38  ;;  %v4306_v25 = vpop.f32.mrb[248].mxu0  ;;  %v4420_v38 = vadd.f32 %v4419_v23, %v4147_v55 }
 0x9a5   :  { %11568 = vst [vmem:[#allocation19_spill] sm:$0xff] %v9873_v27  ;;  %11574 = vst [vmem:[#allocation15_spill] sm:$0xff] %v9881_v33  ;;  %v10878_v42 = vmax.f32 %v9873_v27, 0.0  ;;  %v9887_v52 = vadd.f32 %v4416_v3, %v11576_v0  ;;  %v10888_v37 = vmax.f32 %v9881_v33, 0.0  ;;  %v4307_v18 = vadd.f32 %v4306_v25, %v4147_v55  ;;  %v4308_v3 = vpop.f32.mrb[249].mxu0  ;;  %v4423_v27 = vpop.f32.mrb[250].mxu1 }
 0x9a6   :  { %11571 = vst [vmem:[#allocation21_spill] sm:$0xff] %v9877_v54  ;;  %v10883_v28 = vmax.f32 %v9877_v54, 0.0  ;;  %v4309_v22 = vadd.f32 %v4308_v3, %v4147_v55  ;;  %v4310_v16 = vpop.f32.mrb[250].mxu0  ;;  %v4422_v25 = vadd.f32 %v4421_v29, %v4147_v55  ;;  %v11581_v54 = vmax.f32 %v9869_v1, 0.0  ;;  %v11589_v55 = vld [vmem:[#allocation82_spill] sm:$0xff] }
 0x9a7   :  { %11577 = vst [vmem:[#allocation17_spill] sm:$0xff] %v9887_v52  ;;  %v4603_v59 = vpack.c.bf16 %v10878_v42, %v10879_v39  ;;  %v4604_v0 = vpack.c.bf16 %v10888_v37, %v10889_v13  ;;  %v11578_v42 = vld [vmem:[#allocation79_spill] sm:$0xff]  ;;  %v4311_v4 = vadd.f32 %v4310_v16, %v4152_v46  ;;  %v4312_v19 = vpop.f32.mrb[251].mxu0  ;;  %v11582_v23 = vmax.f32 %v9887_v52, 0.0 }
 0x9a8   :  { %v4605_v45 = vpack.c.bf16 %v10883_v28, %v10884_v9  ;;  %v11579_v39 = vmax.f32 %v11578_v42, 0.0  ;;  %v11583_v28 = vld [vmem:[#allocation80_spill] sm:$0xff]  ;;  %v11587_v33 = vmax.f32 %v11586_v7, 0.0  ;;  %v4424_v42 = vadd.f32 %v4423_v27, %v4152_v46  ;;  %v11592_v13 = vld [vmem:[#allocation83_spill] sm:$0xff] }
 0x9a9   :  { %v4606_v3 = vpack.c.bf16 %v11582_v23, %v11581_v54  ;;  %v11584_v9 = vmax.f32 %v11583_v28, 0.0  ;;  %4770 = vmatprep.subr.bf16.mxu0 %v4604_v0  ;;  %v11590_v29 = vmax.f32 %v11589_v55, 0.0  ;;  %v11593_v1 = vmax.f32 %v11592_v13, 0.0  ;;  %v11601_v0 = vld [vmem:[#allocation86_spill] sm:$0xff] }
 0x9aa   :  { %v9909_v31 = vadd.f32 %v4307_v18, %v11579_v39  ;;  %v9921_v37 = vadd.f32 %v4309_v22, %v11587_v33  ;;  %v4313_v39 = vadd.f32 %v4312_v19, %v4152_v46  ;;  %v4425_v18 = vpop.f32.mrb[251].mxu1  ;;  %4771 = vmatpush1.bf16.msra.mxu0 %v4603_v59  ;;  %v11598_v33 = vld [vmem:[#allocation85_spill] sm:$0xff] }
 0x9ab   :  { %v9917_v44 = vadd.f32 %v4420_v38, %v11584_v9  ;;  %v9925_v16 = vadd.f32 %v4422_v25, %v11590_v29  ;;  %v9929_v52 = vadd.f32 %v4311_v4, %v11593_v1  ;;  %v4426_v54 = vadd.f32 %v4425_v18, %v4152_v46  ;;  %4883 = vmatprep.subr.bf16.mxu1 %v4606_v3  ;;  %v11595_v9 = vld [vmem:[#allocation84_spill] sm:$0xff]  ;;  %v4162_v38 = vpop.permute.xlu1 %4161  ;;  %v4157_v1 = vpop.permute.xlu0 %4156 }
 0x9ac   :  { %11580 = vst [vmem:[#allocation57_spill] sm:$0xff] %v9909_v31  ;;  %11588 = vst [vmem:[#allocation58_spill] sm:$0xff] %v9921_v37  ;;  %v11596_v28 = vmax.f32 %v11595_v9, 0.0  ;;  %v11599_v27 = vmax.f32 %v11598_v33, 0.0  ;;  %4884 = vmatpush1.bf16.msra.mxu1 %v4605_v45  ;;  %v11602_v25 = vmax.f32 %v11601_v0, 0.0  ;;  %v10894_v46 = vmax.f32 %v9909_v31, 0.0 }
 0x9ad   :  { %11585 = vst [vmem:[#allocation26_spill] sm:$0xff] %v9917_v44  ;;  %11591 = vst [vmem:[#allocation95_spill] sm:$0xff] %v9925_v16  ;;  %v10893_v22 = vmax.f32 %v9929_v52, 0.0  ;;  %v10899_v4 = vmax.f32 %v9921_v37, 0.0  ;;  %v4316_v3 = vpop.f32.mrb[252].mxu0  ;;  %v4429_v55 = vpop.f32.mrb[252].mxu1 }
 0x9ae   :  { %11594 = vst [vmem:[#allocation96_spill] sm:$0xff] %v9929_v52  ;;  %v9933_v7 = vadd.f32 %v4424_v42, %v11596_v28  ;;  %v9937_v19 = vadd.f32 %v4313_v39, %v11599_v27  ;;  %v9942_v13 = vadd.f32 %v4426_v54, %v11602_v25  ;;  %v10903_v42 = vmax.f32 %v9917_v44, 0.0  ;;  %v4318_v29 = vpop.f32.mrb[253].mxu0  ;;  %v4431_v33 = vpop.f32.mrb[253].mxu1 }
 0x9af   :  { %v4317_v18 = vadd.f32 %v4316_v3, %v4157_v1  ;;  %v4607_v54 = vpack.c.bf16 %v10893_v22, %v10894_v46  ;;  %v4430_v9 = vadd.f32 %v4429_v55, %v4157_v1  ;;  %v4319_v28 = vadd.f32 %v4318_v29, %v4157_v1  ;;  %v4320_v27 = vpop.f32.mrb[254].mxu0  ;;  %v4433_v45 = vpop.f32.mrb[254].mxu1  ;;  %v11606_v46 = vld [vmem:[#allocation87_spill] sm:$0xff] }
 0x9b0   :  { %11597 = vst [vmem:[#allocation28_spill] sm:$0xff] %v9933_v7  ;;  %11600 = vst [vmem:[#allocation22_spill] sm:$0xff] %v9937_v19  ;;  %v10902_v59 = vmax.f32 %v9933_v7, 0.0  ;;  %v10898_v23 = vmax.f32 %v9937_v19, 0.0  ;;  %v4432_v3 = vadd.f32 %v4431_v33, %v4157_v1  ;;  %v4321_v39 = vadd.f32 %v4320_v27, %v4162_v38  ;;  %v4322_v31 = vpop.f32.mrb[255].mxu0  ;;  %v11609_v19 = vld [vmem:[#allocation88_spill] sm:$0xff] }
 0x9b1   :  { %11603 = vst [vmem:[#allocation24_spill] sm:$0xff] %v9942_v13  ;;  %v11604_v22 = vmax.f32 %v9925_v16, 0.0  ;;  %v11605_v55 = vmax.f32 %v9942_v13, 0.0  ;;  %v11607_v52 = vmax.f32 %v11606_v46, 0.0  ;;  %v4434_v44 = vadd.f32 %v4433_v45, %v4162_v38  ;;  %v11612_v1 = vld [vmem:[#allocation89_spill] sm:$0xff] }
 0x9b2   :  { %v4608_v0 = vpack.c.bf16 %v10898_v23, %v10899_v4  ;;  %v4609_v25 = vpack.c.bf16 %v10902_v59, %v10903_v42  ;;  %v11610_v23 = vmax.f32 %v11609_v19, 0.0  ;;  %v4323_v7 = vadd.f32 %v4322_v31, %v4162_v38  ;;  %v4435_v59 = vpop.f32.mrb[255].mxu1  ;;  %v11615_v42 = vld [vmem:[#allocation90_spill] sm:$0xff] }
 0x9b3   :  { %v4610_v29 = vpack.c.bf16 %v11605_v55, %v11604_v22  ;;  %v9969_v37 = vadd.f32 %v4317_v18, %v11607_v52  ;;  %v11613_v33 = vmax.f32 %v11612_v1, 0.0  ;;  %v11616_v16 = vmax.f32 %v11615_v42, 0.0  ;;  %v11618_v52 = vld [vmem:[#allocation54_spill] sm:$0xff]  ;;  %v11624_v18 = vld [vmem:[#allocation7_spill] sm:$0xff] }
 0x9b4   :  { %v9973_v4 = vadd.f32 %v4319_v28, %v11610_v23  ;;  %4772 = vmatprep.subr.bf16.mxu0 %v4608_v0  ;;  %v4436_v22 = vadd.f32 %v4435_v59, %v4162_v38  ;;  %v11619_v46 = vmax.f32 %v11618_v52, 0.0  ;;  %v11621_v23 = vld [vmem:[#allocation12_spill] sm:$0xff]  ;;  %v11625_v28 = vmax.f32 %v11624_v18, 0.0  ;;  %v6310_v52 = vld [vmem:[%s10392_s3 + $0x108] sm:$0xff]  }
 0x9b5   :  { %11608 = vst [vmem:[#allocation27_spill] sm:$0xff] %v9969_v37  ;;  %v9977_v27 = vadd.f32 %v4432_v3, %v11613_v33  ;;  %v9981_v13 = vadd.f32 %v4321_v39, %v11616_v16  ;;  %4885 = vmatprep.subr.bf16.mxu1 %v4610_v29  ;;  %4773 = vmatpush1.bf16.msra.mxu0 %v4607_v54  ;;  %v11622_v45 = vmax.f32 %v11621_v23, 0.0  ;;  %v11627_v16 = vld [vmem:[#allocation9_spill] sm:$0xff]  ;;  %v6314_v18 = vld [vmem:[%s10392_s3 + $0x128] sm:$0xff]  }
 0x9b6   :  { %11611 = vst [vmem:[#allocation29_spill] sm:$0xff] %v9973_v4  ;;  %v9985_v19 = vadd.f32 %v4430_v9, %v11619_v46  ;;  %v9993_v0 = vadd.f32 %v4323_v7, %v11625_v28  ;;  %4886 = vmatpush1.bf16.msra.mxu1 %v4609_v25  ;;  %v11628_v39 = vmax.f32 %v11627_v16, 0.0  ;;  %v10911_v59 = vmax.f32 %v9973_v4, 0.0  ;;  %v6311_v46 = vld [vmem:[%s10392_s3 + $0x110] sm:$0xff]   ;;  %v6312_v23 = vld [vmem:[%s10392_s3 + $0x118] sm:$0xff]  }
 0x9b7   :  { %11614 = vst [vmem:[#allocation23_spill] sm:$0xff] %v9977_v27  ;;  %11617 = vst [vmem:[#allocation25_spill] sm:$0xff] %v9981_v13  ;;  %v9989_v31 = vadd.f32 %v4434_v44, %v11622_v45  ;;  %v10909_v42 = vmax.f32 %v9981_v13, 0.0  ;;  %v10913_v44 = vmax.f32 %v9969_v37, 0.0  ;;  %v10910_v3 = vmax.f32 %v9977_v27, 0.0  ;;  %v6313_v45 = vld [vmem:[%s10392_s3 + $0x120] sm:$0xff]  }
 0x9b8   :  { %11620 = vst [vmem:[#allocation59_spill] sm:$0xff] %v9985_v19  ;;  %11626 = vst [vmem:[#allocation98_spill] sm:$0xff] %v9993_v0  ;;  %v9998_v38 = vadd.f32 %v4436_v22, %v11628_v39  ;;  %v10907_v9 = vmax.f32 %v9993_v0, 0.0  ;;  %v10912_v25 = vmax.f32 %v9985_v19, 0.0  ;;  %v6309_v22 = vld [vmem:[%s10392_s3 + $0x100] sm:$0xff]   ;;  %v6315_v28 = vld [vmem:[%s10392_s3 + $0x130] sm:$0xff]   ;;  %v4640_v39 = vpop.permute.xlu1 %4639 }
 0x9b9   :  { %11623 = vst [vmem:[#allocation97_spill] sm:$0xff] %v9989_v31  ;;  %v10908_v54 = vmax.f32 %v9989_v31, 0.0  ;;  %v4611_v29 = vpack.c.bf16 %v10909_v42, %v10913_v44  ;;  %v6316_v16 = vld [vmem:[%s10392_s3 + $0x138] sm:$0xff]  }
 0x9ba   :  { %11629 = vst [vmem:[#allocation99_spill] sm:$0xff] %v9998_v38  ;;  %v10906_v7 = vmax.f32 %v9998_v38, 0.0  ;;  %v4612_v55 = vpack.c.bf16 %v10907_v9, %v10911_v59 }
 0x9bb   :  { %v4613_v33 = vpack.c.bf16 %v10908_v54, %v10912_v25 }
 0x9bc   :  { %v4614_v1 = vpack.c.bf16 %v10906_v7, %v10910_v3  ;;  %4774 = vmatprep.subr.bf16.mxu0 %v4612_v55  ;;  %v4635_v55 = vpop.permute.xlu0 %4634  ;;  %v4650_v31 = vpop.permute.xlu1 %4649 }
 0x9bd   :  { %4775 = vmatpush1.bf16.msra.mxu0 %v4611_v29 }
 0x9be   :  { %4887 = vmatprep.subr.bf16.mxu1 %v4614_v1 }
 0x9bf   :  { %4888 = vmatpush1.bf16.msra.mxu1 %v4613_v33 }
 0x9c0   :  { %4793 = vmatmul.mubr.bf16.vlgmr.msra.gmra.mrb[0].mxu0 %v6309_v22  ;;  %v4645_v27 = vpop.permute.xlu0 %4644 }
 0x9c1   :  { %4802 = vmatprep.mubr.bf16.mxu0 %v10978_v5 }
 0x9c2   :  { %4906 = vmatmul.mubr.bf16.vlgmr.msra.gmra.mrb[0].mxu1 %v6309_v22 }
 0x9c3   :  { %4915 = vmatprep.mubr.bf16.mxu1 %v10978_v5 }
 0x9c8   :  { %4803 = vmatmul.mubr.bf16.gmra.mrb[4].mxu0 %v6310_v52 }
 0x9c9   :  { %4812 = vmatprep.mubr.bf16.mxu0 %v10978_v5 }
 0x9ca   :  { %4916 = vmatmul.mubr.bf16.gmra.mrb[4].mxu1 %v6310_v52 }
 0x9cb   :  { %4925 = vmatprep.mubr.bf16.mxu1 %v10978_v5 }
 0x9d0   :  { %4813 = vmatmul.mubr.bf16.gmra.mrb[8].mxu0 %v6311_v46 }
 0x9d1   :  { %4822 = vmatprep.mubr.bf16.mxu0 %v10978_v5 }
 0x9d2   :  { %4926 = vmatmul.mubr.bf16.gmra.mrb[8].mxu1 %v6311_v46 }
 0x9d3   :  { %4935 = vmatprep.mubr.bf16.mxu1 %v10978_v5 }
 0x9d8   :  { %4823 = vmatmul.mubr.bf16.gmra.mrb[12].mxu0 %v6312_v23 }
 0x9d9   :  { %4832 = vmatprep.mubr.bf16.mxu0 %v10978_v5 }
 0x9da   :  { %4936 = vmatmul.mubr.bf16.gmra.mrb[12].mxu1 %v6312_v23 }
 0x9db   :  { %4945 = vmatprep.mubr.bf16.mxu1 %v10978_v5 }
 0x9e0   :  { %4833 = vmatmul.mubr.bf16.gmra.mrb[16].mxu0 %v6313_v45 }
 0x9e1   :  { %4842 = vmatprep.mubr.bf16.mxu0 %v10978_v5 }
 0x9e2   :  { %4946 = vmatmul.mubr.bf16.gmra.mrb[16].mxu1 %v6313_v45 }
 0x9e3   :  { %4955 = vmatprep.mubr.bf16.mxu1 %v10978_v5 }
 0x9e8   :  { %4843 = vmatmul.mubr.bf16.gmra.mrb[20].mxu0 %v6314_v18 }
 0x9e9   :  { %4852 = vmatprep.mubr.bf16.mxu0 %v10978_v5 }
 0x9ea   :  { %4956 = vmatmul.mubr.bf16.gmra.mrb[20].mxu1 %v6314_v18 }
 0x9eb   :  { %4965 = vmatprep.mubr.bf16.mxu1 %v10978_v5 }
 0x9f0   :  { %4853 = vmatmul.mubr.bf16.gmra.mrb[24].mxu0 %v6315_v28 }
 0x9f1   :  { %4862 = vmatprep.mubr.bf16.mxu0 %v10978_v5 }
 0x9f2   :  { %4966 = vmatmul.mubr.bf16.gmra.mrb[24].mxu1 %v6315_v28 }
 0x9f3   :  { %4975 = vmatprep.mubr.bf16.mxu1 %v10978_v5 }
 0x9f8   :  { %4863 = vmatmul.mubr.bf16.gmra.mrb[28].mxu0 %v6316_v16 }
 0x9f9   :  { %5276 = vmatprep.mubr.bf16.mxu0 %v10978_v5 }
 0x9fa   :  { %4976 = vmatmul.mubr.bf16.gmra.mrb[28].mxu1 %v6316_v16 }
 0x9fb   :  { %5389 = vmatprep.mubr.bf16.mxu1 %v10978_v5 }
 0xa93   :  { %v4794_v29 = vpop.f32.mrb[0].mxu0 }
 0xa94   :  { %v4795_v1 = vadd.f32 %v4794_v29, %v4635_v55  ;;  %v4796_v22 = vpop.f32.mrb[1].mxu0 }
 0xa95   :  { %v4907_v33 = vpop.f32.mrb[0].mxu1  ;;  %v4797_v46 = vadd.f32 %v4796_v22, %v4635_v55  ;;  %v4798_v45 = vpop.f32.mrb[2].mxu0 }
 0xa96   :  { %v4908_v52 = vadd.f32 %v4907_v33, %v4635_v55  ;;  %v4909_v23 = vpop.f32.mrb[1].mxu1  ;;  %v4799_v28 = vadd.f32 %v4798_v45, %v4640_v39  ;;  %v4800_v9 = vpop.f32.mrb[3].mxu0  ;;  %v4986_v3 = vmax.f32 %v4795_v1, 0.0 }
 0xa97   :  { %v4910_v18 = vadd.f32 %v4909_v23, %v4635_v55  ;;  %v4911_v7 = vpop.f32.mrb[2].mxu1  ;;  %v4801_v16 = vadd.f32 %v4800_v9, %v4640_v39  ;;  %v4987_v38 = vmax.f32 %v4797_v46, 0.0 }
 0xa98   :  { %v4912_v54 = vadd.f32 %v4911_v7, %v4640_v39  ;;  %v4913_v42 = vpop.f32.mrb[3].mxu1  ;;  %v4990_v59 = vmax.f32 %v4799_v28, 0.0  ;;  %v4988_v44 = vmax.f32 %v4908_v52, 0.0 }
 0xa99   :  { %v4914_v25 = vadd.f32 %v4913_v42, %v4640_v39  ;;  %v4991_v29 = vmax.f32 %v4801_v16, 0.0  ;;  %v4989_v13 = vmax.f32 %v4910_v18, 0.0 }
 0xa9a   :  { %v4992_v0 = vmax.f32 %v4912_v54, 0.0  ;;  %v5067_v33 = vpack.c.bf16 %v4990_v59, %v4986_v3 }
 0xa9b   :  { %v4993_v22 = vmax.f32 %v4914_v25, 0.0  ;;  %v5068_v55 = vpack.c.bf16 %v4991_v29, %v4987_v38  ;;  %v4804_v23 = vpop.f32.mrb[4].mxu0 }
 0xa9c   :  { %v5069_v4 = vpack.c.bf16 %v4992_v0, %v4988_v44  ;;  %v4805_v19 = vadd.f32 %v4804_v23, %v4645_v27  ;;  %v4806_v9 = vpop.f32.mrb[5].mxu0 }
 0xa9d   :  { %v5070_v45 = vpack.c.bf16 %v4993_v22, %v4989_v13  ;;  %v4917_v7 = vpop.f32.mrb[4].mxu1  ;;  %v4807_v1 = vadd.f32 %v4806_v9, %v4645_v27  ;;  %v4808_v42 = vpop.f32.mrb[6].mxu0  ;;  %5244 = vmatprep.subr.bf16.mxu0 %v5068_v55 }
 0xa9e   :  { %v4918_v37 = vadd.f32 %v4917_v7, %v4645_v27  ;;  %v4919_v28 = vpop.f32.mrb[5].mxu1  ;;  %v4809_v54 = vadd.f32 %v4808_v42, %v4650_v31  ;;  %v4810_v46 = vpop.f32.mrb[7].mxu0  ;;  %5245 = vmatpush1.bf16.msra.mxu0 %v5067_v33  ;;  %v4994_v38 = vmax.f32 %v4805_v19, 0.0 }
 0xa9f   :  { %v4920_v39 = vadd.f32 %v4919_v28, %v4645_v27  ;;  %v4921_v52 = vpop.f32.mrb[6].mxu1  ;;  %5357 = vmatprep.subr.bf16.mxu1 %v5070_v45  ;;  %v4811_v3 = vadd.f32 %v4810_v46, %v4650_v31  ;;  %v4995_v18 = vmax.f32 %v4807_v1, 0.0  ;;  %v4660_v22 = vpop.permute.xlu1 %4659 }
 0xaa0   :  { %v4922_v59 = vadd.f32 %v4921_v52, %v4650_v31  ;;  %v4923_v0 = vpop.f32.mrb[7].mxu1  ;;  %5358 = vmatpush1.bf16.msra.mxu1 %v5069_v4  ;;  %v4998_v13 = vmax.f32 %v4809_v54, 0.0  ;;  %v4996_v25 = vmax.f32 %v4918_v37, 0.0  ;;  %v4655_v7 = vpop.permute.xlu0 %4654 }
 0xaa1   :  { %v4924_v44 = vadd.f32 %v4923_v0, %v4650_v31  ;;  %v4999_v29 = vmax.f32 %v4811_v3, 0.0  ;;  %v4997_v23 = vmax.f32 %v4920_v39, 0.0 }
 0xaa2   :  { %v5000_v16 = vmax.f32 %v4922_v59, 0.0  ;;  %v5071_v55 = vpack.c.bf16 %v4998_v13, %v4994_v38 }
 0xaa3   :  { %v5001_v27 = vmax.f32 %v4924_v44, 0.0  ;;  %v5072_v45 = vpack.c.bf16 %v4999_v29, %v4995_v18  ;;  %v4814_v28 = vpop.f32.mrb[8].mxu0 }
 0xaa4   :  { %v5073_v9 = vpack.c.bf16 %v5000_v16, %v4996_v25  ;;  %v4815_v42 = vadd.f32 %v4814_v28, %v4655_v7  ;;  %v4816_v46 = vpop.f32.mrb[9].mxu0 }
 0xaa5   :  { %v5074_v33 = vpack.c.bf16 %v5001_v27, %v4997_v23  ;;  %v4927_v52 = vpop.f32.mrb[8].mxu1  ;;  %v4817_v19 = vadd.f32 %v4816_v46, %v4655_v7  ;;  %v4818_v31 = vpop.f32.mrb[10].mxu0  ;;  %5246 = vmatprep.subr.bf16.mxu0 %v5072_v45 }
 0xaa6   :  { %v4928_v4 = vadd.f32 %v4927_v52, %v4655_v7  ;;  %v4929_v54 = vpop.f32.mrb[9].mxu1  ;;  %v4819_v1 = vadd.f32 %v4818_v31, %v4660_v22  ;;  %v4820_v39 = vpop.f32.mrb[11].mxu0  ;;  %5247 = vmatpush1.bf16.msra.mxu0 %v5071_v55  ;;  %v5002_v13 = vmax.f32 %v4815_v42, 0.0 }
 0xaa7   :  { %v4930_v37 = vadd.f32 %v4929_v54, %v4655_v7  ;;  %v4931_v59 = vpop.f32.mrb[10].mxu1  ;;  %5359 = vmatprep.subr.bf16.mxu1 %v5074_v33  ;;  %v4821_v0 = vadd.f32 %v4820_v39, %v4660_v22  ;;  %v5003_v16 = vmax.f32 %v4817_v19, 0.0  ;;  %v4670_v27 = vpop.permute.xlu1 %4669 }
 0xaa8   :  { %v4932_v3 = vadd.f32 %v4931_v59, %v4660_v22  ;;  %v4933_v38 = vpop.f32.mrb[11].mxu1  ;;  %5360 = vmatpush1.bf16.msra.mxu1 %v5073_v9  ;;  %v5006_v44 = vmax.f32 %v4819_v1, 0.0  ;;  %v5004_v18 = vmax.f32 %v4928_v4, 0.0  ;;  %v4665_v52 = vpop.permute.xlu0 %4664 }
 0xaa9   :  { %v4934_v25 = vadd.f32 %v4933_v38, %v4660_v22  ;;  %v5007_v23 = vmax.f32 %v4821_v0, 0.0  ;;  %v5005_v28 = vmax.f32 %v4930_v37, 0.0 }
 0xaaa   :  { %v5008_v29 = vmax.f32 %v4932_v3, 0.0  ;;  %v5075_v45 = vpack.c.bf16 %v5006_v44, %v5002_v13 }
 0xaab   :  { %v5009_v7 = vmax.f32 %v4934_v25, 0.0  ;;  %v5076_v33 = vpack.c.bf16 %v5007_v23, %v5003_v16  ;;  %v4824_v54 = vpop.f32.mrb[12].mxu0 }
 0xaac   :  { %v5077_v46 = vpack.c.bf16 %v5008_v29, %v5004_v18  ;;  %v4825_v31 = vadd.f32 %v4824_v54, %v4665_v52  ;;  %v4826_v39 = vpop.f32.mrb[13].mxu0 }
 0xaad   :  { %v5078_v55 = vpack.c.bf16 %v5009_v7, %v5005_v28  ;;  %v4937_v59 = vpop.f32.mrb[12].mxu1  ;;  %v4827_v42 = vadd.f32 %v4826_v39, %v4665_v52  ;;  %v4828_v22 = vpop.f32.mrb[14].mxu0  ;;  %5248 = vmatprep.subr.bf16.mxu0 %v5076_v33 }
 0xaae   :  { %v4938_v9 = vadd.f32 %v4937_v59, %v4665_v52  ;;  %v4939_v1 = vpop.f32.mrb[13].mxu1  ;;  %v4829_v19 = vadd.f32 %v4828_v22, %v4670_v27  ;;  %v4830_v37 = vpop.f32.mrb[15].mxu0  ;;  %5249 = vmatpush1.bf16.msra.mxu0 %v5075_v45  ;;  %v5010_v44 = vmax.f32 %v4825_v31, 0.0 }
 0xaaf   :  { %v4940_v4 = vadd.f32 %v4939_v1, %v4665_v52  ;;  %v4941_v3 = vpop.f32.mrb[14].mxu1  ;;  %5361 = vmatprep.subr.bf16.mxu1 %v5078_v55  ;;  %v4831_v38 = vadd.f32 %v4830_v37, %v4670_v27  ;;  %v5011_v29 = vmax.f32 %v4827_v42, 0.0  ;;  %v4680_v7 = vpop.permute.xlu1 %4679 }
 0xab0   :  { %v4942_v0 = vadd.f32 %v4941_v3, %v4670_v27  ;;  %v4943_v13 = vpop.f32.mrb[15].mxu1  ;;  %5362 = vmatpush1.bf16.msra.mxu1 %v5077_v46  ;;  %v5014_v25 = vmax.f32 %v4829_v19, 0.0  ;;  %v5012_v16 = vmax.f32 %v4938_v9, 0.0  ;;  %v4675_v59 = vpop.permute.xlu0 %4674 }
 0xab1   :  { %v4944_v18 = vadd.f32 %v4943_v13, %v4670_v27  ;;  %v5015_v28 = vmax.f32 %v4831_v38, 0.0  ;;  %v5013_v54 = vmax.f32 %v4940_v4, 0.0 }
 0xab2   :  { %v5016_v23 = vmax.f32 %v4942_v0, 0.0  ;;  %v5079_v33 = vpack.c.bf16 %v5014_v25, %v5010_v44 }
 0xab3   :  { %v5017_v52 = vmax.f32 %v4944_v18, 0.0  ;;  %v5080_v55 = vpack.c.bf16 %v5015_v28, %v5011_v29  ;;  %v4834_v1 = vpop.f32.mrb[16].mxu0 }
 0xab4   :  { %v5081_v39 = vpack.c.bf16 %v5016_v23, %v5012_v16  ;;  %v4835_v22 = vadd.f32 %v4834_v1, %v4675_v59  ;;  %v4836_v37 = vpop.f32.mrb[17].mxu0 }
 0xab5   :  { %v5082_v45 = vpack.c.bf16 %v5017_v52, %v5013_v54  ;;  %v4947_v3 = vpop.f32.mrb[16].mxu1  ;;  %v4837_v31 = vadd.f32 %v4836_v37, %v4675_v59  ;;  %v4838_v27 = vpop.f32.mrb[18].mxu0  ;;  %5250 = vmatprep.subr.bf16.mxu0 %v5080_v55 }
 0xab6   :  { %v4948_v46 = vadd.f32 %v4947_v3, %v4675_v59  ;;  %v4949_v19 = vpop.f32.mrb[17].mxu1  ;;  %v4839_v42 = vadd.f32 %v4838_v27, %v4680_v7  ;;  %v4840_v4 = vpop.f32.mrb[19].mxu0  ;;  %5251 = vmatpush1.bf16.msra.mxu0 %v5079_v33  ;;  %v5018_v25 = vmax.f32 %v4835_v22, 0.0 }
 0xab7   :  { %v4950_v9 = vadd.f32 %v4949_v19, %v4675_v59  ;;  %v4951_v0 = vpop.f32.mrb[18].mxu1  ;;  %5363 = vmatprep.subr.bf16.mxu1 %v5082_v45  ;;  %v4841_v13 = vadd.f32 %v4840_v4, %v4680_v7  ;;  %v5019_v23 = vmax.f32 %v4837_v31, 0.0  ;;  %v4690_v52 = vpop.permute.xlu1 %4689 }
 0xab8   :  { %v4952_v38 = vadd.f32 %v4951_v0, %v4680_v7  ;;  %v4953_v44 = vpop.f32.mrb[19].mxu1  ;;  %5364 = vmatpush1.bf16.msra.mxu1 %v5081_v39  ;;  %v5022_v18 = vmax.f32 %v4839_v42, 0.0  ;;  %v5020_v29 = vmax.f32 %v4948_v46, 0.0  ;;  %v4685_v3 = vpop.permute.xlu0 %4684 }
 0xab9   :  { %v4954_v16 = vadd.f32 %v4953_v44, %v4680_v7  ;;  %v5023_v54 = vmax.f32 %v4841_v13, 0.0  ;;  %v5021_v1 = vmax.f32 %v4950_v9, 0.0 }
 0xaba   :  { %v5024_v28 = vmax.f32 %v4952_v38, 0.0  ;;  %v5083_v55 = vpack.c.bf16 %v5022_v18, %v5018_v25 }
 0xabb   :  { %v5025_v59 = vmax.f32 %v4954_v16, 0.0  ;;  %v5084_v45 = vpack.c.bf16 %v5023_v54, %v5019_v23  ;;  %v4844_v19 = vpop.f32.mrb[20].mxu0 }
 0xabc   :  { %v5085_v37 = vpack.c.bf16 %v5024_v28, %v5020_v29  ;;  %v4845_v27 = vadd.f32 %v4844_v19, %v4685_v3  ;;  %v4846_v4 = vpop.f32.mrb[21].mxu0 }
 0xabd   :  { %v5086_v33 = vpack.c.bf16 %v5025_v59, %v5021_v1  ;;  %v4957_v0 = vpop.f32.mrb[20].mxu1  ;;  %v4847_v22 = vadd.f32 %v4846_v4, %v4685_v3  ;;  %v4848_v7 = vpop.f32.mrb[22].mxu0  ;;  %5252 = vmatprep.subr.bf16.mxu0 %v5084_v45 }
 0xabe   :  { %v4958_v39 = vadd.f32 %v4957_v0, %v4685_v3  ;;  %v4959_v42 = vpop.f32.mrb[21].mxu1  ;;  %v4849_v31 = vadd.f32 %v4848_v7, %v4690_v52  ;;  %v4850_v9 = vpop.f32.mrb[23].mxu0  ;;  %5253 = vmatpush1.bf16.msra.mxu0 %v5083_v55  ;;  %v5026_v18 = vmax.f32 %v4845_v27, 0.0 }
 0xabf   :  { %v4960_v46 = vadd.f32 %v4959_v42, %v4685_v3  ;;  %v4961_v38 = vpop.f32.mrb[22].mxu1  ;;  %5365 = vmatprep.subr.bf16.mxu1 %v5086_v33  ;;  %v4851_v44 = vadd.f32 %v4850_v9, %v4690_v52  ;;  %v5027_v28 = vmax.f32 %v4847_v22, 0.0  ;;  %v4700_v59 = vpop.permute.xlu1 %4699 }
 0xac0   :  { %v4962_v13 = vadd.f32 %v4961_v38, %v4690_v52  ;;  %v4963_v25 = vpop.f32.mrb[23].mxu1  ;;  %5366 = vmatpush1.bf16.msra.mxu1 %v5085_v37  ;;  %v5030_v16 = vmax.f32 %v4849_v31, 0.0  ;;  %v5028_v23 = vmax.f32 %v4958_v39, 0.0  ;;  %v4695_v0 = vpop.permute.xlu0 %4694 }
 0xac1   :  { %v4964_v29 = vadd.f32 %v4963_v25, %v4690_v52  ;;  %v5031_v1 = vmax.f32 %v4851_v44, 0.0  ;;  %v5029_v19 = vmax.f32 %v4960_v46, 0.0 }
 0xac2   :  { %v5032_v54 = vmax.f32 %v4962_v13, 0.0  ;;  %v5087_v45 = vpack.c.bf16 %v5030_v16, %v5026_v18 }
 0xac3   :  { %v5033_v3 = vmax.f32 %v4964_v29, 0.0  ;;  %v5088_v33 = vpack.c.bf16 %v5031_v1, %v5027_v28  ;;  %v4854_v42 = vpop.f32.mrb[24].mxu0 }
 0xac4   :  { %v5089_v4 = vpack.c.bf16 %v5032_v54, %v5028_v23  ;;  %v4855_v7 = vadd.f32 %v4854_v42, %v4695_v0  ;;  %v4856_v9 = vpop.f32.mrb[25].mxu0 }
 0xac5   :  { %v5090_v55 = vpack.c.bf16 %v5033_v3, %v5029_v19  ;;  %v4967_v38 = vpop.f32.mrb[24].mxu1  ;;  %v4857_v27 = vadd.f32 %v4856_v9, %v4695_v0  ;;  %v4858_v52 = vpop.f32.mrb[26].mxu0  ;;  %5254 = vmatprep.subr.bf16.mxu0 %v5088_v33 }
 0xac6   :  { %v4968_v37 = vadd.f32 %v4967_v38, %v4695_v0  ;;  %v4969_v31 = vpop.f32.mrb[25].mxu1  ;;  %v4859_v22 = vadd.f32 %v4858_v52, %v4700_v59  ;;  %v4860_v46 = vpop.f32.mrb[27].mxu0  ;;  %5255 = vmatpush1.bf16.msra.mxu0 %v5087_v45  ;;  %v5034_v16 = vmax.f32 %v4855_v7, 0.0 }
 0xac7   :  { %v4970_v39 = vadd.f32 %v4969_v31, %v4695_v0  ;;  %v4971_v13 = vpop.f32.mrb[26].mxu1  ;;  %5367 = vmatprep.subr.bf16.mxu1 %v5090_v55  ;;  %v4861_v25 = vadd.f32 %v4860_v46, %v4700_v59  ;;  %v5035_v54 = vmax.f32 %v4857_v27, 0.0  ;;  %v4710_v3 = vpop.permute.xlu1 %4709 }
 0xac8   :  { %v4972_v44 = vadd.f32 %v4971_v13, %v4700_v59  ;;  %v4973_v18 = vpop.f32.mrb[27].mxu1  ;;  %5368 = vmatpush1.bf16.msra.mxu1 %v5089_v4  ;;  %v5038_v29 = vmax.f32 %v4859_v22, 0.0  ;;  %v5036_v28 = vmax.f32 %v4968_v37, 0.0  ;;  %v4705_v38 = vpop.permute.xlu0 %4704 }
 0xac9   :  { %v4974_v23 = vadd.f32 %v4973_v18, %v4700_v59  ;;  %v5039_v19 = vmax.f32 %v4861_v25, 0.0  ;;  %v5037_v42 = vmax.f32 %v4970_v39, 0.0 }
 0xaca   :  { %v5040_v1 = vmax.f32 %v4972_v44, 0.0  ;;  %v5091_v33 = vpack.c.bf16 %v5038_v29, %v5034_v16 }
 0xacb   :  { %v5041_v0 = vmax.f32 %v4974_v23, 0.0  ;;  %v5092_v55 = vpack.c.bf16 %v5039_v19, %v5035_v54  ;;  %v4864_v31 = vpop.f32.mrb[28].mxu0 }
 0xacc   :  { %v5093_v9 = vpack.c.bf16 %v5040_v1, %v5036_v28  ;;  %v4865_v52 = vadd.f32 %v4864_v31, %v4705_v38  ;;  %v4866_v46 = vpop.f32.mrb[29].mxu0 }
 0xacd   :  { %v5094_v45 = vpack.c.bf16 %v5041_v0, %v5037_v42  ;;  %v4977_v13 = vpop.f32.mrb[28].mxu1  ;;  %v4867_v7 = vadd.f32 %v4866_v46, %v4705_v38  ;;  %v4868_v59 = vpop.f32.mrb[30].mxu0  ;;  %5256 = vmatprep.subr.bf16.mxu0 %v5092_v55 }
 0xace   :  { %v4978_v4 = vadd.f32 %v4977_v13, %v4705_v38  ;;  %v4979_v22 = vpop.f32.mrb[29].mxu1  ;;  %v4869_v27 = vadd.f32 %v4868_v59, %v4710_v3  ;;  %v4870_v39 = vpop.f32.mrb[31].mxu0  ;;  %5257 = vmatpush1.bf16.msra.mxu0 %v5091_v33  ;;  %v5042_v29 = vmax.f32 %v4865_v52, 0.0  ;;  %v6317_v33 = vld [vmem:[%s10394_s5 + $0x100] sm:$0xff]  }
 0xacf   :  { %v4980_v37 = vadd.f32 %v4979_v22, %v4705_v38  ;;  %v4981_v44 = vpop.f32.mrb[30].mxu1  ;;  %5369 = vmatprep.subr.bf16.mxu1 %v5094_v45  ;;  %v4871_v18 = vadd.f32 %v4870_v39, %v4710_v3  ;;  %v5043_v1 = vmax.f32 %v4867_v7, 0.0  ;;  %v6320_v45 = vld [vmem:[%s10394_s5 + $0x118] sm:$0xff]   ;;  %v6321_v52 = vld [vmem:[%s10394_s5 + $0x120] sm:$0xff]   ;;  %v6323_v7 = vld [vmem:[%s10394_s5 + $0x130] sm:$0xff]   ;;  %v5119_v59 = vpop.permute.xlu0 %5118 }
 0xad0   :  { %v4982_v25 = vadd.f32 %v4981_v44, %v4710_v3  ;;  %v4983_v16 = vpop.f32.mrb[31].mxu1  ;;  %5370 = vmatpush1.bf16.msra.mxu1 %v5093_v9  ;;  %v5046_v23 = vmax.f32 %v4869_v27, 0.0  ;;  %v5044_v54 = vmax.f32 %v4978_v4, 0.0  ;;  %v6319_v9 = vld [vmem:[%s10394_s5 + $0x110] sm:$0xff]   ;;  %v6322_v4 = vld [vmem:[%s10394_s5 + $0x128] sm:$0xff]   ;;  %v6324_v22 = vld [vmem:[%s10394_s5 + $0x138] sm:$0xff]  }
 0xad1   :  { %v4984_v28 = vadd.f32 %v4983_v16, %v4710_v3  ;;  %v5047_v42 = vmax.f32 %v4871_v18, 0.0  ;;  %v5045_v0 = vmax.f32 %v4980_v37, 0.0  ;;  %v6318_v3 = vld [vmem:[%s10394_s5 + $0x108] sm:$0xff]   ;;  %v5124_v37 = vpop.permute.xlu1 %5123  ;;  %s6351_s5 = smov [#allocation3]  }
 0xad2   :  { %v5048_v19 = vmax.f32 %v4982_v25, 0.0  ;;  %v5095_v31 = vpack.c.bf16 %v5046_v23, %v5042_v29  ;;  %s5896_s26 = sshll.u32 %s6351_s5, 4  ;;  %s5897_s26 = int_to_ptr.vmem [resolvable:$true] %s5896_s26 }
 0xad3   :  { %v5049_v55 = vmax.f32 %v4984_v28, 0.0  ;;  %v5096_v13 = vpack.c.bf16 %v5047_v42, %v5043_v1  ;;  %v10101_v27 = vpop.permute.xlu0 %5128  ;;  %s6325_s27 = scalar_lea.vmem %s5897_s26, 64  ;;  %p6330_p1 = scmp.lt.s32.totalorder %s5897_s26, %s5897_s26 }
 0xad4   :  { %v5097_v38 = vpack.c.bf16 %v5048_v19, %v5044_v54  ;;  %p6326_p0 = scmp.ne.s32.totalorder %s5897_s26, %s6325_s27  ;;  %p6331_p2 = scmp.lt.s32.totalorder %s6325_s27, %s6325_s27 }
 0xad5   :  { %v5098_v46 = vpack.c.bf16 %v5049_v55, %v5045_v0  ;;  %5258 = vmatprep.subr.bf16.mxu0 %v5096_v13  ;;  %v10103_v44 = vpop.permute.xlu1 %5133 }
 0xad6   :  { %5259 = vmatpush1.bf16.msra.mxu0 %v5095_v31  ;;  %p6332_p3 = por %p6331_p2, %p6330_p1 }
 0xad7   :  { %5371 = vmatprep.subr.bf16.mxu1 %v5098_v46  ;;  %v10105_v39 = vpop.permute.xlu0 %5138  ;;  %v11630_v46 = vmax.f32 %v9577_v43, 0.0  ;;  %v11634_v43 = vmax.f32 %v9593_v2, 0.0 }
 0xad8   :  { %5372 = vmatpush1.bf16.msra.mxu1 %v5097_v38  ;;  %p6333_p4 = pnand %p6332_p3, %p6326_p0 }
 0xad9   :  { %5277 = vmatmul.mubr.bf16.vlgmr.msra.gmra.mrb[32].mxu0 %v6317_v33  ;;  %v5617_v25 = vpop.permute.xlu1 %5616 }
 0xada   :  { %5286 = vmatprep.mubr.bf16.mxu0 %v10978_v5 }
 0xadb   :  { %5390 = vmatmul.mubr.bf16.vlgmr.msra.gmra.mrb[32].mxu1 %v6317_v33  ;;  %v5622_v18 = vpop.permute.xlu0 %5621 }
 0xadc   :  { %5399 = vmatprep.mubr.bf16.mxu1 %v10978_v5 }
 0xadd   :  { %v10107_v16 = vpop.permute.xlu1 %5143 }
 0xadf   :  { %v10109_v29 = vpop.permute.xlu0 %5626 }
 0xae1   :  { %5287 = vmatmul.mubr.bf16.gmra.mrb[36].mxu0 %v6318_v3 }
 0xae2   :  { %5296 = vmatprep.mubr.bf16.mxu0 %v10978_v5 }
 0xae3   :  { %5400 = vmatmul.mubr.bf16.gmra.mrb[36].mxu1 %v6318_v3  ;;  %v10113_v23 = vpop.permute.xlu0 %5631 }
 0xae4   :  { %5409 = vmatprep.mubr.bf16.mxu1 %v10978_v5 }
 0xae7   :  { %v10117_v54 = vpop.permute.xlu0 %5636 }
 0xae9   :  { %5297 = vmatmul.mubr.bf16.gmra.mrb[40].mxu0 %v6319_v9 }
 0xaea   :  { %5306 = vmatprep.mubr.bf16.mxu0 %v10978_v5 }
 0xaeb   :  { %5410 = vmatmul.mubr.bf16.gmra.mrb[40].mxu1 %v6319_v9 }
 0xaec   :  { %5419 = vmatprep.mubr.bf16.mxu1 %v10978_v5 }
 0xaf1   :  { %5307 = vmatmul.mubr.bf16.gmra.mrb[44].mxu0 %v6320_v45 }
 0xaf2   :  { %5316 = vmatprep.mubr.bf16.mxu0 %v10978_v5 }
 0xaf3   :  { %5420 = vmatmul.mubr.bf16.gmra.mrb[44].mxu1 %v6320_v45 }
 0xaf4   :  { %5429 = vmatprep.mubr.bf16.mxu1 %v10978_v5 }
 0xaf9   :  { %5317 = vmatmul.mubr.bf16.gmra.mrb[48].mxu0 %v6321_v52 }
 0xafa   :  { %5326 = vmatprep.mubr.bf16.mxu0 %v10978_v5 }
 0xafb   :  { %5430 = vmatmul.mubr.bf16.gmra.mrb[48].mxu1 %v6321_v52 }
 0xafc   :  { %5439 = vmatprep.mubr.bf16.mxu1 %v10978_v5 }
 0xb01   :  { %5327 = vmatmul.mubr.bf16.gmra.mrb[52].mxu0 %v6322_v4 }
 0xb02   :  { %5336 = vmatprep.mubr.bf16.mxu0 %v10978_v5 }
 0xb03   :  { %5440 = vmatmul.mubr.bf16.gmra.mrb[52].mxu1 %v6322_v4  ;;  %v11631_v4 = vmax.f32 %v9581_v50, 0.0 }
 0xb04   :  { %5449 = vmatprep.mubr.bf16.mxu1 %v10978_v5 }
 0xb09   :  { %5337 = vmatmul.mubr.bf16.gmra.mrb[56].mxu0 %v6323_v7 }
 0xb0a   :  { %5346 = vmatprep.mubr.bf16.mxu0 %v10978_v5 }
 0xb0b   :  { %5450 = vmatmul.mubr.bf16.gmra.mrb[56].mxu1 %v6323_v7 }
 0xb0c   :  { %5459 = vmatprep.mubr.bf16.mxu1 %v10978_v5  ;;  %v10111_v5 = vpop.permute.xlu1 %5148 }
 0xb10   :  { %v10115_v28 = vpop.permute.xlu1 %5153 }
 0xb11   :  { %5347 = vmatmul.mubr.bf16.gmra.mrb[60].mxu0 %v6324_v22 }
 0xb13   :  { %5460 = vmatmul.mubr.bf16.gmra.mrb[60].mxu1 %v6324_v22  ;;  %v11632_v22 = vmax.f32 %v9585_v60, 0.0 }
 0xbac   :  { %v5278_v1 = vpop.f32.mrb[32].mxu0 }
 0xbad   :  { %v5279_v19 = vadd.f32 %v5278_v1, %v5119_v59  ;;  %v5280_v0 = vpop.f32.mrb[33].mxu0 }
 0xbae   :  { %v5391_v42 = vpop.f32.mrb[32].mxu1  ;;  %v5281_v55 = vadd.f32 %v5280_v0, %v5119_v59  ;;  %v5282_v13 = vpop.f32.mrb[34].mxu0  ;;  %v11633_v0 = vmax.f32 %v9589_v32, 0.0  ;;  %v11637_v32 = vmax.f32 %v9607_v6, 0.0 }
 0xbaf   :  { %v5392_v31 = vadd.f32 %v5391_v42, %v5119_v59  ;;  %v5393_v38 = vpop.f32.mrb[33].mxu1  ;;  %v5470_v33 = vadd.f32 %v5279_v19, %v11630_v46  ;;  %v5283_v9 = vadd.f32 %v5282_v13, %v5124_v37  ;;  %v5284_v52 = vpop.f32.mrb[35].mxu0  ;;  %v11635_v46 = vmax.f32 %v9597_v10, 0.0 }
 0xbb0   :  { %v5394_v3 = vadd.f32 %v5393_v38, %v5119_v59  ;;  %v5395_v45 = vpop.f32.mrb[34].mxu1  ;;  %v5471_v24 = vadd.f32 %v5281_v55, %v11632_v22  ;;  %v5285_v61 = vadd.f32 %v5284_v52, %v5124_v37  ;;  %v10133_v55 = vpop.permute.xlu1 %5158 }
 0xbb1   :  { %v5472_v7 = vadd.f32 %v5392_v31, %v11631_v4  ;;  %v5396_v1 = vadd.f32 %v5395_v45, %v5124_v37  ;;  %v5397_v62 = vpop.f32.mrb[35].mxu1  ;;  %v5534_v42 = vmax.f32 %v5470_v33, 0.0  ;;  %v5474_v19 = vadd.f32 %v5283_v9, %v11634_v43  ;;  %v10137_v4 = vpop.permute.xlu0 %5641 }
 0xbb2   :  { %v5473_v15 = vadd.f32 %v5394_v3, %v11633_v0  ;;  %v5398_v59 = vadd.f32 %v5397_v62, %v5124_v37  ;;  %v5535_v13 = vmax.f32 %v5471_v24, 0.0  ;;  %v11636_v31 = vmax.f32 %v9601_v57, 0.0 }
 0xbb3   :  { %v5536_v38 = vmax.f32 %v5472_v7, 0.0  ;;  %v5476_v50 = vadd.f32 %v5396_v1, %v11635_v46  ;;  %v5694_v45 = vmul.f32 %v5617_v25, %v5534_v42  ;;  %v5538_v33 = vmax.f32 %v5474_v19, 0.0 }
 0xbb4   :  { %v5475_v60 = vadd.f32 %v5285_v61, %v11636_v31  ;;  %v5537_v52 = vmax.f32 %v5473_v15, 0.0  ;;  %v5477_v3 = vadd.f32 %v5398_v59, %v11637_v32  ;;  %v5695_v62 = vmul.f32 %v5617_v25, %v5535_v13  ;;  %v5288_v9 = vpop.f32.mrb[36].mxu0 }
 0xbb5   :  { %v5696_v2 = vmul.f32 %v5617_v25, %v5536_v38  ;;  %v5540_v37 = vmax.f32 %v5476_v50, 0.0  ;;  %v5698_v7 = vmul.f32 %v5622_v18, %v5538_v33  ;;  %v5289_v57 = vadd.f32 %v5288_v9, %v10101_v27  ;;  %v5290_v1 = vpop.f32.mrb[37].mxu0 }
 0xbb6   :  { %v5539_v24 = vmax.f32 %v5475_v60, 0.0  ;;  %v5697_v10 = vmul.f32 %v5617_v25, %v5537_v52  ;;  %v5541_v22 = vmax.f32 %v5477_v3, 0.0  ;;  %v5401_v61 = vpop.f32.mrb[36].mxu1  ;;  %v5291_v6 = vadd.f32 %v5290_v1, %v10101_v27  ;;  %v5292_v19 = vpop.f32.mrb[38].mxu0 }
 0xbb7   :  { %v5700_v42 = vmul.f32 %v5622_v18, %v5540_v37  ;;  %v5402_v0 = vadd.f32 %v5401_v61, %v10101_v27  ;;  %v5403_v43 = vpop.f32.mrb[37].mxu1  ;;  %v5758_v59 = vadd.f32 %v5698_v7, %v5694_v45  ;;  %v11638_v13 = vmax.f32 %v9629_v14, 0.0  ;;  %v5294_v31 = vpop.f32.mrb[39].mxu0 }
 0xbb8   :  { %v5699_v15 = vmul.f32 %v5622_v18, %v5539_v24  ;;  %v5701_v38 = vmul.f32 %v5622_v18, %v5541_v22  ;;  %v5404_v25 = vadd.f32 %v5403_v43, %v10101_v27  ;;  %v5405_v50 = vpop.f32.mrb[38].mxu1  ;;  %v11639_v33 = vmax.f32 %v9637_v48, 0.0 }
 0xbb9   :  { %v5478_v46 = vadd.f32 %v5289_v57, %v11638_v13  ;;  %v5800_v60 = vadd.f32 %v5700_v42, %v5696_v2  ;;  %v11640_v3 = vmax.f32 %v9641_v63, 0.0  ;;  %v5407_v24 = vpop.f32.mrb[39].mxu1  ;;  %v11641_v18 = vmax.f32 %v9645_v36, 0.0  ;;  %v10160_v36 = vpop.permute.xlu0 %5646 }
 0xbba   :  { %v5779_v52 = vadd.f32 %v5699_v15, %v5695_v62  ;;  %v5480_v32 = vadd.f32 %v5402_v0, %v11639_v33  ;;  %v5821_v9 = vadd.f32 %v5701_v38, %v5697_v10  ;;  %v5293_v14 = vadd.f32 %v5292_v19, %v10103_v44  ;;  %v10154_v62 = vpop.permute.xlu1 %5163 }
 0xbbb   :  { %v5479_v37 = vadd.f32 %v5291_v6, %v11640_v3  ;;  %v5542_v61 = vmax.f32 %v5478_v46, 0.0  ;;  %v5481_v45 = vadd.f32 %v5404_v25, %v11641_v18  ;;  %v5406_v22 = vadd.f32 %v5405_v50, %v10103_v44 }
 0xbbc   :  { %v5544_v7 = vmax.f32 %v5480_v32, 0.0  ;;  %v5295_v2 = vadd.f32 %v5294_v31, %v10103_v44  ;;  %v11642_v57 = vmax.f32 %v9649_v12, 0.0  ;;  %v5408_v1 = vadd.f32 %v5407_v24, %v10103_v44  ;;  %v5298_v38 = vpop.f32.mrb[40].mxu0 }
 0xbbd   :  { %v5543_v27 = vmax.f32 %v5479_v37, 0.0  ;;  %v5702_v48 = vmul.f32 %v10109_v29, %v5542_v61  ;;  %v5545_v63 = vmax.f32 %v5481_v45, 0.0  ;;  %v11643_v0 = vmax.f32 %v9653_v21, 0.0  ;;  %v5300_v31 = vpop.f32.mrb[41].mxu0 }
 0xbbe   :  { %v5482_v10 = vadd.f32 %v5293_v14, %v11642_v57  ;;  %v5704_v42 = vmul.f32 %v10109_v29, %v5544_v7  ;;  %v11644_v43 = vmax.f32 %v9657_v40, 0.0  ;;  %v11645_v25 = vmax.f32 %v9663_v17, 0.0  ;;  %v5411_v50 = vpop.f32.mrb[40].mxu1  ;;  %v5302_v21 = vpop.f32.mrb[42].mxu0 }
 0xbbf   :  { %v5703_v15 = vmul.f32 %v10109_v29, %v5543_v27  ;;  %v5484_v6 = vadd.f32 %v5406_v22, %v11643_v0  ;;  %v5759_v13 = vadd.f32 %v5758_v59, %v5702_v48  ;;  %v5705_v46 = vmul.f32 %v10109_v29, %v5545_v63  ;;  %v5413_v24 = vpop.f32.mrb[41].mxu1  ;;  %v5304_v29 = vpop.f32.mrb[43].mxu0 }
 0xbc0   :  { %v5483_v19 = vadd.f32 %v5295_v2, %v11644_v43  ;;  %v5546_v12 = vmax.f32 %v5482_v10, 0.0  ;;  %v5485_v44 = vadd.f32 %v5408_v1, %v11645_v25  ;;  %v5801_v33 = vadd.f32 %v5800_v60, %v5704_v42  ;;  %v5415_v45 = vpop.f32.mrb[42].mxu1  ;;  %v10185_v0 = vpop.permute.xlu1 %5168 }
 0xbc1   :  { %v5780_v32 = vadd.f32 %v5779_v52, %v5703_v15  ;;  %v5548_v3 = vmax.f32 %v5484_v6, 0.0  ;;  %v5822_v61 = vadd.f32 %v5821_v9, %v5705_v46  ;;  %v5299_v59 = vadd.f32 %v5298_v38, %v10105_v39  ;;  %v5417_v52 = vpop.f32.mrb[43].mxu1  ;;  %v10190_v38 = vpop.permute.xlu0 %5651 }
 0xbc2   :  { %v5547_v37 = vmax.f32 %v5483_v19, 0.0  ;;  %v5706_v40 = vmul.f32 %v10113_v23, %v5546_v12  ;;  %v5549_v18 = vmax.f32 %v5485_v44, 0.0  ;;  %v5412_v7 = vadd.f32 %v5411_v50, %v10105_v39 }
 0xbc3   :  { %v5708_v14 = vmul.f32 %v10113_v23, %v5548_v3  ;;  %v5301_v60 = vadd.f32 %v5300_v31, %v10105_v39  ;;  %v11646_v9 = vmax.f32 %v9685_v26, 0.0  ;;  %v5414_v48 = vadd.f32 %v5413_v24, %v10105_v39 }
 0xbc4   :  { %v5707_v17 = vmul.f32 %v10113_v23, %v5547_v37  ;;  %v5760_v27 = vadd.f32 %v5759_v13, %v5706_v40  ;;  %v5709_v22 = vmul.f32 %v10113_v23, %v5549_v18  ;;  %v11647_v10 = vmax.f32 %v9693_v20, 0.0  ;;  %v5308_v12 = vpop.f32.mrb[44].mxu0 }
 0xbc5   :  { %v5486_v2 = vadd.f32 %v5299_v59, %v11646_v9  ;;  %v5802_v63 = vadd.f32 %v5801_v33, %v5708_v14  ;;  %v11648_v42 = vmax.f32 %v9697_v58, 0.0  ;;  %v11649_v19 = vmax.f32 %v9701_v35, 0.0  ;;  %v5310_v33 = vpop.f32.mrb[45].mxu0 }
 0xbc6   :  { %v5781_v57 = vadd.f32 %v5780_v32, %v5707_v17  ;;  %v5488_v1 = vadd.f32 %v5412_v7, %v11647_v10  ;;  %v5823_v6 = vadd.f32 %v5822_v61, %v5709_v22  ;;  %v5303_v26 = vadd.f32 %v5302_v21, %v10107_v16  ;;  %v5421_v31 = vpop.f32.mrb[44].mxu1  ;;  %v5312_v18 = vpop.f32.mrb[46].mxu0 }
 0xbc7   :  { %v5487_v15 = vadd.f32 %v5301_v60, %v11648_v42  ;;  %v5550_v43 = vmax.f32 %v5486_v2, 0.0  ;;  %v5489_v23 = vadd.f32 %v5414_v48, %v11649_v19  ;;  %v5416_v46 = vadd.f32 %v5415_v45, %v10107_v16  ;;  %v5423_v40 = vpop.f32.mrb[45].mxu1  ;;  %v5314_v17 = vpop.f32.mrb[47].mxu0 }
 0xbc8   :  { %v5552_v39 = vmax.f32 %v5488_v1, 0.0  ;;  %v5305_v20 = vadd.f32 %v5304_v29, %v10107_v16  ;;  %v11650_v44 = vmax.f32 %v9705_v34, 0.0  ;;  %v5418_v35 = vadd.f32 %v5417_v52, %v10107_v16  ;;  %v5425_v14 = vpop.f32.mrb[46].mxu1  ;;  %v10213_v1 = vpop.permute.xlu1 %5173 }
 0xbc9   :  { %v5551_v13 = vmax.f32 %v5487_v15, 0.0  ;;  %v5710_v58 = vmul.f32 %v10117_v54, %v5550_v43  ;;  %v5553_v25 = vmax.f32 %v5489_v23, 0.0  ;;  %v11651_v37 = vmax.f32 %v9709_v47, 0.0  ;;  %v5427_v47 = vpop.f32.mrb[47].mxu1  ;;  %v10219_v43 = vpop.permute.xlu0 %5656 }
 0xbca   :  { %v5490_v50 = vadd.f32 %v5303_v26, %v11650_v44  ;;  %v5712_v32 = vmul.f32 %v10117_v54, %v5552_v39  ;;  %v11652_v21 = vmax.f32 %v9713_v8, 0.0  ;;  %v11653_v16 = vmax.f32 %v9719_v49, 0.0 }
 0xbcb   :  { %v5711_v3 = vmul.f32 %v10117_v54, %v5551_v13  ;;  %v5492_v24 = vadd.f32 %v5416_v46, %v11651_v37  ;;  %v5761_v59 = vadd.f32 %v5760_v27, %v5710_v58  ;;  %v5713_v34 = vmul.f32 %v10117_v54, %v5553_v25 }
 0xbcc   :  { %v5491_v61 = vadd.f32 %v5305_v20, %v11652_v21  ;;  %v5554_v45 = vmax.f32 %v5490_v50, 0.0  ;;  %v5493_v29 = vadd.f32 %v5418_v35, %v11653_v16  ;;  %v5803_v7 = vadd.f32 %v5802_v63, %v5712_v32  ;;  %v5318_v20 = vpop.f32.mrb[48].mxu0 }
 0xbcd   :  { %v5782_v60 = vadd.f32 %v5781_v57, %v5711_v3  ;;  %v5556_v52 = vmax.f32 %v5492_v24, 0.0  ;;  %v5824_v9 = vadd.f32 %v5823_v6, %v5713_v34  ;;  %v5309_v48 = vadd.f32 %v5308_v12, %v10111_v5 }
 0xbce   :  { %v5555_v22 = vmax.f32 %v5491_v61, 0.0  ;;  %v5714_v8 = vmul.f32 %v10137_v4, %v5554_v45  ;;  %v5557_v2 = vmax.f32 %v5493_v29, 0.0  ;;  %v5422_v49 = vadd.f32 %v5421_v31, %v10111_v5  ;;  %v5431_v44 = vpop.f32.mrb[48].mxu1  ;;  %v11660_v45 = vld [vmem:[#allocation11_spill] sm:$0xff] }
 0xbcf   :  { %v5716_v27 = vmul.f32 %v10137_v4, %v5556_v52  ;;  %v5311_v10 = vadd.f32 %v5310_v33, %v10111_v5  ;;  %v11654_v42 = vmax.f32 %v9741_v11, 0.0  ;;  %v5424_v6 = vadd.f32 %v5423_v40, %v10111_v5  ;;  %v5320_v5 = vpop.f32.mrb[49].mxu0  ;;  %v5433_v33 = vpop.f32.mrb[49].mxu1 }
 0xbd0   :  { %v5715_v54 = vmul.f32 %v10137_v4, %v5555_v22  ;;  %v5762_v63 = vadd.f32 %v5761_v59, %v5714_v8  ;;  %v5717_v57 = vmul.f32 %v10137_v4, %v5557_v2  ;;  %v11655_v26 = vmax.f32 %v9749_v41, 0.0  ;;  %v5322_v32 = vpop.f32.mrb[50].mxu0  ;;  %v5435_v21 = vpop.f32.mrb[50].mxu1 }
 0xbd1   :  { %v5494_v15 = vadd.f32 %v5309_v48, %v11654_v42  ;;  %v5804_v19 = vadd.f32 %v5803_v7, %v5716_v27  ;;  %v11656_v13 = vmax.f32 %v9753_v53, 0.0  ;;  %v11657_v4 = vmax.f32 %v9757_v56, 0.0  ;;  %v5324_v61 = vpop.f32.mrb[51].mxu0  ;;  %v10243_v2 = vpop.permute.xlu1 %5178 }
 0xbd2   :  { %v5783_v23 = vadd.f32 %v5782_v60, %v5715_v54  ;;  %v5496_v39 = vadd.f32 %v5422_v49, %v11655_v26  ;;  %v5825_v12 = vadd.f32 %v5824_v9, %v5717_v57  ;;  %v5313_v11 = vadd.f32 %v5312_v18, %v10115_v28  ;;  %v11662_v60 = vld [vmem:[#allocation91_spill] sm:$0xff]  ;;  %v5662_v49 = vpop.permute.xlu0 %5661 }
 0xbd3   :  { %v5495_v46 = vadd.f32 %v5311_v10, %v11656_v13  ;;  %v5558_v58 = vmax.f32 %v5494_v15, 0.0  ;;  %v5497_v25 = vadd.f32 %v5424_v6, %v11657_v4  ;;  %v5426_v31 = vadd.f32 %v5425_v14, %v10115_v28  ;;  %v5437_v14 = vpop.f32.mrb[51].mxu1 }
 0xbd4   :  { %v5560_v50 = vmax.f32 %v5496_v39, 0.0  ;;  %v5315_v41 = vadd.f32 %v5314_v17, %v10115_v28  ;;  %v11658_v37 = vmax.f32 %v9761_v30, 0.0  ;;  %v5428_v56 = vadd.f32 %v5427_v47, %v10115_v28  ;;  %v5328_v42 = vpop.f32.mrb[52].mxu0 }
 0xbd5   :  { %v5559_v35 = vmax.f32 %v5495_v46, 0.0  ;;  %v5718_v53 = vmul.f32 %v10160_v36, %v5558_v58  ;;  %v5561_v3 = vmax.f32 %v5497_v25, 0.0  ;;  %v11659_v59 = vmax.f32 %v9765_v51, 0.0  ;;  %v5330_v46 = vpop.f32.mrb[53].mxu0  ;;  %v11666_v58 = vld [vmem:[#allocation92_spill] sm:$0xff] }
 0xbd6   :  { %v5498_v24 = vadd.f32 %v5313_v11, %v11658_v37  ;;  %v5720_v40 = vmul.f32 %v10160_v36, %v5560_v50  ;;  %v11661_v16 = vmax.f32 %v11660_v45, 0.0  ;;  %v11663_v52 = vmax.f32 %v11662_v60, 0.0  ;;  %v5441_v13 = vpop.f32.mrb[52].mxu1  ;;  %v11668_v11 = vld [vmem:[#allocation8_spill] sm:$0xff]  ;;  %v11674_v60 = vld [vmem:[#allocation18_spill] sm:$0xff] }
 0xbd7   :  { %v5719_v18 = vmul.f32 %v10160_v36, %v5559_v35  ;;  %v5500_v34 = vadd.f32 %v5426_v31, %v11659_v59  ;;  %v5763_v17 = vadd.f32 %v5762_v63, %v5718_v53  ;;  %v5721_v7 = vmul.f32 %v10160_v36, %v5561_v3  ;;  %v5332_v35 = vpop.f32.mrb[54].mxu0 }
 0xbd8   :  { %v5499_v29 = vadd.f32 %v5315_v41, %v11661_v16  ;;  %v5562_v30 = vmax.f32 %v5498_v24, 0.0  ;;  %v5501_v28 = vadd.f32 %v5428_v56, %v11663_v52  ;;  %v5805_v22 = vadd.f32 %v5804_v19, %v5720_v40  ;;  %v11664_v19 = vld [vmem:[#allocation13_spill] sm:$0xff]  ;;  %v11672_v16 = vld [vmem:[#allocation55_spill] sm:$0xff] }
 0xbd9   :  { %v5784_v47 = vadd.f32 %v5783_v23, %v5719_v18  ;;  %v5564_v9 = vmax.f32 %v5500_v34, 0.0  ;;  %v5826_v48 = vadd.f32 %v5825_v12, %v5721_v7  ;;  %v5319_v54 = vadd.f32 %v5318_v20, %v10133_v55 }
 0xbda   :  { %v5563_v8 = vmax.f32 %v5499_v29, 0.0  ;;  %v5722_v51 = vmul.f32 %v10190_v38, %v5562_v30  ;;  %v5565_v27 = vmax.f32 %v5501_v28, 0.0  ;;  %v5432_v63 = vadd.f32 %v5431_v44, %v10133_v55 }
 0xbdb   :  { %v5724_v10 = vmul.f32 %v10190_v38, %v5564_v9  ;;  %v5321_v57 = vadd.f32 %v5320_v5, %v10133_v55  ;;  %v11665_v23 = vmax.f32 %v11664_v19, 0.0  ;;  %v5434_v39 = vadd.f32 %v5433_v33, %v10133_v55  ;;  %v5443_v5 = vpop.f32.mrb[53].mxu1  ;;  %v5334_v33 = vpop.f32.mrb[55].mxu0 }
 0xbdc   :  { %v5723_v36 = vmul.f32 %v10190_v38, %v5563_v8  ;;  %v5764_v15 = vadd.f32 %v5763_v17, %v5722_v51  ;;  %v5725_v6 = vmul.f32 %v10190_v38, %v5565_v27  ;;  %v11667_v4 = vmax.f32 %v11666_v58, 0.0  ;;  %v11670_v38 = vld [vmem:[#allocation10_spill] sm:$0xff]  ;;  %v5445_v55 = vpop.f32.mrb[54].mxu1  ;;  %v11678_v51 = vld [vmem:[#allocation20_spill] sm:$0xff] }
 0xbdd   :  { %v5502_v26 = vadd.f32 %v5319_v54, %v11665_v23  ;;  %v5806_v20 = vadd.f32 %v5805_v22, %v5724_v10  ;;  %v11669_v44 = vmax.f32 %v11668_v11, 0.0  ;;  %v11671_v53 = vmax.f32 %v11670_v38, 0.0  ;;  %v5447_v59 = vpop.f32.mrb[55].mxu1  ;;  %v11676_v22 = vld [vmem:[#allocation56_spill] sm:$0xff] }
 0xbde   :  { %v5785_v12 = vadd.f32 %v5784_v47, %v5723_v36  ;;  %v5504_v25 = vadd.f32 %v5432_v63, %v11667_v4  ;;  %v5827_v31 = vadd.f32 %v5826_v48, %v5725_v6  ;;  %v5323_v37 = vadd.f32 %v5322_v32, %v10154_v62 }
 0xbdf   :  { %v5503_v50 = vadd.f32 %v5321_v57, %v11669_v44  ;;  %v5566_v41 = vmax.f32 %v5502_v26, 0.0  ;;  %v5505_v3 = vadd.f32 %v5434_v39, %v11671_v53  ;;  %v5436_v40 = vadd.f32 %v5435_v21, %v10154_v62  ;;  %v5338_v57 = vpop.f32.mrb[56].mxu0  ;;  %v5451_v39 = vpop.f32.mrb[56].mxu1 }
 0xbe0   :  { %v5568_v24 = vmax.f32 %v5504_v25, 0.0  ;;  %v5325_v18 = vadd.f32 %v5324_v61, %v10154_v62  ;;  %v11673_v29 = vmax.f32 %v11672_v16, 0.0  ;;  %v5438_v7 = vadd.f32 %v5437_v14, %v10154_v62  ;;  %v10274_v61 = vpop.permute.xlu1 %5183  ;;  %v5667_v62 = vpop.permute.xlu0 %5666  ;;  %v11686_v16 = vld [vmem:[#allocation94_spill] sm:$0xff] }
 0xbe1   :  { %v5567_v56 = vmax.f32 %v5503_v50, 0.0  ;;  %v5726_v34 = vmul.f32 %v10219_v43, %v5566_v41  ;;  %v5569_v45 = vmax.f32 %v5505_v3, 0.0  ;;  %v11675_v52 = vmax.f32 %v11674_v60, 0.0  ;;  %v5340_v58 = vpop.f32.mrb[57].mxu0  ;;  %v5453_v11 = vpop.f32.mrb[57].mxu1  ;;  %v11680_v50 = vld [vmem:[#allocation14_spill] sm:$0xff] }
 0xbe2   :  { %v5506_v17 = vadd.f32 %v5323_v37, %v11673_v29  ;;  %v5728_v30 = vmul.f32 %v10219_v43, %v5568_v24  ;;  %v11677_v21 = vmax.f32 %v11676_v22, 0.0  ;;  %v11679_v27 = vmax.f32 %v11678_v51, 0.0  ;;  %v10282_v44 = vpop.f32.mrb[58].mxu0  ;;  %v10287_v53 = vpop.f32.mrb[58].mxu1  ;;  %v11682_v24 = vld [vmem:[#allocation93_spill] sm:$0xff]  ;;  %v11688_v22 = vld [vmem:[#allocation19_spill] sm:$0xff] }
 0xbe3   :  { %v5727_v32 = vmul.f32 %v10219_v43, %v5567_v56  ;;  %v5508_v28 = vadd.f32 %v5436_v40, %v11675_v52  ;;  %v5765_v9 = vadd.f32 %v5764_v15, %v5726_v34  ;;  %v5729_v8 = vmul.f32 %v10219_v43, %v5569_v45  ;;  %v10295_v34 = vpop.f32.mrb[59].mxu1 }
 0xbe4   :  { %v5507_v47 = vadd.f32 %v5325_v18, %v11677_v21  ;;  %v5570_v48 = vmax.f32 %v5506_v17, 0.0  ;;  %v5509_v54 = vadd.f32 %v5438_v7, %v11679_v27  ;;  %v5807_v14 = vadd.f32 %v5806_v20, %v5728_v30  ;;  %v10302_v60 = vpop.permute.xlu1 %5188  ;;  %v11690_v27 = vld [vmem:[#allocation21_spill] sm:$0xff] }
 0xbe5   :  { %v5786_v10 = vadd.f32 %v5785_v12, %v5727_v32  ;;  %v5572_v36 = vmax.f32 %v5508_v28, 0.0  ;;  %v5828_v6 = vadd.f32 %v5827_v31, %v5729_v8  ;;  %v5329_v26 = vadd.f32 %v5328_v42, %v10185_v0  ;;  %v10289_v42 = vpop.f32.mrb[59].mxu0  ;;  %v5672_v8 = vpop.permute.xlu0 %5671 }
 0xbe6   :  { %v5571_v63 = vmax.f32 %v5507_v47, 0.0  ;;  %v5730_v19 = vmul.f32 %v5662_v49, %v5570_v48  ;;  %v5573_v23 = vmax.f32 %v5509_v54, 0.0  ;;  %v5442_v43 = vadd.f32 %v5441_v13, %v10185_v0 }
 0xbe7   :  { %v5732_v15 = vmul.f32 %v5662_v49, %v5572_v36  ;;  %v5331_v25 = vadd.f32 %v5330_v46, %v10185_v0  ;;  %v11681_v41 = vmax.f32 %v11680_v50, 0.0  ;;  %v5444_v38 = vadd.f32 %v5443_v5, %v10185_v0  ;;  %v11684_v46 = vld [vmem:[#allocation16_spill] sm:$0xff]  ;;  %v5348_v36 = vpop.f32.mrb[60].mxu0 }
 0xbe8   :  { %v5731_v4 = vmul.f32 %v5662_v49, %v5571_v63  ;;  %v5766_v20 = vadd.f32 %v5765_v9, %v5730_v19  ;;  %v5733_v12 = vmul.f32 %v5662_v49, %v5573_v23  ;;  %v11683_v13 = vmax.f32 %v11682_v24, 0.0  ;;  %v11694_v19 = vld [vmem:[#allocation17_spill] sm:$0xff] }
 0xbe9   :  { %v5510_v31 = vadd.f32 %v5329_v26, %v11681_v41  ;;  %v5808_v3 = vadd.f32 %v5807_v14, %v5732_v15  ;;  %v11685_v40 = vmax.f32 %v11684_v46, 0.0  ;;  %v11687_v29 = vmax.f32 %v11686_v16, 0.0  ;;  %v11692_v14 = vld [vmem:[#allocation15_spill] sm:$0xff]  ;;  %v5461_v15 = vpop.f32.mrb[60].mxu1 }
 0xbea   :  { %v5787_v37 = vadd.f32 %v5786_v10, %v5731_v4  ;;  %v5512_v56 = vadd.f32 %v5442_v43, %v11683_v13  ;;  %v5829_v49 = vadd.f32 %v5828_v6, %v5733_v12  ;;  %v5333_v0 = vadd.f32 %v5332_v35, %v10213_v1  ;;  %v5350_v4 = vpop.f32.mrb[61].mxu0  ;;  %v5463_v12 = vpop.f32.mrb[61].mxu1 }
 0xbeb   :  { %v5511_v18 = vadd.f32 %v5331_v25, %v11685_v40  ;;  %v5574_v45 = vmax.f32 %v5510_v31, 0.0  ;;  %v5513_v17 = vadd.f32 %v5444_v38, %v11687_v29  ;;  %v5446_v30 = vadd.f32 %v5445_v55, %v10213_v1  ;;  %v10313_v50 = vpop.f32.mrb[62].mxu0 }
 0xbec   :  { %v5576_v5 = vmax.f32 %v5512_v56, 0.0  ;;  %v5335_v32 = vadd.f32 %v5334_v33, %v10213_v1  ;;  %v11689_v21 = vmax.f32 %v11688_v22, 0.0  ;;  %v5448_v9 = vadd.f32 %v5447_v59, %v10213_v1  ;;  %v11702_v22 = vld [vmem:[#allocation95_spill] sm:$0xff] }
 0xbed   :  { %v5575_v7 = vmax.f32 %v5511_v18, 0.0  ;;  %v5734_v52 = vmul.f32 %v5667_v62, %v5574_v45  ;;  %v5577_v28 = vmax.f32 %v5513_v17, 0.0  ;;  %v11691_v35 = vmax.f32 %v11690_v27, 0.0  ;;  %v11696_v45 = vld [vmem:[#allocation57_spill] sm:$0xff] }
 0xbee   :  { %v5514_v47 = vadd.f32 %v5333_v0, %v11689_v21  ;;  %v5736_v48 = vmul.f32 %v5667_v62, %v5576_v5  ;;  %v11693_v10 = vmax.f32 %v11692_v14, 0.0  ;;  %v11695_v23 = vmax.f32 %v11694_v19, 0.0  ;;  %v11698_v5 = vld [vmem:[#allocation26_spill] sm:$0xff] }
 0xbef   :  { %v5735_v51 = vmul.f32 %v5667_v62, %v5575_v7  ;;  %v5516_v54 = vadd.f32 %v5446_v30, %v11691_v35  ;;  %v5767_v33 = vadd.f32 %v5766_v20, %v5734_v52  ;;  %v5737_v63 = vmul.f32 %v5667_v62, %v5577_v28  ;;  %v10316_v20 = vpop.f32.mrb[62].mxu1  ;;  %v10318_v62 = vpop.f32.mrb[63].mxu0 }
 0xbf0   :  { %v5515_v55 = vadd.f32 %v5335_v32, %v11693_v10  ;;  %v5578_v6 = vmax.f32 %v5514_v47, 0.0  ;;  %v5517_v26 = vadd.f32 %v5448_v9, %v11695_v23  ;;  %v5809_v43 = vadd.f32 %v5808_v3, %v5736_v48  ;;  %v11700_v32 = vld [vmem:[#allocation58_spill] sm:$0xff] }
 0xbf1   :  { %v5788_v1 = vadd.f32 %v5787_v37, %v5735_v51  ;;  %v5580_v59 = vmax.f32 %v5516_v54, 0.0  ;;  %v5830_v41 = vadd.f32 %v5829_v49, %v5737_v63  ;;  %v5339_v24 = vadd.f32 %v5338_v57, %v10243_v2  ;;  %v10322_v37 = vpop.f32.mrb[63].mxu1  ;;  %v5194_v57 = vpop.permute.xlu1 %5193  ;;  %v11704_v54 = vld [vmem:[#allocation96_spill] sm:$0xff]  ;;  %v11708_v23 = vld [vmem:[#allocation22_spill] sm:$0xff] }
 0xbf2   :  { %v5579_v25 = vmax.f32 %v5515_v55, 0.0  ;;  %v5738_v31 = vmul.f32 %v5672_v8, %v5578_v6  ;;  %v5581_v38 = vmax.f32 %v5517_v26, 0.0  ;;  %v5452_v46 = vadd.f32 %v5451_v39, %v10243_v2 }
 0xbf3   :  { %v5740_v13 = vmul.f32 %v5672_v8, %v5580_v59  ;;  %v5341_v3 = vadd.f32 %v5340_v58, %v10243_v2  ;;  %v11697_v49 = vmax.f32 %v11696_v45, 0.0  ;;  %v5454_v29 = vadd.f32 %v5453_v11, %v10243_v2 }
 0xbf4   :  { %v5739_v56 = vmul.f32 %v5672_v8, %v5579_v25  ;;  %v5768_v40 = vadd.f32 %v5767_v33, %v5738_v31  ;;  %v5741_v18 = vmul.f32 %v5672_v8, %v5581_v38  ;;  %v11699_v7 = vmax.f32 %v11698_v5, 0.0  ;;  %v5677_v8 = vpop.permute.xlu0 %5676  ;;  %v11712_v5 = vld [vmem:[#allocation27_spill] sm:$0xff] }
 0xbf5   :  { %v5518_v16 = vadd.f32 %v5339_v24, %v11697_v49  ;;  %v5810_v17 = vadd.f32 %v5809_v43, %v5740_v13  ;;  %v11701_v52 = vmax.f32 %v11700_v32, 0.0  ;;  %v11703_v21 = vmax.f32 %v11702_v22, 0.0  ;;  %v5682_v31 = vpop.permute.xlu1 %5681 }
 0xbf6   :  { %v5789_v0 = vadd.f32 %v5788_v1, %v5739_v56  ;;  %v5520_v30 = vadd.f32 %v5452_v46, %v11699_v7  ;;  %v5831_v28 = vadd.f32 %v5830_v41, %v5741_v18  ;;  %v5343_v9 = vadd.f32 %v10282_v44, %v10274_v61  ;;  %v11706_v44 = vld [vmem:[#allocation28_spill] sm:$0xff] }
 0xbf7   :  { %v5519_v39 = vadd.f32 %v5341_v3, %v11701_v52  ;;  %v5582_v58 = vmax.f32 %v5518_v16, 0.0  ;;  %v5521_v47 = vadd.f32 %v5454_v29, %v11703_v21  ;;  %v5456_v11 = vadd.f32 %v10287_v53, %v10274_v61  ;;  %v11714_v52 = vld [vmem:[#allocation59_spill] sm:$0xff] }
 0xbf8   :  { %v5584_v48 = vmax.f32 %v5520_v30, 0.0  ;;  %v5345_v51 = vadd.f32 %v10289_v42, %v10274_v61  ;;  %v11705_v14 = vmax.f32 %v11704_v54, 0.0  ;;  %v5458_v55 = vadd.f32 %v10295_v34, %v10274_v61  ;;  %v11710_v42 = vld [vmem:[#allocation24_spill] sm:$0xff] }
 0xbf9   :  { %v5583_v2 = vmax.f32 %v5519_v39, 0.0  ;;  %v5742_v27 = vmul.f32 %v5677_v8, %v5582_v58  ;;  %v5585_v35 = vmax.f32 %v5521_v47, 0.0  ;;  %v11707_v6 = vmax.f32 %v11706_v44, 0.0  ;;  %v11716_v58 = vld [vmem:[#allocation29_spill] sm:$0xff] }
 0xbfa   :  { %v5522_v10 = vadd.f32 %v5343_v9, %v11705_v14  ;;  %v5744_v33 = vmul.f32 %v5677_v8, %v5584_v48  ;;  %v11709_v26 = vmax.f32 %v11708_v23, 0.0  ;;  %v11711_v25 = vmax.f32 %v11710_v42, 0.0  ;;  %v5687_v48 = vpop.permute.xlu0 %5686 }
 0xbfb   :  { %v5743_v63 = vmul.f32 %v5677_v8, %v5583_v2  ;;  %v5524_v19 = vadd.f32 %v5456_v11, %v11707_v6  ;;  %v5769_v53 = vadd.f32 %v5768_v40, %v5742_v27  ;;  %v5745_v1 = vmul.f32 %v5677_v8, %v5585_v35  ;;  %v11720_v35 = vld [vmem:[#allocation25_spill] sm:$0xff] }
 0xbfc   :  { %v5523_v43 = vadd.f32 %v5345_v51, %v11709_v26  ;;  %v5586_v59 = vmax.f32 %v5522_v10, 0.0  ;;  %v5525_v41 = vadd.f32 %v5458_v55, %v11711_v25  ;;  %v5811_v38 = vadd.f32 %v5810_v17, %v5744_v33 }
 0xbfd   :  { %v5790_v24 = vadd.f32 %v5789_v0, %v5743_v63  ;;  %v5588_v13 = vmax.f32 %v5524_v19, 0.0  ;;  %v5832_v61 = vadd.f32 %v5831_v28, %v5745_v1  ;;  %v5349_v3 = vadd.f32 %v5348_v36, %v10302_v60  ;;  %v11722_v63 = vld [vmem:[#allocation97_spill] sm:$0xff] }
 0xbfe   :  { %v5587_v56 = vmax.f32 %v5523_v43, 0.0  ;;  %v5746_v34 = vmul.f32 %v5682_v31, %v5586_v59  ;;  %v5589_v46 = vmax.f32 %v5525_v41, 0.0  ;;  %v5462_v49 = vadd.f32 %v5461_v15, %v10302_v60  ;;  %v11718_v15 = vld [vmem:[#allocation23_spill] sm:$0xff]  ;;  %v5692_v59 = vpop.permute.xlu1 %5691 }
 0xbff   :  { %v5748_v18 = vmul.f32 %v5682_v31, %v5588_v13  ;;  %v5351_v40 = vadd.f32 %v5350_v4, %v10302_v60  ;;  %v11713_v7 = vmax.f32 %v11712_v5, 0.0  ;;  %v5464_v17 = vadd.f32 %v5463_v12, %v10302_v60 }
 0xc00   :  { %v5747_v45 = vmul.f32 %v5682_v31, %v5587_v56  ;;  %v5770_v16 = vadd.f32 %v5769_v53, %v5746_v34  ;;  %v5749_v29 = vmul.f32 %v5682_v31, %v5589_v46  ;;  %v11715_v39 = vmax.f32 %v11714_v52, 0.0  ;;  %v11726_v53 = vld [vmem:[#allocation99_spill] sm:$0xff] }
 0xc01   :  { %v5526_v30 = vadd.f32 %v5349_v3, %v11713_v7  ;;  %v5812_v0 = vadd.f32 %v5811_v38, %v5748_v18  ;;  %v11717_v36 = vmax.f32 %v11716_v58, 0.0  ;;  %v11719_v9 = vmax.f32 %v11718_v15, 0.0  ;;  %v5846_v58 = vpop.permute.xlu0 %5845 }
 0xc02   :  { %v5791_v32 = vadd.f32 %v5790_v24, %v5747_v45  ;;  %v5528_v28 = vadd.f32 %v5462_v49, %v11715_v39  ;;  %v5833_v21 = vadd.f32 %v5832_v61, %v5749_v29  ;;  %v5353_v8 = vadd.f32 %v10313_v50, %v5194_v57  ;;  %v11724_v50 = vld [vmem:[#allocation98_spill] sm:$0xff] }
 0xc03   :  { %v5527_v22 = vadd.f32 %v5351_v40, %v11717_v36  ;;  %v5590_v47 = vmax.f32 %v5526_v30, 0.0  ;;  %v5529_v4 = vadd.f32 %v5464_v17, %v11719_v9  ;;  %v5466_v60 = vadd.f32 %v10316_v20, %v5194_v57 }
 0xc04   :  { %v5592_v2 = vmax.f32 %v5528_v28, 0.0  ;;  %v5355_v12 = vadd.f32 %v10318_v62, %v5194_v57  ;;  %v11721_v54 = vmax.f32 %v11720_v35, 0.0  ;;  %v5468_v10 = vadd.f32 %v10322_v37, %v5194_v57 }
 0xc05   :  { %v5591_v11 = vmax.f32 %v5527_v22, 0.0  ;;  %v5750_v51 = vmul.f32 %v5687_v48, %v5590_v47  ;;  %v5593_v27 = vmax.f32 %v5529_v4, 0.0  ;;  %v11723_v44 = vmax.f32 %v11722_v63, 0.0 }
 0xc06   :  { %v5530_v14 = vadd.f32 %v5353_v8, %v11721_v54  ;;  %v5752_v55 = vmul.f32 %v5687_v48, %v5592_v2  ;;  %v11725_v19 = vmax.f32 %v11724_v50, 0.0  ;;  %v11727_v62 = vmax.f32 %v11726_v53, 0.0  ;;  %v11728_v8 = vld [vmem:[#allocation6_spill] sm:$0xff] }
 0xc07   :  { %v5751_v33 = vmul.f32 %v5687_v48, %v5591_v11  ;;  %v5532_v6 = vadd.f32 %v5466_v60, %v11723_v44  ;;  %v5771_v26 = vadd.f32 %v5770_v16, %v5750_v51  ;;  %v5753_v43 = vmul.f32 %v5687_v48, %v5593_v27 }
 0xc08   :  { %v5531_v23 = vadd.f32 %v5355_v12, %v11725_v19  ;;  %v5594_v20 = vmax.f32 %v5530_v14, 0.0  ;;  %v5533_v1 = vadd.f32 %v5468_v10, %v11727_v62  ;;  %v5813_v42 = vadd.f32 %v5812_v0, %v5752_v55 }
 0xc09   :  { %v5792_v25 = vadd.f32 %v5791_v32, %v5751_v33  ;;  %v5596_v41 = vmax.f32 %v5532_v6, 0.0  ;;  %v5834_v37 = vadd.f32 %v5833_v21, %v5753_v43  ;;  %v6350_v32 = vmov 1966171168  }
 0xc0a   :  { %v5595_v31 = vmax.f32 %v5531_v23, 0.0  ;;  %v5754_v57 = vmul.f32 %v5692_v59, %v5594_v20  ;;  %v5597_v38 = vmax.f32 %v5533_v1, 0.0  ;;  %v5863_v52 = vunpack.c.l.s4 %v6350_v32 }
 0xc0b   :  { %v5756_v24 = vmul.f32 %v5692_v59, %v5596_v41  ;;  %v11729_v48 = vsub.s32 0, %v11728_v8  ;;  %v11730_v19 = vlaneseq }
 0xc0c   :  { %v5755_v13 = vmul.f32 %v5692_v59, %v5595_v31  ;;  %v5772_v56 = vadd.f32 %v5771_v26, %v5754_v57  ;;  %v5757_v61 = vmul.f32 %v5692_v59, %v5597_v38  ;;  %v5864_v4 = vunpack.c.0.s8 %v5863_v52 }
 0xc0d   :  { %v5814_v34 = vadd.f32 %v5813_v42, %v5756_v24  ;;  %v5851_v2 = vrot.slane %v5846_v58, %v11729_v48  ;;  %vm5887_vm0 = vcmp.lt.s32.totalorder %v11730_v19, 512 }
 0xc0e   :  { %v5793_v46 = vadd.f32 %v5792_v25, %v5755_v13  ;;  %v5773_v3 = vrot.slane %v5772_v56, 4  ;;  %v5835_v18 = vadd.f32 %v5834_v37, %v5757_v61  ;;  %v5867_v10 = vsub.s32 %v5864_v4, %v11728_v8 }
 0xc0f   :  { %v5815_v45 = vrot.slane %v5814_v34, 4 }
 0xc10   :  { %v5794_v49 = vrot.slane %v5793_v46, 4  ;;  %v5774_v40 = vadd.f32 %v5773_v3, %v5772_v56  ;;  %v5836_v16 = vrot.slane %v5835_v18, 4 }
 0xc11   :  { %v5816_v29 = vadd.f32 %v5815_v45, %v5814_v34 }
 0xc12   :  { %v5795_v5 = vadd.f32 %v5794_v49, %v5793_v46  ;;  %v5775_v7 = vrot.slane %v5774_v40, 2  ;;  %v5837_v30 = vadd.f32 %v5836_v16, %v5835_v18 }
 0xc13   :  { %v5817_v17 = vrot.slane %v5816_v29, 2 }
 0xc14   :  { %v5796_v0 = vrot.slane %v5795_v5, 2  ;;  %v5776_v39 = vadd.f32 %v5775_v7, %v5774_v40  ;;  %v5838_v28 = vrot.slane %v5837_v30, 2 }
 0xc15   :  { %v5818_v36 = vadd.f32 %v5817_v17, %v5816_v29 }
 0xc16   :  { %v5797_v22 = vadd.f32 %v5796_v0, %v5795_v5  ;;  %v5777_v21 = vrot.slane %v5776_v39, 1  ;;  %v5839_v47 = vadd.f32 %v5838_v28, %v5837_v30 }
 0xc17   :  { %v5819_v15 = vrot.slane %v5818_v36, 1 }
 0xc18   :  { %v5798_v9 = vrot.slane %v5797_v22, 1  ;;  %v5778_v11 = vadd.f32 %v5777_v21, %v5776_v39  ;;  %v5840_v60 = vrot.slane %v5839_v47, 1 }
 0xc19   :  { %v5820_v12 = vadd.f32 %v5819_v15, %v5818_v36 }
 0xc1a   :  { %v5799_v51 = vadd.f32 %v5798_v9, %v5797_v22  ;;  %v5841_v27 = vadd.f32 %v5840_v60, %v5839_v47  ;;  %v5852_v35 = vadd.f32 %v5851_v2, %v5778_v11 }
 0xc1b   :  { %v5854_v14 = vadd.f32 %v5851_v2, %v5820_v12 }
 0xc1c   :  { %v5853_v54 = vadd.f32 %v5851_v2, %v5799_v51  ;;  %v5855_v55 = vadd.f32 %v5851_v2, %v5841_v27 }
 0xc1e   :  { %v5860_v33 = vcombine.low %v5852_v35, %v5853_v54  ;;  %v5861_v63 = vcombine.low %v5854_v14, %v5855_v55 }
 0xc20   :  { %v5868_v44 = vrot.slane %v5860_v33, %v5867_v10  ;;  %v5875_v6 = vrot.slane %v5861_v63, %v5867_v10 }
 0xc22   :  { %v5876_v50 = vcombine.low %v5868_v44, %v5875_v6 }
 0xc24   :  { %v5883_v23 = vrot.slane %v5876_v50, %v5867_v10 }
 0xc26   :  { %5889 = vst.msk [vmem:[#allocation3] sm:$0xf] %vm5887_vm0, %v5883_v23 }
 0xc27   :  { %6336 = shalt.err (!%p6333_p4)
}
 0xc28   :  { %s6337_s29 = scalar_lea.hbm %s10398_s9, 64 }
 0xc29   :  { %p6338_p5 = scmp.ne.s32.totalorder %s10398_s9, %s6337_s29  ;;  %p6341_p6 = scmp.lt.u32.totalorder %s6337_s29, %s10398_s9 }
 0xc2b   :  { %p6343_p7 = pnand %p6341_p6, %p6338_p5 }
 0xc2d   :  { %6346 = shalt.err (!%p6343_p7)
}
 0xc2e   :  { %5899 = dma.vmem_to_hbm [thread:$0]  %s5897_s26, 64, %s10398_s9, [#allocation4]  }
 0xc2f   :  { %6347 = dma.done.wait [#allocation4], 64  }
 0xc30   :  { %6348 = vsyncadd [#allocation4], 4294967232 }
 0xc31   :  { %5903 = vsyncpa [#allocation4], 1 }

</bundles_post_ra>
